<compile_context>
chip_gen: v7x
topology: tpu7x:2x2x1
jax: 0.10.0
libtpu: 0.0.40
codegen_flags: <defaults>
</compile_context>

<pallas_src>
import jax
import jax.numpy as jnp
from jax.experimental import pallas as pl
from jax.experimental.pallas import tpu as pltpu

NB_INPUT = 10    # sequence length fed to the model
NB_OUTPUT = 5    # number of autoregressive predictions
HID = 100        # GRU hidden size (PyTorch module)
HP = 128         # padded hidden size for TPU lanes


# ----------------------------------------------------------------------------
# Pallas kernel: full autoregressive forward pass (matmuls + gates on-chip)
# ----------------------------------------------------------------------------
def rnn_kernel(x_ref, wi0_ref, bi0_ref, bhn0_ref, whid_ref,
               wi1_ref, bi1_ref, bhn1_ref, wlin_ref, blin_ref, out_ref):
    f32 = jnp.float32
    bf16 = jnp.bfloat16
    B, T = x_ref.shape

    wi0 = wi0_ref[...]        # (1, 3*HP)   layer-0 input weights (f32)
    bi0 = bi0_ref[...]        # (1, 3*HP)   b_ih0 with (b_ih+b_hh) pre-added on r/z
    bhn0 = bhn0_ref[...]      # (1, HP)     b_hh0 n-gate block
    whid = whid_ref[...]      # (2*HP, 6*HP) block-diag [Whh0 | Whh1] (bf16)
    wi1 = wi1_ref[...]        # (HP, 3*HP)  layer-1 input weights (bf16)
    bi1 = bi1_ref[...]        # (1, 3*HP)
    bhn1 = bhn1_ref[...]      # (1, HP)
    wlin = wlin_ref[...]      # (1, HP)     final linear weights
    blin = blin_ref[...]      # (1, 1)

    def gates(xg, hg, h_prev, bhn):
        # xg already contains b_ih (+ b_hh on the r/z blocks).  Gate math f32.
        if hg is None:                      # first timestep: h_prev == 0, hg == 0
            rz = jax.nn.sigmoid(xg[:, :2 * HP])
            n = jnp.tanh(xg[:, 2 * HP:] + rz[:, :HP] * bhn)
            return (1.0 - rz[:, HP:]) * n
        rz = jax.nn.sigmoid(xg[:, :2 * HP] + hg[:, :2 * HP])
        n = jnp.tanh(xg[:, 2 * HP:] + rz[:, :HP] * (hg[:, 2 * HP:] + bhn))
        return (1.0 - rz[:, HP:]) * n + rz[:, HP:] * h_prev

    def step(seq, t, h0, h1, first):
        x_t = seq[:, t:t + 1]                                   # (B, 1) static slice
        xg0 = x_t * wi0 + bi0                                   # (B, 3*HP) f32
        if first:
            h0 = gates(xg0, None, None, bhn0)
            hg1 = None
        else:
            h_cat = jnp.concatenate([h0, h1], axis=1).astype(bf16)      # (B, 2*HP)
            hg_all = jnp.dot(h_cat, whid, preferred_element_type=f32)   # (B, 6*HP)
            h0 = gates(xg0, hg_all[:, :3 * HP], h0, bhn0)
            hg1 = hg_all[:, 3 * HP:]
        xg1 = jnp.dot(h0.astype(bf16), wi1, preferred_element_type=f32) + bi1
        h1 = gates(xg1, hg1, h1, bhn1)
        return h0, h1

    def outer(_k, seq):
        h0, h1 = step(seq, 0, None, None, True)
        for t in range(1, T):                                   # unrolled inner loop
            h0, h1 = step(seq, t, h0, h1, False)
        pred = jnp.sum(h1 * wlin, axis=1, keepdims=True) + blin  # (B, 1)
        # slide window: drop oldest element, append prediction
        return jnp.concatenate([seq[:, 1:], pred], axis=1)

    seq = jax.lax.fori_loop(0, NB_OUTPUT, outer, x_ref[...].astype(f32))
    out_ref[...] = seq[:, T - NB_OUTPUT:]                        # (B, NB_OUTPUT)


def my_rnn_forward(x, kp, block_b=128):
    """x: (B, NB_INPUT) float32.  Returns (B, NB_OUTPUT, 1), matching PyTorch."""
    B, T = x.shape
    assert T == NB_INPUT

    # Pad batch to a multiple of 8 sublanes; tile on a batch grid if large.
    Bp = max(8, -(-B // 8) * 8)
    if Bp > block_b:
        Bp = -(-Bp // block_b) * block_b
        bb = block_b
    else:
        bb = Bp
    nblk = Bp // bb
    xp = jnp.zeros((Bp, T), jnp.float32).at[:B].set(x.astype(jnp.float32))

    weights = (kp["wi0"], kp["bi0"], kp["bhn0"], kp["whid"],
               kp["wi1"], kp["bi1"], kp["bhn1"], kp["wlin"], kp["blin"])
    w_specs = [pl.BlockSpec(w.shape, lambda i: (0, 0)) for w in weights]
    in_specs = [pl.BlockSpec((bb, T), lambda i: (i, 0))] + w_specs
    out_spec = pl.BlockSpec((bb, NB_OUTPUT), lambda i: (i, 0))

    # Advisory cost estimate for XLA scheduling.
    steps = NB_OUTPUT * T
    flops = 2 * Bp * (NB_OUTPUT * (T - 1) * (2 * HP) * (6 * HP)   # fused recurrence
                      + steps * HP * (3 * HP))                    # layer-1 input matmul
    trans = Bp * steps * 2 * 3 * HP
    bytes_acc = int(xp.nbytes) + sum(int(w.nbytes) for w in weights) \
        + Bp * NB_OUTPUT * 4

    out = pl.pallas_call(
        rnn_kernel,
        out_shape=jax.ShapeDtypeStruct((Bp, NB_OUTPUT), jnp.float32),
        grid=(nblk,),
        in_specs=in_specs,
        out_specs=out_spec,
        compiler_params=pltpu.CompilerParams(
            dimension_semantics=("parallel",)),
        cost_estimate=pl.CostEstimate(
            flops=flops, transcendentals=trans, bytes_accessed=bytes_acc),
    )(xp, *weights)
    return out[:B, :, None]


# ----------------------------------------------------------------------------
# Parameter construction (deterministic, PyTorch shapes) + packing to the
# kernel layout
# ----------------------------------------------------------------------------
def init_params(key):
    k = 1.0 / jnp.sqrt(jnp.float32(HID))
    keys = jax.random.split(key, 10)

    def u(kk, shape):
        return jax.random.uniform(kk, shape, jnp.float32, minval=-k, maxval=k)

    return {
        "W_ih0": u(keys[0], (3 * HID, 1)),     # PyTorch weight_ih_l0, gates [r|z|n]
        "W_hh0": u(keys[1], (3 * HID, HID)),   # weight_hh_l0
        "b_ih0": u(keys[2], (3 * HID,)),
        "b_hh0": u(keys[3], (3 * HID,)),
        "W_ih1": u(keys[4], (3 * HID, HID)),   # weight_ih_l1
        "W_hh1": u(keys[5], (3 * HID, HID)),
        "b_ih1": u(keys[6], (3 * HID,)),
        "b_hh1": u(keys[7], (3 * HID,)),
        "W_lin": u(keys[8], (1, HID)),         # lin.weight
        "b_lin": u(keys[9], (1,)),             # lin.bias
    }


def _pad_gate_cols(w):
    # w: (in_dim, 3*HID) -> (in_dim, 3*HP), zero-padding each gate block.
    parts = [jnp.pad(w[:, g * HID:(g + 1) * HID], ((0, 0), (0, HP - HID)))
             for g in range(3)]
    return jnp.concatenate(parts, axis=1)


def _pad_rows(w):
    return jnp.pad(w, ((0, HP - w.shape[0]), (0, 0)))


def pack_kernel_params(p):
    f32, bf16 = jnp.float32, jnp.bfloat16

    def fold_bias(b_ih, b_hh):
        # pre-add b_ih + b_hh on r/z gate blocks; keep n-block = b_ih_n only.
        rz = b_ih[:2 * HID] + b_hh[:2 * HID]
        return _pad_gate_cols(jnp.concatenate([rz, b_ih[2 * HID:]])[None, :])

    wh0 = _pad_rows(_pad_gate_cols(p["W_hh0"].T))            # (HP, 3*HP)
    wh1 = _pad_rows(_pad_gate_cols(p["W_hh1"].T))            # (HP, 3*HP)
    # Fused block-diagonal recurrence weight: [h0|h1] @ whid -> [hg0|hg1]
    whid = jnp.zeros((2 * HP, 6 * HP), f32)
    whid = whid.at[:HP, :3 * HP].set(wh0)
    whid = whid.at[HP:, 3 * HP:].set(wh1)

    return {
        # layer 0: input_size = 1 (input gate math stays elementwise f32)
        "wi0": _pad_gate_cols(p["W_ih0"].T).astype(f32),                  # (1, 3*HP)
        "bi0": fold_bias(p["b_ih0"], p["b_hh0"]).astype(f32),             # (1, 3*HP)
        "bhn0": jnp.pad(p["b_hh0"][2 * HID:][None, :],
                        ((0, 0), (0, HP - HID))).astype(f32),             # (1, HP)
        # fused recurrence weight (bf16 MXU operands)
        "whid": whid.astype(bf16),                                        # (2HP, 6HP)
        # layer 1: input_size = HID
        "wi1": _pad_rows(_pad_gate_cols(p["W_ih1"].T)).astype(bf16),      # (HP, 3*HP)
        "bi1": fold_bias(p["b_ih1"], p["b_hh1"]).astype(f32),             # (1, 3*HP)
        "bhn1": jnp.pad(p["b_hh1"][2 * HID:][None, :],
                        ((0, 0), (0, HP - HID))).astype(f32),             # (1, HP)
        # final linear
        "wlin": jnp.pad(p["W_lin"], ((0, 0), (0, HP - HID))).astype(f32), # (1, HP)
        "blin": p["b_lin"][None, :].astype(f32),                          # (1, 1)
    }


# ----------------------------------------------------------------------------
# Pure-JAX reference (mirrors the PyTorch forward, eval semantics).
# bf16_matmul=True mimics the kernel's bf16 matmul operands (f32 accumulation).
# ----------------------------------------------------------------------------
def ref_forward(x, p, bf16_matmul=False):
    B, T = x.shape
    f32 = jnp.float32

    def mm(a, w):          # a @ w.T, optionally with bf16 operands / f32 accum
        if bf16_matmul:
            return jnp.dot(a.astype(jnp.bfloat16), w.T.astype(jnp.bfloat16),
                           preferred_element_type=f32)
        return a @ w.T

    def cell(gi, h, W_hh, b_hh):
        gh = mm(h, W_hh) + b_hh
        r = jax.nn.sigmoid(gi[:, :HID] + gh[:, :HID])
        z = jax.nn.sigmoid(gi[:, HID:2 * HID] + gh[:, HID:2 * HID])
        n = jnp.tanh(gi[:, 2 * HID:] + r * gh[:, 2 * HID:])
        return (1.0 - z) * n + z * h

    seq = x.astype(f32)
    for _k in range(NB_OUTPUT):
        h0 = jnp.zeros((B, HID), f32)
        h1 = jnp.zeros((B, HID), f32)
        for t in range(T):
            x_t = seq[:, t:t + 1]
            gi0 = x_t @ p["W_ih0"].T + p["b_ih0"]      # scalar input: f32 (no matmul)
            h0 = cell(gi0, h0, p["W_hh0"], p["b_hh0"])
            gi1 = mm(h0, p["W_ih1"]) + p["b_ih1"]
            h1 = cell(gi1, h1, p["W_hh1"], p["b_hh1"])
        pred = h1 @ p["W_lin"].T + p["b_lin"]
        seq = jnp.concatenate([seq[:, 1:], pred], axis=1)
    return seq[:, -NB_OUTPUT:][:, :, None]


if __name__ == "__main__":
    key = jax.random.PRNGKey(0)
    k_param, k_x = jax.random.split(key)

    params = init_params(k_param)
    kparams = pack_kernel_params(params)

    batch = 2
    x = jax.random.normal(k_x, (batch, NB_INPUT), jnp.float32)

    out = my_rnn_forward(x, kparams)
    out = jax.block_until_ready(out)
    assert out.shape == (batch, NB_OUTPUT, 1), out.shape
    assert bool(jnp.all(jnp.isfinite(out)))

    # Tight check vs a reference matching the kernel's bf16-operand matmuls.
    ref_bf = ref_forward(x, params, bf16_matmul=True)
    assert jnp.allclose(out, ref_bf, atol=1e-3, rtol=1e-3), (
        "mismatch vs bf16-matched reference", out, ref_bf)

    # Loose sanity check vs exact f32 (PyTorch eval) semantics.
    ref_f32 = ref_forward(x, params, bf16_matmul=False)
    assert float(jnp.max(jnp.abs(out - ref_f32))) < 5e-2, (
        "mismatch vs f32 reference", out, ref_f32)

    print("KERNEL_OK")
</pallas_src>

<mosaic_0001>
module attributes {stable_mosaic.version = 11 : i64} {
  func.func @rnn_kernel(%arg0: i32, %arg1: memref<8x10xf32, #tpu.memory_space<vmem>>, %arg2: memref<1x384xf32, #tpu.memory_space<vmem>>, %arg3: memref<1x384xf32, #tpu.memory_space<vmem>>, %arg4: memref<1x128xf32, #tpu.memory_space<vmem>>, %arg5: memref<256x768xbf16, #tpu.memory_space<vmem>>, %arg6: memref<128x384xbf16, #tpu.memory_space<vmem>>, %arg7: memref<1x384xf32, #tpu.memory_space<vmem>>, %arg8: memref<1x128xf32, #tpu.memory_space<vmem>>, %arg9: memref<1x128xf32, #tpu.memory_space<vmem>>, %arg10: memref<1x1xf32, #tpu.memory_space<vmem>>, %arg11: memref<8x5xf32, #tpu.memory_space<vmem>>) attributes {dimension_semantics = [#tpu.dimension_semantics<parallel>], iteration_bounds = array<i64: 1>, scalar_prefetch = 0 : i64, scratch_operands = 0 : i64, tpu.core_type = #tpu.core_type<tc>, window_params = [{transform_indices = @transform_0, window_bounds = array<i64: 8, 10>}, {pipeline_mode = #tpu.pipeline_mode<synchronous>, transform_indices = @transform_1, window_bounds = array<i64: 1, 384>}, {pipeline_mode = #tpu.pipeline_mode<synchronous>, transform_indices = @transform_2, window_bounds = array<i64: 1, 384>}, {pipeline_mode = #tpu.pipeline_mode<synchronous>, transform_indices = @transform_3, window_bounds = array<i64: 1, 128>}, {pipeline_mode = #tpu.pipeline_mode<synchronous>, transform_indices = @transform_4, window_bounds = array<i64: 256, 768>}, {pipeline_mode = #tpu.pipeline_mode<synchronous>, transform_indices = @transform_5, window_bounds = array<i64: 128, 384>}, {pipeline_mode = #tpu.pipeline_mode<synchronous>, transform_indices = @transform_6, window_bounds = array<i64: 1, 384>}, {pipeline_mode = #tpu.pipeline_mode<synchronous>, transform_indices = @transform_7, window_bounds = array<i64: 1, 128>}, {pipeline_mode = #tpu.pipeline_mode<synchronous>, transform_indices = @transform_8, window_bounds = array<i64: 1, 128>}, {pipeline_mode = #tpu.pipeline_mode<synchronous>, transform_indices = @transform_9, window_bounds = array<i64: 1, 1>}, {transform_indices = @transform_10, window_bounds = array<i64: 8, 5>}]} {
    %c0 = arith.constant 0 : index
    %c0_0 = arith.constant 0 : index
    %0 = vector.load %arg2[%c0, %c0_0] : memref<1x384xf32, #tpu.memory_space<vmem>>, vector<1x384xf32>
    %c0_1 = arith.constant 0 : index
    %c0_2 = arith.constant 0 : index
    %1 = vector.load %arg3[%c0_1, %c0_2] : memref<1x384xf32, #tpu.memory_space<vmem>>, vector<1x384xf32>
    %c0_3 = arith.constant 0 : index
    %c0_4 = arith.constant 0 : index
    %2 = vector.load %arg4[%c0_3, %c0_4] : memref<1x128xf32, #tpu.memory_space<vmem>>, vector<1x128xf32>
    %c0_5 = arith.constant 0 : index
    %c0_6 = arith.constant 0 : index
    %3 = vector.load %arg5[%c0_5, %c0_6] : memref<256x768xbf16, #tpu.memory_space<vmem>>, vector<256x768xbf16>
    %c0_7 = arith.constant 0 : index
    %c0_8 = arith.constant 0 : index
    %4 = vector.load %arg6[%c0_7, %c0_8] : memref<128x384xbf16, #tpu.memory_space<vmem>>, vector<128x384xbf16>
    %c0_9 = arith.constant 0 : index
    %c0_10 = arith.constant 0 : index
    %5 = vector.load %arg7[%c0_9, %c0_10] : memref<1x384xf32, #tpu.memory_space<vmem>>, vector<1x384xf32>
    %c0_11 = arith.constant 0 : index
    %c0_12 = arith.constant 0 : index
    %6 = vector.load %arg8[%c0_11, %c0_12] : memref<1x128xf32, #tpu.memory_space<vmem>>, vector<1x128xf32>
    %c0_13 = arith.constant 0 : index
    %c0_14 = arith.constant 0 : index
    %7 = vector.load %arg9[%c0_13, %c0_14] : memref<1x128xf32, #tpu.memory_space<vmem>>, vector<1x128xf32>
    %c0_15 = arith.constant 0 : index
    %c0_16 = arith.constant 0 : index
    %8 = vector.load %arg10[%c0_15, %c0_16] : memref<1x1xf32, #tpu.memory_space<vmem>>, vector<1x1xf32>
    %c0_17 = arith.constant 0 : index
    %c0_18 = arith.constant 0 : index
    %9 = vector.load %arg1[%c0_17, %c0_18] : memref<8x10xf32, #tpu.memory_space<vmem>>, vector<8x10xf32>
    %c0_i32 = arith.constant 0 : i32
    %c5_i32 = arith.constant 5 : i32
    %10 = arith.addi %c0_i32, %c5_i32 : i32
    %c1_i32 = arith.constant 1 : i32
    %11 = scf.for %arg12 = %c0_i32 to %10 step %c1_i32 iter_args(%arg13 = %9) -> (vector<8x10xf32>)  : i32 {
      %14 = vector.extract_strided_slice %arg13 {offsets = [0, 0], sizes = [8, 1], strides = [1, 1]} : vector<8x10xf32> to vector<8x1xf32>
      %15 = vector.broadcast %14 : vector<8x1xf32> to vector<8x384xf32>
      %16 = vector.broadcast %0 : vector<1x384xf32> to vector<8x384xf32>
      %17 = arith.mulf %15, %16 : vector<8x384xf32>
      %18 = vector.broadcast %1 : vector<1x384xf32> to vector<8x384xf32>
      %19 = arith.addf %17, %18 : vector<8x384xf32>
      %20 = vector.extract_strided_slice %19 {offsets = [0, 0], sizes = [8, 256], strides = [1, 1]} : vector<8x384xf32> to vector<8x256xf32>
      %21 = arith.negf %20 : vector<8x256xf32>
      %22 = math.exp %21 : vector<8x256xf32>
      %cst = arith.constant 1.000000e+00 : f32
      %23 = vector.broadcast %cst : f32 to vector<8x256xf32>
      %24 = arith.addf %23, %22 : vector<8x256xf32>
      %25 = arith.divf %23, %24 : vector<8x256xf32>
      %26 = vector.extract_strided_slice %19 {offsets = [0, 256], sizes = [8, 128], strides = [1, 1]} : vector<8x384xf32> to vector<8x128xf32>
      %27 = vector.extract_strided_slice %25 {offsets = [0, 0], sizes = [8, 128], strides = [1, 1]} : vector<8x256xf32> to vector<8x128xf32>
      %28 = vector.broadcast %2 : vector<1x128xf32> to vector<8x128xf32>
      %29 = arith.mulf %27, %28 : vector<8x128xf32>
      %30 = arith.addf %26, %29 : vector<8x128xf32>
      %31 = math.tanh %30 : vector<8x128xf32>
      %32 = vector.extract_strided_slice %25 {offsets = [0, 128], sizes = [8, 128], strides = [1, 1]} : vector<8x256xf32> to vector<8x128xf32>
      %cst_21 = arith.constant 1.000000e+00 : f32
      %33 = vector.broadcast %cst_21 : f32 to vector<8x128xf32>
      %34 = arith.subf %33, %32 : vector<8x128xf32>
      %35 = arith.mulf %34, %31 : vector<8x128xf32>
      %36 = arith.truncf %35 : vector<8x128xf32> to vector<8x128xbf16>
      %cst_22 = arith.constant dense<0.000000e+00> : vector<8x384xf32>
      %37 = tpu.matmul %36, %4, %cst_22 {dimension_numbers = #tpu.dot_dimension_numbers<[1], [0], [0], [1], [0, 0, 1, 1], [], []>} : vector<8x128xbf16>, vector<128x384xbf16>, vector<8x384xf32> -> vector<8x384xf32>
      %38 = vector.broadcast %5 : vector<1x384xf32> to vector<8x384xf32>
      %39 = arith.addf %37, %38 : vector<8x384xf32>
      %40 = vector.extract_strided_slice %39 {offsets = [0, 0], sizes = [8, 256], strides = [1, 1]} : vector<8x384xf32> to vector<8x256xf32>
      %41 = arith.negf %40 : vector<8x256xf32>
      %42 = math.exp %41 : vector<8x256xf32>
      %cst_23 = arith.constant 1.000000e+00 : f32
      %43 = vector.broadcast %cst_23 : f32 to vector<8x256xf32>
      %44 = arith.addf %43, %42 : vector<8x256xf32>
      %45 = arith.divf %43, %44 : vector<8x256xf32>
      %46 = vector.extract_strided_slice %39 {offsets = [0, 256], sizes = [8, 128], strides = [1, 1]} : vector<8x384xf32> to vector<8x128xf32>
      %47 = vector.extract_strided_slice %45 {offsets = [0, 0], sizes = [8, 128], strides = [1, 1]} : vector<8x256xf32> to vector<8x128xf32>
      %48 = vector.broadcast %6 : vector<1x128xf32> to vector<8x128xf32>
      %49 = arith.mulf %47, %48 : vector<8x128xf32>
      %50 = arith.addf %46, %49 : vector<8x128xf32>
      %51 = math.tanh %50 : vector<8x128xf32>
      %52 = vector.extract_strided_slice %45 {offsets = [0, 128], sizes = [8, 128], strides = [1, 1]} : vector<8x256xf32> to vector<8x128xf32>
      %cst_24 = arith.constant 1.000000e+00 : f32
      %53 = vector.broadcast %cst_24 : f32 to vector<8x128xf32>
      %54 = arith.subf %53, %52 : vector<8x128xf32>
      %55 = arith.mulf %54, %51 : vector<8x128xf32>
      %56 = vector.extract_strided_slice %arg13 {offsets = [0, 1], sizes = [8, 1], strides = [1, 1]} : vector<8x10xf32> to vector<8x1xf32>
      %57 = vector.broadcast %56 : vector<8x1xf32> to vector<8x384xf32>
      %58 = vector.broadcast %0 : vector<1x384xf32> to vector<8x384xf32>
      %59 = arith.mulf %57, %58 : vector<8x384xf32>
      %60 = vector.broadcast %1 : vector<1x384xf32> to vector<8x384xf32>
      %61 = arith.addf %59, %60 : vector<8x384xf32>
      %62 = tpu.concatenate %35, %55 in 1 : vector<8x128xf32>, vector<8x128xf32> -> vector<8x256xf32>
      %63 = arith.truncf %62 : vector<8x256xf32> to vector<8x256xbf16>
      %cst_25 = arith.constant dense<0.000000e+00> : vector<8x768xf32>
      %64 = tpu.matmul %63, %3, %cst_25 {dimension_numbers = #tpu.dot_dimension_numbers<[1], [0], [0], [1], [0, 0, 1, 1], [], []>} : vector<8x256xbf16>, vector<256x768xbf16>, vector<8x768xf32> -> vector<8x768xf32>
      %65 = vector.extract_strided_slice %64 {offsets = [0, 0], sizes = [8, 384], strides = [1, 1]} : vector<8x768xf32> to vector<8x384xf32>
      %66 = vector.extract_strided_slice %61 {offsets = [0, 0], sizes = [8, 256], strides = [1, 1]} : vector<8x384xf32> to vector<8x256xf32>
      %67 = vector.extract_strided_slice %65 {offsets = [0, 0], sizes = [8, 256], strides = [1, 1]} : vector<8x384xf32> to vector<8x256xf32>
      %68 = arith.addf %66, %67 : vector<8x256xf32>
      %69 = arith.negf %68 : vector<8x256xf32>
      %70 = math.exp %69 : vector<8x256xf32>
      %cst_26 = arith.constant 1.000000e+00 : f32
      %71 = vector.broadcast %cst_26 : f32 to vector<8x256xf32>
      %72 = arith.addf %71, %70 : vector<8x256xf32>
      %73 = arith.divf %71, %72 : vector<8x256xf32>
      %74 = vector.extract_strided_slice %61 {offsets = [0, 256], sizes = [8, 128], strides = [1, 1]} : vector<8x384xf32> to vector<8x128xf32>
      %75 = vector.extract_strided_slice %73 {offsets = [0, 0], sizes = [8, 128], strides = [1, 1]} : vector<8x256xf32> to vector<8x128xf32>
      %76 = vector.extract_strided_slice %65 {offsets = [0, 256], sizes = [8, 128], strides = [1, 1]} : vector<8x384xf32> to vector<8x128xf32>
      %77 = vector.broadcast %2 : vector<1x128xf32> to vector<8x128xf32>
      %78 = arith.addf %76, %77 : vector<8x128xf32>
      %79 = arith.mulf %75, %78 : vector<8x128xf32>
      %80 = arith.addf %74, %79 : vector<8x128xf32>
      %81 = math.tanh %80 : vector<8x128xf32>
      %82 = vector.extract_strided_slice %73 {offsets = [0, 128], sizes = [8, 128], strides = [1, 1]} : vector<8x256xf32> to vector<8x128xf32>
      %cst_27 = arith.constant 1.000000e+00 : f32
      %83 = vector.broadcast %cst_27 : f32 to vector<8x128xf32>
      %84 = arith.subf %83, %82 : vector<8x128xf32>
      %85 = arith.mulf %84, %81 : vector<8x128xf32>
      %86 = vector.extract_strided_slice %73 {offsets = [0, 128], sizes = [8, 128], strides = [1, 1]} : vector<8x256xf32> to vector<8x128xf32>
      %87 = arith.mulf %86, %35 : vector<8x128xf32>
      %88 = arith.addf %85, %87 : vector<8x128xf32>
      %89 = vector.extract_strided_slice %64 {offsets = [0, 384], sizes = [8, 384], strides = [1, 1]} : vector<8x768xf32> to vector<8x384xf32>
      %90 = arith.truncf %88 : vector<8x128xf32> to vector<8x128xbf16>
      %cst_28 = arith.constant dense<0.000000e+00> : vector<8x384xf32>
      %91 = tpu.matmul %90, %4, %cst_28 {dimension_numbers = #tpu.dot_dimension_numbers<[1], [0], [0], [1], [0, 0, 1, 1], [], []>} : vector<8x128xbf16>, vector<128x384xbf16>, vector<8x384xf32> -> vector<8x384xf32>
      %92 = vector.broadcast %5 : vector<1x384xf32> to vector<8x384xf32>
      %93 = arith.addf %91, %92 : vector<8x384xf32>
      %94 = vector.extract_strided_slice %93 {offsets = [0, 0], sizes = [8, 256], strides = [1, 1]} : vector<8x384xf32> to vector<8x256xf32>
      %95 = vector.extract_strided_slice %89 {offsets = [0, 0], sizes = [8, 256], strides = [1, 1]} : vector<8x384xf32> to vector<8x256xf32>
      %96 = arith.addf %94, %95 : vector<8x256xf32>
      %97 = arith.negf %96 : vector<8x256xf32>
      %98 = math.exp %97 : vector<8x256xf32>
      %cst_29 = arith.constant 1.000000e+00 : f32
      %99 = vector.broadcast %cst_29 : f32 to vector<8x256xf32>
      %100 = arith.addf %99, %98 : vector<8x256xf32>
      %101 = arith.divf %99, %100 : vector<8x256xf32>
      %102 = vector.extract_strided_slice %93 {offsets = [0, 256], sizes = [8, 128], strides = [1, 1]} : vector<8x384xf32> to vector<8x128xf32>
      %103 = vector.extract_strided_slice %101 {offsets = [0, 0], sizes = [8, 128], strides = [1, 1]} : vector<8x256xf32> to vector<8x128xf32>
      %104 = vector.extract_strided_slice %89 {offsets = [0, 256], sizes = [8, 128], strides = [1, 1]} : vector<8x384xf32> to vector<8x128xf32>
      %105 = vector.broadcast %6 : vector<1x128xf32> to vector<8x128xf32>
      %106 = arith.addf %104, %105 : vector<8x128xf32>
      %107 = arith.mulf %103, %106 : vector<8x128xf32>
      %108 = arith.addf %102, %107 : vector<8x128xf32>
      %109 = math.tanh %108 : vector<8x128xf32>
      %110 = vector.extract_strided_slice %101 {offsets = [0, 128], sizes = [8, 128], strides = [1, 1]} : vector<8x256xf32> to vector<8x128xf32>
      %cst_30 = arith.constant 1.000000e+00 : f32
      %111 = vector.broadcast %cst_30 : f32 to vector<8x128xf32>
      %112 = arith.subf %111, %110 : vector<8x128xf32>
      %113 = arith.mulf %112, %109 : vector<8x128xf32>
      %114 = vector.extract_strided_slice %101 {offsets = [0, 128], sizes = [8, 128], strides = [1, 1]} : vector<8x256xf32> to vector<8x128xf32>
      %115 = arith.mulf %114, %55 : vector<8x128xf32>
      %116 = arith.addf %113, %115 : vector<8x128xf32>
      %117 = vector.extract_strided_slice %arg13 {offsets = [0, 2], sizes = [8, 1], strides = [1, 1]} : vector<8x10xf32> to vector<8x1xf32>
      %118 = vector.broadcast %117 : vector<8x1xf32> to vector<8x384xf32>
      %119 = vector.broadcast %0 : vector<1x384xf32> to vector<8x384xf32>
      %120 = arith.mulf %118, %119 : vector<8x384xf32>
      %121 = vector.broadcast %1 : vector<1x384xf32> to vector<8x384xf32>
      %122 = arith.addf %120, %121 : vector<8x384xf32>
      %123 = tpu.concatenate %88, %116 in 1 : vector<8x128xf32>, vector<8x128xf32> -> vector<8x256xf32>
      %124 = arith.truncf %123 : vector<8x256xf32> to vector<8x256xbf16>
      %cst_31 = arith.constant dense<0.000000e+00> : vector<8x768xf32>
      %125 = tpu.matmul %124, %3, %cst_31 {dimension_numbers = #tpu.dot_dimension_numbers<[1], [0], [0], [1], [0, 0, 1, 1], [], []>} : vector<8x256xbf16>, vector<256x768xbf16>, vector<8x768xf32> -> vector<8x768xf32>
      %126 = vector.extract_strided_slice %125 {offsets = [0, 0], sizes = [8, 384], strides = [1, 1]} : vector<8x768xf32> to vector<8x384xf32>
      %127 = vector.extract_strided_slice %122 {offsets = [0, 0], sizes = [8, 256], strides = [1, 1]} : vector<8x384xf32> to vector<8x256xf32>
      %128 = vector.extract_strided_slice %126 {offsets = [0, 0], sizes = [8, 256], strides = [1, 1]} : vector<8x384xf32> to vector<8x256xf32>
      %129 = arith.addf %127, %128 : vector<8x256xf32>
      %130 = arith.negf %129 : vector<8x256xf32>
      %131 = math.exp %130 : vector<8x256xf32>
      %cst_32 = arith.constant 1.000000e+00 : f32
      %132 = vector.broadcast %cst_32 : f32 to vector<8x256xf32>
      %133 = arith.addf %132, %131 : vector<8x256xf32>
      %134 = arith.divf %132, %133 : vector<8x256xf32>
      %135 = vector.extract_strided_slice %122 {offsets = [0, 256], sizes = [8, 128], strides = [1, 1]} : vector<8x384xf32> to vector<8x128xf32>
      %136 = vector.extract_strided_slice %134 {offsets = [0, 0], sizes = [8, 128], strides = [1, 1]} : vector<8x256xf32> to vector<8x128xf32>
      %137 = vector.extract_strided_slice %126 {offsets = [0, 256], sizes = [8, 128], strides = [1, 1]} : vector<8x384xf32> to vector<8x128xf32>
      %138 = vector.broadcast %2 : vector<1x128xf32> to vector<8x128xf32>
      %139 = arith.addf %137, %138 : vector<8x128xf32>
      %140 = arith.mulf %136, %139 : vector<8x128xf32>
      %141 = arith.addf %135, %140 : vector<8x128xf32>
      %142 = math.tanh %141 : vector<8x128xf32>
      %143 = vector.extract_strided_slice %134 {offsets = [0, 128], sizes = [8, 128], strides = [1, 1]} : vector<8x256xf32> to vector<8x128xf32>
      %cst_33 = arith.constant 1.000000e+00 : f32
      %144 = vector.broadcast %cst_33 : f32 to vector<8x128xf32>
      %145 = arith.subf %144, %143 : vector<8x128xf32>
      %146 = arith.mulf %145, %142 : vector<8x128xf32>
      %147 = vector.extract_strided_slice %134 {offsets = [0, 128], sizes = [8, 128], strides = [1, 1]} : vector<8x256xf32> to vector<8x128xf32>
      %148 = arith.mulf %147, %88 : vector<8x128xf32>
      %149 = arith.addf %146, %148 : vector<8x128xf32>
      %150 = vector.extract_strided_slice %125 {offsets = [0, 384], sizes = [8, 384], strides = [1, 1]} : vector<8x768xf32> to vector<8x384xf32>
      %151 = arith.truncf %149 : vector<8x128xf32> to vector<8x128xbf16>
      %cst_34 = arith.constant dense<0.000000e+00> : vector<8x384xf32>
      %152 = tpu.matmul %151, %4, %cst_34 {dimension_numbers = #tpu.dot_dimension_numbers<[1], [0], [0], [1], [0, 0, 1, 1], [], []>} : vector<8x128xbf16>, vector<128x384xbf16>, vector<8x384xf32> -> vector<8x384xf32>
      %153 = vector.broadcast %5 : vector<1x384xf32> to vector<8x384xf32>
      %154 = arith.addf %152, %153 : vector<8x384xf32>
      %155 = vector.extract_strided_slice %154 {offsets = [0, 0], sizes = [8, 256], strides = [1, 1]} : vector<8x384xf32> to vector<8x256xf32>
      %156 = vector.extract_strided_slice %150 {offsets = [0, 0], sizes = [8, 256], strides = [1, 1]} : vector<8x384xf32> to vector<8x256xf32>
      %157 = arith.addf %155, %156 : vector<8x256xf32>
      %158 = arith.negf %157 : vector<8x256xf32>
      %159 = math.exp %158 : vector<8x256xf32>
      %cst_35 = arith.constant 1.000000e+00 : f32
      %160 = vector.broadcast %cst_35 : f32 to vector<8x256xf32>
      %161 = arith.addf %160, %159 : vector<8x256xf32>
      %162 = arith.divf %160, %161 : vector<8x256xf32>
      %163 = vector.extract_strided_slice %154 {offsets = [0, 256], sizes = [8, 128], strides = [1, 1]} : vector<8x384xf32> to vector<8x128xf32>
      %164 = vector.extract_strided_slice %162 {offsets = [0, 0], sizes = [8, 128], strides = [1, 1]} : vector<8x256xf32> to vector<8x128xf32>
      %165 = vector.extract_strided_slice %150 {offsets = [0, 256], sizes = [8, 128], strides = [1, 1]} : vector<8x384xf32> to vector<8x128xf32>
      %166 = vector.broadcast %6 : vector<1x128xf32> to vector<8x128xf32>
      %167 = arith.addf %165, %166 : vector<8x128xf32>
      %168 = arith.mulf %164, %167 : vector<8x128xf32>
      %169 = arith.addf %163, %168 : vector<8x128xf32>
      %170 = math.tanh %169 : vector<8x128xf32>
      %171 = vector.extract_strided_slice %162 {offsets = [0, 128], sizes = [8, 128], strides = [1, 1]} : vector<8x256xf32> to vector<8x128xf32>
      %cst_36 = arith.constant 1.000000e+00 : f32
      %172 = vector.broadcast %cst_36 : f32 to vector<8x128xf32>
      %173 = arith.subf %172, %171 : vector<8x128xf32>
      %174 = arith.mulf %173, %170 : vector<8x128xf32>
      %175 = vector.extract_strided_slice %162 {offsets = [0, 128], sizes = [8, 128], strides = [1, 1]} : vector<8x256xf32> to vector<8x128xf32>
      %176 = arith.mulf %175, %116 : vector<8x128xf32>
      %177 = arith.addf %174, %176 : vector<8x128xf32>
      %178 = vector.extract_strided_slice %arg13 {offsets = [0, 3], sizes = [8, 1], strides = [1, 1]} : vector<8x10xf32> to vector<8x1xf32>
      %179 = vector.broadcast %178 : vector<8x1xf32> to vector<8x384xf32>
      %180 = vector.broadcast %0 : vector<1x384xf32> to vector<8x384xf32>
      %181 = arith.mulf %179, %180 : vector<8x384xf32>
      %182 = vector.broadcast %1 : vector<1x384xf32> to vector<8x384xf32>
      %183 = arith.addf %181, %182 : vector<8x384xf32>
      %184 = tpu.concatenate %149, %177 in 1 : vector<8x128xf32>, vector<8x128xf32> -> vector<8x256xf32>
      %185 = arith.truncf %184 : vector<8x256xf32> to vector<8x256xbf16>
      %cst_37 = arith.constant dense<0.000000e+00> : vector<8x768xf32>
      %186 = tpu.matmul %185, %3, %cst_37 {dimension_numbers = #tpu.dot_dimension_numbers<[1], [0], [0], [1], [0, 0, 1, 1], [], []>} : vector<8x256xbf16>, vector<256x768xbf16>, vector<8x768xf32> -> vector<8x768xf32>
      %187 = vector.extract_strided_slice %186 {offsets = [0, 0], sizes = [8, 384], strides = [1, 1]} : vector<8x768xf32> to vector<8x384xf32>
      %188 = vector.extract_strided_slice %183 {offsets = [0, 0], sizes = [8, 256], strides = [1, 1]} : vector<8x384xf32> to vector<8x256xf32>
      %189 = vector.extract_strided_slice %187 {offsets = [0, 0], sizes = [8, 256], strides = [1, 1]} : vector<8x384xf32> to vector<8x256xf32>
      %190 = arith.addf %188, %189 : vector<8x256xf32>
      %191 = arith.negf %190 : vector<8x256xf32>
      %192 = math.exp %191 : vector<8x256xf32>
      %cst_38 = arith.constant 1.000000e+00 : f32
      %193 = vector.broadcast %cst_38 : f32 to vector<8x256xf32>
      %194 = arith.addf %193, %192 : vector<8x256xf32>
      %195 = arith.divf %193, %194 : vector<8x256xf32>
      %196 = vector.extract_strided_slice %183 {offsets = [0, 256], sizes = [8, 128], strides = [1, 1]} : vector<8x384xf32> to vector<8x128xf32>
      %197 = vector.extract_strided_slice %195 {offsets = [0, 0], sizes = [8, 128], strides = [1, 1]} : vector<8x256xf32> to vector<8x128xf32>
      %198 = vector.extract_strided_slice %187 {offsets = [0, 256], sizes = [8, 128], strides = [1, 1]} : vector<8x384xf32> to vector<8x128xf32>
      %199 = vector.broadcast %2 : vector<1x128xf32> to vector<8x128xf32>
      %200 = arith.addf %198, %199 : vector<8x128xf32>
      %201 = arith.mulf %197, %200 : vector<8x128xf32>
      %202 = arith.addf %196, %201 : vector<8x128xf32>
      %203 = math.tanh %202 : vector<8x128xf32>
      %204 = vector.extract_strided_slice %195 {offsets = [0, 128], sizes = [8, 128], strides = [1, 1]} : vector<8x256xf32> to vector<8x128xf32>
      %cst_39 = arith.constant 1.000000e+00 : f32
      %205 = vector.broadcast %cst_39 : f32 to vector<8x128xf32>
      %206 = arith.subf %205, %204 : vector<8x128xf32>
      %207 = arith.mulf %206, %203 : vector<8x128xf32>
      %208 = vector.extract_strided_slice %195 {offsets = [0, 128], sizes = [8, 128], strides = [1, 1]} : vector<8x256xf32> to vector<8x128xf32>
      %209 = arith.mulf %208, %149 : vector<8x128xf32>
      %210 = arith.addf %207, %209 : vector<8x128xf32>
      %211 = vector.extract_strided_slice %186 {offsets = [0, 384], sizes = [8, 384], strides = [1, 1]} : vector<8x768xf32> to vector<8x384xf32>
      %212 = arith.truncf %210 : vector<8x128xf32> to vector<8x128xbf16>
      %cst_40 = arith.constant dense<0.000000e+00> : vector<8x384xf32>
      %213 = tpu.matmul %212, %4, %cst_40 {dimension_numbers = #tpu.dot_dimension_numbers<[1], [0], [0], [1], [0, 0, 1, 1], [], []>} : vector<8x128xbf16>, vector<128x384xbf16>, vector<8x384xf32> -> vector<8x384xf32>
      %214 = vector.broadcast %5 : vector<1x384xf32> to vector<8x384xf32>
      %215 = arith.addf %213, %214 : vector<8x384xf32>
      %216 = vector.extract_strided_slice %215 {offsets = [0, 0], sizes = [8, 256], strides = [1, 1]} : vector<8x384xf32> to vector<8x256xf32>
      %217 = vector.extract_strided_slice %211 {offsets = [0, 0], sizes = [8, 256], strides = [1, 1]} : vector<8x384xf32> to vector<8x256xf32>
      %218 = arith.addf %216, %217 : vector<8x256xf32>
      %219 = arith.negf %218 : vector<8x256xf32>
      %220 = math.exp %219 : vector<8x256xf32>
      %cst_41 = arith.constant 1.000000e+00 : f32
      %221 = vector.broadcast %cst_41 : f32 to vector<8x256xf32>
      %222 = arith.addf %221, %220 : vector<8x256xf32>
      %223 = arith.divf %221, %222 : vector<8x256xf32>
      %224 = vector.extract_strided_slice %215 {offsets = [0, 256], sizes = [8, 128], strides = [1, 1]} : vector<8x384xf32> to vector<8x128xf32>
      %225 = vector.extract_strided_slice %223 {offsets = [0, 0], sizes = [8, 128], strides = [1, 1]} : vector<8x256xf32> to vector<8x128xf32>
      %226 = vector.extract_strided_slice %211 {offsets = [0, 256], sizes = [8, 128], strides = [1, 1]} : vector<8x384xf32> to vector<8x128xf32>
      %227 = vector.broadcast %6 : vector<1x128xf32> to vector<8x128xf32>
      %228 = arith.addf %226, %227 : vector<8x128xf32>
      %229 = arith.mulf %225, %228 : vector<8x128xf32>
      %230 = arith.addf %224, %229 : vector<8x128xf32>
      %231 = math.tanh %230 : vector<8x128xf32>
      %232 = vector.extract_strided_slice %223 {offsets = [0, 128], sizes = [8, 128], strides = [1, 1]} : vector<8x256xf32> to vector<8x128xf32>
      %cst_42 = arith.constant 1.000000e+00 : f32
      %233 = vector.broadcast %cst_42 : f32 to vector<8x128xf32>
      %234 = arith.subf %233, %232 : vector<8x128xf32>
      %235 = arith.mulf %234, %231 : vector<8x128xf32>
      %236 = vector.extract_strided_slice %223 {offsets = [0, 128], sizes = [8, 128], strides = [1, 1]} : vector<8x256xf32> to vector<8x128xf32>
      %237 = arith.mulf %236, %177 : vector<8x128xf32>
      %238 = arith.addf %235, %237 : vector<8x128xf32>
      %239 = vector.extract_strided_slice %arg13 {offsets = [0, 4], sizes = [8, 1], strides = [1, 1]} : vector<8x10xf32> to vector<8x1xf32>
      %240 = vector.broadcast %239 : vector<8x1xf32> to vector<8x384xf32>
      %241 = vector.broadcast %0 : vector<1x384xf32> to vector<8x384xf32>
      %242 = arith.mulf %240, %241 : vector<8x384xf32>
      %243 = vector.broadcast %1 : vector<1x384xf32> to vector<8x384xf32>
      %244 = arith.addf %242, %243 : vector<8x384xf32>
      %245 = tpu.concatenate %210, %238 in 1 : vector<8x128xf32>, vector<8x128xf32> -> vector<8x256xf32>
      %246 = arith.truncf %245 : vector<8x256xf32> to vector<8x256xbf16>
      %cst_43 = arith.constant dense<0.000000e+00> : vector<8x768xf32>
      %247 = tpu.matmul %246, %3, %cst_43 {dimension_numbers = #tpu.dot_dimension_numbers<[1], [0], [0], [1], [0, 0, 1, 1], [], []>} : vector<8x256xbf16>, vector<256x768xbf16>, vector<8x768xf32> -> vector<8x768xf32>
      %248 = vector.extract_strided_slice %247 {offsets = [0, 0], sizes = [8, 384], strides = [1, 1]} : vector<8x768xf32> to vector<8x384xf32>
      %249 = vector.extract_strided_slice %244 {offsets = [0, 0], sizes = [8, 256], strides = [1, 1]} : vector<8x384xf32> to vector<8x256xf32>
      %250 = vector.extract_strided_slice %248 {offsets = [0, 0], sizes = [8, 256], strides = [1, 1]} : vector<8x384xf32> to vector<8x256xf32>
      %251 = arith.addf %249, %250 : vector<8x256xf32>
      %252 = arith.negf %251 : vector<8x256xf32>
      %253 = math.exp %252 : vector<8x256xf32>
      %cst_44 = arith.constant 1.000000e+00 : f32
      %254 = vector.broadcast %cst_44 : f32 to vector<8x256xf32>
      %255 = arith.addf %254, %253 : vector<8x256xf32>
      %256 = arith.divf %254, %255 : vector<8x256xf32>
      %257 = vector.extract_strided_slice %244 {offsets = [0, 256], sizes = [8, 128], strides = [1, 1]} : vector<8x384xf32> to vector<8x128xf32>
      %258 = vector.extract_strided_slice %256 {offsets = [0, 0], sizes = [8, 128], strides = [1, 1]} : vector<8x256xf32> to vector<8x128xf32>
      %259 = vector.extract_strided_slice %248 {offsets = [0, 256], sizes = [8, 128], strides = [1, 1]} : vector<8x384xf32> to vector<8x128xf32>
      %260 = vector.broadcast %2 : vector<1x128xf32> to vector<8x128xf32>
      %261 = arith.addf %259, %260 : vector<8x128xf32>
      %262 = arith.mulf %258, %261 : vector<8x128xf32>
      %263 = arith.addf %257, %262 : vector<8x128xf32>
      %264 = math.tanh %263 : vector<8x128xf32>
      %265 = vector.extract_strided_slice %256 {offsets = [0, 128], sizes = [8, 128], strides = [1, 1]} : vector<8x256xf32> to vector<8x128xf32>
      %cst_45 = arith.constant 1.000000e+00 : f32
      %266 = vector.broadcast %cst_45 : f32 to vector<8x128xf32>
      %267 = arith.subf %266, %265 : vector<8x128xf32>
      %268 = arith.mulf %267, %264 : vector<8x128xf32>
      %269 = vector.extract_strided_slice %256 {offsets = [0, 128], sizes = [8, 128], strides = [1, 1]} : vector<8x256xf32> to vector<8x128xf32>
      %270 = arith.mulf %269, %210 : vector<8x128xf32>
      %271 = arith.addf %268, %270 : vector<8x128xf32>
      %272 = vector.extract_strided_slice %247 {offsets = [0, 384], sizes = [8, 384], strides = [1, 1]} : vector<8x768xf32> to vector<8x384xf32>
      %273 = arith.truncf %271 : vector<8x128xf32> to vector<8x128xbf16>
      %cst_46 = arith.constant dense<0.000000e+00> : vector<8x384xf32>
      %274 = tpu.matmul %273, %4, %cst_46 {dimension_numbers = #tpu.dot_dimension_numbers<[1], [0], [0], [1], [0, 0, 1, 1], [], []>} : vector<8x128xbf16>, vector<128x384xbf16>, vector<8x384xf32> -> vector<8x384xf32>
      %275 = vector.broadcast %5 : vector<1x384xf32> to vector<8x384xf32>
      %276 = arith.addf %274, %275 : vector<8x384xf32>
      %277 = vector.extract_strided_slice %276 {offsets = [0, 0], sizes = [8, 256], strides = [1, 1]} : vector<8x384xf32> to vector<8x256xf32>
      %278 = vector.extract_strided_slice %272 {offsets = [0, 0], sizes = [8, 256], strides = [1, 1]} : vector<8x384xf32> to vector<8x256xf32>
      %279 = arith.addf %277, %278 : vector<8x256xf32>
      %280 = arith.negf %279 : vector<8x256xf32>
      %281 = math.exp %280 : vector<8x256xf32>
      %cst_47 = arith.constant 1.000000e+00 : f32
      %282 = vector.broadcast %cst_47 : f32 to vector<8x256xf32>
      %283 = arith.addf %282, %281 : vector<8x256xf32>
      %284 = arith.divf %282, %283 : vector<8x256xf32>
      %285 = vector.extract_strided_slice %276 {offsets = [0, 256], sizes = [8, 128], strides = [1, 1]} : vector<8x384xf32> to vector<8x128xf32>
      %286 = vector.extract_strided_slice %284 {offsets = [0, 0], sizes = [8, 128], strides = [1, 1]} : vector<8x256xf32> to vector<8x128xf32>
      %287 = vector.extract_strided_slice %272 {offsets = [0, 256], sizes = [8, 128], strides = [1, 1]} : vector<8x384xf32> to vector<8x128xf32>
      %288 = vector.broadcast %6 : vector<1x128xf32> to vector<8x128xf32>
      %289 = arith.addf %287, %288 : vector<8x128xf32>
      %290 = arith.mulf %286, %289 : vector<8x128xf32>
      %291 = arith.addf %285, %290 : vector<8x128xf32>
      %292 = math.tanh %291 : vector<8x128xf32>
      %293 = vector.extract_strided_slice %284 {offsets = [0, 128], sizes = [8, 128], strides = [1, 1]} : vector<8x256xf32> to vector<8x128xf32>
      %cst_48 = arith.constant 1.000000e+00 : f32
      %294 = vector.broadcast %cst_48 : f32 to vector<8x128xf32>
      %295 = arith.subf %294, %293 : vector<8x128xf32>
      %296 = arith.mulf %295, %292 : vector<8x128xf32>
      %297 = vector.extract_strided_slice %284 {offsets = [0, 128], sizes = [8, 128], strides = [1, 1]} : vector<8x256xf32> to vector<8x128xf32>
      %298 = arith.mulf %297, %238 : vector<8x128xf32>
      %299 = arith.addf %296, %298 : vector<8x128xf32>
      %300 = vector.extract_strided_slice %arg13 {offsets = [0, 5], sizes = [8, 1], strides = [1, 1]} : vector<8x10xf32> to vector<8x1xf32>
      %301 = vector.broadcast %300 : vector<8x1xf32> to vector<8x384xf32>
      %302 = vector.broadcast %0 : vector<1x384xf32> to vector<8x384xf32>
      %303 = arith.mulf %301, %302 : vector<8x384xf32>
      %304 = vector.broadcast %1 : vector<1x384xf32> to vector<8x384xf32>
      %305 = arith.addf %303, %304 : vector<8x384xf32>
      %306 = tpu.concatenate %271, %299 in 1 : vector<8x128xf32>, vector<8x128xf32> -> vector<8x256xf32>
      %307 = arith.truncf %306 : vector<8x256xf32> to vector<8x256xbf16>
      %cst_49 = arith.constant dense<0.000000e+00> : vector<8x768xf32>
      %308 = tpu.matmul %307, %3, %cst_49 {dimension_numbers = #tpu.dot_dimension_numbers<[1], [0], [0], [1], [0, 0, 1, 1], [], []>} : vector<8x256xbf16>, vector<256x768xbf16>, vector<8x768xf32> -> vector<8x768xf32>
      %309 = vector.extract_strided_slice %308 {offsets = [0, 0], sizes = [8, 384], strides = [1, 1]} : vector<8x768xf32> to vector<8x384xf32>
      %310 = vector.extract_strided_slice %305 {offsets = [0, 0], sizes = [8, 256], strides = [1, 1]} : vector<8x384xf32> to vector<8x256xf32>
      %311 = vector.extract_strided_slice %309 {offsets = [0, 0], sizes = [8, 256], strides = [1, 1]} : vector<8x384xf32> to vector<8x256xf32>
      %312 = arith.addf %310, %311 : vector<8x256xf32>
      %313 = arith.negf %312 : vector<8x256xf32>
      %314 = math.exp %313 : vector<8x256xf32>
      %cst_50 = arith.constant 1.000000e+00 : f32
      %315 = vector.broadcast %cst_50 : f32 to vector<8x256xf32>
      %316 = arith.addf %315, %314 : vector<8x256xf32>
      %317 = arith.divf %315, %316 : vector<8x256xf32>
      %318 = vector.extract_strided_slice %305 {offsets = [0, 256], sizes = [8, 128], strides = [1, 1]} : vector<8x384xf32> to vector<8x128xf32>
      %319 = vector.extract_strided_slice %317 {offsets = [0, 0], sizes = [8, 128], strides = [1, 1]} : vector<8x256xf32> to vector<8x128xf32>
      %320 = vector.extract_strided_slice %309 {offsets = [0, 256], sizes = [8, 128], strides = [1, 1]} : vector<8x384xf32> to vector<8x128xf32>
      %321 = vector.broadcast %2 : vector<1x128xf32> to vector<8x128xf32>
      %322 = arith.addf %320, %321 : vector<8x128xf32>
      %323 = arith.mulf %319, %322 : vector<8x128xf32>
      %324 = arith.addf %318, %323 : vector<8x128xf32>
      %325 = math.tanh %324 : vector<8x128xf32>
      %326 = vector.extract_strided_slice %317 {offsets = [0, 128], sizes = [8, 128], strides = [1, 1]} : vector<8x256xf32> to vector<8x128xf32>
      %cst_51 = arith.constant 1.000000e+00 : f32
      %327 = vector.broadcast %cst_51 : f32 to vector<8x128xf32>
      %328 = arith.subf %327, %326 : vector<8x128xf32>
      %329 = arith.mulf %328, %325 : vector<8x128xf32>
      %330 = vector.extract_strided_slice %317 {offsets = [0, 128], sizes = [8, 128], strides = [1, 1]} : vector<8x256xf32> to vector<8x128xf32>
      %331 = arith.mulf %330, %271 : vector<8x128xf32>
      %332 = arith.addf %329, %331 : vector<8x128xf32>
      %333 = vector.extract_strided_slice %308 {offsets = [0, 384], sizes = [8, 384], strides = [1, 1]} : vector<8x768xf32> to vector<8x384xf32>
      %334 = arith.truncf %332 : vector<8x128xf32> to vector<8x128xbf16>
      %cst_52 = arith.constant dense<0.000000e+00> : vector<8x384xf32>
      %335 = tpu.matmul %334, %4, %cst_52 {dimension_numbers = #tpu.dot_dimension_numbers<[1], [0], [0], [1], [0, 0, 1, 1], [], []>} : vector<8x128xbf16>, vector<128x384xbf16>, vector<8x384xf32> -> vector<8x384xf32>
      %336 = vector.broadcast %5 : vector<1x384xf32> to vector<8x384xf32>
      %337 = arith.addf %335, %336 : vector<8x384xf32>
      %338 = vector.extract_strided_slice %337 {offsets = [0, 0], sizes = [8, 256], strides = [1, 1]} : vector<8x384xf32> to vector<8x256xf32>
      %339 = vector.extract_strided_slice %333 {offsets = [0, 0], sizes = [8, 256], strides = [1, 1]} : vector<8x384xf32> to vector<8x256xf32>
      %340 = arith.addf %338, %339 : vector<8x256xf32>
      %341 = arith.negf %340 : vector<8x256xf32>
      %342 = math.exp %341 : vector<8x256xf32>
      %cst_53 = arith.constant 1.000000e+00 : f32
      %343 = vector.broadcast %cst_53 : f32 to vector<8x256xf32>
      %344 = arith.addf %343, %342 : vector<8x256xf32>
      %345 = arith.divf %343, %344 : vector<8x256xf32>
      %346 = vector.extract_strided_slice %337 {offsets = [0, 256], sizes = [8, 128], strides = [1, 1]} : vector<8x384xf32> to vector<8x128xf32>
      %347 = vector.extract_strided_slice %345 {offsets = [0, 0], sizes = [8, 128], strides = [1, 1]} : vector<8x256xf32> to vector<8x128xf32>
      %348 = vector.extract_strided_slice %333 {offsets = [0, 256], sizes = [8, 128], strides = [1, 1]} : vector<8x384xf32> to vector<8x128xf32>
      %349 = vector.broadcast %6 : vector<1x128xf32> to vector<8x128xf32>
      %350 = arith.addf %348, %349 : vector<8x128xf32>
      %351 = arith.mulf %347, %350 : vector<8x128xf32>
      %352 = arith.addf %346, %351 : vector<8x128xf32>
      %353 = math.tanh %352 : vector<8x128xf32>
      %354 = vector.extract_strided_slice %345 {offsets = [0, 128], sizes = [8, 128], strides = [1, 1]} : vector<8x256xf32> to vector<8x128xf32>
      %cst_54 = arith.constant 1.000000e+00 : f32
      %355 = vector.broadcast %cst_54 : f32 to vector<8x128xf32>
      %356 = arith.subf %355, %354 : vector<8x128xf32>
      %357 = arith.mulf %356, %353 : vector<8x128xf32>
      %358 = vector.extract_strided_slice %345 {offsets = [0, 128], sizes = [8, 128], strides = [1, 1]} : vector<8x256xf32> to vector<8x128xf32>
      %359 = arith.mulf %358, %299 : vector<8x128xf32>
      %360 = arith.addf %357, %359 : vector<8x128xf32>
      %361 = vector.extract_strided_slice %arg13 {offsets = [0, 6], sizes = [8, 1], strides = [1, 1]} : vector<8x10xf32> to vector<8x1xf32>
      %362 = vector.broadcast %361 : vector<8x1xf32> to vector<8x384xf32>
      %363 = vector.broadcast %0 : vector<1x384xf32> to vector<8x384xf32>
      %364 = arith.mulf %362, %363 : vector<8x384xf32>
      %365 = vector.broadcast %1 : vector<1x384xf32> to vector<8x384xf32>
      %366 = arith.addf %364, %365 : vector<8x384xf32>
      %367 = tpu.concatenate %332, %360 in 1 : vector<8x128xf32>, vector<8x128xf32> -> vector<8x256xf32>
      %368 = arith.truncf %367 : vector<8x256xf32> to vector<8x256xbf16>
      %cst_55 = arith.constant dense<0.000000e+00> : vector<8x768xf32>
      %369 = tpu.matmul %368, %3, %cst_55 {dimension_numbers = #tpu.dot_dimension_numbers<[1], [0], [0], [1], [0, 0, 1, 1], [], []>} : vector<8x256xbf16>, vector<256x768xbf16>, vector<8x768xf32> -> vector<8x768xf32>
      %370 = vector.extract_strided_slice %369 {offsets = [0, 0], sizes = [8, 384], strides = [1, 1]} : vector<8x768xf32> to vector<8x384xf32>
      %371 = vector.extract_strided_slice %366 {offsets = [0, 0], sizes = [8, 256], strides = [1, 1]} : vector<8x384xf32> to vector<8x256xf32>
      %372 = vector.extract_strided_slice %370 {offsets = [0, 0], sizes = [8, 256], strides = [1, 1]} : vector<8x384xf32> to vector<8x256xf32>
      %373 = arith.addf %371, %372 : vector<8x256xf32>
      %374 = arith.negf %373 : vector<8x256xf32>
      %375 = math.exp %374 : vector<8x256xf32>
      %cst_56 = arith.constant 1.000000e+00 : f32
      %376 = vector.broadcast %cst_56 : f32 to vector<8x256xf32>
      %377 = arith.addf %376, %375 : vector<8x256xf32>
      %378 = arith.divf %376, %377 : vector<8x256xf32>
      %379 = vector.extract_strided_slice %366 {offsets = [0, 256], sizes = [8, 128], strides = [1, 1]} : vector<8x384xf32> to vector<8x128xf32>
      %380 = vector.extract_strided_slice %378 {offsets = [0, 0], sizes = [8, 128], strides = [1, 1]} : vector<8x256xf32> to vector<8x128xf32>
      %381 = vector.extract_strided_slice %370 {offsets = [0, 256], sizes = [8, 128], strides = [1, 1]} : vector<8x384xf32> to vector<8x128xf32>
      %382 = vector.broadcast %2 : vector<1x128xf32> to vector<8x128xf32>
      %383 = arith.addf %381, %382 : vector<8x128xf32>
      %384 = arith.mulf %380, %383 : vector<8x128xf32>
      %385 = arith.addf %379, %384 : vector<8x128xf32>
      %386 = math.tanh %385 : vector<8x128xf32>
      %387 = vector.extract_strided_slice %378 {offsets = [0, 128], sizes = [8, 128], strides = [1, 1]} : vector<8x256xf32> to vector<8x128xf32>
      %cst_57 = arith.constant 1.000000e+00 : f32
      %388 = vector.broadcast %cst_57 : f32 to vector<8x128xf32>
      %389 = arith.subf %388, %387 : vector<8x128xf32>
      %390 = arith.mulf %389, %386 : vector<8x128xf32>
      %391 = vector.extract_strided_slice %378 {offsets = [0, 128], sizes = [8, 128], strides = [1, 1]} : vector<8x256xf32> to vector<8x128xf32>
      %392 = arith.mulf %391, %332 : vector<8x128xf32>
      %393 = arith.addf %390, %392 : vector<8x128xf32>
      %394 = vector.extract_strided_slice %369 {offsets = [0, 384], sizes = [8, 384], strides = [1, 1]} : vector<8x768xf32> to vector<8x384xf32>
      %395 = arith.truncf %393 : vector<8x128xf32> to vector<8x128xbf16>
      %cst_58 = arith.constant dense<0.000000e+00> : vector<8x384xf32>
      %396 = tpu.matmul %395, %4, %cst_58 {dimension_numbers = #tpu.dot_dimension_numbers<[1], [0], [0], [1], [0, 0, 1, 1], [], []>} : vector<8x128xbf16>, vector<128x384xbf16>, vector<8x384xf32> -> vector<8x384xf32>
      %397 = vector.broadcast %5 : vector<1x384xf32> to vector<8x384xf32>
      %398 = arith.addf %396, %397 : vector<8x384xf32>
      %399 = vector.extract_strided_slice %398 {offsets = [0, 0], sizes = [8, 256], strides = [1, 1]} : vector<8x384xf32> to vector<8x256xf32>
      %400 = vector.extract_strided_slice %394 {offsets = [0, 0], sizes = [8, 256], strides = [1, 1]} : vector<8x384xf32> to vector<8x256xf32>
      %401 = arith.addf %399, %400 : vector<8x256xf32>
      %402 = arith.negf %401 : vector<8x256xf32>
      %403 = math.exp %402 : vector<8x256xf32>
      %cst_59 = arith.constant 1.000000e+00 : f32
      %404 = vector.broadcast %cst_59 : f32 to vector<8x256xf32>
      %405 = arith.addf %404, %403 : vector<8x256xf32>
      %406 = arith.divf %404, %405 : vector<8x256xf32>
      %407 = vector.extract_strided_slice %398 {offsets = [0, 256], sizes = [8, 128], strides = [1, 1]} : vector<8x384xf32> to vector<8x128xf32>
      %408 = vector.extract_strided_slice %406 {offsets = [0, 0], sizes = [8, 128], strides = [1, 1]} : vector<8x256xf32> to vector<8x128xf32>
      %409 = vector.extract_strided_slice %394 {offsets = [0, 256], sizes = [8, 128], strides = [1, 1]} : vector<8x384xf32> to vector<8x128xf32>
      %410 = vector.broadcast %6 : vector<1x128xf32> to vector<8x128xf32>
      %411 = arith.addf %409, %410 : vector<8x128xf32>
      %412 = arith.mulf %408, %411 : vector<8x128xf32>
      %413 = arith.addf %407, %412 : vector<8x128xf32>
      %414 = math.tanh %413 : vector<8x128xf32>
      %415 = vector.extract_strided_slice %406 {offsets = [0, 128], sizes = [8, 128], strides = [1, 1]} : vector<8x256xf32> to vector<8x128xf32>
      %cst_60 = arith.constant 1.000000e+00 : f32
      %416 = vector.broadcast %cst_60 : f32 to vector<8x128xf32>
      %417 = arith.subf %416, %415 : vector<8x128xf32>
      %418 = arith.mulf %417, %414 : vector<8x128xf32>
      %419 = vector.extract_strided_slice %406 {offsets = [0, 128], sizes = [8, 128], strides = [1, 1]} : vector<8x256xf32> to vector<8x128xf32>
      %420 = arith.mulf %419, %360 : vector<8x128xf32>
      %421 = arith.addf %418, %420 : vector<8x128xf32>
      %422 = vector.extract_strided_slice %arg13 {offsets = [0, 7], sizes = [8, 1], strides = [1, 1]} : vector<8x10xf32> to vector<8x1xf32>
      %423 = vector.broadcast %422 : vector<8x1xf32> to vector<8x384xf32>
      %424 = vector.broadcast %0 : vector<1x384xf32> to vector<8x384xf32>
      %425 = arith.mulf %423, %424 : vector<8x384xf32>
      %426 = vector.broadcast %1 : vector<1x384xf32> to vector<8x384xf32>
      %427 = arith.addf %425, %426 : vector<8x384xf32>
      %428 = tpu.concatenate %393, %421 in 1 : vector<8x128xf32>, vector<8x128xf32> -> vector<8x256xf32>
      %429 = arith.truncf %428 : vector<8x256xf32> to vector<8x256xbf16>
      %cst_61 = arith.constant dense<0.000000e+00> : vector<8x768xf32>
      %430 = tpu.matmul %429, %3, %cst_61 {dimension_numbers = #tpu.dot_dimension_numbers<[1], [0], [0], [1], [0, 0, 1, 1], [], []>} : vector<8x256xbf16>, vector<256x768xbf16>, vector<8x768xf32> -> vector<8x768xf32>
      %431 = vector.extract_strided_slice %430 {offsets = [0, 0], sizes = [8, 384], strides = [1, 1]} : vector<8x768xf32> to vector<8x384xf32>
      %432 = vector.extract_strided_slice %427 {offsets = [0, 0], sizes = [8, 256], strides = [1, 1]} : vector<8x384xf32> to vector<8x256xf32>
      %433 = vector.extract_strided_slice %431 {offsets = [0, 0], sizes = [8, 256], strides = [1, 1]} : vector<8x384xf32> to vector<8x256xf32>
      %434 = arith.addf %432, %433 : vector<8x256xf32>
      %435 = arith.negf %434 : vector<8x256xf32>
      %436 = math.exp %435 : vector<8x256xf32>
      %cst_62 = arith.constant 1.000000e+00 : f32
      %437 = vector.broadcast %cst_62 : f32 to vector<8x256xf32>
      %438 = arith.addf %437, %436 : vector<8x256xf32>
      %439 = arith.divf %437, %438 : vector<8x256xf32>
      %440 = vector.extract_strided_slice %427 {offsets = [0, 256], sizes = [8, 128], strides = [1, 1]} : vector<8x384xf32> to vector<8x128xf32>
      %441 = vector.extract_strided_slice %439 {offsets = [0, 0], sizes = [8, 128], strides = [1, 1]} : vector<8x256xf32> to vector<8x128xf32>
      %442 = vector.extract_strided_slice %431 {offsets = [0, 256], sizes = [8, 128], strides = [1, 1]} : vector<8x384xf32> to vector<8x128xf32>
      %443 = vector.broadcast %2 : vector<1x128xf32> to vector<8x128xf32>
      %444 = arith.addf %442, %443 : vector<8x128xf32>
      %445 = arith.mulf %441, %444 : vector<8x128xf32>
      %446 = arith.addf %440, %445 : vector<8x128xf32>
      %447 = math.tanh %446 : vector<8x128xf32>
      %448 = vector.extract_strided_slice %439 {offsets = [0, 128], sizes = [8, 128], strides = [1, 1]} : vector<8x256xf32> to vector<8x128xf32>
      %cst_63 = arith.constant 1.000000e+00 : f32
      %449 = vector.broadcast %cst_63 : f32 to vector<8x128xf32>
      %450 = arith.subf %449, %448 : vector<8x128xf32>
      %451 = arith.mulf %450, %447 : vector<8x128xf32>
      %452 = vector.extract_strided_slice %439 {offsets = [0, 128], sizes = [8, 128], strides = [1, 1]} : vector<8x256xf32> to vector<8x128xf32>
      %453 = arith.mulf %452, %393 : vector<8x128xf32>
      %454 = arith.addf %451, %453 : vector<8x128xf32>
      %455 = vector.extract_strided_slice %430 {offsets = [0, 384], sizes = [8, 384], strides = [1, 1]} : vector<8x768xf32> to vector<8x384xf32>
      %456 = arith.truncf %454 : vector<8x128xf32> to vector<8x128xbf16>
      %cst_64 = arith.constant dense<0.000000e+00> : vector<8x384xf32>
      %457 = tpu.matmul %456, %4, %cst_64 {dimension_numbers = #tpu.dot_dimension_numbers<[1], [0], [0], [1], [0, 0, 1, 1], [], []>} : vector<8x128xbf16>, vector<128x384xbf16>, vector<8x384xf32> -> vector<8x384xf32>
      %458 = vector.broadcast %5 : vector<1x384xf32> to vector<8x384xf32>
      %459 = arith.addf %457, %458 : vector<8x384xf32>
      %460 = vector.extract_strided_slice %459 {offsets = [0, 0], sizes = [8, 256], strides = [1, 1]} : vector<8x384xf32> to vector<8x256xf32>
      %461 = vector.extract_strided_slice %455 {offsets = [0, 0], sizes = [8, 256], strides = [1, 1]} : vector<8x384xf32> to vector<8x256xf32>
      %462 = arith.addf %460, %461 : vector<8x256xf32>
      %463 = arith.negf %462 : vector<8x256xf32>
      %464 = math.exp %463 : vector<8x256xf32>
      %cst_65 = arith.constant 1.000000e+00 : f32
      %465 = vector.broadcast %cst_65 : f32 to vector<8x256xf32>
      %466 = arith.addf %465, %464 : vector<8x256xf32>
      %467 = arith.divf %465, %466 : vector<8x256xf32>
      %468 = vector.extract_strided_slice %459 {offsets = [0, 256], sizes = [8, 128], strides = [1, 1]} : vector<8x384xf32> to vector<8x128xf32>
      %469 = vector.extract_strided_slice %467 {offsets = [0, 0], sizes = [8, 128], strides = [1, 1]} : vector<8x256xf32> to vector<8x128xf32>
      %470 = vector.extract_strided_slice %455 {offsets = [0, 256], sizes = [8, 128], strides = [1, 1]} : vector<8x384xf32> to vector<8x128xf32>
      %471 = vector.broadcast %6 : vector<1x128xf32> to vector<8x128xf32>
      %472 = arith.addf %470, %471 : vector<8x128xf32>
      %473 = arith.mulf %469, %472 : vector<8x128xf32>
      %474 = arith.addf %468, %473 : vector<8x128xf32>
      %475 = math.tanh %474 : vector<8x128xf32>
      %476 = vector.extract_strided_slice %467 {offsets = [0, 128], sizes = [8, 128], strides = [1, 1]} : vector<8x256xf32> to vector<8x128xf32>
      %cst_66 = arith.constant 1.000000e+00 : f32
      %477 = vector.broadcast %cst_66 : f32 to vector<8x128xf32>
      %478 = arith.subf %477, %476 : vector<8x128xf32>
      %479 = arith.mulf %478, %475 : vector<8x128xf32>
      %480 = vector.extract_strided_slice %467 {offsets = [0, 128], sizes = [8, 128], strides = [1, 1]} : vector<8x256xf32> to vector<8x128xf32>
      %481 = arith.mulf %480, %421 : vector<8x128xf32>
      %482 = arith.addf %479, %481 : vector<8x128xf32>
      %483 = vector.extract_strided_slice %arg13 {offsets = [0, 8], sizes = [8, 1], strides = [1, 1]} : vector<8x10xf32> to vector<8x1xf32>
      %484 = vector.broadcast %483 : vector<8x1xf32> to vector<8x384xf32>
      %485 = vector.broadcast %0 : vector<1x384xf32> to vector<8x384xf32>
      %486 = arith.mulf %484, %485 : vector<8x384xf32>
      %487 = vector.broadcast %1 : vector<1x384xf32> to vector<8x384xf32>
      %488 = arith.addf %486, %487 : vector<8x384xf32>
      %489 = tpu.concatenate %454, %482 in 1 : vector<8x128xf32>, vector<8x128xf32> -> vector<8x256xf32>
      %490 = arith.truncf %489 : vector<8x256xf32> to vector<8x256xbf16>
      %cst_67 = arith.constant dense<0.000000e+00> : vector<8x768xf32>
      %491 = tpu.matmul %490, %3, %cst_67 {dimension_numbers = #tpu.dot_dimension_numbers<[1], [0], [0], [1], [0, 0, 1, 1], [], []>} : vector<8x256xbf16>, vector<256x768xbf16>, vector<8x768xf32> -> vector<8x768xf32>
      %492 = vector.extract_strided_slice %491 {offsets = [0, 0], sizes = [8, 384], strides = [1, 1]} : vector<8x768xf32> to vector<8x384xf32>
      %493 = vector.extract_strided_slice %488 {offsets = [0, 0], sizes = [8, 256], strides = [1, 1]} : vector<8x384xf32> to vector<8x256xf32>
      %494 = vector.extract_strided_slice %492 {offsets = [0, 0], sizes = [8, 256], strides = [1, 1]} : vector<8x384xf32> to vector<8x256xf32>
      %495 = arith.addf %493, %494 : vector<8x256xf32>
      %496 = arith.negf %495 : vector<8x256xf32>
      %497 = math.exp %496 : vector<8x256xf32>
      %cst_68 = arith.constant 1.000000e+00 : f32
      %498 = vector.broadcast %cst_68 : f32 to vector<8x256xf32>
      %499 = arith.addf %498, %497 : vector<8x256xf32>
      %500 = arith.divf %498, %499 : vector<8x256xf32>
      %501 = vector.extract_strided_slice %488 {offsets = [0, 256], sizes = [8, 128], strides = [1, 1]} : vector<8x384xf32> to vector<8x128xf32>
      %502 = vector.extract_strided_slice %500 {offsets = [0, 0], sizes = [8, 128], strides = [1, 1]} : vector<8x256xf32> to vector<8x128xf32>
      %503 = vector.extract_strided_slice %492 {offsets = [0, 256], sizes = [8, 128], strides = [1, 1]} : vector<8x384xf32> to vector<8x128xf32>
      %504 = vector.broadcast %2 : vector<1x128xf32> to vector<8x128xf32>
      %505 = arith.addf %503, %504 : vector<8x128xf32>
      %506 = arith.mulf %502, %505 : vector<8x128xf32>
      %507 = arith.addf %501, %506 : vector<8x128xf32>
      %508 = math.tanh %507 : vector<8x128xf32>
      %509 = vector.extract_strided_slice %500 {offsets = [0, 128], sizes = [8, 128], strides = [1, 1]} : vector<8x256xf32> to vector<8x128xf32>
      %cst_69 = arith.constant 1.000000e+00 : f32
      %510 = vector.broadcast %cst_69 : f32 to vector<8x128xf32>
      %511 = arith.subf %510, %509 : vector<8x128xf32>
      %512 = arith.mulf %511, %508 : vector<8x128xf32>
      %513 = vector.extract_strided_slice %500 {offsets = [0, 128], sizes = [8, 128], strides = [1, 1]} : vector<8x256xf32> to vector<8x128xf32>
      %514 = arith.mulf %513, %454 : vector<8x128xf32>
      %515 = arith.addf %512, %514 : vector<8x128xf32>
      %516 = vector.extract_strided_slice %491 {offsets = [0, 384], sizes = [8, 384], strides = [1, 1]} : vector<8x768xf32> to vector<8x384xf32>
      %517 = arith.truncf %515 : vector<8x128xf32> to vector<8x128xbf16>
      %cst_70 = arith.constant dense<0.000000e+00> : vector<8x384xf32>
      %518 = tpu.matmul %517, %4, %cst_70 {dimension_numbers = #tpu.dot_dimension_numbers<[1], [0], [0], [1], [0, 0, 1, 1], [], []>} : vector<8x128xbf16>, vector<128x384xbf16>, vector<8x384xf32> -> vector<8x384xf32>
      %519 = vector.broadcast %5 : vector<1x384xf32> to vector<8x384xf32>
      %520 = arith.addf %518, %519 : vector<8x384xf32>
      %521 = vector.extract_strided_slice %520 {offsets = [0, 0], sizes = [8, 256], strides = [1, 1]} : vector<8x384xf32> to vector<8x256xf32>
      %522 = vector.extract_strided_slice %516 {offsets = [0, 0], sizes = [8, 256], strides = [1, 1]} : vector<8x384xf32> to vector<8x256xf32>
      %523 = arith.addf %521, %522 : vector<8x256xf32>
      %524 = arith.negf %523 : vector<8x256xf32>
      %525 = math.exp %524 : vector<8x256xf32>
      %cst_71 = arith.constant 1.000000e+00 : f32
      %526 = vector.broadcast %cst_71 : f32 to vector<8x256xf32>
      %527 = arith.addf %526, %525 : vector<8x256xf32>
      %528 = arith.divf %526, %527 : vector<8x256xf32>
      %529 = vector.extract_strided_slice %520 {offsets = [0, 256], sizes = [8, 128], strides = [1, 1]} : vector<8x384xf32> to vector<8x128xf32>
      %530 = vector.extract_strided_slice %528 {offsets = [0, 0], sizes = [8, 128], strides = [1, 1]} : vector<8x256xf32> to vector<8x128xf32>
      %531 = vector.extract_strided_slice %516 {offsets = [0, 256], sizes = [8, 128], strides = [1, 1]} : vector<8x384xf32> to vector<8x128xf32>
      %532 = vector.broadcast %6 : vector<1x128xf32> to vector<8x128xf32>
      %533 = arith.addf %531, %532 : vector<8x128xf32>
      %534 = arith.mulf %530, %533 : vector<8x128xf32>
      %535 = arith.addf %529, %534 : vector<8x128xf32>
      %536 = math.tanh %535 : vector<8x128xf32>
      %537 = vector.extract_strided_slice %528 {offsets = [0, 128], sizes = [8, 128], strides = [1, 1]} : vector<8x256xf32> to vector<8x128xf32>
      %cst_72 = arith.constant 1.000000e+00 : f32
      %538 = vector.broadcast %cst_72 : f32 to vector<8x128xf32>
      %539 = arith.subf %538, %537 : vector<8x128xf32>
      %540 = arith.mulf %539, %536 : vector<8x128xf32>
      %541 = vector.extract_strided_slice %528 {offsets = [0, 128], sizes = [8, 128], strides = [1, 1]} : vector<8x256xf32> to vector<8x128xf32>
      %542 = arith.mulf %541, %482 : vector<8x128xf32>
      %543 = arith.addf %540, %542 : vector<8x128xf32>
      %544 = vector.extract_strided_slice %arg13 {offsets = [0, 9], sizes = [8, 1], strides = [1, 1]} : vector<8x10xf32> to vector<8x1xf32>
      %545 = vector.broadcast %544 : vector<8x1xf32> to vector<8x384xf32>
      %546 = vector.broadcast %0 : vector<1x384xf32> to vector<8x384xf32>
      %547 = arith.mulf %545, %546 : vector<8x384xf32>
      %548 = vector.broadcast %1 : vector<1x384xf32> to vector<8x384xf32>
      %549 = arith.addf %547, %548 : vector<8x384xf32>
      %550 = tpu.concatenate %515, %543 in 1 : vector<8x128xf32>, vector<8x128xf32> -> vector<8x256xf32>
      %551 = arith.truncf %550 : vector<8x256xf32> to vector<8x256xbf16>
      %cst_73 = arith.constant dense<0.000000e+00> : vector<8x768xf32>
      %552 = tpu.matmul %551, %3, %cst_73 {dimension_numbers = #tpu.dot_dimension_numbers<[1], [0], [0], [1], [0, 0, 1, 1], [], []>} : vector<8x256xbf16>, vector<256x768xbf16>, vector<8x768xf32> -> vector<8x768xf32>
      %553 = vector.extract_strided_slice %552 {offsets = [0, 0], sizes = [8, 384], strides = [1, 1]} : vector<8x768xf32> to vector<8x384xf32>
      %554 = vector.extract_strided_slice %549 {offsets = [0, 0], sizes = [8, 256], strides = [1, 1]} : vector<8x384xf32> to vector<8x256xf32>
      %555 = vector.extract_strided_slice %553 {offsets = [0, 0], sizes = [8, 256], strides = [1, 1]} : vector<8x384xf32> to vector<8x256xf32>
      %556 = arith.addf %554, %555 : vector<8x256xf32>
      %557 = arith.negf %556 : vector<8x256xf32>
      %558 = math.exp %557 : vector<8x256xf32>
      %cst_74 = arith.constant 1.000000e+00 : f32
      %559 = vector.broadcast %cst_74 : f32 to vector<8x256xf32>
      %560 = arith.addf %559, %558 : vector<8x256xf32>
      %561 = arith.divf %559, %560 : vector<8x256xf32>
      %562 = vector.extract_strided_slice %549 {offsets = [0, 256], sizes = [8, 128], strides = [1, 1]} : vector<8x384xf32> to vector<8x128xf32>
      %563 = vector.extract_strided_slice %561 {offsets = [0, 0], sizes = [8, 128], strides = [1, 1]} : vector<8x256xf32> to vector<8x128xf32>
      %564 = vector.extract_strided_slice %553 {offsets = [0, 256], sizes = [8, 128], strides = [1, 1]} : vector<8x384xf32> to vector<8x128xf32>
      %565 = vector.broadcast %2 : vector<1x128xf32> to vector<8x128xf32>
      %566 = arith.addf %564, %565 : vector<8x128xf32>
      %567 = arith.mulf %563, %566 : vector<8x128xf32>
      %568 = arith.addf %562, %567 : vector<8x128xf32>
      %569 = math.tanh %568 : vector<8x128xf32>
      %570 = vector.extract_strided_slice %561 {offsets = [0, 128], sizes = [8, 128], strides = [1, 1]} : vector<8x256xf32> to vector<8x128xf32>
      %cst_75 = arith.constant 1.000000e+00 : f32
      %571 = vector.broadcast %cst_75 : f32 to vector<8x128xf32>
      %572 = arith.subf %571, %570 : vector<8x128xf32>
      %573 = arith.mulf %572, %569 : vector<8x128xf32>
      %574 = vector.extract_strided_slice %561 {offsets = [0, 128], sizes = [8, 128], strides = [1, 1]} : vector<8x256xf32> to vector<8x128xf32>
      %575 = arith.mulf %574, %515 : vector<8x128xf32>
      %576 = arith.addf %573, %575 : vector<8x128xf32>
      %577 = vector.extract_strided_slice %552 {offsets = [0, 384], sizes = [8, 384], strides = [1, 1]} : vector<8x768xf32> to vector<8x384xf32>
      %578 = arith.truncf %576 : vector<8x128xf32> to vector<8x128xbf16>
      %cst_76 = arith.constant dense<0.000000e+00> : vector<8x384xf32>
      %579 = tpu.matmul %578, %4, %cst_76 {dimension_numbers = #tpu.dot_dimension_numbers<[1], [0], [0], [1], [0, 0, 1, 1], [], []>} : vector<8x128xbf16>, vector<128x384xbf16>, vector<8x384xf32> -> vector<8x384xf32>
      %580 = vector.broadcast %5 : vector<1x384xf32> to vector<8x384xf32>
      %581 = arith.addf %579, %580 : vector<8x384xf32>
      %582 = vector.extract_strided_slice %581 {offsets = [0, 0], sizes = [8, 256], strides = [1, 1]} : vector<8x384xf32> to vector<8x256xf32>
      %583 = vector.extract_strided_slice %577 {offsets = [0, 0], sizes = [8, 256], strides = [1, 1]} : vector<8x384xf32> to vector<8x256xf32>
      %584 = arith.addf %582, %583 : vector<8x256xf32>
      %585 = arith.negf %584 : vector<8x256xf32>
      %586 = math.exp %585 : vector<8x256xf32>
      %cst_77 = arith.constant 1.000000e+00 : f32
      %587 = vector.broadcast %cst_77 : f32 to vector<8x256xf32>
      %588 = arith.addf %587, %586 : vector<8x256xf32>
      %589 = arith.divf %587, %588 : vector<8x256xf32>
      %590 = vector.extract_strided_slice %581 {offsets = [0, 256], sizes = [8, 128], strides = [1, 1]} : vector<8x384xf32> to vector<8x128xf32>
      %591 = vector.extract_strided_slice %589 {offsets = [0, 0], sizes = [8, 128], strides = [1, 1]} : vector<8x256xf32> to vector<8x128xf32>
      %592 = vector.extract_strided_slice %577 {offsets = [0, 256], sizes = [8, 128], strides = [1, 1]} : vector<8x384xf32> to vector<8x128xf32>
      %593 = vector.broadcast %6 : vector<1x128xf32> to vector<8x128xf32>
      %594 = arith.addf %592, %593 : vector<8x128xf32>
      %595 = arith.mulf %591, %594 : vector<8x128xf32>
      %596 = arith.addf %590, %595 : vector<8x128xf32>
      %597 = math.tanh %596 : vector<8x128xf32>
      %598 = vector.extract_strided_slice %589 {offsets = [0, 128], sizes = [8, 128], strides = [1, 1]} : vector<8x256xf32> to vector<8x128xf32>
      %cst_78 = arith.constant 1.000000e+00 : f32
      %599 = vector.broadcast %cst_78 : f32 to vector<8x128xf32>
      %600 = arith.subf %599, %598 : vector<8x128xf32>
      %601 = arith.mulf %600, %597 : vector<8x128xf32>
      %602 = vector.extract_strided_slice %589 {offsets = [0, 128], sizes = [8, 128], strides = [1, 1]} : vector<8x256xf32> to vector<8x128xf32>
      %603 = arith.mulf %602, %543 : vector<8x128xf32>
      %604 = arith.addf %601, %603 : vector<8x128xf32>
      %605 = vector.broadcast %7 : vector<1x128xf32> to vector<8x128xf32>
      %606 = arith.mulf %604, %605 : vector<8x128xf32>
      %cst_79 = arith.constant dense<0.000000e+00> : vector<8xf32>
      %607 = vector.multi_reduction <add>, %606, %cst_79 [1] : vector<8x128xf32> to vector<8xf32>
      %608 = vector.shape_cast %607 : vector<8xf32> to vector<8x1xf32>
      %609 = vector.broadcast %8 : vector<1x1xf32> to vector<8x1xf32>
      %610 = arith.addf %608, %609 : vector<8x1xf32>
      %611 = vector.extract_strided_slice %arg13 {offsets = [0, 1], sizes = [8, 9], strides = [1, 1]} : vector<8x10xf32> to vector<8x9xf32>
      %612 = tpu.concatenate %611, %610 in 1 : vector<8x9xf32>, vector<8x1xf32> -> vector<8x10xf32>
      scf.yield %612 : vector<8x10xf32>
    }
    %12 = vector.extract_strided_slice %11 {offsets = [0, 5], sizes = [8, 5], strides = [1, 1]} : vector<8x10xf32> to vector<8x5xf32>
    %c0_19 = arith.constant 0 : index
    %c0_20 = arith.constant 0 : index
    %13 = vector.load %arg11[%c0_19, %c0_20] : memref<8x5xf32, #tpu.memory_space<vmem>>, vector<8x5xf32>
    tpu.vector_store %arg11[%c0_19, %c0_20], %12 {strides = array<i32>} : memref<8x5xf32, #tpu.memory_space<vmem>>, vector<8x5xf32>,
    return
  }
  func.func @transform_0(%arg0: i32) -> (i32, i32) {
    %c0_i32 = arith.constant 0 : i32
    %c0_i32_0 = arith.constant 0 : i32
    return %arg0, %c0_i32 : i32, i32
  }
  func.func @transform_1(%arg0: i32) -> (i32, i32) {
    %c0_i32 = arith.constant 0 : i32
    %c0_i32_0 = arith.constant 0 : i32
    %c0_i32_1 = arith.constant 0 : i32
    return %c0_i32, %c0_i32_0 : i32, i32
  }
  func.func @transform_2(%arg0: i32) -> (i32, i32) {
    %c0_i32 = arith.constant 0 : i32
    %c0_i32_0 = arith.constant 0 : i32
    %c0_i32_1 = arith.constant 0 : i32
    return %c0_i32, %c0_i32_0 : i32, i32
  }
  func.func @transform_3(%arg0: i32) -> (i32, i32) {
    %c0_i32 = arith.constant 0 : i32
    %c0_i32_0 = arith.constant 0 : i32
    %c0_i32_1 = arith.constant 0 : i32
    return %c0_i32, %c0_i32_0 : i32, i32
  }
  func.func @transform_4(%arg0: i32) -> (i32, i32) {
    %c0_i32 = arith.constant 0 : i32
    %c0_i32_0 = arith.constant 0 : i32
    %c0_i32_1 = arith.constant 0 : i32
    return %c0_i32, %c0_i32_0 : i32, i32
  }
  func.func @transform_5(%arg0: i32) -> (i32, i32) {
    %c0_i32 = arith.constant 0 : i32
    %c0_i32_0 = arith.constant 0 : i32
    %c0_i32_1 = arith.constant 0 : i32
    return %c0_i32, %c0_i32_0 : i32, i32
  }
  func.func @transform_6(%arg0: i32) -> (i32, i32) {
    %c0_i32 = arith.constant 0 : i32
    %c0_i32_0 = arith.constant 0 : i32
    %c0_i32_1 = arith.constant 0 : i32
    return %c0_i32, %c0_i32_0 : i32, i32
  }
  func.func @transform_7(%arg0: i32) -> (i32, i32) {
    %c0_i32 = arith.constant 0 : i32
    %c0_i32_0 = arith.constant 0 : i32
    %c0_i32_1 = arith.constant 0 : i32
    return %c0_i32, %c0_i32_0 : i32, i32
  }
  func.func @transform_8(%arg0: i32) -> (i32, i32) {
    %c0_i32 = arith.constant 0 : i32
    %c0_i32_0 = arith.constant 0 : i32
    %c0_i32_1 = arith.constant 0 : i32
    return %c0_i32, %c0_i32_0 : i32, i32
  }
  func.func @transform_9(%arg0: i32) -> (i32, i32) {
    %c0_i32 = arith.constant 0 : i32
    %c0_i32_0 = arith.constant 0 : i32
    %c0_i32_1 = arith.constant 0 : i32
    return %c0_i32, %c0_i32_0 : i32, i32
  }
  func.func @transform_10(%arg0: i32) -> (i32, i32) {
    %c0_i32 = arith.constant 0 : i32
    %c0_i32_0 = arith.constant 0 : i32
    return %arg0, %c0_i32 : i32, i32
  }
}

</mosaic_0001>

<bundles_post_ra>
// kernel: tpu_custom_call.1
= control target key start
LH: loop header
LB: loop body
LE: loop exit
PB: predicated region body
PF: predicated region fallthrough
CT: control target
= control target key end

     0   :  { %s6718_s0 = inlined_call_operand.hbm [shape: f32[8,10], index: 0, kind: input, shape index: {}]   ;;  %s6719_s1 = inlined_call_operand.vmem [shape: f32[1,384], index: 1, kind: input, shape index: {}]   ;;  %s6720_s2 = inlined_call_operand.vmem [shape: f32[1,384], index: 2, kind: input, shape index: {}]   ;;  %s6721_s3 = inlined_call_operand.vmem [shape: f32[1,128], index: 3, kind: input, shape index: {}]   ;;  %s6722_s4 = inlined_call_operand.hbm [shape: bf16[256,768], index: 4, kind: input, shape index: {}]   ;;  %s6723_s5 = inlined_call_operand.hbm [shape: bf16[128,384], index: 5, kind: input, shape index: {}]   ;;  %s6724_s6 = inlined_call_operand.vmem [shape: f32[1,384], index: 6, kind: input, shape index: {}]   ;;  %s6725_s7 = inlined_call_operand.vmem [shape: f32[1,128], index: 7, kind: input, shape index: {}]   ;;  %s6726_s8 = inlined_call_operand.vmem [shape: f32[1,128], index: 8, kind: input, shape index: {}]   ;;  %s6727_s9 = inlined_call_operand.<no memory space> [shape: f32[1,1], index: 9, kind: input, shape index: {}]   ;;  %s6728_s10 = inlined_call_operand.hbm [shape: f32[8,5], index: 10, kind: output, shape index: {}]  }
   0x1   :  { %v15_v0 = vstv %s6727_s9 }
   0x2   :  { %16 = vst [vmem:[#allocation2] sm:$0x1] %v15_v0 }
   0x3   :  { %17 = vsyncpa [#allocation4], 0 }
   0x4   :  { %18 = vsyncpa [#allocation7], 0 }
   0x5   :  { %19 = vsyncpa [#allocation5], 0  ;;  %s4225_s15 = smov [#allocation6]   ;;  %s4115_s19 = scalar_lea.hbm %s6722_s4, 12288 }
   0x6   :  { %s41_s16 = sshll.u32 %s4225_s15, 4  ;;  %p4116_p0 = scmp.ne.s32.totalorder %s6722_s4, %s4115_s19  ;;  %s42_s16 = int_to_ptr.vmem [resolvable:$true] %s41_s16 }
   0x7   :  { %p4119_p1 = scmp.lt.u32.totalorder %s4115_s19, %s6722_s4 }
   0x9   :  { %p4121_p2 = pnand %p4119_p1, %p4116_p0 }
   0xb   :  { %4124 = shalt.err (!%p4121_p2)
}
   0xc   :  { %s4125_s9 = scalar_lea.vmem %s42_s16, 12288  ;;  %p4130_p4 = scmp.lt.s32.totalorder %s42_s16, %s42_s16 }
   0xd   :  { %p4126_p3 = scmp.ne.s32.totalorder %s42_s16, %s4125_s9  ;;  %p4131_p5 = scmp.lt.s32.totalorder %s4125_s9, %s4125_s9 }
   0xf   :  { %p4132_p6 = por %p4131_p5, %p4130_p4 }
  0x11   :  { %p4133_p7 = pnand %p4132_p6, %p4126_p3 }
  0x13   :  { %4136 = shalt.err (!%p4133_p7)
}
  0x14   :  { %s4226_s24 = smov 384   ;;  %s4227_s25 = smov 24  }
  0x15   :  { %47 = dma.hbm_to_vmem [thread:$0]  %s6722_s4, 12288, %s42_s16, [#allocation7], %s4226_s24, %s4226_s24, %s4227_s25  }
  0x16   :  { %s4228_s28 = smov [#allocation3]   ;;  %s4229_s30 = smov [#allocation8]  }
  0x17   :  { %s26_s29 = sshll.u32 %s4228_s28, 4  ;;  %s53_s11 = sshll.u32 %s4229_s30, 4  ;;  %s27_s29 = int_to_ptr.vmem [resolvable:$true] %s26_s29  ;;  %s54_s11 = int_to_ptr.vmem [resolvable:$true] %s53_s11 }
  0x18   :  { %s4137_s14 = scalar_lea.hbm %s6718_s0, 128 }
  0x19   :  { %p4138_p8 = scmp.ne.s32.totalorder %s6718_s0, %s4137_s14  ;;  %p4141_p9 = scmp.lt.u32.totalorder %s4137_s14, %s6718_s0 }
  0x1b   :  { %p4143_p10 = pnand %p4141_p9, %p4138_p8 }
  0x1d   :  { %4146 = shalt.err (!%p4143_p10)
}
  0x1e   :  { %s4147_s4 = scalar_lea.vmem %s27_s29, 128  ;;  %p4152_p12 = scmp.lt.s32.totalorder %s27_s29, %s27_s29 }
  0x1f   :  { %p4148_p11 = scmp.ne.s32.totalorder %s27_s29, %s4147_s4  ;;  %p4153_p13 = scmp.lt.s32.totalorder %s4147_s4, %s4147_s4 }
  0x21   :  { %p4154_p0 = por %p4153_p13, %p4152_p12 }
  0x23   :  { %p4155_p1 = pnand %p4154_p0, %p4148_p11 }
  0x25   :  { %4158 = shalt.err (!%p4155_p1)
}
  0x26   :  { %29 = dma.hbm_to_vmem [thread:$0]  %s6718_s0, 128, %s27_s29, [#allocation4]  }
  0x27   :  { %s4159_s23 = scalar_lea.hbm %s6723_s5, 3072 }
  0x28   :  { %p4160_p2 = scmp.ne.s32.totalorder %s6723_s5, %s4159_s23  ;;  %p4163_p3 = scmp.lt.u32.totalorder %s4159_s23, %s6723_s5 }
  0x2a   :  { %p4165_p4 = pnand %p4163_p3, %p4160_p2 }
  0x2c   :  { %4168 = shalt.err (!%p4165_p4)
}
  0x2d   :  { %s4169_s27 = scalar_lea.vmem %s54_s11, 3072  ;;  %p4174_p6 = scmp.lt.s32.totalorder %s54_s11, %s54_s11 }
  0x2e   :  { %p4170_p5 = scmp.ne.s32.totalorder %s54_s11, %s4169_s27  ;;  %p4175_p7 = scmp.lt.s32.totalorder %s4169_s27, %s4169_s27 }
  0x30   :  { %p4176_p8 = por %p4175_p7, %p4174_p6 }
  0x32   :  { %p4177_p9 = pnand %p4176_p8, %p4170_p5 }
  0x34   :  { %4180 = shalt.err (!%p4177_p9)
}
  0x35   :  { %s4230_s0 = smov 192   ;;  %s4231_s28 = smov 12  }
  0x36   :  { %59 = dma.hbm_to_vmem [thread:$0]  %s6723_s5, 3072, %s54_s11, [#allocation7], %s4230_s0, %s4230_s0, %s4231_s28  }
  0x37   :  { %4211 = dma.done.wait [#allocation4], 128  }
  0x38   :  { %4212 = vsyncadd [#allocation4], 4294967168 }
  0x39   :  { %4213 = dma.done.wait [#allocation7], 15360  }
  0x3a   :  { %4214 = vsyncadd [#allocation7], 4294951936  ;;  %v4345_v1 = vld [vmem:[%s6719_s1] sm:$0x7]  ;;  %v4357_v4 = vld [vmem:[#allocation6] sm:$0xff]  ;;  %s4632_s4 = smov 0  }
  0x3b   :  { %7142 = vst [vmem:[#allocation13_spill] sm:$0xff] %v4345_v1  ;;  %v4350_v2 = vld [vmem:[%s6720_s2] sm:$0x7]  ;;  %7145 = vst [vmem:[#allocation16_spill] sm:$0xff] %v4357_v4  ;;  %v4359_v5 = vld [vmem:[#allocation6 + $0x8] sm:$0xff] }
  0x3c   :  { %7143 = vst [vmem:[#allocation14_spill] sm:$0xff] %v4350_v2  ;;  %v4355_v3 = vld [vmem:[%s6721_s3] ss:$0 sm:$0xff]  ;;  %7146 = vst [vmem:[#allocation17_spill] sm:$0xff] %v4359_v5  ;;  %v4363_v7 = vld [vmem:[#allocation6 + $0x18] sm:$0xff] }
  0x3d   :  { %7144 = vst [vmem:[#allocation15_spill] sm:$0xff] %v4355_v3  ;;  %v4361_v6 = vld [vmem:[#allocation6 + $0x10] sm:$0xff]  ;;  %7148 = vst [vmem:[#allocation19_spill] sm:$0xff] %v4363_v7  ;;  %v4365_v8 = vld [vmem:[#allocation6 + $0x20] sm:$0xff] }
  0x3e   :  { %7147 = vst [vmem:[#allocation18_spill] sm:$0xff] %v4361_v6  ;;  %7149 = vst [vmem:[#allocation20_spill] sm:$0xff] %v4365_v8  ;;  %v4367_v9 = vld [vmem:[#allocation6 + $0x28] sm:$0xff]  ;;  %v4369_v10 = vld [vmem:[#allocation6 + $0x30] sm:$0xff] }
  0x3f   :  { %7150 = vst [vmem:[#allocation21_spill] sm:$0xff] %v4367_v9  ;;  %7151 = vst [vmem:[#allocation22_spill] sm:$0xff] %v4369_v10  ;;  %v4371_v11 = vld [vmem:[#allocation6 + $0x38] sm:$0xff]  ;;  %v4373_v12 = vld [vmem:[#allocation6 + $0x40] sm:$0xff] }
  0x40   :  { %7152 = vst [vmem:[#allocation23_spill] sm:$0xff] %v4371_v11  ;;  %7153 = vst [vmem:[#allocation24_spill] sm:$0xff] %v4373_v12  ;;  %v4375_v13 = vld [vmem:[#allocation6 + $0x48] sm:$0xff]  ;;  %v4377_v14 = vld [vmem:[#allocation6 + $0x50] sm:$0xff] }
  0x41   :  { %7154 = vst [vmem:[#allocation25_spill] sm:$0xff] %v4375_v13  ;;  %7155 = vst [vmem:[#allocation26_spill] sm:$0xff] %v4377_v14  ;;  %v4379_v15 = vld [vmem:[#allocation6 + $0x58] sm:$0xff]  ;;  %v4381_v16 = vld [vmem:[#allocation6 + $0x60] sm:$0xff] }
  0x42   :  { %7156 = vst [vmem:[#allocation27_spill] sm:$0xff] %v4379_v15  ;;  %7157 = vst [vmem:[#allocation28_spill] sm:$0xff] %v4381_v16  ;;  %v4383_v17 = vld [vmem:[#allocation6 + $0x68] sm:$0xff]  ;;  %v4385_v18 = vld [vmem:[#allocation6 + $0x70] sm:$0xff] }
  0x43   :  { %7158 = vst [vmem:[#allocation29_spill] sm:$0xff] %v4383_v17  ;;  %7159 = vst [vmem:[#allocation30_spill] sm:$0xff] %v4385_v18  ;;  %v4387_v19 = vld [vmem:[#allocation6 + $0x78] sm:$0xff]  ;;  %v4389_v20 = vld [vmem:[#allocation6 + $0x80] sm:$0xff] }
  0x44   :  { %7160 = vst [vmem:[#allocation31_spill] sm:$0xff] %v4387_v19  ;;  %7161 = vst [vmem:[#allocation32_spill] sm:$0xff] %v4389_v20  ;;  %v4391_v21 = vld [vmem:[#allocation6 + $0x88] sm:$0xff]  ;;  %v4393_v22 = vld [vmem:[#allocation6 + $0x90] sm:$0xff] }
  0x45   :  { %7162 = vst [vmem:[#allocation33_spill] sm:$0xff] %v4391_v21  ;;  %7163 = vst [vmem:[#allocation34_spill] sm:$0xff] %v4393_v22  ;;  %v4395_v23 = vld [vmem:[#allocation6 + $0x98] sm:$0xff]  ;;  %v4397_v24 = vld [vmem:[#allocation6 + $0xa0] sm:$0xff] }
  0x46   :  { %7164 = vst [vmem:[#allocation35_spill] sm:$0xff] %v4395_v23  ;;  %7165 = vst [vmem:[#allocation36_spill] sm:$0xff] %v4397_v24  ;;  %v4399_v25 = vld [vmem:[#allocation6 + $0xa8] sm:$0xff]  ;;  %v4401_v26 = vld [vmem:[#allocation6 + $0xb0] sm:$0xff] }
  0x47   :  { %7166 = vst [vmem:[#allocation37_spill] sm:$0xff] %v4399_v25  ;;  %7167 = vst [vmem:[#allocation38_spill] sm:$0xff] %v4401_v26  ;;  %v4403_v27 = vld [vmem:[#allocation6 + $0xb8] sm:$0xff]  ;;  %v4405_v28 = vld [vmem:[#allocation6 + $0xc0] sm:$0xff] }
  0x48   :  { %7168 = vst [vmem:[#allocation39_spill] sm:$0xff] %v4403_v27  ;;  %7169 = vst [vmem:[#allocation40_spill] sm:$0xff] %v4405_v28  ;;  %v4407_v29 = vld [vmem:[#allocation6 + $0xc8] sm:$0xff]  ;;  %v4409_v30 = vld [vmem:[#allocation6 + $0xd0] sm:$0xff] }
  0x49   :  { %7170 = vst [vmem:[#allocation41_spill] sm:$0xff] %v4407_v29  ;;  %7171 = vst [vmem:[#allocation42_spill] sm:$0xff] %v4409_v30  ;;  %v4411_v31 = vld [vmem:[#allocation6 + $0xd8] sm:$0xff]  ;;  %v4413_v32 = vld [vmem:[#allocation6 + $0xe0] sm:$0xff] }
  0x4a   :  { %7172 = vst [vmem:[#allocation43_spill] sm:$0xff] %v4411_v31  ;;  %7173 = vst [vmem:[#allocation44_spill] sm:$0xff] %v4413_v32  ;;  %v4415_v33 = vld [vmem:[#allocation6 + $0xe8] sm:$0xff]  ;;  %v4417_v34 = vld [vmem:[#allocation6 + $0xf0] sm:$0xff] }
  0x4b   :  { %7174 = vst [vmem:[#allocation45_spill] sm:$0xff] %v4415_v33  ;;  %7175 = vst [vmem:[#allocation46_spill] sm:$0xff] %v4417_v34  ;;  %v4419_v35 = vld [vmem:[#allocation6 + $0xf8] sm:$0xff]  ;;  %v4421_v36 = vld [vmem:[#allocation6 + $0x100] sm:$0xff] }
  0x4c   :  { %7176 = vst [vmem:[#allocation47_spill] sm:$0xff] %v4419_v35  ;;  %7177 = vst [vmem:[#allocation48_spill] sm:$0xff] %v4421_v36  ;;  %v4423_v37 = vld [vmem:[#allocation6 + $0x108] sm:$0xff]  ;;  %v4425_v38 = vld [vmem:[#allocation6 + $0x110] sm:$0xff] }
  0x4d   :  { %7178 = vst [vmem:[#allocation49_spill] sm:$0xff] %v4423_v37  ;;  %7179 = vst [vmem:[#allocation50_spill] sm:$0xff] %v4425_v38  ;;  %v4427_v39 = vld [vmem:[#allocation6 + $0x118] sm:$0xff]  ;;  %v4429_v40 = vld [vmem:[#allocation6 + $0x120] sm:$0xff] }
  0x4e   :  { %7180 = vst [vmem:[#allocation51_spill] sm:$0xff] %v4427_v39  ;;  %7181 = vst [vmem:[#allocation52_spill] sm:$0xff] %v4429_v40  ;;  %v4431_v41 = vld [vmem:[#allocation6 + $0x128] sm:$0xff]  ;;  %v4433_v42 = vld [vmem:[#allocation6 + $0x130] sm:$0xff] }
  0x4f   :  { %7182 = vst [vmem:[#allocation53_spill] sm:$0xff] %v4431_v41  ;;  %7183 = vst [vmem:[#allocation54_spill] sm:$0xff] %v4433_v42  ;;  %v4435_v43 = vld [vmem:[#allocation6 + $0x138] sm:$0xff]  ;;  %v4437_v44 = vld [vmem:[#allocation6 + $0x140] sm:$0xff] }
  0x50   :  { %7184 = vst [vmem:[#allocation55_spill] sm:$0xff] %v4435_v43  ;;  %7185 = vst [vmem:[#allocation56_spill] sm:$0xff] %v4437_v44  ;;  %v4439_v45 = vld [vmem:[#allocation6 + $0x148] sm:$0xff]  ;;  %v4441_v46 = vld [vmem:[#allocation6 + $0x150] sm:$0xff] }
  0x51   :  { %7186 = vst [vmem:[#allocation57_spill] sm:$0xff] %v4439_v45  ;;  %7187 = vst [vmem:[#allocation58_spill] sm:$0xff] %v4441_v46  ;;  %v4443_v47 = vld [vmem:[#allocation6 + $0x158] sm:$0xff]  ;;  %v4445_v48 = vld [vmem:[#allocation6 + $0x160] sm:$0xff] }
  0x52   :  { %7188 = vst [vmem:[#allocation59_spill] sm:$0xff] %v4443_v47  ;;  %7189 = vst [vmem:[#allocation60_spill] sm:$0xff] %v4445_v48  ;;  %v4447_v49 = vld [vmem:[#allocation6 + $0x168] sm:$0xff]  ;;  %v4449_v50 = vld [vmem:[#allocation6 + $0x170] sm:$0xff] }
  0x53   :  { %7190 = vst [vmem:[#allocation61_spill] sm:$0xff] %v4447_v49  ;;  %7191 = vst [vmem:[#allocation62_spill] sm:$0xff] %v4449_v50  ;;  %v4451_v51 = vld [vmem:[#allocation6 + $0x178] sm:$0xff]  ;;  %v4453_v52 = vld [vmem:[#allocation6 + $0x180] sm:$0xff] }
  0x54   :  { %7192 = vst [vmem:[#allocation63_spill] sm:$0xff] %v4451_v51  ;;  %7193 = vst [vmem:[#allocation64_spill] sm:$0xff] %v4453_v52  ;;  %v4455_v53 = vld [vmem:[#allocation6 + $0x188] sm:$0xff]  ;;  %v4457_v54 = vld [vmem:[#allocation6 + $0x190] sm:$0xff] }
  0x55   :  { %7194 = vst [vmem:[#allocation65_spill] sm:$0xff] %v4455_v53  ;;  %7195 = vst [vmem:[#allocation66_spill] sm:$0xff] %v4457_v54  ;;  %v4459_v55 = vld [vmem:[#allocation6 + $0x198] sm:$0xff]  ;;  %v4461_v56 = vld [vmem:[#allocation6 + $0x1a0] sm:$0xff] }
  0x56   :  { %7196 = vst [vmem:[#allocation67_spill] sm:$0xff] %v4459_v55  ;;  %7197 = vst [vmem:[#allocation68_spill] sm:$0xff] %v4461_v56  ;;  %v4463_v57 = vld [vmem:[#allocation6 + $0x1a8] sm:$0xff]  ;;  %v4465_v58 = vld [vmem:[#allocation6 + $0x1b0] sm:$0xff] }
  0x57   :  { %7198 = vst [vmem:[#allocation69_spill] sm:$0xff] %v4463_v57  ;;  %7199 = vst [vmem:[#allocation70_spill] sm:$0xff] %v4465_v58  ;;  %v4467_v59 = vld [vmem:[#allocation6 + $0x1b8] sm:$0xff]  ;;  %v4469_v60 = vld [vmem:[#allocation6 + $0x1c0] sm:$0xff] }
  0x58   :  { %7200 = vst [vmem:[#allocation71_spill] sm:$0xff] %v4467_v59  ;;  %7201 = vst [vmem:[#allocation72_spill] sm:$0xff] %v4469_v60  ;;  %v4471_v61 = vld [vmem:[#allocation6 + $0x1c8] sm:$0xff]  ;;  %v4473_v62 = vld [vmem:[#allocation6 + $0x1d0] sm:$0xff] }
  0x59   :  { %7202 = vst [vmem:[#allocation73_spill] sm:$0xff] %v4471_v61  ;;  %7203 = vst [vmem:[#allocation74_spill] sm:$0xff] %v4473_v62  ;;  %v4475_v63 = vld [vmem:[#allocation6 + $0x1d8] sm:$0xff]  ;;  %v4477_v0 = vld [vmem:[#allocation6 + $0x1e0] sm:$0xff] }
  0x5a   :  { %7204 = vst [vmem:[#allocation75_spill] sm:$0xff] %v4475_v63  ;;  %7205 = vst [vmem:[#allocation76_spill] sm:$0xff] %v4477_v0  ;;  %v4479_v54 = vld [vmem:[#allocation6 + $0x1e8] sm:$0xff]  ;;  %v4481_v48 = vld [vmem:[#allocation6 + $0x1f0] sm:$0xff] }
  0x5b   :  { %7206 = vst [vmem:[#allocation77_spill] sm:$0xff] %v4479_v54  ;;  %7207 = vst [vmem:[#allocation78_spill] sm:$0xff] %v4481_v48  ;;  %v4483_v51 = vld [vmem:[#allocation6 + $0x1f8] sm:$0xff]  ;;  %v4485_v57 = vld [vmem:[#allocation6 + $0x200] sm:$0xff] }
  0x5c   :  { %7208 = vst [vmem:[#allocation79_spill] sm:$0xff] %v4483_v51  ;;  %7209 = vst [vmem:[#allocation80_spill] sm:$0xff] %v4485_v57  ;;  %v4487_v42 = vld [vmem:[#allocation6 + $0x208] sm:$0xff]  ;;  %v4489_v45 = vld [vmem:[#allocation6 + $0x210] sm:$0xff] }
  0x5d   :  { %7210 = vst [vmem:[#allocation81_spill] sm:$0xff] %v4487_v42  ;;  %7211 = vst [vmem:[#allocation82_spill] sm:$0xff] %v4489_v45  ;;  %v4491_v60 = vld [vmem:[#allocation6 + $0x218] sm:$0xff]  ;;  %v4493_v36 = vld [vmem:[#allocation6 + $0x220] sm:$0xff] }
  0x5e   :  { %7212 = vst [vmem:[#allocation83_spill] sm:$0xff] %v4491_v60  ;;  %7213 = vst [vmem:[#allocation84_spill] sm:$0xff] %v4493_v36  ;;  %v4495_v39 = vld [vmem:[#allocation6 + $0x228] sm:$0xff]  ;;  %v4497_v63 = vld [vmem:[#allocation6 + $0x230] sm:$0xff] }
  0x5f   :  { %7214 = vst [vmem:[#allocation85_spill] sm:$0xff] %v4495_v39  ;;  %7215 = vst [vmem:[#allocation86_spill] sm:$0xff] %v4497_v63  ;;  %v4499_v30 = vld [vmem:[#allocation6 + $0x238] sm:$0xff]  ;;  %v4501_v33 = vld [vmem:[#allocation6 + $0x240] sm:$0xff] }
  0x60   :  { %7216 = vst [vmem:[#allocation87_spill] sm:$0xff] %v4499_v30  ;;  %7217 = vst [vmem:[#allocation88_spill] sm:$0xff] %v4501_v33  ;;  %v4503_v48 = vld [vmem:[#allocation6 + $0x248] sm:$0xff]  ;;  %v4505_v24 = vld [vmem:[#allocation6 + $0x250] sm:$0xff] }
  0x61   :  { %7218 = vst [vmem:[#allocation89_spill] sm:$0xff] %v4503_v48  ;;  %7219 = vst [vmem:[#allocation90_spill] sm:$0xff] %v4505_v24  ;;  %v4507_v27 = vld [vmem:[#allocation6 + $0x258] sm:$0xff]  ;;  %v4509_v42 = vld [vmem:[#allocation6 + $0x260] sm:$0xff] }
  0x62   :  { %7220 = vst [vmem:[#allocation91_spill] sm:$0xff] %v4507_v27  ;;  %7221 = vst [vmem:[#allocation92_spill] sm:$0xff] %v4509_v42  ;;  %v4511_v18 = vld [vmem:[#allocation6 + $0x268] sm:$0xff]  ;;  %v4513_v21 = vld [vmem:[#allocation6 + $0x270] sm:$0xff] }
  0x63   :  { %7222 = vst [vmem:[#allocation93_spill] sm:$0xff] %v4511_v18  ;;  %7223 = vst [vmem:[#allocation94_spill] sm:$0xff] %v4513_v21  ;;  %v4515_v36 = vld [vmem:[#allocation6 + $0x278] sm:$0xff]  ;;  %v4517_v12 = vld [vmem:[#allocation6 + $0x280] sm:$0xff] }
  0x64   :  { %7224 = vst [vmem:[#allocation95_spill] sm:$0xff] %v4515_v36  ;;  %7225 = vst [vmem:[#allocation96_spill] sm:$0xff] %v4517_v12  ;;  %v4519_v15 = vld [vmem:[#allocation6 + $0x288] sm:$0xff]  ;;  %v4521_v30 = vld [vmem:[#allocation6 + $0x290] sm:$0xff] }
  0x65   :  { %7226 = vst [vmem:[#allocation97_spill] sm:$0xff] %v4519_v15  ;;  %7227 = vst [vmem:[#allocation98_spill] sm:$0xff] %v4521_v30  ;;  %v4523_v6 = vld [vmem:[#allocation6 + $0x298] sm:$0xff]  ;;  %v4525_v9 = vld [vmem:[#allocation6 + $0x2a0] sm:$0xff] }
  0x66   :  { %7228 = vst [vmem:[#allocation99_spill] sm:$0xff] %v4523_v6  ;;  %7229 = vst [vmem:[#allocation100_spill] sm:$0xff] %v4525_v9  ;;  %v4527_v24 = vld [vmem:[#allocation6 + $0x2a8] sm:$0xff]  ;;  %v4529_v48 = vld [vmem:[#allocation6 + $0x2b0] sm:$0xff] }
  0x67   :  { %7230 = vst [vmem:[#allocation101_spill] sm:$0xff] %v4527_v24  ;;  %7231 = vst [vmem:[#allocation102_spill] sm:$0xff] %v4529_v48  ;;  %v4531_v42 = vld [vmem:[#allocation6 + $0x2b8] sm:$0xff]  ;;  %v4533_v18 = vld [vmem:[#allocation6 + $0x2c0] sm:$0xff] }
  0x68   :  { %7232 = vst [vmem:[#allocation103_spill] sm:$0xff] %v4531_v42  ;;  %7233 = vst [vmem:[#allocation104_spill] sm:$0xff] %v4533_v18  ;;  %v4535_v21 = vld [vmem:[#allocation6 + $0x2c8] sm:$0xff]  ;;  %v4537_v36 = vld [vmem:[#allocation6 + $0x2d0] sm:$0xff] }
  0x69   :  { %7234 = vst [vmem:[#allocation105_spill] sm:$0xff] %v4535_v21  ;;  %7235 = vst [vmem:[#allocation106_spill] sm:$0xff] %v4537_v36  ;;  %v4539_v12 = vld [vmem:[#allocation6 + $0x2d8] sm:$0xff]  ;;  %v4541_v15 = vld [vmem:[#allocation6 + $0x2e0] sm:$0xff] }
  0x6a   :  { %7236 = vst [vmem:[#allocation107_spill] sm:$0xff] %v4539_v12  ;;  %7237 = vst [vmem:[#allocation108_spill] sm:$0xff] %v4541_v15  ;;  %v4543_v30 = vld [vmem:[#allocation6 + $0x2e8] sm:$0xff]  ;;  %v4545_v6 = vld [vmem:[#allocation6 + $0x2f0] sm:$0xff] }
  0x6b   :  { %7238 = vst [vmem:[#allocation109_spill] sm:$0xff] %v4543_v30  ;;  %7239 = vst [vmem:[#allocation110_spill] sm:$0xff] %v4545_v6  ;;  %v4547_v9 = vld [vmem:[#allocation6 + $0x2f8] sm:$0xff]  ;;  %v4549_v24 = vld [vmem:[#allocation8] sm:$0xff] }
  0x6c   :  { %7240 = vst [vmem:[#allocation111_spill] sm:$0xff] %v4547_v9  ;;  %7241 = vst [vmem:[#allocation112_spill] sm:$0xff] %v4549_v24  ;;  %v4551_v48 = vld [vmem:[#allocation8 + $0x8] sm:$0xf]  ;;  %v4553_v42 = vld [vmem:[#allocation8 + $0xc] sm:$0xff] }
  0x6d   :  { %7242 = vst [vmem:[#allocation113_spill] sm:$0xff] %v4551_v48  ;;  %7243 = vst [vmem:[#allocation114_spill] sm:$0xff] %v4553_v42  ;;  %v4555_v18 = vld [vmem:[#allocation8 + $0x14] sm:$0xf]  ;;  %v4557_v21 = vld [vmem:[#allocation8 + $0x18] sm:$0xff] }
  0x6e   :  { %7244 = vst [vmem:[#allocation115_spill] sm:$0xff] %v4555_v18  ;;  %7245 = vst [vmem:[#allocation116_spill] sm:$0xff] %v4557_v21  ;;  %v4559_v36 = vld [vmem:[#allocation8 + $0x20] sm:$0xf]  ;;  %v4561_v12 = vld [vmem:[#allocation8 + $0x24] sm:$0xff] }
  0x6f   :  { %7246 = vst [vmem:[#allocation117_spill] sm:$0xff] %v4559_v36  ;;  %7247 = vst [vmem:[#allocation118_spill] sm:$0xff] %v4561_v12  ;;  %v4563_v15 = vld [vmem:[#allocation8 + $0x2c] sm:$0xf]  ;;  %v4565_v30 = vld [vmem:[#allocation8 + $0x30] sm:$0xff] }
  0x70   :  { %7248 = vst [vmem:[#allocation119_spill] sm:$0xff] %v4563_v15  ;;  %7249 = vst [vmem:[#allocation120_spill] sm:$0xff] %v4565_v30  ;;  %v4567_v6 = vld [vmem:[#allocation8 + $0x38] sm:$0xf]  ;;  %v4569_v9 = vld [vmem:[#allocation8 + $0x3c] sm:$0xff] }
  0x71   :  { %7250 = vst [vmem:[#allocation121_spill] sm:$0xff] %v4567_v6  ;;  %7251 = vst [vmem:[#allocation122_spill] sm:$0xff] %v4569_v9  ;;  %v4571_v33 = vld [vmem:[#allocation8 + $0x44] sm:$0xf]  ;;  %v4573_v27 = vld [vmem:[#allocation8 + $0x48] sm:$0xff] }
  0x72   :  { %7252 = vst [vmem:[#allocation123_spill] sm:$0xff] %v4571_v33  ;;  %7253 = vst [vmem:[#allocation124_spill] sm:$0xff] %v4573_v27  ;;  %v4575_v60 = vld [vmem:[#allocation8 + $0x50] sm:$0xf]  ;;  %v4577_v63 = vld [vmem:[#allocation8 + $0x54] sm:$0xff] }
  0x73   :  { %7254 = vst [vmem:[#allocation125_spill] sm:$0xff] %v4575_v60  ;;  %7255 = vst [vmem:[#allocation126_spill] sm:$0xff] %v4577_v63  ;;  %v4579_v45 = vld [vmem:[#allocation8 + $0x5c] sm:$0xf]  ;;  %v4581_v39 = vld [vmem:[#allocation8 + $0x60] sm:$0xff] }
  0x74   :  { %7256 = vst [vmem:[#allocation127_spill] sm:$0xff] %v4579_v45  ;;  %7257 = vst [vmem:[#allocation128_spill] sm:$0xff] %v4581_v39  ;;  %v4583_v54 = vld [vmem:[#allocation8 + $0x68] sm:$0xf]  ;;  %v4585_v57 = vld [vmem:[#allocation8 + $0x6c] sm:$0xff] }
  0x75   :  { %7258 = vst [vmem:[#allocation129_spill] sm:$0xff] %v4583_v54  ;;  %7259 = vst [vmem:[#allocation130_spill] sm:$0xff] %v4585_v57  ;;  %v4587_v0 = vld [vmem:[#allocation8 + $0x74] sm:$0xf]  ;;  %v4589_v51 = vld [vmem:[#allocation8 + $0x78] sm:$0xff] }
  0x76   :  { %7260 = vst [vmem:[#allocation131_spill] sm:$0xff] %v4587_v0  ;;  %7261 = vst [vmem:[#allocation132_spill] sm:$0xff] %v4589_v51  ;;  %v4591_v59 = vld [vmem:[#allocation8 + $0x80] sm:$0xf]  ;;  %v4593_v62 = vld [vmem:[#allocation8 + $0x84] sm:$0xff] }
  0x77   :  { %7262 = vst [vmem:[#allocation133_spill] sm:$0xff] %v4591_v59  ;;  %7263 = vst [vmem:[#allocation134_spill] sm:$0xff] %v4593_v62  ;;  %v4595_v58 = vld [vmem:[#allocation8 + $0x8c] sm:$0xf]  ;;  %v4597_v61 = vld [vmem:[#allocation8 + $0x90] sm:$0xff] }
  0x78   :  { %7264 = vst [vmem:[#allocation135_spill] sm:$0xff] %v4595_v58  ;;  %7265 = vst [vmem:[#allocation136_spill] sm:$0xff] %v4597_v61  ;;  %v4599_v53 = vld [vmem:[#allocation8 + $0x98] sm:$0xf]  ;;  %v4601_v56 = vld [vmem:[#allocation8 + $0x9c] sm:$0xff] }
  0x79   :  { %7266 = vst [vmem:[#allocation137_spill] sm:$0xff] %v4599_v53  ;;  %7267 = vst [vmem:[#allocation138_spill] sm:$0xff] %v4601_v56  ;;  %v4603_v52 = vld [vmem:[#allocation8 + $0xa4] sm:$0xf]  ;;  %v4605_v55 = vld [vmem:[#allocation8 + $0xa8] sm:$0xff] }
  0x7a   :  { %7268 = vst [vmem:[#allocation139_spill] sm:$0xff] %v4603_v52  ;;  %7269 = vst [vmem:[#allocation140_spill] sm:$0xff] %v4605_v55  ;;  %v4607_v47 = vld [vmem:[#allocation8 + $0xb0] sm:$0xf]  ;;  %v4609_v50 = vld [vmem:[#allocation8 + $0xb4] sm:$0xff] }
  0x7b   :  { %7270 = vst [vmem:[#allocation141_spill] sm:$0xff] %v4607_v47  ;;  %7271 = vst [vmem:[#allocation142_spill] sm:$0xff] %v4609_v50  ;;  %v4611_v46 = vld [vmem:[#allocation8 + $0xbc] sm:$0xf]  ;;  %v4616_v49 = vld [vmem:[%s6724_s6] sm:$0x7] }
  0x7c   :  { %7272 = vst [vmem:[#allocation143_spill] sm:$0xff] %v4611_v46  ;;  %7273 = vst [vmem:[#allocation144_spill] sm:$0xff] %v4616_v49  ;;  %v4621_v41 = vld [vmem:[%s6725_s7] ss:$0 sm:$0xff]  ;;  %v213_v43 = vld [vmem:[#allocation3] sm:$0xff]  }
  0x7d   :  { %7274 = vst [vmem:[#allocation145_spill] sm:$0xff] %v4621_v41  ;;  %v4626_v44 = vld [vmem:[%s6726_s8] ss:$0 sm:$0xff] }
  0x7e   :  { %7275 = vst [vmem:[#allocation146_spill] sm:$0xff] %v4626_v44  ;;  %v4628_v40 = vld [vmem:[#allocation2] ss:$0 sm:$0xff] }
  0x7f   :  { %7276 = vst [vmem:[#allocation147_spill] sm:$0xff] %v4628_v40 }
  0x80 LB: > { %v7277_v38 = vld [vmem:[#allocation50_spill] sm:$0xff]  ;;  %v7278_v37 = vld [vmem:[#allocation49_spill] sm:$0xff]  ;;  %v7280_v32 = vld [vmem:[#allocation44_spill] sm:$0xff]  ;;  %7318 = vst [vmem:[#allocation148_spill] sm:$0xff] %v4219_v43  ;;  %v6804_v41 = vmov 0   ;;  %v6813_v35 = vmov 0.0   ;;  %v4219_v43 = vphi %v213_v43, %v8251_v43   ;;  %s4223_s4 = sphi %s4632_s4, %s219_s4  }
  0x81   : > { %v7279_v34 = vld [vmem:[#allocation46_spill] sm:$0xff]  ;;  %v7281_v31 = vld [vmem:[#allocation43_spill] sm:$0xff]  ;;  %v7282_v29 = vld [vmem:[#allocation41_spill] sm:$0xff]  ;;  %3904 = vset.pattern.permute.xlu0 %v6804_v41  ;;  %464 = vmatprep.mubr.bf16.mxu0 %v6804_v41  ;;  %vm4234_vm0 = vmmov 0   ;;  %s4244_s6 = smov 127   ;;  %s4245_s7 = smov 9  }
  0x82   : > { %v7283_v28 = vld [vmem:[#allocation40_spill] sm:$0xff]  ;;  %v7284_v26 = vld [vmem:[#allocation38_spill] sm:$0xff]  ;;  %v7285_v25 = vld [vmem:[#allocation37_spill] sm:$0xff]  ;;  %223 = vperm.xlu0 %3904, %v4219_v43   ;;  %3665 = vmatprep.subr.bf16.mxu1 %v6813_v35  ;;  %vm3379_vm1 = vcmask 72704   ;;  %s219_s4 = sadd.s32 1, %s4223_s4  }
  0x83   : > { %v7286_v23 = vld [vmem:[#allocation35_spill] sm:$0xff]  ;;  %v7287_v22 = vld [vmem:[#allocation34_spill] sm:$0xff]  ;;  %v7288_v20 = vld [vmem:[#allocation32_spill] sm:$0xff]  ;;  %p216_p10 = scmp.ge.s32.totalorder %s219_s4, 5  }
  0x84   : > { %v7289_v19 = vld [vmem:[#allocation31_spill] sm:$0xff]  ;;  %v7290_v17 = vld [vmem:[#allocation29_spill] sm:$0xff]  ;;  %v7291_v16 = vld [vmem:[#allocation28_spill] sm:$0xff]  ;;  %s4246_s8 = smov (%p216_p10), 123   ;;  %s4247_s16 = smov (%p216_p10), [#allocation9]   ;;  %vm3385_vm2 = vcmask (%p216_p10), 39936  }
  0x85   : > { %v7292_v14 = vld [vmem:[#allocation26_spill] sm:$0xff]  ;;  %v7293_v13 = vld [vmem:[#allocation25_spill] sm:$0xff]  ;;  %v7294_v11 = vld [vmem:[#allocation23_spill] sm:$0xff]  ;;  %s3393_s20 = sshll.u32 (%p216_p10), %s4247_s16, 4  ;;  %s3394_s20 = int_to_ptr.vmem [resolvable:$true] %s3393_s20 }
  0x86   : > { %v7295_v10 = vld [vmem:[#allocation22_spill] sm:$0xff]  ;;  %v7296_v8 = vld [vmem:[#allocation20_spill] sm:$0xff]  ;;  %v7297_v7 = vld [vmem:[#allocation19_spill] sm:$0xff]  ;;  %s4181_s21 = scalar_lea.vmem (%p216_p10), %s3394_s20, 128  ;;  %p4186_p12 = scmp.lt.s32.totalorder (%p216_p10), %s3394_s20, %s3394_s20 }
  0x87   : > { %v7298_v5 = vld [vmem:[#allocation17_spill] sm:$0xff]  ;;  %v7299_v4 = vld [vmem:[#allocation16_spill] sm:$0xff]  ;;  %v7300_v2 = vld [vmem:[#allocation14_spill] sm:$0xff]  ;;  %p4182_p11 = scmp.ne.s32.totalorder (%p216_p10), %s3394_s20, %s4181_s21  ;;  %p4187_p13 = scmp.lt.s32.totalorder (%p216_p10), %s4181_s21, %s4181_s21 }
  0x88   : > { %v7301_v1 = vld [vmem:[#allocation13_spill] sm:$0xff]  ;;  %v7302_v63 = vld [vmem:[#allocation126_spill] sm:$0xff]  ;;  %v7304_v61 = vld [vmem:[#allocation136_spill] sm:$0xff] }
  0x89   : > { %v7303_v62 = vld [vmem:[#allocation134_spill] sm:$0xff]  ;;  %v7306_v55 = vld [vmem:[#allocation140_spill] sm:$0xff]  ;;  %v7320_v18 = vld [vmem:[#allocation115_spill] sm:$0xff]  ;;  %p4188_p0 = por (%p216_p10), %p4187_p13, %p4186_p12 }
  0x8a   : > { %v7305_v57 = vld [vmem:[#allocation130_spill] sm:$0xff]  ;;  %v7309_v51 = vld [vmem:[#allocation132_spill] sm:$0xff]  ;;  %v7321_v48 = vld [vmem:[#allocation113_spill] sm:$0xff] }
  0x8b   : > { %v7307_v50 = vld [vmem:[#allocation142_spill] sm:$0xff]  ;;  %v7310_v39 = vld [vmem:[#allocation128_spill] sm:$0xff]  ;;  %v4653_v49 = vcombine.low %v7321_v48, %v7320_v18  ;;  %v7323_v15 = vld [vmem:[#allocation119_spill] sm:$0xff]  ;;  %p4189_p1 = pnand (%p216_p10), %p4188_p0, %p4182_p11 }
  0x8c   : > { %v7308_v56 = vld [vmem:[#allocation138_spill] sm:$0xff]  ;;  %v7311_v27 = vld [vmem:[#allocation124_spill] sm:$0xff]  ;;  %v7324_v36 = vld [vmem:[#allocation117_spill] sm:$0xff] }
  0x8d   : > { %v7312_v30 = vld [vmem:[#allocation120_spill] sm:$0xff]  ;;  %v7313_v9 = vld [vmem:[#allocation122_spill] sm:$0xff]  ;;  %7322 = vst [vmem:[#allocation150_spill] sm:$0xff] %v4653_v49  ;;  %3666 = vmatpush3.bf16.msra.mxu1 %v4653_v49  ;;  %v4670_v18 = vcombine.low %v7324_v36, %v7323_v15  ;;  %v7326_v33 = vld [vmem:[#allocation123_spill] sm:$0xff]  ;;  %v4723_v36 = vcombine.high %v7309_v51, %v7303_v62  ;;  %v4747_v48 = vcombine.low %v7304_v61, %v7308_v56 }
  0x8e   : > { %v7314_v21 = vld [vmem:[#allocation116_spill] sm:$0xff]  ;;  %v7315_v12 = vld [vmem:[#allocation118_spill] sm:$0xff]  ;;  %3667 = vmatprep.subr.bf16.mxu1 %v6813_v35  ;;  %v7327_v6 = vld [vmem:[#allocation121_spill] sm:$0xff] }
  0x8f   : > { %v7316_v42 = vld [vmem:[#allocation114_spill] sm:$0xff]  ;;  %v7317_v24 = vld [vmem:[#allocation112_spill] sm:$0xff]  ;;  %v4661_v41 = vcombine.high %v7314_v21, %v7315_v12  ;;  %7325 = vst [vmem:[#allocation151_spill] sm:$0xff] %v4670_v18  ;;  %v4686_v15 = vcombine.low %v7327_v6, %v7326_v33  ;;  %v7329_v45 = vld [vmem:[#allocation127_spill] sm:$0xff] }
  0x90   : > { %v4645_v40 = vcombine.high %v7317_v24, %v7316_v42  ;;  %v4649_v44 = vcombine.low %v7317_v24, %v7316_v42  ;;  %v4666_v24 = vcombine.low %v7314_v21, %v7315_v12  ;;  %v4677_v42 = vcombine.high %v7312_v30, %v7313_v9  ;;  %v7330_v60 = vld [vmem:[#allocation125_spill] sm:$0xff]  ;;  %v7333_v0 = vld [vmem:[#allocation131_spill] sm:$0xff]  ;;  %7336 = vst [vmem:[#allocation156_spill] sm:$0xff] %v4723_v36 }
  0x91   : > { %3668 = vmatpush3.bf16.msra.mxu1 %v4670_v18  ;;  %v4682_v12 = vcombine.low %v7312_v30, %v7313_v9  ;;  %7328 = vst [vmem:[#allocation152_spill] sm:$0xff] %v4686_v15  ;;  %v4693_v21 = vcombine.high %v7311_v27, %v7302_v63  ;;  %v4698_v9 = vcombine.low %v7311_v27, %v7302_v63  ;;  %v7334_v54 = vld [vmem:[#allocation129_spill] sm:$0xff]  ;;  %v7337_v58 = vld [vmem:[#allocation135_spill] sm:$0xff]  ;;  %7342 = vst [vmem:[#allocation159_spill] sm:$0xff] %v4747_v48 }
  0x92   : > { %7319 = vst [vmem:[#allocation149_spill] sm:$0xff] %v4645_v40  ;;  %432 = vmatprep.subr.bf16.mxu0 %v4645_v40  ;;  %3669 = vmatprep.subr.bf16.mxu1 %v6813_v35  ;;  %v4702_v6 = vcombine.low %v7330_v60, %v7329_v45  ;;  %v4709_v30 = vcombine.high %v7310_v39, %v7305_v57  ;;  %v7338_v59 = vld [vmem:[#allocation133_spill] sm:$0xff]  ;;  %v7343_v52 = vld [vmem:[#allocation139_spill] sm:$0xff] }
  0x93   : > { %433 = vmatpush1.bf16.msra.mxu0 %v4649_v44  ;;  %v4714_v27 = vcombine.low %v7310_v39, %v7305_v57  ;;  %v4718_v33 = vcombine.low %v7334_v54, %v7333_v0  ;;  %v4733_v39 = vcombine.low %v7338_v59, %v7337_v58  ;;  %v7340_v0 = vmov 0.0   ;;  %v7344_v53 = vld [vmem:[#allocation137_spill] sm:$0xff]  ;;  %v7348_v46 = vld [vmem:[#allocation143_spill] sm:$0xff] }
  0x94   : > { %434 = vmatprep.subr.bf16.mxu0 %v4661_v41  ;;  %7331 = vst [vmem:[#allocation153_spill] sm:$0xff] %v4702_v6  ;;  %7332 = vst [vmem:[#allocation154_spill] sm:$0xff] %v4709_v30  ;;  %v4739_v45 = vcombine.high %v7304_v61, %v7308_v56  ;;  %3681 = vmatprep.mubr.msk.bf16.mxu1 %vm4234_vm0, %v7340_v0  ;;  %v4757_v54 = vcombine.high %v7306_v55, %v7307_v50  ;;  %v7349_v47 = vld [vmem:[#allocation141_spill] sm:$0xff]  ;;  %v7359_v3 = vld [vmem:[#allocation15_spill] sm:$0xff] }
  0x95   : > { %3670 = vmatpush3.bf16.msra.mxu1 %v4686_v15  ;;  %7335 = vst [vmem:[#allocation155_spill] sm:$0xff] %v4718_v33  ;;  %7339 = vst [vmem:[#allocation157_spill] sm:$0xff] %v4733_v39  ;;  %v4763_v56 = vcombine.low %v7306_v55, %v7307_v50  ;;  %v4779_v50 = vcombine.high %v7298_v5, %v7296_v8 }
  0x96   : > { %3671 = vmatprep.subr.bf16.mxu1 %v6813_v35  ;;  %7341 = vst [vmem:[#allocation158_spill] sm:$0xff] %v4739_v45  ;;  %7346 = vst [vmem:[#allocation161_spill] sm:$0xff] %v4757_v54 }
  0x97   : > { %435 = vmatpush1.bf16.msra.mxu0 %v4666_v24  ;;  %7347 = vst [vmem:[#allocation162_spill] sm:$0xff] %v4763_v56  ;;  %7352 = vst [vmem:[#allocation165_spill] sm:$0xff] %v4779_v50 }
  0x98   : > { %436 = vmatprep.subr.bf16.mxu0 %v4677_v42 }
  0x99   : > { %3672 = vmatpush3.bf16.msra.mxu1 %v4702_v6 }
  0x9a   : > { %3673 = vmatprep.subr.bf16.mxu1 %v6813_v35  ;;  %v4729_v35 = vcombine.low %v7309_v51, %v7303_v62  ;;  %v4751_v51 = vcombine.low %v7344_v53, %v7343_v52  ;;  %v4767_v52 = vcombine.low %v7349_v47, %v7348_v46  ;;  %v4775_v53 = vcombine.high %v7299_v4, %v7297_v7 }
  0x9b   : > { %437 = vmatpush1.bf16.msra.mxu0 %v4682_v12  ;;  %v227_v46 = vlaneseq }
  0x9c   : > { %438 = vmatprep.subr.bf16.mxu0 %v4693_v21  ;;  %7345 = vst [vmem:[#allocation160_spill] sm:$0xff] %v4751_v51  ;;  %7350 = vst [vmem:[#allocation163_spill] sm:$0xff] %v4767_v52 }
  0x9d   : > { %3674 = vmatpush3.bf16.msra.mxu1 %v4718_v33  ;;  %7351 = vst [vmem:[#allocation164_spill] sm:$0xff] %v4775_v53  ;;  %v228_v47 = vshrl.u32 %v227_v46, 7 }
  0x9e   : > { %3675 = vmatprep.subr.bf16.mxu1 %v7340_v0 }
  0x9f   : > { %439 = vmatpush1.bf16.msra.mxu0 %v4698_v9  ;;  %v4783_v55 = vsub.s32 0, %v228_v47  ;;  %v4785_v57 = vsub.s32 1, %v228_v47  ;;  %v4807_v15 = vsub.s32 2, %v228_v47 }
  0xa0   : > { %440 = vmatprep.subr.bf16.mxu0 %v4709_v30 }
  0xa1   : > { %3676 = vmatpush3.bf16.msra.mxu1 %v4733_v39  ;;  %v4789_v58 = vrot.slane %v7301_v1, %v4783_v55  ;;  %v4793_v59 = vrot.slane %v7301_v1, %v4785_v57  ;;  %v4797_v60 = vrot.slane %v7300_v2, %v4783_v55  ;;  %v4802_v46 = vrot.slane %v7300_v2, %v4785_v57 }
  0xa2   : > { %3677 = vmatprep.subr.bf16.mxu1 %v7340_v0  ;;  %v4811_v18 = vrot.slane %v7301_v1, %v4807_v15 }
  0xa3   : > { %441 = vmatpush1.bf16.msra.mxu0 %v4714_v27  ;;  %7353 = vst [vmem:[#allocation166_spill] sm:$0xff] %v4789_v58  ;;  %7354 = vst [vmem:[#allocation167_spill] sm:$0xff] %v4793_v59 }
  0xa4   : > { %442 = vmatprep.subr.bf16.mxu0 %v4723_v36  ;;  %7355 = vst [vmem:[#allocation168_spill] sm:$0xff] %v4797_v60  ;;  %7356 = vst [vmem:[#allocation169_spill] sm:$0xff] %v4802_v46 }
  0xa5   : > { %3678 = vmatpush3.bf16.msra.mxu1 %v4751_v51  ;;  %7357 = vst [vmem:[#allocation170_spill] sm:$0xff] %v4811_v18 }
  0xa6   : > { %3679 = vmatprep.subr.bf16.mxu1 %v7340_v0 }
  0xa7   : > { %443 = vmatpush1.bf16.msra.mxu0 %v4729_v35 }
  0xa8   : > { %444 = vmatprep.subr.bf16.mxu0 %v4739_v45 }
  0xa9   : > { %3680 = vmatpush3.bf16.msra.mxu1 %v4767_v52 }
  0xaa   : > { %1068 = vmatprep.subr.bf16.mxu1 %v4779_v50 }
  0xab   : > { %445 = vmatpush1.bf16.msra.mxu0 %v4747_v48 }
  0xac   : > { %446 = vmatprep.subr.bf16.mxu0 %v4757_v54 }
  0xaf   : > { %447 = vmatpush1.bf16.msra.mxu0 %v4763_v56 }
  0xb0   : > { %1027 = vmatprep.subr.bf16.mxu0 %v4775_v53 }
 0x101   : > { %v224_v61 = vpop.permute.xlu0 %223 }
 0x102   : > { %v242_v62 = vmul.f32 %v4789_v58, %v224_v61  ;;  %v243_v63 = vmul.f32 %v4793_v59, %v224_v61  ;;  %v4815_v59 = vrot.slane %v7300_v2, %v4807_v15  ;;  %v4824_v2 = vcombine.low %v7299_v4, %v7297_v7  ;;  %v7460_v58 = vld [vmem:[#allocation107_spill] sm:$0xff] }
 0x103   : > { %v4882_v4 = vcombine.high %v7286_v23, %v7284_v26  ;;  %v4892_v7 = vcombine.low %v7286_v23, %v7284_v26  ;;  %v7385_v23 = vld [vmem:[#allocation52_spill] sm:$0xff] }
 0x104   : > { %v261_v50 = vadd.f32 %v4797_v60, %v242_v62  ;;  %v262_v51 = vadd.f32 %v4802_v46, %v243_v63  ;;  %7358 = vst [vmem:[#allocation171_spill] sm:$0xff] %v4815_v59  ;;  %7361 = vst [vmem:[#allocation173_spill] sm:$0xff] %v4824_v2  ;;  %v7451_v46 = vld [vmem:[#allocation104_spill] sm:$0xff] }
 0x105   : > { %7372 = vst [vmem:[#allocation184_spill] sm:$0xff] %v4882_v4  ;;  %7374 = vst [vmem:[#allocation186_spill] sm:$0xff] %v4892_v7 }
 0x106   : > { %v3411_v52 = vmul.f32 -1.442695, %v261_v50  ;;  %v3412_v39 = vmul.f32 -1.442695, %v262_v51  ;;  %v244_v50 = vmul.f32 %v4811_v18, %v224_v61 }
 0x108   : > { %3915 = vpow2.f32 %v3411_v52 }
 0x109   : > { %3917 = vpow2.f32 %v3412_v39  ;;  %v263_v39 = vadd.f32 %v4815_v59, %v244_v50  ;;  %v4836_v50 = vcombine.high %v7295_v10, %v7293_v13  ;;  %v7444_v59 = vld [vmem:[#allocation95_spill] sm:$0xff] }
 0x10b   : > { %7363 = vst [vmem:[#allocation175_spill] sm:$0xff] %v4836_v50 }
 0x112   : > { %v3916_v33 = vpop.eup %3915 }
 0x113   : > { %v270_v6 = vadd.f32 1.0, %v3916_v33  ;;  %v3918_v49 = vpop.eup %3917 }
 0x114   : > { %v271_v62 = vadd.f32 1.0, %v3918_v49  ;;  %v4828_v49 = vcombine.low %v7298_v5, %v7296_v8  ;;  %v4888_v5 = vcombine.low %v7287_v22, %v7285_v25  ;;  %v4900_v8 = vcombine.high %v7283_v28, %v7281_v31 }
 0x115   : > { %3919 = vrcp.f32 %v270_v6 }
 0x116   : > { %3921 = vrcp.f32 %v271_v62  ;;  %7362 = vst [vmem:[#allocation174_spill] sm:$0xff] %v4828_v49  ;;  %v4840_v62 = vcombine.high %v7294_v11, %v7292_v14  ;;  %7373 = vst [vmem:[#allocation185_spill] sm:$0xff] %v4888_v5 }
 0x117   : > { %7375 = vst [vmem:[#allocation187_spill] sm:$0xff] %v4900_v8 }
 0x118   : > { %7364 = vst [vmem:[#allocation176_spill] sm:$0xff] %v4840_v62 }
 0x11f   : > { %v3920_v52 = vpop.eup %3919 }
 0x120   : > { %v282_v33 = vmul.f32 %v3920_v52, %v7359_v3  ;;  %v3922_v6 = vpop.eup %3921  ;;  %v4848_v52 = vcombine.low %v7295_v10, %v7293_v13  ;;  %v4904_v10 = vcombine.low %v7283_v28, %v7281_v31  ;;  %v4913_v13 = vcombine.low %v7282_v29, %v7280_v32  ;;  %v7388_v28 = vld [vmem:[#allocation56_spill] sm:$0xff] }
 0x121   : > { %v285_v51 = vsub.f32 1.0, %v3922_v6  ;;  %v4868_v6 = vcombine.low %v7291_v16, %v7289_v19 }
 0x122   : > { %v283_v47 = vadd.f32 %v282_v33, %v263_v39  ;;  %7365 = vst [vmem:[#allocation177_spill] sm:$0xff] %v4848_v52  ;;  %v4852_v39 = vcombine.low %v7294_v11, %v7292_v14  ;;  %v4858_v33 = vcombine.high %v7291_v16, %v7289_v19  ;;  %7376 = vst [vmem:[#allocation188_spill] sm:$0xff] %v4904_v10 }
 0x123   : > { %7369 = vst [vmem:[#allocation181_spill] sm:$0xff] %v4868_v6  ;;  %v4908_v11 = vcombine.high %v7282_v29, %v7280_v32  ;;  %7378 = vst [vmem:[#allocation190_spill] sm:$0xff] %v4913_v13  ;;  %v4920_v14 = vcombine.high %v7279_v34, %v7278_v37  ;;  %v4924_v16 = vcombine.low %v7279_v34, %v7278_v37  ;;  %v7389_v29 = vld [vmem:[#allocation53_spill] sm:$0xff]  ;;  %v7393_v34 = vld [vmem:[#allocation58_spill] sm:$0xff] }
 0x124   : > { %3923 = vtanh.f32 %v283_v47  ;;  %7366 = vst [vmem:[#allocation178_spill] sm:$0xff] %v4852_v39  ;;  %7367 = vst [vmem:[#allocation179_spill] sm:$0xff] %v4858_v33  ;;  %v4862_v47 = vcombine.high %v7290_v17, %v7288_v20  ;;  %v4948_v31 = vcombine.high %v7389_v29, %v7388_v28  ;;  %v7392_v32 = vld [vmem:[#allocation61_spill] sm:$0xff]  ;;  %v7396_v37 = vld [vmem:[#allocation62_spill] sm:$0xff] }
 0x125   : > { %7377 = vst [vmem:[#allocation189_spill] sm:$0xff] %v4908_v11  ;;  %7379 = vst [vmem:[#allocation191_spill] sm:$0xff] %v4920_v14 }
 0x126   : > { %7368 = vst [vmem:[#allocation180_spill] sm:$0xff] %v4862_v47  ;;  %7380 = vst [vmem:[#allocation192_spill] sm:$0xff] %v4924_v16 }
 0x127   : > { %7390 = vst [vmem:[#allocation197_spill] sm:$0xff] %v4948_v31 }
 0x12e   : > { %v3924_v63 = vpop.eup %3923 }
 0x12f   : > { %v4820_v1 = vmul.f32 %v3924_v63, %v285_v51  ;;  %v4872_v51 = vcombine.low %v7290_v17, %v7288_v20  ;;  %v4878_v63 = vcombine.high %v7287_v22, %v7285_v25  ;;  %v7381_v17 = vld [vmem:[#allocation47_spill] sm:$0xff] }
 0x130   : > { %v4928_v19 = vcombine.high %v7381_v17, %v7277_v38  ;;  %v4933_v20 = vcombine.low %v7381_v17, %v7277_v38  ;;  %v7384_v22 = vld [vmem:[#allocation55_spill] sm:$0xff]  ;;  %v4953_v17 = vcombine.low %v7389_v29, %v7388_v28 }
 0x131   : > { %7360 = vst [vmem:[#allocation172_spill] sm:$0xff] %v4820_v1  ;;  %v4832_v61 = vpack.c.bf16 %v4820_v1, %v4820_v1  ;;  %7370 = vst [vmem:[#allocation182_spill] sm:$0xff] %v4872_v51  ;;  %v4940_v25 = vcombine.high %v7385_v23, %v7384_v22  ;;  %v4944_v26 = vcombine.low %v7385_v23, %v7384_v22  ;;  %v7397_v38 = vld [vmem:[#allocation59_spill] sm:$0xff]  ;;  %v7443_v1 = vld [vmem:[#allocation98_spill] sm:$0xff] }
 0x132   : > { %7371 = vst [vmem:[#allocation183_spill] sm:$0xff] %v4878_v63  ;;  %7382 = vst [vmem:[#allocation193_spill] sm:$0xff] %v4928_v19  ;;  %v4960_v22 = vcombine.high %v7393_v34, %v7392_v32  ;;  %v4964_v23 = vcombine.low %v7393_v34, %v7392_v32  ;;  %v4973_v28 = vcombine.low %v7397_v38, %v7396_v37  ;;  %v7400_v29 = vld [vmem:[#allocation67_spill] sm:$0xff] }
 0x133   : > { %465 = vmatmul.mubr.bf16.vlgmr.msra.gmra.mrb[0].mxu0 %v4832_v61  ;;  %3682 = vmatmul.mubr.bf16.vlgmr.msra.gmra.mrb[0].mxu1 %v4832_v61  ;;  %7383 = vst [vmem:[#allocation194_spill] sm:$0xff] %v4933_v20  ;;  %7386 = vst [vmem:[#allocation195_spill] sm:$0xff] %v4940_v25  ;;  %v5081_v3 = vcombine.high %v7444_v59, %v7443_v1 }
 0x134   : > { %1028 = vmatpush1.bf16.msra.mxu0 %v4824_v2  ;;  %1069 = vmatpush1.bf16.msra.mxu1 %v4828_v49  ;;  %7387 = vst [vmem:[#allocation196_spill] sm:$0xff] %v4944_v26  ;;  %7391 = vst [vmem:[#allocation198_spill] sm:$0xff] %v4953_v17 }
 0x135   : > { %1029 = vmatprep.subr.bf16.mxu0 %v4836_v50  ;;  %1070 = vmatprep.subr.bf16.mxu1 %v4840_v62  ;;  %7394 = vst [vmem:[#allocation199_spill] sm:$0xff] %v4960_v22  ;;  %7395 = vst [vmem:[#allocation200_spill] sm:$0xff] %v4964_v23  ;;  %v7437_v62 = vld [vmem:[#allocation89_spill] sm:$0xff] }
 0x136   : > { %7399 = vst [vmem:[#allocation202_spill] sm:$0xff] %v4973_v28  ;;  %7445 = vst [vmem:[#allocation224_spill] sm:$0xff] %v5081_v3 }
 0x138   : > { %1030 = vmatpush1.bf16.msra.mxu0 %v4848_v52  ;;  %1071 = vmatpush1.bf16.msra.mxu1 %v4852_v39 }
 0x139   : > { %1031 = vmatprep.subr.bf16.mxu0 %v4858_v33  ;;  %1072 = vmatprep.subr.bf16.mxu1 %v4862_v47  ;;  %v7429_v47 = vld [vmem:[#allocation83_spill] sm:$0xff] }
 0x13c   : > { %1032 = vmatpush1.bf16.msra.mxu0 %v4868_v6  ;;  %1073 = vmatpush1.bf16.msra.mxu1 %v4872_v51 }
 0x13d   : > { %1033 = vmatprep.subr.bf16.mxu0 %v4878_v63  ;;  %1074 = vmatprep.subr.bf16.mxu1 %v4882_v4  ;;  %v7421_v4 = vld [vmem:[#allocation77_spill] sm:$0xff] }
 0x140   : > { %1034 = vmatpush1.bf16.msra.mxu0 %v4888_v5  ;;  %1075 = vmatpush1.bf16.msra.mxu1 %v4892_v7 }
 0x141   : > { %1035 = vmatprep.subr.bf16.mxu0 %v4900_v8  ;;  %1076 = vmatprep.subr.bf16.mxu1 %v4908_v11  ;;  %v7413_v11 = vld [vmem:[#allocation71_spill] sm:$0xff] }
 0x144   : > { %1036 = vmatpush1.bf16.msra.mxu0 %v4904_v10  ;;  %1077 = vmatpush1.bf16.msra.mxu1 %v4913_v13 }
 0x145   : > { %1037 = vmatprep.subr.bf16.mxu0 %v4920_v14  ;;  %1078 = vmatprep.subr.bf16.mxu1 %v4928_v19  ;;  %v7405_v19 = vld [vmem:[#allocation65_spill] sm:$0xff] }
 0x148   : > { %1038 = vmatpush1.bf16.msra.mxu0 %v4924_v16  ;;  %1079 = vmatpush1.bf16.msra.mxu1 %v4933_v20  ;;  %v4968_v20 = vcombine.high %v7397_v38, %v7396_v37  ;;  %v7408_v38 = vld [vmem:[#allocation73_spill] sm:$0xff] }
 0x149   : > { %1039 = vmatprep.subr.bf16.mxu0 %v4940_v25  ;;  %1080 = vmatprep.subr.bf16.mxu1 %v4948_v31  ;;  %v7404_v31 = vld [vmem:[#allocation68_spill] sm:$0xff] }
 0x14a   : > { %7398 = vst [vmem:[#allocation201_spill] sm:$0xff] %v4968_v20  ;;  %v4988_v13 = vcombine.high %v7405_v19, %v7404_v31  ;;  %v4993_v37 = vcombine.low %v7405_v19, %v7404_v31  ;;  %v7416_v31 = vld [vmem:[#allocation79_spill] sm:$0xff] }
 0x14c   : > { %1040 = vmatpush1.bf16.msra.mxu0 %v4944_v26  ;;  %1081 = vmatpush1.bf16.msra.mxu1 %v4953_v17  ;;  %v7401_v17 = vld [vmem:[#allocation64_spill] sm:$0xff]  ;;  %7406 = vst [vmem:[#allocation205_spill] sm:$0xff] %v4988_v13  ;;  %7407 = vst [vmem:[#allocation206_spill] sm:$0xff] %v4993_v37 }
 0x14d   : > { %1041 = vmatprep.subr.bf16.mxu0 %v4960_v22  ;;  %1082 = vmatprep.subr.bf16.mxu1 %v4968_v20  ;;  %v4980_v32 = vcombine.high %v7401_v17, %v7400_v29  ;;  %v4984_v34 = vcombine.low %v7401_v17, %v7400_v29  ;;  %v7412_v20 = vld [vmem:[#allocation74_spill] sm:$0xff] }
 0x14e   : > { %v5008_v7 = vcombine.high %v7413_v11, %v7412_v20  ;;  %v5013_v19 = vcombine.low %v7413_v11, %v7412_v20  ;;  %v7424_v20 = vld [vmem:[#allocation85_spill] sm:$0xff] }
 0x14f   : > { %7402 = vst [vmem:[#allocation203_spill] sm:$0xff] %v4980_v32  ;;  %7403 = vst [vmem:[#allocation204_spill] sm:$0xff] %v4984_v34 }
 0x150   : > { %1042 = vmatpush1.bf16.msra.mxu0 %v4964_v23  ;;  %1083 = vmatpush1.bf16.msra.mxu1 %v4973_v28  ;;  %v7409_v28 = vld [vmem:[#allocation70_spill] sm:$0xff]  ;;  %7414 = vst [vmem:[#allocation209_spill] sm:$0xff] %v5008_v7  ;;  %7415 = vst [vmem:[#allocation210_spill] sm:$0xff] %v5013_v19 }
 0x151   : > { %1043 = vmatprep.subr.bf16.mxu0 %v4980_v32  ;;  %1084 = vmatprep.subr.bf16.mxu1 %v4988_v13  ;;  %v5000_v17 = vcombine.high %v7409_v28, %v7408_v38  ;;  %v5004_v29 = vcombine.low %v7409_v28, %v7408_v38  ;;  %v7420_v13 = vld [vmem:[#allocation80_spill] sm:$0xff] }
 0x152   : > { %v5028_v51 = vcombine.high %v7421_v4, %v7420_v13  ;;  %v5033_v11 = vcombine.low %v7421_v4, %v7420_v13  ;;  %v7432_v13 = vld [vmem:[#allocation91_spill] sm:$0xff] }
 0x153   : > { %7410 = vst [vmem:[#allocation207_spill] sm:$0xff] %v5000_v17  ;;  %7411 = vst [vmem:[#allocation208_spill] sm:$0xff] %v5004_v29 }
 0x154   : > { %1044 = vmatpush1.bf16.msra.mxu0 %v4984_v34  ;;  %1085 = vmatpush1.bf16.msra.mxu1 %v4993_v37  ;;  %v7417_v37 = vld [vmem:[#allocation76_spill] sm:$0xff]  ;;  %7422 = vst [vmem:[#allocation213_spill] sm:$0xff] %v5028_v51  ;;  %7423 = vst [vmem:[#allocation214_spill] sm:$0xff] %v5033_v11 }
 0x155   : > { %1045 = vmatprep.subr.bf16.mxu0 %v5000_v17  ;;  %1086 = vmatprep.subr.bf16.mxu1 %v5008_v7  ;;  %v5020_v28 = vcombine.high %v7417_v37, %v7416_v31  ;;  %v5024_v38 = vcombine.low %v7417_v37, %v7416_v31  ;;  %v7428_v7 = vld [vmem:[#allocation86_spill] sm:$0xff] }
 0x156   : > { %v5048_v39 = vcombine.high %v7429_v47, %v7428_v7  ;;  %v5053_v4 = vcombine.low %v7429_v47, %v7428_v7  ;;  %v7440_v47 = vld [vmem:[#allocation97_spill] sm:$0xff] }
 0x157   : > { %7418 = vst [vmem:[#allocation211_spill] sm:$0xff] %v5020_v28  ;;  %7419 = vst [vmem:[#allocation212_spill] sm:$0xff] %v5024_v38 }
 0x158   : > { %1046 = vmatpush1.bf16.msra.mxu0 %v5004_v29  ;;  %1087 = vmatpush1.bf16.msra.mxu1 %v5013_v19  ;;  %v7425_v19 = vld [vmem:[#allocation82_spill] sm:$0xff]  ;;  %7430 = vst [vmem:[#allocation217_spill] sm:$0xff] %v5048_v39  ;;  %7431 = vst [vmem:[#allocation218_spill] sm:$0xff] %v5053_v4 }
 0x159   : > { %1047 = vmatprep.subr.bf16.mxu0 %v5020_v28  ;;  %1088 = vmatprep.subr.bf16.mxu1 %v5028_v51  ;;  %v5040_v31 = vcombine.high %v7425_v19, %v7424_v20  ;;  %v5044_v37 = vcombine.low %v7425_v19, %v7424_v20  ;;  %v7436_v51 = vld [vmem:[#allocation92_spill] sm:$0xff] }
 0x15a   : > { %v5068_v49 = vcombine.high %v7437_v62, %v7436_v51  ;;  %v5073_v7 = vcombine.low %v7437_v62, %v7436_v51  ;;  %v7448_v51 = vld [vmem:[#allocation103_spill] sm:$0xff]  ;;  %v7449_v62 = vld [vmem:[#allocation100_spill] sm:$0xff] }
 0x15b   : > { %7426 = vst [vmem:[#allocation215_spill] sm:$0xff] %v5040_v31  ;;  %7427 = vst [vmem:[#allocation216_spill] sm:$0xff] %v5044_v37  ;;  %v5097_v18 = vcombine.high %v7449_v62, %v7448_v51 }
 0x15c   : > { %1048 = vmatpush1.bf16.msra.mxu0 %v5024_v38  ;;  %1089 = vmatpush1.bf16.msra.mxu1 %v5033_v11  ;;  %v7433_v11 = vld [vmem:[#allocation88_spill] sm:$0xff]  ;;  %7438 = vst [vmem:[#allocation221_spill] sm:$0xff] %v5068_v49  ;;  %7439 = vst [vmem:[#allocation222_spill] sm:$0xff] %v5073_v7 }
 0x15d   : > { %1049 = vmatprep.subr.bf16.mxu0 %v5040_v31  ;;  %1090 = vmatprep.subr.bf16.mxu1 %v5048_v39  ;;  %v5060_v19 = vcombine.high %v7433_v11, %v7432_v13  ;;  %v5064_v20 = vcombine.low %v7433_v11, %v7432_v13  ;;  %v5093_v13 = vcombine.low %v7444_v59, %v7443_v1  ;;  %v7457_v59 = vld [vmem:[#allocation106_spill] sm:$0xff] }
 0x15e   : > { %7450 = vst [vmem:[#allocation227_spill] sm:$0xff] %v5097_v18 }
 0x15f   : > { %7434 = vst [vmem:[#allocation219_spill] sm:$0xff] %v5060_v19  ;;  %7435 = vst [vmem:[#allocation220_spill] sm:$0xff] %v5064_v20 }
 0x160   : > { %1050 = vmatpush1.bf16.msra.mxu0 %v5044_v37  ;;  %1091 = vmatpush1.bf16.msra.mxu1 %v5053_v4  ;;  %v7441_v4 = vld [vmem:[#allocation94_spill] sm:$0xff]  ;;  %7447 = vst [vmem:[#allocation226_spill] sm:$0xff] %v5093_v13 }
 0x161   : > { %1051 = vmatprep.subr.bf16.mxu0 %v5060_v19  ;;  %v5077_v39 = vcombine.high %v7441_v4, %v7440_v47  ;;  %1092 = vmatprep.subr.bf16.mxu1 %v5068_v49  ;;  %v5087_v11 = vcombine.low %v7441_v4, %v7440_v47  ;;  %v7452_v49 = vld [vmem:[#allocation101_spill] sm:$0xff]  ;;  %v5107_v4 = vcombine.low %v7449_v62, %v7448_v51  ;;  %v7465_v62 = vld [vmem:[#allocation18_spill] sm:$0xff] }
 0x162   : > { %v5102_v60 = vcombine.high %v7452_v49, %v7451_v46  ;;  %v5113_v1 = vcombine.low %v7452_v49, %v7451_v46  ;;  %v7456_v47 = vld [vmem:[#allocation109_spill] sm:$0xff] }
 0x163   : > { %7442 = vst [vmem:[#allocation223_spill] sm:$0xff] %v5077_v39  ;;  %7446 = vst [vmem:[#allocation225_spill] sm:$0xff] %v5087_v11  ;;  %v5127_v51 = vcombine.low %v7457_v59, %v7456_v47  ;;  %v7464_v49 = vld [vmem:[#allocation21_spill] sm:$0xff] }
 0x164   : > { %1052 = vmatpush1.bf16.msra.mxu0 %v5064_v20  ;;  %1093 = vmatpush1.bf16.msra.mxu1 %v5073_v7  ;;  %7453 = vst [vmem:[#allocation228_spill] sm:$0xff] %v5102_v60  ;;  %7454 = vst [vmem:[#allocation229_spill] sm:$0xff] %v5107_v4  ;;  %v7459_v7 = vld [vmem:[#allocation110_spill] sm:$0xff] }
 0x165   : > { %1053 = vmatprep.subr.bf16.mxu0 %v5077_v39  ;;  %1094 = vmatprep.subr.bf16.mxu1 %v5081_v3  ;;  %7455 = vst [vmem:[#allocation230_spill] sm:$0xff] %v5113_v1  ;;  %v5117_v3 = vcombine.high %v7457_v59, %v7456_v47  ;;  %7462 = vst [vmem:[#allocation233_spill] sm:$0xff] %v5127_v51  ;;  %v5133_v46 = vcombine.low %v7460_v58, %v7459_v7  ;;  %v4235_v47 = vmov 1  }
 0x166   : > { %3905 = vset.pattern.permute.xlu0 %v4235_v47 }
 0x167   : > { %7458 = vst [vmem:[#allocation231_spill] sm:$0xff] %v5117_v3  ;;  %7463 = vst [vmem:[#allocation234_spill] sm:$0xff] %v5133_v46  ;;  %537 = vperm.xlu0 %3905, %v4219_v43  }
 0x168   : > { %1054 = vmatpush1.bf16.msra.mxu0 %v5087_v11  ;;  %1095 = vmatpush1.bf16.msra.mxu1 %v5093_v13  ;;  %v5122_v11 = vcombine.high %v7460_v58, %v7459_v7  ;;  %v7467_v7 = vld [vmem:[#allocation144_spill] sm:$0xff] }
 0x169   : > { %1055 = vmatprep.subr.bf16.mxu0 %v5097_v18  ;;  %1096 = vmatprep.subr.bf16.mxu1 %v5102_v60  ;;  %v5140_v60 = vcombine.high %v7465_v62, %v7464_v49  ;;  %v5147_v58 = vrot.slane %v7467_v7, %v4783_v55 }
 0x16a   : > { %7461 = vst [vmem:[#allocation232_spill] sm:$0xff] %v5122_v11 }
 0x16b   : > { %7466 = vst [vmem:[#allocation235_spill] sm:$0xff] %v5140_v60  ;;  %7468 = vst [vmem:[#allocation236_spill] sm:$0xff] %v5147_v58 }
 0x16c   : > { %1056 = vmatpush1.bf16.msra.mxu0 %v5107_v4  ;;  %1097 = vmatpush1.bf16.msra.mxu1 %v5113_v1 }
 0x16d   : > { %1057 = vmatprep.subr.bf16.mxu0 %v5117_v3  ;;  %1098 = vmatprep.subr.bf16.mxu1 %v5122_v11 }
 0x170   : > { %1058 = vmatpush1.bf16.msra.mxu0 %v5127_v51  ;;  %1099 = vmatpush1.bf16.msra.mxu1 %v5133_v46  ;;  %v5151_v46 = vrot.slane %v7467_v7, %v4785_v57  ;;  %v5157_v57 = vrot.slane %v7467_v7, %v4807_v15  ;;  %v5167_v15 = vcombine.low %v7465_v62, %v7464_v49  ;;  %v7477_v7 = vld [vmem:[#allocation45_spill] sm:$0xff] }
 0x171   : > { %1173 = vmatprep.subr.bf16.mxu1 %v4645_v40  ;;  %1109 = vmatprep.subr.bf16.mxu0 %v5140_v60 }
 0x206   : > { %v466_v59 = vpop.f32.mrb[0].mxu0  ;;  %v507_v11 = vpop.f32.mrb[0].mxu1 }
 0x207   : > { %v467_v1 = vadd.f32 %v466_v59, %v5147_v58  ;;  %v468_v13 = vpop.f32.mrb[1].mxu0  ;;  %v3683_v40 = vpop.f32.mrb[1].mxu1 }
 0x208   : > { %v470_v51 = vpop.f32.mrb[2].mxu0  ;;  %v510_v60 = vpop.f32.mrb[2].mxu1  ;;  %v469_v43 = vadd.f32 %v468_v13, %v5151_v46 }
 0x209   : > { %v3438_v3 = vmul.f32 -1.442695, %v467_v1  ;;  %v471_v47 = vpop.f32.mrb[3].mxu0  ;;  %v3684_v4 = vpop.f32.mrb[3].mxu1  ;;  %v508_v60 = vadd.f32 %v507_v11, %v5157_v57  ;;  %v7469_v1 = vld [vmem:[#allocation145_spill] sm:$0xff] }
 0x20a   : > { %v3439_v55 = vmul.f32 -1.442695, %v469_v43 }
 0x20b   : > { %3925 = vpow2.f32 %v3438_v3 }
 0x20c   : > { %3927 = vpow2.f32 %v3439_v55 }
 0x215   : > { %v3926_v18 = vpop.eup %3925 }
 0x216   : > { %v519_v39 = vadd.f32 1.0, %v3926_v18  ;;  %v3928_v20 = vpop.eup %3927 }
 0x217   : > { %v520_v59 = vadd.f32 1.0, %v3928_v20  ;;  %v7470_v20 = vld [vmem:[#allocation27_spill] sm:$0xff] }
 0x218   : > { %3929 = vrcp.f32 %v519_v39  ;;  %v7471_v39 = vld [vmem:[#allocation24_spill] sm:$0xff] }
 0x219   : > { %3931 = vrcp.f32 %v520_v59  ;;  %v5171_v11 = vcombine.high %v7471_v39, %v7470_v20  ;;  %v5178_v55 = vcombine.low %v7471_v39, %v7470_v20  ;;  %v7472_v59 = vld [vmem:[#allocation33_spill] sm:$0xff]  ;;  %v7478_v20 = vld [vmem:[#allocation42_spill] sm:$0xff] }
 0x21a   : > { %v5208_v39 = vcombine.high %v7478_v20, %v7477_v7 }
 0x222   : > { %v3930_v40 = vpop.eup %3929 }
 0x223   : > { %v531_v51 = vmul.f32 %v3930_v40, %v7469_v1  ;;  %v3932_v3 = vpop.eup %3931  ;;  %v7473_v40 = vld [vmem:[#allocation30_spill] sm:$0xff] }
 0x224   : > { %v534_v13 = vsub.f32 1.0, %v3932_v3  ;;  %v7475_v3 = vld [vmem:[#allocation39_spill] sm:$0xff] }
 0x225   : > { %v532_v4 = vadd.f32 %v531_v51, %v508_v60  ;;  %v5183_v60 = vcombine.high %v7473_v40, %v7472_v59  ;;  %v7474_v51 = vmov 0  }
 0x227   : > { %3933 = vtanh.f32 %v532_v4  ;;  %v5191_v4 = vcombine.low %v7473_v40, %v7472_v59  ;;  %v5215_v40 = vcombine.low %v7478_v20, %v7477_v7  ;;  %v7483_v7 = vld [vmem:[#allocation57_spill] sm:$0xff]  ;;  %v7484_v20 = vld [vmem:[#allocation54_spill] sm:$0xff] }
 0x228   : > { %v5232_v62 = vcombine.high %v7484_v20, %v7483_v7 }
 0x229   : > { %7479 = vst [vmem:[#allocation237_spill] sm:$0xff] %v5215_v40 }
 0x231   : > { %v3934_v43 = vpop.eup %3933 }
 0x232   : > { %v5161_v47 = vmul.f32 %v3934_v43, %v534_v13  ;;  %v7476_v13 = vld [vmem:[#allocation36_spill] sm:$0xff] }
 0x233   : > { %v5196_v43 = vcombine.high %v7476_v13, %v7475_v3 }
 0x234   : > { %v546_v18 = vpack.c.bf16 %v5161_v47, %v5161_v47 }
 0x236   : > { %1059 = vmatprep.mubr.bf16.mxu0 %v546_v18  ;;  %1100 = vmatprep.mubr.bf16.mxu1 %v546_v18 }
 0x237   : > { %1060 = vmatmul.mubr.bf16.vlgmr.msra.gmra.mrb[4].mxu0 %v4832_v61  ;;  %1101 = vmatmul.mubr.bf16.vlgmr.msra.gmra.mrb[4].mxu1 %v4832_v61 }
 0x238   : > { %1110 = vmatpush1.bf16.msra.mxu0 %v5167_v15  ;;  %1141 = vmatprep.mubr.bf16.mxu0 %v546_v18  ;;  %v5203_v18 = vcombine.low %v7476_v13, %v7475_v3  ;;  %v7480_v3 = vld [vmem:[#allocation51_spill] sm:$0xff]  ;;  %v7481_v13 = vld [vmem:[#allocation48_spill] sm:$0xff] }
 0x239   : > { %1111 = vmatprep.subr.bf16.mxu0 %v5171_v11  ;;  %1174 = vmatpush1.bf16.msra.mxu1 %v4649_v44  ;;  %v5220_v49 = vcombine.high %v7481_v13, %v7480_v3  ;;  %v5227_v59 = vcombine.low %v7481_v13, %v7480_v3  ;;  %v7486_v3 = vld [vmem:[#allocation63_spill] sm:$0xff]  ;;  %v7487_v13 = vld [vmem:[#allocation60_spill] sm:$0xff] }
 0x23a   : > { %1175 = vmatprep.subr.bf16.mxu1 %v4661_v41  ;;  %1205 = vmatprep.mubr.bf16.mxu1 %v7474_v51 }
 0x23b   : > { %7482 = vst [vmem:[#allocation238_spill] sm:$0xff] %v5227_v59 }
 0x23c   : > { %1112 = vmatpush1.bf16.msra.mxu0 %v5178_v55 }
 0x23d   : > { %1113 = vmatprep.subr.bf16.mxu0 %v5183_v60  ;;  %1176 = vmatpush1.bf16.msra.mxu1 %v4666_v24 }
 0x23e   : > { %1177 = vmatprep.subr.bf16.mxu1 %v4677_v42 }
 0x240   : > { %1114 = vmatpush1.bf16.msra.mxu0 %v5191_v4 }
 0x241   : > { %1115 = vmatprep.subr.bf16.mxu0 %v5196_v43  ;;  %1178 = vmatpush1.bf16.msra.mxu1 %v4682_v12 }
 0x242   : > { %1179 = vmatprep.subr.bf16.mxu1 %v4693_v21 }
 0x244   : > { %1116 = vmatpush1.bf16.msra.mxu0 %v5203_v18 }
 0x245   : > { %1117 = vmatprep.subr.bf16.mxu0 %v5208_v39  ;;  %1180 = vmatpush1.bf16.msra.mxu1 %v4698_v9 }
 0x246   : > { %1181 = vmatprep.subr.bf16.mxu1 %v4709_v30  ;;  %v5239_v30 = vcombine.low %v7484_v20, %v7483_v7  ;;  %v7489_v7 = vld [vmem:[#allocation69_spill] sm:$0xff]  ;;  %v7490_v20 = vld [vmem:[#allocation66_spill] sm:$0xff] }
 0x248   : > { %1118 = vmatpush1.bf16.msra.mxu0 %v5215_v40  ;;  %7485 = vst [vmem:[#allocation239_spill] sm:$0xff] %v5239_v30  ;;  %v5244_v40 = vcombine.high %v7487_v13, %v7486_v3 }
 0x249   : > { %1119 = vmatprep.subr.bf16.mxu0 %v5220_v49  ;;  %1182 = vmatpush1.bf16.msra.mxu1 %v4714_v27 }
 0x24a   : > { %1183 = vmatprep.subr.bf16.mxu1 %v4723_v36  ;;  %v5251_v36 = vcombine.low %v7487_v13, %v7486_v3  ;;  %v7493_v3 = vld [vmem:[#allocation75_spill] sm:$0xff]  ;;  %v7494_v13 = vld [vmem:[#allocation72_spill] sm:$0xff] }
 0x24c   : > { %1120 = vmatpush1.bf16.msra.mxu0 %v5227_v59  ;;  %7488 = vst [vmem:[#allocation240_spill] sm:$0xff] %v5251_v36  ;;  %v5256_v59 = vcombine.high %v7490_v20, %v7489_v7 }
 0x24d   : > { %1121 = vmatprep.subr.bf16.mxu0 %v5232_v62  ;;  %1184 = vmatpush1.bf16.msra.mxu1 %v4729_v35 }
 0x24e   : > { %1185 = vmatprep.subr.bf16.mxu1 %v4739_v45  ;;  %7491 = vst [vmem:[#allocation241_spill] sm:$0xff] %v5256_v59  ;;  %v5263_v45 = vcombine.low %v7490_v20, %v7489_v7  ;;  %v7497_v7 = vld [vmem:[#allocation81_spill] sm:$0xff]  ;;  %v7498_v20 = vld [vmem:[#allocation78_spill] sm:$0xff] }
 0x250   : > { %1122 = vmatpush1.bf16.msra.mxu0 %v5239_v30  ;;  %7492 = vst [vmem:[#allocation242_spill] sm:$0xff] %v5263_v45  ;;  %v5268_v30 = vcombine.high %v7494_v13, %v7493_v3 }
 0x251   : > { %1123 = vmatprep.subr.bf16.mxu0 %v5244_v40  ;;  %1186 = vmatpush1.bf16.msra.mxu1 %v4747_v48 }
 0x252   : > { %1187 = vmatprep.subr.bf16.mxu1 %v4757_v54  ;;  %7495 = vst [vmem:[#allocation243_spill] sm:$0xff] %v5268_v30  ;;  %v5275_v54 = vcombine.low %v7494_v13, %v7493_v3  ;;  %v7505_v13 = vld [vmem:[#allocation93_spill] sm:$0xff] }
 0x254   : > { %1124 = vmatpush1.bf16.msra.mxu0 %v5251_v36  ;;  %7496 = vst [vmem:[#allocation244_spill] sm:$0xff] %v5275_v54  ;;  %v5280_v36 = vcombine.high %v7498_v20, %v7497_v7 }
 0x255   : > { %1125 = vmatprep.subr.bf16.mxu0 %v5256_v59  ;;  %1188 = vmatpush1.bf16.msra.mxu1 %v4763_v56  ;;  %v5285_v59 = vcombine.low %v7498_v20, %v7497_v7  ;;  %v7501_v56 = vld [vmem:[#allocation87_spill] sm:$0xff] }
 0x256   : > { %3685 = vmatprep.subr.bf16.mxu1 %v7340_v0  ;;  %7499 = vst [vmem:[#allocation245_spill] sm:$0xff] %v5280_v36  ;;  %v7509_v20 = vld [vmem:[#allocation99_spill] sm:$0xff] }
 0x257   : > { %7500 = vst [vmem:[#allocation246_spill] sm:$0xff] %v5285_v59 }
 0x258   : > { %1126 = vmatpush1.bf16.msra.mxu0 %v5263_v45  ;;  %v7502_v45 = vld [vmem:[#allocation84_spill] sm:$0xff] }
 0x259   : > { %1127 = vmatprep.subr.bf16.mxu0 %v5268_v30  ;;  %v5290_v48 = vcombine.high %v7502_v45, %v7501_v56  ;;  %v5295_v3 = vcombine.low %v7502_v45, %v7501_v56  ;;  %v7513_v56 = vld [vmem:[#allocation105_spill] sm:$0xff] }
 0x25b   : > { %7503 = vst [vmem:[#allocation247_spill] sm:$0xff] %v5290_v48  ;;  %7504 = vst [vmem:[#allocation248_spill] sm:$0xff] %v5295_v3 }
 0x25c   : > { %1128 = vmatpush1.bf16.msra.mxu0 %v5275_v54  ;;  %v7506_v54 = vld [vmem:[#allocation90_spill] sm:$0xff] }
 0x25d   : > { %1129 = vmatprep.subr.bf16.mxu0 %v5280_v36  ;;  %v5300_v30 = vcombine.high %v7506_v54, %v7505_v13  ;;  %v5305_v7 = vcombine.low %v7506_v54, %v7505_v13  ;;  %v7517_v54 = vld [vmem:[#allocation111_spill] sm:$0xff] }
 0x25f   : > { %7507 = vst [vmem:[#allocation249_spill] sm:$0xff] %v5300_v30  ;;  %7508 = vst [vmem:[#allocation250_spill] sm:$0xff] %v5305_v7 }
 0x260   : > { %1130 = vmatpush1.bf16.msra.mxu0 %v5285_v59  ;;  %v7510_v59 = vld [vmem:[#allocation96_spill] sm:$0xff] }
 0x261   : > { %1131 = vmatprep.subr.bf16.mxu0 %v5290_v48  ;;  %v5310_v36 = vcombine.high %v7510_v59, %v7509_v20  ;;  %v5315_v45 = vcombine.low %v7510_v59, %v7509_v20  ;;  %v7526_v59 = vld [vmem:[#allocation231_spill] sm:$0xff] }
 0x263   : > { %7511 = vst [vmem:[#allocation251_spill] sm:$0xff] %v5310_v36  ;;  %7512 = vst [vmem:[#allocation252_spill] sm:$0xff] %v5315_v45 }
 0x264   : > { %1132 = vmatpush1.bf16.msra.mxu0 %v5295_v3  ;;  %v7514_v3 = vld [vmem:[#allocation102_spill] sm:$0xff] }
 0x265   : > { %1133 = vmatprep.subr.bf16.mxu0 %v5300_v30  ;;  %v5320_v48 = vcombine.high %v7514_v3, %v7513_v56  ;;  %v5325_v13 = vcombine.low %v7514_v3, %v7513_v56  ;;  %v7522_v3 = vld [vmem:[#allocation223_spill] sm:$0xff]  ;;  %v7525_v56 = vld [vmem:[#allocation229_spill] sm:$0xff] }
 0x267   : > { %7515 = vst [vmem:[#allocation253_spill] sm:$0xff] %v5320_v48  ;;  %7516 = vst [vmem:[#allocation254_spill] sm:$0xff] %v5325_v13 }
 0x268   : > { %1134 = vmatpush1.bf16.msra.mxu0 %v5305_v7  ;;  %v7518_v7 = vld [vmem:[#allocation108_spill] sm:$0xff] }
 0x269   : > { %1135 = vmatprep.subr.bf16.mxu0 %v5310_v36  ;;  %v5330_v30 = vcombine.high %v7518_v7, %v7517_v54  ;;  %v5335_v20 = vcombine.low %v7518_v7, %v7517_v54  ;;  %v7523_v7 = vld [vmem:[#allocation225_spill] sm:$0xff]  ;;  %v7524_v54 = vld [vmem:[#allocation227_spill] sm:$0xff] }
 0x26b   : > { %7519 = vst [vmem:[#allocation255_spill] sm:$0xff] %v5330_v30  ;;  %7520 = vst [vmem:[#allocation256_spill] sm:$0xff] %v5335_v20 }
 0x26c   : > { %1136 = vmatpush1.bf16.msra.mxu0 %v5315_v45 }
 0x26d   : > { %1137 = vmatprep.subr.bf16.mxu0 %v5320_v48 }
 0x270   : > { %1138 = vmatpush1.bf16.msra.mxu0 %v5325_v13 }
 0x271   : > { %1139 = vmatprep.subr.bf16.mxu0 %v5330_v30 }
 0x274   : > { %1140 = vmatpush1.bf16.msra.mxu0 %v5335_v20 }
 0x275   : > { %1287 = vmatprep.subr.bf16.mxu0 %v4775_v53 }
 0x277   : > { %1142 = vmatmul.mubr.bf16.vlgmr.msra.gmra.mrb[8].mxu0 %v4832_v61  ;;  %v7521_v61 = vld [vmem:[#allocation220_spill] sm:$0xff] }
 0x278   : > { %1288 = vmatpush1.bf16.msra.mxu0 %v4824_v2 }
 0x279   : > { %1289 = vmatprep.subr.bf16.mxu0 %v4836_v50 }
 0x27c   : > { %1290 = vmatpush1.bf16.msra.mxu0 %v4848_v52 }
 0x27d   : > { %1291 = vmatprep.subr.bf16.mxu0 %v4858_v33 }
 0x280   : > { %1292 = vmatpush1.bf16.msra.mxu0 %v4868_v6 }
 0x281   : > { %1293 = vmatprep.subr.bf16.mxu0 %v4878_v63 }
 0x284   : > { %1294 = vmatpush1.bf16.msra.mxu0 %v4888_v5 }
 0x285   : > { %1295 = vmatprep.subr.bf16.mxu0 %v4900_v8  ;;  %v7535_v8 = vld [vmem:[#allocation171_spill] sm:$0xff] }
 0x288   : > { %1296 = vmatpush1.bf16.msra.mxu0 %v4904_v10 }
 0x289   : > { %1297 = vmatprep.subr.bf16.mxu0 %v4920_v14 }
 0x28c   : > { %1298 = vmatpush1.bf16.msra.mxu0 %v4924_v16 }
 0x28d   : > { %1299 = vmatprep.subr.bf16.mxu0 %v4940_v25 }
 0x290   : > { %1300 = vmatpush1.bf16.msra.mxu0 %v4944_v26 }
 0x291   : > { %1301 = vmatprep.subr.bf16.mxu0 %v4960_v22 }
 0x294   : > { %1302 = vmatpush1.bf16.msra.mxu0 %v4964_v23 }
 0x295   : > { %1303 = vmatprep.subr.bf16.mxu0 %v4980_v32 }
 0x298   : > { %1304 = vmatpush1.bf16.msra.mxu0 %v4984_v34 }
 0x299   : > { %1305 = vmatprep.subr.bf16.mxu0 %v5000_v17 }
 0x29c   : > { %1306 = vmatpush1.bf16.msra.mxu0 %v5004_v29 }
 0x29d   : > { %1307 = vmatprep.subr.bf16.mxu0 %v5020_v28  ;;  %v7527_v28 = vld [vmem:[#allocation233_spill] sm:$0xff] }
 0x2a0   : > { %1308 = vmatpush1.bf16.msra.mxu0 %v5024_v38  ;;  %v7528_v38 = vld [vmem:[#allocation235_spill] sm:$0xff] }
 0x2a1   : > { %1309 = vmatprep.subr.bf16.mxu0 %v5040_v31  ;;  %v538_v31 = vpop.permute.xlu0 %537 }
 0x2a4   : > { %1310 = vmatpush1.bf16.msra.mxu0 %v5044_v37  ;;  %v7529_v37 = vld [vmem:[#allocation166_spill] sm:$0xff] }
 0x2a5   : > { %1311 = vmatprep.subr.bf16.mxu0 %v5060_v19  ;;  %v540_v29 = vmul.f32 %v538_v31, %v7529_v37  ;;  %v7530_v19 = vld [vmem:[#allocation167_spill] sm:$0xff] }
 0x2a6   : > { %v541_v17 = vmul.f32 %v538_v31, %v7530_v19 }
 0x2a8   : > { %1312 = vmatpush1.bf16.msra.mxu0 %v7521_v61  ;;  %v7531_v61 = vld [vmem:[#allocation168_spill] sm:$0xff] }
 0x2a9   : > { %1313 = vmatprep.subr.bf16.mxu0 %v7522_v3  ;;  %v543_v34 = vadd.f32 %v540_v29, %v7531_v61  ;;  %v7533_v61 = vld [vmem:[#allocation170_spill] sm:$0xff] }
 0x2aa   : > { %v542_v10 = vmul.f32 %v538_v31, %v7533_v61 }
 0x2ac   : > { %1314 = vmatpush1.bf16.msra.mxu0 %v7523_v7  ;;  %v7532_v7 = vld [vmem:[#allocation169_spill] sm:$0xff] }
 0x2ad   : > { %1315 = vmatprep.subr.bf16.mxu0 %v7524_v54  ;;  %v544_v23 = vadd.f32 %v541_v17, %v7532_v7 }
 0x2b0   : > { %1316 = vmatpush1.bf16.msra.mxu0 %v7525_v56 }
 0x2b1   : > { %1317 = vmatprep.subr.bf16.mxu0 %v7526_v59 }
 0x2b4   : > { %1318 = vmatpush1.bf16.msra.mxu0 %v7527_v28 }
 0x2b5   : > { %1369 = vmatprep.subr.bf16.mxu0 %v7528_v38 }
 0x30a   : > { %v1061_v3 = vpop.f32.mrb[4].mxu0  ;;  %v1102_v32 = vpop.f32.mrb[4].mxu1 }
 0x30b   : > { %v1150_v54 = vadd.f32 %v1061_v3, %v543_v34  ;;  %v1063_v22 = vpop.f32.mrb[5].mxu0  ;;  %v5377_v56 = vpop.f32.mrb[5].mxu1  ;;  %v7534_v34 = vld [vmem:[#allocation15_spill] sm:$0xff] }
 0x30c   : > { %v1065_v59 = vpop.f32.mrb[6].mxu0  ;;  %v1106_v26 = vpop.f32.mrb[6].mxu1  ;;  %v1151_v16 = vadd.f32 %v1063_v22, %v544_v23  ;;  %v1164_v3 = vadd.f32 %v7534_v34, %v1102_v32  ;;  %v7537_v32 = vld [vmem:[#allocation150_spill] sm:$0xff] }
 0x30d   : > { %v3537_v28 = vmul.f32 -1.442695, %v1150_v54  ;;  %v1066_v25 = vpop.f32.mrb[7].mxu0  ;;  %v1107_v38 = vpop.f32.mrb[7].mxu1  ;;  %v545_v59 = vadd.f32 %v542_v10, %v7535_v8  ;;  %v7539_v10 = vld [vmem:[#allocation152_spill] sm:$0xff] }
 0x30e   : > { %v3538_v37 = vmul.f32 -1.442695, %v1151_v16  ;;  %v7540_v38 = vld [vmem:[#allocation153_spill] sm:$0xff] }
 0x30f   : > { %3935 = vpow2.f32 %v3537_v28  ;;  %v7536_v28 = vld [vmem:[#allocation172_spill] sm:$0xff] }
 0x310   : > { %3937 = vpow2.f32 %v3538_v37 }
 0x319   : > { %v3936_v19 = vpop.eup %3935 }
 0x31a   : > { %v1158_v14 = vadd.f32 1.0, %v3936_v19  ;;  %v3938_v29 = vpop.eup %3937 }
 0x31b   : > { %v1159_v17 = vadd.f32 1.0, %v3938_v29 }
 0x31c   : > { %3939 = vrcp.f32 %v1158_v14 }
 0x31d   : > { %3941 = vrcp.f32 %v1159_v17 }
 0x326   : > { %v3940_v7 = vpop.eup %3939 }
 0x327   : > { %v1165_v26 = vmul.f32 %v3940_v7, %v1164_v3  ;;  %v3942_v22 = vpop.eup %3941  ;;  %v7538_v7 = vld [vmem:[#allocation151_spill] sm:$0xff] }
 0x328   : > { %v1168_v23 = vsub.f32 1.0, %v3942_v22  ;;  %v1170_v37 = vmul.f32 %v3942_v22, %v7536_v28  ;;  %v7544_v22 = vld [vmem:[#allocation163_spill] sm:$0xff]  ;;  %v7547_v28 = vld [vmem:[#allocation176_spill] sm:$0xff] }
 0x329   : > { %v1166_v25 = vadd.f32 %v1165_v26, %v545_v59  ;;  %v7541_v59 = vld [vmem:[#allocation155_spill] sm:$0xff]  ;;  %v7542_v26 = vld [vmem:[#allocation157_spill] sm:$0xff] }
 0x32b   : > { %3943 = vtanh.f32 %v1166_v25  ;;  %v7543_v25 = vld [vmem:[#allocation160_spill] sm:$0xff] }
 0x335   : > { %v3944_v16 = vpop.eup %3943 }
 0x336   : > { %v1169_v19 = vmul.f32 %v3944_v16, %v1168_v23  ;;  %v7545_v23 = vld [vmem:[#allocation165_spill] sm:$0xff]  ;;  %v7546_v16 = vld [vmem:[#allocation174_spill] sm:$0xff] }
 0x338   : > { %v5383_v14 = vadd.f32 %v1170_v37, %v1169_v19  ;;  %v7548_v37 = vld [vmem:[#allocation178_spill] sm:$0xff]  ;;  %v7549_v19 = vld [vmem:[#allocation180_spill] sm:$0xff] }
 0x33a   : > { %v5387_v31 = vpack.c.bf16 %v5383_v14, %v5383_v14 }
 0x33c   : > { %1206 = vmatmul.mubr.bf16.vlgmr.msra.gmra.mrb[8].mxu1 %v5387_v31 }
 0x33d   : > { %3686 = vmatpush3.bf16.msra.mxu1 %v7537_v32  ;;  %3701 = vmatprep.mubr.msk.bf16.mxu1 %vm4234_vm0, %v7340_v0 }
 0x33e   : > { %3687 = vmatprep.subr.bf16.mxu1 %v7340_v0 }
 0x341   : > { %3688 = vmatpush3.bf16.msra.mxu1 %v7538_v7 }
 0x342   : > { %3689 = vmatprep.subr.bf16.mxu1 %v7340_v0 }
 0x345   : > { %3690 = vmatpush3.bf16.msra.mxu1 %v7539_v10 }
 0x346   : > { %3691 = vmatprep.subr.bf16.mxu1 %v7340_v0 }
 0x349   : > { %3692 = vmatpush3.bf16.msra.mxu1 %v7540_v38 }
 0x34a   : > { %v1143_v54 = vpop.f32.mrb[8].mxu0  ;;  %3693 = vmatprep.subr.bf16.mxu1 %v7340_v0 }
 0x34b   : > { %v5400_v29 = vpop.f32.mrb[9].mxu0 }
 0x34c   : > { %v1147_v17 = vpop.f32.mrb[10].mxu0 }
 0x34d   : > { %v1148_v3 = vpop.f32.mrb[11].mxu0  ;;  %3694 = vmatpush3.bf16.msra.mxu1 %v7541_v59  ;;  %v7550_v17 = vld [vmem:[#allocation182_spill] sm:$0xff] }
 0x34e   : > { %3695 = vmatprep.subr.bf16.mxu1 %v7340_v0  ;;  %v7551_v3 = vld [vmem:[#allocation184_spill] sm:$0xff]  ;;  %v7556_v59 = vld [vmem:[#allocation194_spill] sm:$0xff] }
 0x351   : > { %3696 = vmatpush3.bf16.msra.mxu1 %v7542_v26  ;;  %v7553_v26 = vld [vmem:[#allocation189_spill] sm:$0xff] }
 0x352   : > { %3697 = vmatprep.subr.bf16.mxu1 %v7340_v0 }
 0x355   : > { %3698 = vmatpush3.bf16.msra.mxu1 %v7543_v25  ;;  %v7552_v25 = vld [vmem:[#allocation186_spill] sm:$0xff] }
 0x356   : > { %3699 = vmatprep.subr.bf16.mxu1 %v7340_v0 }
 0x359   : > { %3700 = vmatpush3.bf16.msra.mxu1 %v7544_v22  ;;  %v7554_v22 = vld [vmem:[#allocation190_spill] sm:$0xff] }
 0x35a   : > { %1328 = vmatprep.subr.bf16.mxu1 %v7545_v23  ;;  %v7555_v23 = vld [vmem:[#allocation193_spill] sm:$0xff] }
 0x35c   : > { %3702 = vmatmul.mubr.bf16.vlgmr.msra.gmra.mrb[12].mxu1 %v5387_v31 }
 0x35d   : > { %1329 = vmatpush1.bf16.msra.mxu1 %v7546_v16  ;;  %v7557_v16 = vld [vmem:[#allocation197_spill] sm:$0xff] }
 0x35e   : > { %1330 = vmatprep.subr.bf16.mxu1 %v7547_v28  ;;  %v7558_v28 = vld [vmem:[#allocation198_spill] sm:$0xff] }
 0x361   : > { %1331 = vmatpush1.bf16.msra.mxu1 %v7548_v37  ;;  %v7559_v37 = vld [vmem:[#allocation201_spill] sm:$0xff] }
 0x362   : > { %1332 = vmatprep.subr.bf16.mxu1 %v7549_v19  ;;  %v7560_v19 = vld [vmem:[#allocation202_spill] sm:$0xff] }
 0x365   : > { %1333 = vmatpush1.bf16.msra.mxu1 %v7550_v17  ;;  %v7561_v17 = vld [vmem:[#allocation205_spill] sm:$0xff] }
 0x366   : > { %1334 = vmatprep.subr.bf16.mxu1 %v7551_v3  ;;  %v7562_v3 = vld [vmem:[#allocation206_spill] sm:$0xff] }
 0x369   : > { %1335 = vmatpush1.bf16.msra.mxu1 %v7552_v25  ;;  %v7563_v25 = vld [vmem:[#allocation209_spill] sm:$0xff] }
 0x36a   : > { %1336 = vmatprep.subr.bf16.mxu1 %v7553_v26  ;;  %v7564_v26 = vld [vmem:[#allocation210_spill] sm:$0xff] }
 0x36d   : > { %1337 = vmatpush1.bf16.msra.mxu1 %v7554_v22  ;;  %v7565_v22 = vld [vmem:[#allocation213_spill] sm:$0xff] }
 0x36e   : > { %1338 = vmatprep.subr.bf16.mxu1 %v7555_v23  ;;  %v7566_v23 = vld [vmem:[#allocation214_spill] sm:$0xff] }
 0x371   : > { %1339 = vmatpush1.bf16.msra.mxu1 %v7556_v59  ;;  %v7567_v59 = vld [vmem:[#allocation217_spill] sm:$0xff] }
 0x372   : > { %1340 = vmatprep.subr.bf16.mxu1 %v7557_v16  ;;  %v7568_v16 = vld [vmem:[#allocation218_spill] sm:$0xff] }
 0x375   : > { %1341 = vmatpush1.bf16.msra.mxu1 %v7558_v28  ;;  %v7569_v28 = vld [vmem:[#allocation221_spill] sm:$0xff] }
 0x376   : > { %1342 = vmatprep.subr.bf16.mxu1 %v7559_v37  ;;  %v7570_v37 = vld [vmem:[#allocation222_spill] sm:$0xff] }
 0x379   : > { %1343 = vmatpush1.bf16.msra.mxu1 %v7560_v19  ;;  %v7571_v19 = vld [vmem:[#allocation224_spill] sm:$0xff] }
 0x37a   : > { %1344 = vmatprep.subr.bf16.mxu1 %v7561_v17  ;;  %v7572_v17 = vld [vmem:[#allocation226_spill] sm:$0xff] }
 0x37d   : > { %1345 = vmatpush1.bf16.msra.mxu1 %v7562_v3  ;;  %v7573_v3 = vld [vmem:[#allocation228_spill] sm:$0xff] }
 0x37e   : > { %1346 = vmatprep.subr.bf16.mxu1 %v7563_v25  ;;  %v7574_v25 = vld [vmem:[#allocation230_spill] sm:$0xff] }
 0x381   : > { %1347 = vmatpush1.bf16.msra.mxu1 %v7564_v26  ;;  %v7575_v26 = vld [vmem:[#allocation232_spill] sm:$0xff] }
 0x382   : > { %1348 = vmatprep.subr.bf16.mxu1 %v7565_v22  ;;  %v7576_v22 = vld [vmem:[#allocation234_spill] sm:$0xff] }
 0x385   : > { %1349 = vmatpush1.bf16.msra.mxu1 %v7566_v23  ;;  %v7577_v23 = vld [vmem:[#allocation149_spill] sm:$0xff] }
 0x386   : > { %1350 = vmatprep.subr.bf16.mxu1 %v7567_v59  ;;  %v4236_v59 = vmov 2  }
 0x387   : > { %3906 = vset.pattern.permute.xlu1 %v4236_v59 }
 0x389   : > { %1351 = vmatpush1.bf16.msra.mxu1 %v7568_v16  ;;  %v7578_v16 = vld [vmem:[#allocation148_spill] sm:$0xff] }
 0x38a   : > { %1352 = vmatprep.subr.bf16.mxu1 %v7569_v28  ;;  %1277 = vperm.xlu1 %3906, %v7578_v16   ;;  %v1268_v16 = vadd.f32 %v7469_v1, %v5400_v29  ;;  %v7581_v29 = vld [vmem:[#allocation156_spill] sm:$0xff] }
 0x38d   : > { %1353 = vmatpush1.bf16.msra.mxu1 %v7570_v37 }
 0x38e   : > { %1354 = vmatprep.subr.bf16.mxu1 %v7571_v19 }
 0x391   : > { %1355 = vmatpush1.bf16.msra.mxu1 %v7572_v17 }
 0x392   : > { %1356 = vmatprep.subr.bf16.mxu1 %v7573_v3 }
 0x395   : > { %1357 = vmatpush1.bf16.msra.mxu1 %v7574_v25 }
 0x396   : > { %1358 = vmatprep.subr.bf16.mxu1 %v7575_v26 }
 0x399   : > { %1359 = vmatpush1.bf16.msra.mxu1 %v7576_v22 }
 0x39a   : > { %1433 = vmatprep.subr.bf16.mxu1 %v7577_v23 }
 0x40f   : > { %v1207_v28 = vpop.f32.mrb[8].mxu1 }
 0x410   : > { %v1208_v37 = vadd.f32 %v1207_v28, %v5147_v58  ;;  %v1209_v19 = vpop.f32.mrb[9].mxu1 }
 0x411   : > { %v1210_v17 = vadd.f32 %v1209_v19, %v5151_v46  ;;  %v1211_v38 = vpop.f32.mrb[10].mxu1 }
 0x412   : > { %v1254_v3 = vadd.f32 %v1208_v37, %v5377_v56  ;;  %v1212_v25 = vpop.f32.mrb[11].mxu1 }
 0x413   : > { %v1255_v10 = vadd.f32 %v1210_v17, %v1143_v54 }
 0x414   : > { %v3539_v26 = vmul.f32 -1.442695, %v1254_v3  ;;  %v7583_v3 = vld [vmem:[#allocation158_spill] sm:$0xff] }
 0x415   : > { %v3540_v22 = vmul.f32 -1.442695, %v1255_v10 }
 0x416   : > { %3945 = vpow2.f32 %v3539_v26 }
 0x417   : > { %3947 = vpow2.f32 %v3540_v22 }
 0x420   : > { %v3946_v23 = vpop.eup %3945 }
 0x421   : > { %v1262_v7 = vadd.f32 1.0, %v3946_v23  ;;  %v3948_v59 = vpop.eup %3947 }
 0x422   : > { %v1263_v28 = vadd.f32 1.0, %v3948_v59  ;;  %v7584_v59 = vld [vmem:[#allocation239_spill] sm:$0xff] }
 0x423   : > { %3949 = vrcp.f32 %v1262_v7 }
 0x424   : > { %3951 = vrcp.f32 %v1263_v28  ;;  %v7585_v28 = vld [vmem:[#allocation159_spill] sm:$0xff] }
 0x42d   : > { %v3950_v58 = vpop.eup %3949 }
 0x42e   : > { %v1269_v32 = vmul.f32 %v3950_v58, %v1268_v16  ;;  %v3952_v10 = vpop.eup %3951  ;;  %v7582_v16 = vld [vmem:[#allocation238_spill] sm:$0xff] }
 0x42f   : > { %v1248_v19 = vpop.f32.mrb[12].mxu1  ;;  %v1272_v22 = vsub.f32 1.0, %v3952_v10  ;;  %v1274_v37 = vmul.f32 %v3952_v10, %v5161_v47  ;;  %v7579_v47 = vld [vmem:[#allocation154_spill] sm:$0xff]  ;;  %v7592_v10 = vld [vmem:[#allocation244_spill] sm:$0xff] }
 0x430   : > { %v1249_v56 = vadd.f32 %v1248_v19, %v5157_v57  ;;  %v3703_v38 = vpop.f32.mrb[13].mxu1  ;;  %v7586_v19 = vld [vmem:[#allocation161_spill] sm:$0xff] }
 0x431   : > { %v1251_v54 = vpop.f32.mrb[14].mxu1  ;;  %v7588_v38 = vld [vmem:[#allocation241_spill] sm:$0xff] }
 0x432   : > { %v1270_v25 = vadd.f32 %v1269_v32, %v1249_v56  ;;  %v3704_v26 = vpop.f32.mrb[15].mxu1  ;;  %v7580_v32 = vld [vmem:[#allocation237_spill] sm:$0xff]  ;;  %v7587_v56 = vld [vmem:[#allocation240_spill] sm:$0xff]  ;;  %v7589_v54 = vld [vmem:[#allocation162_spill] sm:$0xff] }
 0x433   : > { %v7591_v26 = vld [vmem:[#allocation243_spill] sm:$0xff] }
 0x434   : > { %3953 = vtanh.f32 %v1270_v25  ;;  %v7590_v25 = vld [vmem:[#allocation242_spill] sm:$0xff] }
 0x43e   : > { %v3954_v23 = vpop.eup %3953 }
 0x43f   : > { %v1273_v7 = vmul.f32 %v3954_v23, %v1272_v22  ;;  %v7593_v22 = vld [vmem:[#allocation245_spill] sm:$0xff]  ;;  %v7594_v23 = vld [vmem:[#allocation246_spill] sm:$0xff] }
 0x441   : > { %v5451_v17 = vadd.f32 %v1274_v37, %v1273_v7  ;;  %v7595_v7 = vld [vmem:[#allocation247_spill] sm:$0xff]  ;;  %v7596_v37 = vld [vmem:[#allocation248_spill] sm:$0xff] }
 0x443   : > { %v1286_v58 = vpack.c.bf16 %v5451_v17, %v5451_v17 }
 0x445   : > { %1319 = vmatprep.mubr.bf16.mxu0 %v1286_v58  ;;  %1360 = vmatprep.mubr.bf16.mxu1 %v1286_v58 }
 0x446   : > { %1320 = vmatmul.mubr.bf16.vlgmr.msra.gmra.mrb[12].mxu0 %v5387_v31  ;;  %1361 = vmatmul.mubr.bf16.vlgmr.msra.gmra.mrb[16].mxu1 %v5387_v31 }
 0x447   : > { %1370 = vmatpush1.bf16.msra.mxu0 %v5167_v15  ;;  %1401 = vmatprep.mubr.bf16.mxu0 %v1286_v58  ;;  %v7597_v58 = vld [vmem:[#allocation249_spill] sm:$0xff] }
 0x448   : > { %1371 = vmatprep.subr.bf16.mxu0 %v5171_v11  ;;  %1434 = vmatpush1.bf16.msra.mxu1 %v4649_v44 }
 0x449   : > { %1435 = vmatprep.subr.bf16.mxu1 %v4661_v41  ;;  %1465 = vmatprep.mubr.bf16.mxu1 %v7474_v51 }
 0x44b   : > { %1372 = vmatpush1.bf16.msra.mxu0 %v5178_v55 }
 0x44c   : > { %1373 = vmatprep.subr.bf16.mxu0 %v5183_v60  ;;  %1436 = vmatpush1.bf16.msra.mxu1 %v4666_v24 }
 0x44d   : > { %1437 = vmatprep.subr.bf16.mxu1 %v4677_v42 }
 0x44f   : > { %1374 = vmatpush1.bf16.msra.mxu0 %v5191_v4 }
 0x450   : > { %1375 = vmatprep.subr.bf16.mxu0 %v5196_v43  ;;  %1438 = vmatpush1.bf16.msra.mxu1 %v4682_v12 }
 0x451   : > { %1439 = vmatprep.subr.bf16.mxu1 %v4693_v21 }
 0x453   : > { %1376 = vmatpush1.bf16.msra.mxu0 %v5203_v18 }
 0x454   : > { %1377 = vmatprep.subr.bf16.mxu0 %v5208_v39  ;;  %1440 = vmatpush1.bf16.msra.mxu1 %v4698_v9 }
 0x455   : > { %1441 = vmatprep.subr.bf16.mxu1 %v7579_v47 }
 0x457   : > { %1378 = vmatpush1.bf16.msra.mxu0 %v7580_v32 }
 0x458   : > { %1379 = vmatprep.subr.bf16.mxu0 %v5220_v49  ;;  %1442 = vmatpush1.bf16.msra.mxu1 %v4714_v27 }
 0x459   : > { %1443 = vmatprep.subr.bf16.mxu1 %v7581_v29 }
 0x45b   : > { %1380 = vmatpush1.bf16.msra.mxu0 %v7582_v16 }
 0x45c   : > { %1381 = vmatprep.subr.bf16.mxu0 %v5232_v62  ;;  %1444 = vmatpush1.bf16.msra.mxu1 %v4729_v35 }
 0x45d   : > { %1445 = vmatprep.subr.bf16.mxu1 %v7583_v3 }
 0x45f   : > { %1382 = vmatpush1.bf16.msra.mxu0 %v7584_v59 }
 0x460   : > { %1383 = vmatprep.subr.bf16.mxu0 %v5244_v40  ;;  %1446 = vmatpush1.bf16.msra.mxu1 %v7585_v28 }
 0x461   : > { %1447 = vmatprep.subr.bf16.mxu1 %v7586_v19 }
 0x463   : > { %1384 = vmatpush1.bf16.msra.mxu0 %v7587_v56 }
 0x464   : > { %1385 = vmatprep.subr.bf16.mxu0 %v7588_v38  ;;  %1448 = vmatpush1.bf16.msra.mxu1 %v7589_v54  ;;  %v7598_v38 = vld [vmem:[#allocation250_spill] sm:$0xff] }
 0x465   : > { %3705 = vmatprep.subr.bf16.mxu1 %v7340_v0 }
 0x467   : > { %1386 = vmatpush1.bf16.msra.mxu0 %v7590_v25 }
 0x468   : > { %1387 = vmatprep.subr.bf16.mxu0 %v7591_v26 }
 0x46b   : > { %1388 = vmatpush1.bf16.msra.mxu0 %v7592_v10 }
 0x46c   : > { %1389 = vmatprep.subr.bf16.mxu0 %v7593_v22 }
 0x46f   : > { %1390 = vmatpush1.bf16.msra.mxu0 %v7594_v23 }
 0x470   : > { %1391 = vmatprep.subr.bf16.mxu0 %v7595_v7 }
 0x473   : > { %1392 = vmatpush1.bf16.msra.mxu0 %v7596_v37 }
 0x474   : > { %1393 = vmatprep.subr.bf16.mxu0 %v7597_v58 }
 0x477   : > { %1394 = vmatpush1.bf16.msra.mxu0 %v7598_v38 }
 0x478   : > { %1395 = vmatprep.subr.bf16.mxu0 %v5310_v36 }
 0x47b   : > { %1396 = vmatpush1.bf16.msra.mxu0 %v5315_v45 }
 0x47c   : > { %1397 = vmatprep.subr.bf16.mxu0 %v5320_v48 }
 0x47f   : > { %1398 = vmatpush1.bf16.msra.mxu0 %v5325_v13 }
 0x480   : > { %1399 = vmatprep.subr.bf16.mxu0 %v5330_v30  ;;  %v7599_v30 = vld [vmem:[#allocation187_spill] sm:$0xff] }
 0x483   : > { %1400 = vmatpush1.bf16.msra.mxu0 %v5335_v20  ;;  %v7600_v20 = vld [vmem:[#allocation188_spill] sm:$0xff] }
 0x484   : > { %1547 = vmatprep.subr.bf16.mxu0 %v4775_v53  ;;  %v7601_v53 = vld [vmem:[#allocation191_spill] sm:$0xff] }
 0x486   : > { %1402 = vmatmul.mubr.bf16.vlgmr.msra.gmra.mrb[16].mxu0 %v5387_v31  ;;  %v7602_v31 = vld [vmem:[#allocation192_spill] sm:$0xff] }
 0x487   : > { %1548 = vmatpush1.bf16.msra.mxu0 %v4824_v2  ;;  %v7603_v2 = vld [vmem:[#allocation195_spill] sm:$0xff] }
 0x488   : > { %1549 = vmatprep.subr.bf16.mxu0 %v4836_v50  ;;  %v7604_v50 = vld [vmem:[#allocation196_spill] sm:$0xff] }
 0x48b   : > { %1550 = vmatpush1.bf16.msra.mxu0 %v4848_v52  ;;  %v7605_v52 = vld [vmem:[#allocation199_spill] sm:$0xff] }
 0x48c   : > { %1551 = vmatprep.subr.bf16.mxu0 %v4858_v33  ;;  %v7606_v33 = vld [vmem:[#allocation200_spill] sm:$0xff] }
 0x48f   : > { %1552 = vmatpush1.bf16.msra.mxu0 %v4868_v6  ;;  %v7607_v6 = vld [vmem:[#allocation203_spill] sm:$0xff] }
 0x490   : > { %1553 = vmatprep.subr.bf16.mxu0 %v4878_v63  ;;  %v7608_v63 = vld [vmem:[#allocation204_spill] sm:$0xff] }
 0x493   : > { %1554 = vmatpush1.bf16.msra.mxu0 %v4888_v5  ;;  %v7609_v5 = vld [vmem:[#allocation207_spill] sm:$0xff] }
 0x494   : > { %1555 = vmatprep.subr.bf16.mxu0 %v7599_v30  ;;  %v7610_v30 = vld [vmem:[#allocation208_spill] sm:$0xff] }
 0x497   : > { %1556 = vmatpush1.bf16.msra.mxu0 %v7600_v20  ;;  %v7611_v20 = vld [vmem:[#allocation211_spill] sm:$0xff] }
 0x498   : > { %1557 = vmatprep.subr.bf16.mxu0 %v7601_v53  ;;  %v7612_v53 = vld [vmem:[#allocation212_spill] sm:$0xff] }
 0x49b   : > { %1558 = vmatpush1.bf16.msra.mxu0 %v7602_v31  ;;  %v7613_v31 = vld [vmem:[#allocation215_spill] sm:$0xff] }
 0x49c   : > { %1559 = vmatprep.subr.bf16.mxu0 %v7603_v2  ;;  %v7614_v2 = vld [vmem:[#allocation216_spill] sm:$0xff] }
 0x49f   : > { %1560 = vmatpush1.bf16.msra.mxu0 %v7604_v50  ;;  %v7615_v50 = vld [vmem:[#allocation219_spill] sm:$0xff] }
 0x4a0   : > { %1561 = vmatprep.subr.bf16.mxu0 %v7605_v52  ;;  %v7616_v52 = vld [vmem:[#allocation220_spill] sm:$0xff] }
 0x4a3   : > { %1562 = vmatpush1.bf16.msra.mxu0 %v7606_v33  ;;  %v7617_v33 = vld [vmem:[#allocation223_spill] sm:$0xff] }
 0x4a4   : > { %1563 = vmatprep.subr.bf16.mxu0 %v7607_v6  ;;  %v7618_v6 = vld [vmem:[#allocation225_spill] sm:$0xff] }
 0x4a7   : > { %1564 = vmatpush1.bf16.msra.mxu0 %v7608_v63  ;;  %v7619_v63 = vld [vmem:[#allocation227_spill] sm:$0xff] }
 0x4a8   : > { %1565 = vmatprep.subr.bf16.mxu0 %v7609_v5  ;;  %v7620_v5 = vld [vmem:[#allocation229_spill] sm:$0xff] }
 0x4ab   : > { %1566 = vmatpush1.bf16.msra.mxu0 %v7610_v30  ;;  %v7621_v30 = vld [vmem:[#allocation231_spill] sm:$0xff] }
 0x4ac   : > { %1567 = vmatprep.subr.bf16.mxu0 %v7611_v20  ;;  %v7622_v20 = vld [vmem:[#allocation233_spill] sm:$0xff] }
 0x4af   : > { %1568 = vmatpush1.bf16.msra.mxu0 %v7612_v53  ;;  %v7623_v53 = vld [vmem:[#allocation235_spill] sm:$0xff] }
 0x4b0   : > { %1569 = vmatprep.subr.bf16.mxu0 %v7613_v31  ;;  %v1278_v31 = vpop.permute.xlu1 %1277 }
 0x4b3   : > { %1570 = vmatpush1.bf16.msra.mxu0 %v7614_v2  ;;  %v7624_v2 = vld [vmem:[#allocation166_spill] sm:$0xff] }
 0x4b4   : > { %1571 = vmatprep.subr.bf16.mxu0 %v7615_v50  ;;  %v1280_v13 = vmul.f32 %v1278_v31, %v7624_v2  ;;  %v7625_v50 = vld [vmem:[#allocation167_spill] sm:$0xff] }
 0x4b5   : > { %v1281_v48 = vmul.f32 %v1278_v31, %v7625_v50 }
 0x4b7   : > { %1572 = vmatpush1.bf16.msra.mxu0 %v7616_v52  ;;  %v7626_v52 = vld [vmem:[#allocation168_spill] sm:$0xff] }
 0x4b8   : > { %1573 = vmatprep.subr.bf16.mxu0 %v7617_v33  ;;  %v1283_v45 = vadd.f32 %v1280_v13, %v7626_v52  ;;  %v1282_v52 = vmul.f32 %v1278_v31, %v7533_v61 }
 0x4bb   : > { %1574 = vmatpush1.bf16.msra.mxu0 %v7618_v6  ;;  %v7627_v6 = vld [vmem:[#allocation169_spill] sm:$0xff] }
 0x4bc   : > { %1575 = vmatprep.subr.bf16.mxu0 %v7619_v63  ;;  %v1284_v38 = vadd.f32 %v1281_v48, %v7627_v6 }
 0x4bf   : > { %1576 = vmatpush1.bf16.msra.mxu0 %v7620_v5 }
 0x4c0   : > { %1577 = vmatprep.subr.bf16.mxu0 %v7621_v30 }
 0x4c3   : > { %1578 = vmatpush1.bf16.msra.mxu0 %v7622_v20 }
 0x4c4   : > { %1629 = vmatprep.subr.bf16.mxu0 %v7623_v53 }
 0x519   : > { %v1321_v33 = vpop.f32.mrb[12].mxu0  ;;  %v1362_v36 = vpop.f32.mrb[16].mxu1 }
 0x51a   : > { %v1410_v63 = vadd.f32 %v1321_v33, %v1283_v45  ;;  %v1323_v58 = vpop.f32.mrb[13].mxu0  ;;  %v5543_v5 = vpop.f32.mrb[17].mxu1  ;;  %v1424_v45 = vadd.f32 %v7534_v34, %v1362_v36  ;;  %v7628_v36 = vld [vmem:[#allocation150_spill] sm:$0xff] }
 0x51b   : > { %v1325_v30 = vpop.f32.mrb[14].mxu0  ;;  %v1366_v37 = vpop.f32.mrb[18].mxu1  ;;  %v1411_v23 = vadd.f32 %v1323_v58, %v1284_v38 }
 0x51c   : > { %v3541_v20 = vmul.f32 -1.442695, %v1410_v63  ;;  %v1326_v7 = vpop.f32.mrb[15].mxu0  ;;  %v1367_v53 = vpop.f32.mrb[19].mxu1  ;;  %v1285_v30 = vadd.f32 %v1282_v52, %v7535_v8  ;;  %v7629_v52 = vld [vmem:[#allocation151_spill] sm:$0xff] }
 0x51d   : > { %v3542_v2 = vmul.f32 -1.442695, %v1411_v23  ;;  %v7631_v7 = vld [vmem:[#allocation153_spill] sm:$0xff] }
 0x51e   : > { %3955 = vpow2.f32 %v3541_v20 }
 0x51f   : > { %3957 = vpow2.f32 %v3542_v2 }
 0x528   : > { %v3956_v50 = vpop.eup %3955 }
 0x529   : > { %v1418_v22 = vadd.f32 1.0, %v3956_v50  ;;  %v3958_v13 = vpop.eup %3957 }
 0x52a   : > { %v1419_v48 = vadd.f32 1.0, %v3958_v13 }
 0x52b   : > { %3959 = vrcp.f32 %v1418_v22 }
 0x52c   : > { %3961 = vrcp.f32 %v1419_v48 }
 0x535   : > { %v3960_v33 = vpop.eup %3959 }
 0x536   : > { %v1425_v37 = vmul.f32 %v3960_v33, %v1424_v45  ;;  %v3962_v53 = vpop.eup %3961  ;;  %v7632_v45 = vld [vmem:[#allocation155_spill] sm:$0xff]  ;;  %v7633_v33 = vld [vmem:[#allocation157_spill] sm:$0xff] }
 0x537   : > { %v1428_v20 = vsub.f32 1.0, %v3962_v53  ;;  %v1430_v2 = vmul.f32 %v3962_v53, %v5383_v14  ;;  %v7630_v14 = vld [vmem:[#allocation152_spill] sm:$0xff]  ;;  %v7637_v53 = vld [vmem:[#allocation174_spill] sm:$0xff] }
 0x538   : > { %v1426_v63 = vadd.f32 %v1425_v37, %v1285_v30  ;;  %v7634_v30 = vld [vmem:[#allocation160_spill] sm:$0xff]  ;;  %v7635_v37 = vld [vmem:[#allocation163_spill] sm:$0xff] }
 0x53a   : > { %3963 = vtanh.f32 %v1426_v63  ;;  %v7636_v63 = vld [vmem:[#allocation165_spill] sm:$0xff] }
 0x544   : > { %v3964_v38 = vpop.eup %3963 }
 0x545   : > { %v1429_v50 = vmul.f32 %v3964_v38, %v1428_v20  ;;  %v7638_v20 = vld [vmem:[#allocation176_spill] sm:$0xff]  ;;  %v7639_v38 = vld [vmem:[#allocation178_spill] sm:$0xff] }
 0x547   : > { %v5549_v22 = vadd.f32 %v1430_v2, %v1429_v50  ;;  %v7640_v2 = vld [vmem:[#allocation180_spill] sm:$0xff]  ;;  %v7641_v50 = vld [vmem:[#allocation182_spill] sm:$0xff] }
 0x549   : > { %v5553_v23 = vpack.c.bf16 %v5549_v22, %v5549_v22 }
 0x54b   : > { %1466 = vmatmul.mubr.bf16.vlgmr.msra.gmra.mrb[20].mxu1 %v5553_v23 }
 0x54c   : > { %3706 = vmatpush3.bf16.msra.mxu1 %v7628_v36  ;;  %3721 = vmatprep.mubr.msk.bf16.mxu1 %vm4234_vm0, %v7340_v0 }
 0x54d   : > { %3707 = vmatprep.subr.bf16.mxu1 %v7340_v0 }
 0x550   : > { %3708 = vmatpush3.bf16.msra.mxu1 %v7629_v52 }
 0x551   : > { %3709 = vmatprep.subr.bf16.mxu1 %v7340_v0 }
 0x554   : > { %3710 = vmatpush3.bf16.msra.mxu1 %v7630_v14 }
 0x555   : > { %3711 = vmatprep.subr.bf16.mxu1 %v7340_v0 }
 0x558   : > { %3712 = vmatpush3.bf16.msra.mxu1 %v7631_v7 }
 0x559   : > { %v1403_v58 = vpop.f32.mrb[16].mxu0  ;;  %3713 = vmatprep.subr.bf16.mxu1 %v7340_v0 }
 0x55a   : > { %v5566_v31 = vpop.f32.mrb[17].mxu0 }
 0x55b   : > { %v1407_v13 = vpop.f32.mrb[18].mxu0 }
 0x55c   : > { %v1408_v48 = vpop.f32.mrb[19].mxu0  ;;  %3714 = vmatpush3.bf16.msra.mxu1 %v7632_v45  ;;  %v7642_v13 = vld [vmem:[#allocation184_spill] sm:$0xff] }
 0x55d   : > { %3715 = vmatprep.subr.bf16.mxu1 %v7340_v0  ;;  %v7643_v48 = vld [vmem:[#allocation186_spill] sm:$0xff] }
 0x560   : > { %3716 = vmatpush3.bf16.msra.mxu1 %v7633_v33  ;;  %v7647_v33 = vld [vmem:[#allocation194_spill] sm:$0xff] }
 0x561   : > { %3717 = vmatprep.subr.bf16.mxu1 %v7340_v0 }
 0x564   : > { %3718 = vmatpush3.bf16.msra.mxu1 %v7634_v30  ;;  %v7644_v30 = vld [vmem:[#allocation189_spill] sm:$0xff] }
 0x565   : > { %3719 = vmatprep.subr.bf16.mxu1 %v7340_v0 }
 0x568   : > { %3720 = vmatpush3.bf16.msra.mxu1 %v7635_v37  ;;  %v7645_v37 = vld [vmem:[#allocation190_spill] sm:$0xff] }
 0x569   : > { %1588 = vmatprep.subr.bf16.mxu1 %v7636_v63  ;;  %v7646_v63 = vld [vmem:[#allocation193_spill] sm:$0xff] }
 0x56b   : > { %3722 = vmatmul.mubr.bf16.vlgmr.msra.gmra.mrb[24].mxu1 %v5553_v23 }
 0x56c   : > { %1589 = vmatpush1.bf16.msra.mxu1 %v7637_v53  ;;  %v7648_v53 = vld [vmem:[#allocation197_spill] sm:$0xff] }
 0x56d   : > { %1590 = vmatprep.subr.bf16.mxu1 %v7638_v20  ;;  %v7649_v20 = vld [vmem:[#allocation198_spill] sm:$0xff] }
 0x570   : > { %1591 = vmatpush1.bf16.msra.mxu1 %v7639_v38  ;;  %v7650_v38 = vld [vmem:[#allocation201_spill] sm:$0xff] }
 0x571   : > { %1592 = vmatprep.subr.bf16.mxu1 %v7640_v2  ;;  %v7651_v2 = vld [vmem:[#allocation202_spill] sm:$0xff] }
 0x574   : > { %1593 = vmatpush1.bf16.msra.mxu1 %v7641_v50  ;;  %v7652_v50 = vld [vmem:[#allocation205_spill] sm:$0xff] }
 0x575   : > { %1594 = vmatprep.subr.bf16.mxu1 %v7642_v13  ;;  %v7653_v13 = vld [vmem:[#allocation206_spill] sm:$0xff] }
 0x578   : > { %1595 = vmatpush1.bf16.msra.mxu1 %v7643_v48  ;;  %v7654_v48 = vld [vmem:[#allocation209_spill] sm:$0xff] }
 0x579   : > { %1596 = vmatprep.subr.bf16.mxu1 %v7644_v30  ;;  %v7655_v30 = vld [vmem:[#allocation210_spill] sm:$0xff] }
 0x57c   : > { %1597 = vmatpush1.bf16.msra.mxu1 %v7645_v37  ;;  %v7656_v37 = vld [vmem:[#allocation213_spill] sm:$0xff] }
 0x57d   : > { %1598 = vmatprep.subr.bf16.mxu1 %v7646_v63  ;;  %v7657_v63 = vld [vmem:[#allocation214_spill] sm:$0xff] }
 0x580   : > { %1599 = vmatpush1.bf16.msra.mxu1 %v7647_v33  ;;  %v7658_v33 = vld [vmem:[#allocation217_spill] sm:$0xff] }
 0x581   : > { %1600 = vmatprep.subr.bf16.mxu1 %v7648_v53  ;;  %v7659_v53 = vld [vmem:[#allocation218_spill] sm:$0xff] }
 0x584   : > { %1601 = vmatpush1.bf16.msra.mxu1 %v7649_v20  ;;  %v7660_v20 = vld [vmem:[#allocation221_spill] sm:$0xff] }
 0x585   : > { %1602 = vmatprep.subr.bf16.mxu1 %v7650_v38  ;;  %v7661_v38 = vld [vmem:[#allocation222_spill] sm:$0xff] }
 0x588   : > { %1603 = vmatpush1.bf16.msra.mxu1 %v7651_v2  ;;  %v7662_v2 = vld [vmem:[#allocation224_spill] sm:$0xff] }
 0x589   : > { %1604 = vmatprep.subr.bf16.mxu1 %v7652_v50  ;;  %v7663_v50 = vld [vmem:[#allocation226_spill] sm:$0xff] }
 0x58c   : > { %1605 = vmatpush1.bf16.msra.mxu1 %v7653_v13  ;;  %v7664_v13 = vld [vmem:[#allocation228_spill] sm:$0xff] }
 0x58d   : > { %1606 = vmatprep.subr.bf16.mxu1 %v7654_v48  ;;  %v7665_v48 = vld [vmem:[#allocation230_spill] sm:$0xff] }
 0x590   : > { %1607 = vmatpush1.bf16.msra.mxu1 %v7655_v30  ;;  %v7666_v30 = vld [vmem:[#allocation232_spill] sm:$0xff] }
 0x591   : > { %1608 = vmatprep.subr.bf16.mxu1 %v7656_v37  ;;  %v7667_v37 = vld [vmem:[#allocation234_spill] sm:$0xff] }
 0x594   : > { %1609 = vmatpush1.bf16.msra.mxu1 %v7657_v63  ;;  %v7668_v63 = vld [vmem:[#allocation149_spill] sm:$0xff] }
 0x595   : > { %1610 = vmatprep.subr.bf16.mxu1 %v7658_v33  ;;  %v4237_v33 = vmov 3  }
 0x596   : > { %3907 = vset.pattern.permute.xlu1 %v4237_v33 }
 0x598   : > { %1611 = vmatpush1.bf16.msra.mxu1 %v7659_v53  ;;  %v7669_v53 = vld [vmem:[#allocation148_spill] sm:$0xff] }
 0x599   : > { %1612 = vmatprep.subr.bf16.mxu1 %v7660_v20  ;;  %1537 = vperm.xlu1 %3907, %v7669_v53   ;;  %v1528_v53 = vadd.f32 %v7469_v1, %v5566_v31 }
 0x59c   : > { %1613 = vmatpush1.bf16.msra.mxu1 %v7661_v38  ;;  %v7670_v38 = vld [vmem:[#allocation236_spill] sm:$0xff] }
 0x59d   : > { %1614 = vmatprep.subr.bf16.mxu1 %v7662_v2 }
 0x5a0   : > { %1615 = vmatpush1.bf16.msra.mxu1 %v7663_v50 }
 0x5a1   : > { %1616 = vmatprep.subr.bf16.mxu1 %v7664_v13 }
 0x5a4   : > { %1617 = vmatpush1.bf16.msra.mxu1 %v7665_v48 }
 0x5a5   : > { %1618 = vmatprep.subr.bf16.mxu1 %v7666_v30 }
 0x5a8   : > { %1619 = vmatpush1.bf16.msra.mxu1 %v7667_v37 }
 0x5a9   : > { %1693 = vmatprep.subr.bf16.mxu1 %v7668_v63 }
 0x61e   : > { %v1467_v20 = vpop.f32.mrb[20].mxu1 }
 0x61f   : > { %v1468_v45 = vadd.f32 %v1467_v20, %v7670_v38  ;;  %v1469_v2 = vpop.f32.mrb[21].mxu1 }
 0x620   : > { %v1470_v50 = vadd.f32 %v1469_v2, %v5151_v46  ;;  %v1471_v7 = vpop.f32.mrb[22].mxu1 }
 0x621   : > { %v1514_v13 = vadd.f32 %v1468_v45, %v5543_v5  ;;  %v1472_v48 = vpop.f32.mrb[23].mxu1 }
 0x622   : > { %v1515_v14 = vadd.f32 %v1470_v50, %v1403_v58  ;;  %v7675_v48 = vld [vmem:[#allocation248_spill] sm:$0xff] }
 0x623   : > { %v3543_v30 = vmul.f32 -1.442695, %v1514_v13 }
 0x624   : > { %v3544_v37 = vmul.f32 -1.442695, %v1515_v14 }
 0x625   : > { %3965 = vpow2.f32 %v3543_v30 }
 0x626   : > { %3967 = vpow2.f32 %v3544_v37 }
 0x62f   : > { %v3966_v63 = vpop.eup %3965 }
 0x630   : > { %v1522_v52 = vadd.f32 1.0, %v3966_v63  ;;  %v3968_v33 = vpop.eup %3967 }
 0x631   : > { %v1523_v20 = vadd.f32 1.0, %v3968_v33  ;;  %v7676_v33 = vld [vmem:[#allocation249_spill] sm:$0xff] }
 0x632   : > { %3969 = vrcp.f32 %v1522_v52 }
 0x633   : > { %3971 = vrcp.f32 %v1523_v20  ;;  %v7677_v20 = vld [vmem:[#allocation250_spill] sm:$0xff] }
 0x63c   : > { %v3970_v38 = vpop.eup %3969 }
 0x63d   : > { %v1529_v36 = vmul.f32 %v3970_v38, %v1528_v53  ;;  %v3972_v14 = vpop.eup %3971  ;;  %v7673_v53 = vld [vmem:[#allocation246_spill] sm:$0xff]  ;;  %v7674_v38 = vld [vmem:[#allocation247_spill] sm:$0xff] }
 0x63e   : > { %v1508_v2 = vpop.f32.mrb[24].mxu1  ;;  %v1532_v37 = vsub.f32 1.0, %v3972_v14  ;;  %v1534_v50 = vmul.f32 %v3972_v14, %v5451_v17  ;;  %v7671_v17 = vld [vmem:[#allocation241_spill] sm:$0xff]  ;;  %v7684_v14 = vld [vmem:[#allocation164_spill] sm:$0xff] }
 0x63f   : > { %v1509_v5 = vadd.f32 %v1508_v2, %v5157_v57  ;;  %v3723_v7 = vpop.f32.mrb[25].mxu1  ;;  %v7678_v2 = vld [vmem:[#allocation251_spill] sm:$0xff] }
 0x640   : > { %v1511_v58 = vpop.f32.mrb[26].mxu1  ;;  %v7680_v7 = vld [vmem:[#allocation253_spill] sm:$0xff] }
 0x641   : > { %v1530_v45 = vadd.f32 %v1529_v36, %v1509_v5  ;;  %v3724_v30 = vpop.f32.mrb[27].mxu1  ;;  %v7672_v36 = vld [vmem:[#allocation245_spill] sm:$0xff]  ;;  %v7679_v5 = vld [vmem:[#allocation252_spill] sm:$0xff]  ;;  %v7681_v58 = vld [vmem:[#allocation254_spill] sm:$0xff] }
 0x642   : > { %v7683_v30 = vld [vmem:[#allocation256_spill] sm:$0xff] }
 0x643   : > { %3973 = vtanh.f32 %v1530_v45  ;;  %v7682_v45 = vld [vmem:[#allocation255_spill] sm:$0xff] }
 0x64d   : > { %v3974_v63 = vpop.eup %3973 }
 0x64e   : > { %v1533_v52 = vmul.f32 %v3974_v63, %v1532_v37  ;;  %v7685_v37 = vld [vmem:[#allocation173_spill] sm:$0xff]  ;;  %v7686_v63 = vld [vmem:[#allocation175_spill] sm:$0xff] }
 0x650   : > { %v5617_v13 = vadd.f32 %v1534_v50, %v1533_v52  ;;  %v7687_v52 = vld [vmem:[#allocation177_spill] sm:$0xff]  ;;  %v7688_v50 = vld [vmem:[#allocation179_spill] sm:$0xff] }
 0x652   : > { %v1546_v31 = vpack.c.bf16 %v5617_v13, %v5617_v13 }
 0x654   : > { %1579 = vmatprep.mubr.bf16.mxu0 %v1546_v31  ;;  %1620 = vmatprep.mubr.bf16.mxu1 %v1546_v31 }
 0x655   : > { %1580 = vmatmul.mubr.bf16.vlgmr.msra.gmra.mrb[20].mxu0 %v5553_v23  ;;  %1621 = vmatmul.mubr.bf16.vlgmr.msra.gmra.mrb[28].mxu1 %v5553_v23 }
 0x656   : > { %1630 = vmatpush1.bf16.msra.mxu0 %v5167_v15  ;;  %1661 = vmatprep.mubr.bf16.mxu0 %v1546_v31  ;;  %v7689_v31 = vld [vmem:[#allocation181_spill] sm:$0xff] }
 0x657   : > { %1631 = vmatprep.subr.bf16.mxu0 %v5171_v11  ;;  %1694 = vmatpush1.bf16.msra.mxu1 %v4649_v44 }
 0x658   : > { %1695 = vmatprep.subr.bf16.mxu1 %v4661_v41  ;;  %1725 = vmatprep.mubr.bf16.mxu1 %v7474_v51 }
 0x65a   : > { %1632 = vmatpush1.bf16.msra.mxu0 %v5178_v55 }
 0x65b   : > { %1633 = vmatprep.subr.bf16.mxu0 %v5183_v60  ;;  %1696 = vmatpush1.bf16.msra.mxu1 %v4666_v24 }
 0x65c   : > { %1697 = vmatprep.subr.bf16.mxu1 %v4677_v42 }
 0x65e   : > { %1634 = vmatpush1.bf16.msra.mxu0 %v5191_v4 }
 0x65f   : > { %1635 = vmatprep.subr.bf16.mxu0 %v5196_v43  ;;  %1698 = vmatpush1.bf16.msra.mxu1 %v4682_v12 }
 0x660   : > { %1699 = vmatprep.subr.bf16.mxu1 %v4693_v21 }
 0x662   : > { %1636 = vmatpush1.bf16.msra.mxu0 %v5203_v18 }
 0x663   : > { %1637 = vmatprep.subr.bf16.mxu0 %v5208_v39  ;;  %1700 = vmatpush1.bf16.msra.mxu1 %v4698_v9 }
 0x664   : > { %1701 = vmatprep.subr.bf16.mxu1 %v7579_v47 }
 0x666   : > { %1638 = vmatpush1.bf16.msra.mxu0 %v7580_v32 }
 0x667   : > { %1639 = vmatprep.subr.bf16.mxu0 %v5220_v49  ;;  %1702 = vmatpush1.bf16.msra.mxu1 %v4714_v27 }
 0x668   : > { %1703 = vmatprep.subr.bf16.mxu1 %v7581_v29 }
 0x66a   : > { %1640 = vmatpush1.bf16.msra.mxu0 %v7582_v16 }
 0x66b   : > { %1641 = vmatprep.subr.bf16.mxu0 %v5232_v62  ;;  %1704 = vmatpush1.bf16.msra.mxu1 %v4729_v35 }
 0x66c   : > { %1705 = vmatprep.subr.bf16.mxu1 %v7583_v3 }
 0x66e   : > { %1642 = vmatpush1.bf16.msra.mxu0 %v7584_v59 }
 0x66f   : > { %1643 = vmatprep.subr.bf16.mxu0 %v5244_v40  ;;  %1706 = vmatpush1.bf16.msra.mxu1 %v7585_v28 }
 0x670   : > { %1707 = vmatprep.subr.bf16.mxu1 %v7586_v19 }
 0x672   : > { %1644 = vmatpush1.bf16.msra.mxu0 %v7587_v56 }
 0x673   : > { %1645 = vmatprep.subr.bf16.mxu0 %v7671_v17  ;;  %1708 = vmatpush1.bf16.msra.mxu1 %v7589_v54 }
 0x674   : > { %3725 = vmatprep.subr.bf16.mxu1 %v7340_v0 }
 0x676   : > { %1646 = vmatpush1.bf16.msra.mxu0 %v7590_v25 }
 0x677   : > { %1647 = vmatprep.subr.bf16.mxu0 %v7591_v26 }
 0x67a   : > { %1648 = vmatpush1.bf16.msra.mxu0 %v7592_v10 }
 0x67b   : > { %1649 = vmatprep.subr.bf16.mxu0 %v7672_v36 }
 0x67e   : > { %1650 = vmatpush1.bf16.msra.mxu0 %v7673_v53 }
 0x67f   : > { %1651 = vmatprep.subr.bf16.mxu0 %v7674_v38 }
 0x682   : > { %1652 = vmatpush1.bf16.msra.mxu0 %v7675_v48 }
 0x683   : > { %1653 = vmatprep.subr.bf16.mxu0 %v7676_v33 }
 0x686   : > { %1654 = vmatpush1.bf16.msra.mxu0 %v7677_v20 }
 0x687   : > { %1655 = vmatprep.subr.bf16.mxu0 %v7678_v2 }
 0x68a   : > { %1656 = vmatpush1.bf16.msra.mxu0 %v7679_v5 }
 0x68b   : > { %1657 = vmatprep.subr.bf16.mxu0 %v7680_v7  ;;  %v7690_v7 = vld [vmem:[#allocation183_spill] sm:$0xff] }
 0x68e   : > { %1658 = vmatpush1.bf16.msra.mxu0 %v7681_v58  ;;  %v7691_v58 = vld [vmem:[#allocation185_spill] sm:$0xff] }
 0x68f   : > { %1659 = vmatprep.subr.bf16.mxu0 %v7682_v45  ;;  %v7692_v45 = vld [vmem:[#allocation187_spill] sm:$0xff] }
 0x692   : > { %1660 = vmatpush1.bf16.msra.mxu0 %v7683_v30  ;;  %v7693_v30 = vld [vmem:[#allocation188_spill] sm:$0xff] }
 0x693   : > { %1807 = vmatprep.subr.bf16.mxu0 %v7684_v14  ;;  %v7694_v14 = vld [vmem:[#allocation191_spill] sm:$0xff] }
 0x695   : > { %1662 = vmatmul.mubr.bf16.vlgmr.msra.gmra.mrb[24].mxu0 %v5553_v23  ;;  %v7695_v23 = vld [vmem:[#allocation192_spill] sm:$0xff] }
 0x696   : > { %1808 = vmatpush1.bf16.msra.mxu0 %v7685_v37  ;;  %v7696_v37 = vld [vmem:[#allocation195_spill] sm:$0xff] }
 0x697   : > { %1809 = vmatprep.subr.bf16.mxu0 %v7686_v63  ;;  %v7697_v63 = vld [vmem:[#allocation196_spill] sm:$0xff] }
 0x69a   : > { %1810 = vmatpush1.bf16.msra.mxu0 %v7687_v52  ;;  %v7698_v52 = vld [vmem:[#allocation199_spill] sm:$0xff] }
 0x69b   : > { %1811 = vmatprep.subr.bf16.mxu0 %v7688_v50  ;;  %v7699_v50 = vld [vmem:[#allocation200_spill] sm:$0xff] }
 0x69e   : > { %1812 = vmatpush1.bf16.msra.mxu0 %v7689_v31  ;;  %v7700_v31 = vld [vmem:[#allocation203_spill] sm:$0xff] }
 0x69f   : > { %1813 = vmatprep.subr.bf16.mxu0 %v7690_v7  ;;  %v7701_v7 = vld [vmem:[#allocation204_spill] sm:$0xff] }
 0x6a2   : > { %1814 = vmatpush1.bf16.msra.mxu0 %v7691_v58  ;;  %v7702_v58 = vld [vmem:[#allocation207_spill] sm:$0xff] }
 0x6a3   : > { %1815 = vmatprep.subr.bf16.mxu0 %v7692_v45  ;;  %v7703_v45 = vld [vmem:[#allocation208_spill] sm:$0xff] }
 0x6a6   : > { %1816 = vmatpush1.bf16.msra.mxu0 %v7693_v30  ;;  %v7704_v30 = vld [vmem:[#allocation211_spill] sm:$0xff] }
 0x6a7   : > { %1817 = vmatprep.subr.bf16.mxu0 %v7694_v14  ;;  %v7705_v14 = vld [vmem:[#allocation212_spill] sm:$0xff] }
 0x6aa   : > { %1818 = vmatpush1.bf16.msra.mxu0 %v7695_v23  ;;  %v7706_v23 = vld [vmem:[#allocation215_spill] sm:$0xff] }
 0x6ab   : > { %1819 = vmatprep.subr.bf16.mxu0 %v7696_v37  ;;  %v7707_v37 = vld [vmem:[#allocation216_spill] sm:$0xff] }
 0x6ae   : > { %1820 = vmatpush1.bf16.msra.mxu0 %v7697_v63  ;;  %v7708_v63 = vld [vmem:[#allocation219_spill] sm:$0xff] }
 0x6af   : > { %1821 = vmatprep.subr.bf16.mxu0 %v7698_v52  ;;  %v7709_v52 = vld [vmem:[#allocation220_spill] sm:$0xff] }
 0x6b2   : > { %1822 = vmatpush1.bf16.msra.mxu0 %v7699_v50  ;;  %v7710_v50 = vld [vmem:[#allocation223_spill] sm:$0xff] }
 0x6b3   : > { %1823 = vmatprep.subr.bf16.mxu0 %v7700_v31  ;;  %v7711_v31 = vld [vmem:[#allocation225_spill] sm:$0xff] }
 0x6b6   : > { %1824 = vmatpush1.bf16.msra.mxu0 %v7701_v7  ;;  %v7712_v7 = vld [vmem:[#allocation227_spill] sm:$0xff] }
 0x6b7   : > { %1825 = vmatprep.subr.bf16.mxu0 %v7702_v58  ;;  %v7713_v58 = vld [vmem:[#allocation229_spill] sm:$0xff] }
 0x6ba   : > { %1826 = vmatpush1.bf16.msra.mxu0 %v7703_v45  ;;  %v7714_v45 = vld [vmem:[#allocation231_spill] sm:$0xff] }
 0x6bb   : > { %1827 = vmatprep.subr.bf16.mxu0 %v7704_v30  ;;  %v7715_v30 = vld [vmem:[#allocation233_spill] sm:$0xff] }
 0x6be   : > { %1828 = vmatpush1.bf16.msra.mxu0 %v7705_v14  ;;  %v7716_v14 = vld [vmem:[#allocation235_spill] sm:$0xff] }
 0x6bf   : > { %1829 = vmatprep.subr.bf16.mxu0 %v7706_v23  ;;  %v1538_v23 = vpop.permute.xlu1 %1537 }
 0x6c2   : > { %1830 = vmatpush1.bf16.msra.mxu0 %v7707_v37  ;;  %v7717_v37 = vld [vmem:[#allocation166_spill] sm:$0xff] }
 0x6c3   : > { %1831 = vmatprep.subr.bf16.mxu0 %v7708_v63  ;;  %v1540_v5 = vmul.f32 %v1538_v23, %v7717_v37  ;;  %v7718_v63 = vld [vmem:[#allocation167_spill] sm:$0xff] }
 0x6c4   : > { %v1541_v2 = vmul.f32 %v1538_v23, %v7718_v63 }
 0x6c6   : > { %1832 = vmatpush1.bf16.msra.mxu0 %v7709_v52  ;;  %v7719_v52 = vld [vmem:[#allocation168_spill] sm:$0xff] }
 0x6c7   : > { %1833 = vmatprep.subr.bf16.mxu0 %v7710_v50  ;;  %v1543_v20 = vadd.f32 %v1540_v5, %v7719_v52  ;;  %v1542_v52 = vmul.f32 %v1538_v23, %v7533_v61 }
 0x6ca   : > { %1834 = vmatpush1.bf16.msra.mxu0 %v7711_v31  ;;  %v1544_v31 = vadd.f32 %v1541_v2, %v7627_v6 }
 0x6cb   : > { %1835 = vmatprep.subr.bf16.mxu0 %v7712_v7 }
 0x6ce   : > { %1836 = vmatpush1.bf16.msra.mxu0 %v7713_v58 }
 0x6cf   : > { %1837 = vmatprep.subr.bf16.mxu0 %v7714_v45 }
 0x6d2   : > { %1838 = vmatpush1.bf16.msra.mxu0 %v7715_v30 }
 0x6d3   : > { %1889 = vmatprep.subr.bf16.mxu0 %v7716_v14 }
 0x728   : > { %v1581_v50 = vpop.f32.mrb[20].mxu0  ;;  %v1622_v33 = vpop.f32.mrb[28].mxu1 }
 0x729   : > { %v1670_v7 = vadd.f32 %v1581_v50, %v1543_v20  ;;  %v1583_v48 = vpop.f32.mrb[21].mxu0  ;;  %v5709_v58 = vpop.f32.mrb[29].mxu1  ;;  %v1684_v20 = vadd.f32 %v7534_v34, %v1622_v33  ;;  %v7720_v33 = vld [vmem:[#allocation150_spill] sm:$0xff] }
 0x72a   : > { %v1585_v45 = vpop.f32.mrb[22].mxu0  ;;  %v1626_v38 = vpop.f32.mrb[30].mxu1  ;;  %v1671_v36 = vadd.f32 %v1583_v48, %v1544_v31 }
 0x72b   : > { %v3545_v30 = vmul.f32 -1.442695, %v1670_v7  ;;  %v1586_v53 = vpop.f32.mrb[23].mxu0  ;;  %v1627_v14 = vpop.f32.mrb[31].mxu1  ;;  %v1545_v45 = vadd.f32 %v1542_v52, %v7535_v8  ;;  %v7723_v52 = vld [vmem:[#allocation153_spill] sm:$0xff] }
 0x72c   : > { %v3546_v37 = vmul.f32 -1.442695, %v1671_v36 }
 0x72d   : > { %3975 = vpow2.f32 %v3545_v30 }
 0x72e   : > { %3977 = vpow2.f32 %v3546_v37 }
 0x737   : > { %v3976_v63 = vpop.eup %3975 }
 0x738   : > { %v1678_v10 = vadd.f32 1.0, %v3976_v63  ;;  %v3978_v5 = vpop.eup %3977  ;;  %v7721_v63 = vld [vmem:[#allocation151_spill] sm:$0xff] }
 0x739   : > { %v1679_v2 = vadd.f32 1.0, %v3978_v5 }
 0x73a   : > { %3979 = vrcp.f32 %v1678_v10 }
 0x73b   : > { %3981 = vrcp.f32 %v1679_v2 }
 0x744   : > { %v3980_v50 = vpop.eup %3979 }
 0x745   : > { %v1685_v38 = vmul.f32 %v3980_v50, %v1684_v20  ;;  %v3982_v48 = vpop.eup %3981  ;;  %v7724_v20 = vld [vmem:[#allocation155_spill] sm:$0xff]  ;;  %v7725_v50 = vld [vmem:[#allocation157_spill] sm:$0xff] }
 0x746   : > { %v1688_v7 = vsub.f32 1.0, %v3982_v48  ;;  %v1690_v30 = vmul.f32 %v3982_v48, %v5549_v22  ;;  %v7722_v22 = vld [vmem:[#allocation152_spill] sm:$0xff]  ;;  %v7729_v48 = vld [vmem:[#allocation174_spill] sm:$0xff] }
 0x747   : > { %v1686_v53 = vadd.f32 %v1685_v38, %v1545_v45  ;;  %v7726_v45 = vld [vmem:[#allocation160_spill] sm:$0xff]  ;;  %v7727_v38 = vld [vmem:[#allocation163_spill] sm:$0xff] }
 0x749   : > { %3983 = vtanh.f32 %v1686_v53  ;;  %v7728_v53 = vld [vmem:[#allocation165_spill] sm:$0xff] }
 0x753   : > { %v3984_v36 = vpop.eup %3983 }
 0x754   : > { %v1689_v14 = vmul.f32 %v3984_v36, %v1688_v7  ;;  %v7730_v7 = vld [vmem:[#allocation176_spill] sm:$0xff]  ;;  %v7731_v36 = vld [vmem:[#allocation178_spill] sm:$0xff] }
 0x756   : > { %v5715_v10 = vadd.f32 %v1690_v30, %v1689_v14  ;;  %v7732_v30 = vld [vmem:[#allocation180_spill] sm:$0xff]  ;;  %v7733_v14 = vld [vmem:[#allocation182_spill] sm:$0xff] }
 0x758   : > { %v5719_v37 = vpack.c.bf16 %v5715_v10, %v5715_v10 }
 0x75a   : > { %1726 = vmatmul.mubr.bf16.vlgmr.msra.gmra.mrb[32].mxu1 %v5719_v37 }
 0x75b   : > { %3726 = vmatpush3.bf16.msra.mxu1 %v7720_v33  ;;  %3741 = vmatprep.mubr.msk.bf16.mxu1 %vm4234_vm0, %v7340_v0 }
 0x75c   : > { %3727 = vmatprep.subr.bf16.mxu1 %v7340_v0 }
 0x75f   : > { %3728 = vmatpush3.bf16.msra.mxu1 %v7721_v63 }
 0x760   : > { %3729 = vmatprep.subr.bf16.mxu1 %v7340_v0 }
 0x763   : > { %3730 = vmatpush3.bf16.msra.mxu1 %v7722_v22 }
 0x764   : > { %3731 = vmatprep.subr.bf16.mxu1 %v7340_v0 }
 0x767   : > { %3732 = vmatpush3.bf16.msra.mxu1 %v7723_v52 }
 0x768   : > { %v1663_v31 = vpop.f32.mrb[24].mxu0  ;;  %3733 = vmatprep.subr.bf16.mxu1 %v7340_v0 }
 0x769   : > { %v5732_v23 = vpop.f32.mrb[25].mxu0 }
 0x76a   : > { %v1667_v5 = vpop.f32.mrb[26].mxu0 }
 0x76b   : > { %v1668_v2 = vpop.f32.mrb[27].mxu0  ;;  %3734 = vmatpush3.bf16.msra.mxu1 %v7724_v20  ;;  %v7734_v5 = vld [vmem:[#allocation184_spill] sm:$0xff] }
 0x76c   : > { %3735 = vmatprep.subr.bf16.mxu1 %v7340_v0  ;;  %v7735_v2 = vld [vmem:[#allocation186_spill] sm:$0xff] }
 0x76f   : > { %3736 = vmatpush3.bf16.msra.mxu1 %v7725_v50  ;;  %v7739_v50 = vld [vmem:[#allocation194_spill] sm:$0xff] }
 0x770   : > { %3737 = vmatprep.subr.bf16.mxu1 %v7340_v0 }
 0x773   : > { %3738 = vmatpush3.bf16.msra.mxu1 %v7726_v45  ;;  %v7736_v45 = vld [vmem:[#allocation189_spill] sm:$0xff] }
 0x774   : > { %3739 = vmatprep.subr.bf16.mxu1 %v7340_v0 }
 0x777   : > { %3740 = vmatpush3.bf16.msra.mxu1 %v7727_v38  ;;  %v7737_v38 = vld [vmem:[#allocation190_spill] sm:$0xff] }
 0x778   : > { %1848 = vmatprep.subr.bf16.mxu1 %v7728_v53  ;;  %v7738_v53 = vld [vmem:[#allocation193_spill] sm:$0xff] }
 0x77a   : > { %3742 = vmatmul.mubr.bf16.vlgmr.msra.gmra.mrb[36].mxu1 %v5719_v37 }
 0x77b   : > { %1849 = vmatpush1.bf16.msra.mxu1 %v7729_v48  ;;  %v7740_v48 = vld [vmem:[#allocation197_spill] sm:$0xff] }
 0x77c   : > { %1850 = vmatprep.subr.bf16.mxu1 %v7730_v7  ;;  %v7741_v7 = vld [vmem:[#allocation198_spill] sm:$0xff] }
 0x77f   : > { %1851 = vmatpush1.bf16.msra.mxu1 %v7731_v36  ;;  %v7742_v36 = vld [vmem:[#allocation201_spill] sm:$0xff] }
 0x780   : > { %1852 = vmatprep.subr.bf16.mxu1 %v7732_v30  ;;  %v7743_v30 = vld [vmem:[#allocation202_spill] sm:$0xff] }
 0x783   : > { %1853 = vmatpush1.bf16.msra.mxu1 %v7733_v14  ;;  %v7744_v14 = vld [vmem:[#allocation205_spill] sm:$0xff] }
 0x784   : > { %1854 = vmatprep.subr.bf16.mxu1 %v7734_v5  ;;  %v7745_v5 = vld [vmem:[#allocation206_spill] sm:$0xff] }
 0x787   : > { %1855 = vmatpush1.bf16.msra.mxu1 %v7735_v2  ;;  %v7746_v2 = vld [vmem:[#allocation209_spill] sm:$0xff] }
 0x788   : > { %1856 = vmatprep.subr.bf16.mxu1 %v7736_v45  ;;  %v7747_v45 = vld [vmem:[#allocation210_spill] sm:$0xff] }
 0x78b   : > { %1857 = vmatpush1.bf16.msra.mxu1 %v7737_v38  ;;  %v7748_v38 = vld [vmem:[#allocation213_spill] sm:$0xff] }
 0x78c   : > { %1858 = vmatprep.subr.bf16.mxu1 %v7738_v53  ;;  %v7749_v53 = vld [vmem:[#allocation214_spill] sm:$0xff] }
 0x78f   : > { %1859 = vmatpush1.bf16.msra.mxu1 %v7739_v50  ;;  %v7750_v50 = vld [vmem:[#allocation217_spill] sm:$0xff] }
 0x790   : > { %1860 = vmatprep.subr.bf16.mxu1 %v7740_v48  ;;  %v7751_v48 = vld [vmem:[#allocation218_spill] sm:$0xff] }
 0x793   : > { %1861 = vmatpush1.bf16.msra.mxu1 %v7741_v7  ;;  %v7752_v7 = vld [vmem:[#allocation221_spill] sm:$0xff] }
 0x794   : > { %1862 = vmatprep.subr.bf16.mxu1 %v7742_v36  ;;  %v7753_v36 = vld [vmem:[#allocation222_spill] sm:$0xff] }
 0x797   : > { %1863 = vmatpush1.bf16.msra.mxu1 %v7743_v30  ;;  %v7754_v30 = vld [vmem:[#allocation224_spill] sm:$0xff] }
 0x798   : > { %1864 = vmatprep.subr.bf16.mxu1 %v7744_v14  ;;  %v7755_v14 = vld [vmem:[#allocation226_spill] sm:$0xff] }
 0x79b   : > { %1865 = vmatpush1.bf16.msra.mxu1 %v7745_v5  ;;  %v7756_v5 = vld [vmem:[#allocation228_spill] sm:$0xff] }
 0x79c   : > { %1866 = vmatprep.subr.bf16.mxu1 %v7746_v2  ;;  %v7757_v2 = vld [vmem:[#allocation230_spill] sm:$0xff] }
 0x79f   : > { %1867 = vmatpush1.bf16.msra.mxu1 %v7747_v45  ;;  %v7758_v45 = vld [vmem:[#allocation232_spill] sm:$0xff] }
 0x7a0   : > { %1868 = vmatprep.subr.bf16.mxu1 %v7748_v38  ;;  %v7759_v38 = vld [vmem:[#allocation234_spill] sm:$0xff] }
 0x7a3   : > { %1869 = vmatpush1.bf16.msra.mxu1 %v7749_v53  ;;  %v7760_v53 = vld [vmem:[#allocation149_spill] sm:$0xff] }
 0x7a4   : > { %1870 = vmatprep.subr.bf16.mxu1 %v7750_v50  ;;  %v4238_v50 = vmov 4  }
 0x7a5   : > { %3908 = vset.pattern.permute.xlu1 %v4238_v50 }
 0x7a7   : > { %1871 = vmatpush1.bf16.msra.mxu1 %v7751_v48  ;;  %v7761_v48 = vld [vmem:[#allocation148_spill] sm:$0xff] }
 0x7a8   : > { %1872 = vmatprep.subr.bf16.mxu1 %v7752_v7  ;;  %1797 = vperm.xlu1 %3908, %v7761_v48   ;;  %v1788_v48 = vadd.f32 %v7469_v1, %v5732_v23 }
 0x7ab   : > { %1873 = vmatpush1.bf16.msra.mxu1 %v7753_v36  ;;  %v7762_v36 = vld [vmem:[#allocation236_spill] sm:$0xff] }
 0x7ac   : > { %1874 = vmatprep.subr.bf16.mxu1 %v7754_v30 }
 0x7af   : > { %1875 = vmatpush1.bf16.msra.mxu1 %v7755_v14 }
 0x7b0   : > { %1876 = vmatprep.subr.bf16.mxu1 %v7756_v5 }
 0x7b3   : > { %1877 = vmatpush1.bf16.msra.mxu1 %v7757_v2 }
 0x7b4   : > { %1878 = vmatprep.subr.bf16.mxu1 %v7758_v45 }
 0x7b7   : > { %1879 = vmatpush1.bf16.msra.mxu1 %v7759_v38 }
 0x7b8   : > { %1953 = vmatprep.subr.bf16.mxu1 %v7760_v53 }
 0x82d   : > { %v1727_v7 = vpop.f32.mrb[32].mxu1 }
 0x82e   : > { %v1728_v20 = vadd.f32 %v1727_v7, %v7762_v36  ;;  %v1729_v30 = vpop.f32.mrb[33].mxu1 }
 0x82f   : > { %v1730_v14 = vadd.f32 %v1729_v30, %v5151_v46  ;;  %v1731_v52 = vpop.f32.mrb[34].mxu1 }
 0x830   : > { %v1774_v5 = vadd.f32 %v1728_v20, %v5709_v58  ;;  %v1732_v2 = vpop.f32.mrb[35].mxu1 }
 0x831   : > { %v1775_v22 = vadd.f32 %v1730_v14, %v1663_v31  ;;  %v7767_v2 = vld [vmem:[#allocation248_spill] sm:$0xff] }
 0x832   : > { %v3547_v45 = vmul.f32 -1.442695, %v1774_v5 }
 0x833   : > { %v3548_v38 = vmul.f32 -1.442695, %v1775_v22 }
 0x834   : > { %3985 = vpow2.f32 %v3547_v45 }
 0x835   : > { %3987 = vpow2.f32 %v3548_v38 }
 0x83e   : > { %v3986_v53 = vpop.eup %3985 }
 0x83f   : > { %v1782_v63 = vadd.f32 1.0, %v3986_v53  ;;  %v3988_v50 = vpop.eup %3987 }
 0x840   : > { %v1783_v7 = vadd.f32 1.0, %v3988_v50  ;;  %v7768_v50 = vld [vmem:[#allocation249_spill] sm:$0xff] }
 0x841   : > { %3989 = vrcp.f32 %v1782_v63 }
 0x842   : > { %3991 = vrcp.f32 %v1783_v7  ;;  %v7769_v7 = vld [vmem:[#allocation250_spill] sm:$0xff] }
 0x84b   : > { %v3990_v36 = vpop.eup %3989 }
 0x84c   : > { %v1789_v33 = vmul.f32 %v3990_v36, %v1788_v48  ;;  %v3992_v22 = vpop.eup %3991  ;;  %v7765_v48 = vld [vmem:[#allocation246_spill] sm:$0xff]  ;;  %v7766_v36 = vld [vmem:[#allocation247_spill] sm:$0xff] }
 0x84d   : > { %v1768_v30 = vpop.f32.mrb[36].mxu1  ;;  %v1792_v38 = vsub.f32 1.0, %v3992_v22  ;;  %v1794_v14 = vmul.f32 %v3992_v22, %v5617_v13  ;;  %v7763_v13 = vld [vmem:[#allocation244_spill] sm:$0xff] }
 0x84e   : > { %v1769_v58 = vadd.f32 %v1768_v30, %v5157_v57  ;;  %v3743_v52 = vpop.f32.mrb[37].mxu1  ;;  %v7770_v30 = vld [vmem:[#allocation251_spill] sm:$0xff]  ;;  %v7776_v22 = vld [vmem:[#allocation164_spill] sm:$0xff] }
 0x84f   : > { %v1771_v31 = vpop.f32.mrb[38].mxu1  ;;  %v7772_v52 = vld [vmem:[#allocation253_spill] sm:$0xff] }
 0x850   : > { %v1790_v20 = vadd.f32 %v1789_v33, %v1769_v58  ;;  %v3744_v45 = vpop.f32.mrb[39].mxu1  ;;  %v7764_v33 = vld [vmem:[#allocation245_spill] sm:$0xff]  ;;  %v7771_v58 = vld [vmem:[#allocation252_spill] sm:$0xff]  ;;  %v7773_v31 = vld [vmem:[#allocation254_spill] sm:$0xff] }
 0x851   : > { %v7775_v45 = vld [vmem:[#allocation256_spill] sm:$0xff] }
 0x852   : > { %3993 = vtanh.f32 %v1790_v20  ;;  %v7774_v20 = vld [vmem:[#allocation255_spill] sm:$0xff] }
 0x85c   : > { %v3994_v53 = vpop.eup %3993 }
 0x85d   : > { %v1793_v63 = vmul.f32 %v3994_v53, %v1792_v38  ;;  %v7777_v38 = vld [vmem:[#allocation173_spill] sm:$0xff]  ;;  %v7778_v53 = vld [vmem:[#allocation175_spill] sm:$0xff] }
 0x85f   : > { %v5783_v5 = vadd.f32 %v1794_v14, %v1793_v63  ;;  %v7779_v63 = vld [vmem:[#allocation177_spill] sm:$0xff]  ;;  %v7780_v14 = vld [vmem:[#allocation179_spill] sm:$0xff] }
 0x861   : > { %v1806_v23 = vpack.c.bf16 %v5783_v5, %v5783_v5 }
 0x863   : > { %1839 = vmatprep.mubr.bf16.mxu0 %v1806_v23  ;;  %1880 = vmatprep.mubr.bf16.mxu1 %v1806_v23 }
 0x864   : > { %1840 = vmatmul.mubr.bf16.vlgmr.msra.gmra.mrb[28].mxu0 %v5719_v37  ;;  %1881 = vmatmul.mubr.bf16.vlgmr.msra.gmra.mrb[40].mxu1 %v5719_v37 }
 0x865   : > { %1890 = vmatpush1.bf16.msra.mxu0 %v5167_v15  ;;  %1921 = vmatprep.mubr.bf16.mxu0 %v1806_v23  ;;  %v7781_v23 = vld [vmem:[#allocation181_spill] sm:$0xff] }
 0x866   : > { %1891 = vmatprep.subr.bf16.mxu0 %v5171_v11  ;;  %1954 = vmatpush1.bf16.msra.mxu1 %v4649_v44 }
 0x867   : > { %1955 = vmatprep.subr.bf16.mxu1 %v4661_v41  ;;  %1985 = vmatprep.mubr.bf16.mxu1 %v7474_v51 }
 0x869   : > { %1892 = vmatpush1.bf16.msra.mxu0 %v5178_v55 }
 0x86a   : > { %1893 = vmatprep.subr.bf16.mxu0 %v5183_v60  ;;  %1956 = vmatpush1.bf16.msra.mxu1 %v4666_v24 }
 0x86b   : > { %1957 = vmatprep.subr.bf16.mxu1 %v4677_v42 }
 0x86d   : > { %1894 = vmatpush1.bf16.msra.mxu0 %v5191_v4 }
 0x86e   : > { %1895 = vmatprep.subr.bf16.mxu0 %v5196_v43  ;;  %1958 = vmatpush1.bf16.msra.mxu1 %v4682_v12 }
 0x86f   : > { %1959 = vmatprep.subr.bf16.mxu1 %v4693_v21 }
 0x871   : > { %1896 = vmatpush1.bf16.msra.mxu0 %v5203_v18 }
 0x872   : > { %1897 = vmatprep.subr.bf16.mxu0 %v5208_v39  ;;  %1960 = vmatpush1.bf16.msra.mxu1 %v4698_v9 }
 0x873   : > { %1961 = vmatprep.subr.bf16.mxu1 %v7579_v47 }
 0x875   : > { %1898 = vmatpush1.bf16.msra.mxu0 %v7580_v32 }
 0x876   : > { %1899 = vmatprep.subr.bf16.mxu0 %v5220_v49  ;;  %1962 = vmatpush1.bf16.msra.mxu1 %v4714_v27 }
 0x877   : > { %1963 = vmatprep.subr.bf16.mxu1 %v7581_v29 }
 0x879   : > { %1900 = vmatpush1.bf16.msra.mxu0 %v7582_v16 }
 0x87a   : > { %1901 = vmatprep.subr.bf16.mxu0 %v5232_v62  ;;  %1964 = vmatpush1.bf16.msra.mxu1 %v4729_v35 }
 0x87b   : > { %1965 = vmatprep.subr.bf16.mxu1 %v7583_v3 }
 0x87d   : > { %1902 = vmatpush1.bf16.msra.mxu0 %v7584_v59 }
 0x87e   : > { %1903 = vmatprep.subr.bf16.mxu0 %v5244_v40  ;;  %1966 = vmatpush1.bf16.msra.mxu1 %v7585_v28 }
 0x87f   : > { %1967 = vmatprep.subr.bf16.mxu1 %v7586_v19 }
 0x881   : > { %1904 = vmatpush1.bf16.msra.mxu0 %v7587_v56 }
 0x882   : > { %1905 = vmatprep.subr.bf16.mxu0 %v7671_v17  ;;  %1968 = vmatpush1.bf16.msra.mxu1 %v7589_v54 }
 0x883   : > { %3745 = vmatprep.subr.bf16.mxu1 %v7340_v0 }
 0x885   : > { %1906 = vmatpush1.bf16.msra.mxu0 %v7590_v25 }
 0x886   : > { %1907 = vmatprep.subr.bf16.mxu0 %v7591_v26 }
 0x889   : > { %1908 = vmatpush1.bf16.msra.mxu0 %v7763_v13 }
 0x88a   : > { %1909 = vmatprep.subr.bf16.mxu0 %v7764_v33 }
 0x88d   : > { %1910 = vmatpush1.bf16.msra.mxu0 %v7765_v48 }
 0x88e   : > { %1911 = vmatprep.subr.bf16.mxu0 %v7766_v36 }
 0x891   : > { %1912 = vmatpush1.bf16.msra.mxu0 %v7767_v2 }
 0x892   : > { %1913 = vmatprep.subr.bf16.mxu0 %v7768_v50 }
 0x895   : > { %1914 = vmatpush1.bf16.msra.mxu0 %v7769_v7 }
 0x896   : > { %1915 = vmatprep.subr.bf16.mxu0 %v7770_v30 }
 0x899   : > { %1916 = vmatpush1.bf16.msra.mxu0 %v7771_v58 }
 0x89a   : > { %1917 = vmatprep.subr.bf16.mxu0 %v7772_v52  ;;  %v7782_v52 = vld [vmem:[#allocation183_spill] sm:$0xff] }
 0x89d   : > { %1918 = vmatpush1.bf16.msra.mxu0 %v7773_v31  ;;  %v7783_v31 = vld [vmem:[#allocation185_spill] sm:$0xff] }
 0x89e   : > { %1919 = vmatprep.subr.bf16.mxu0 %v7774_v20  ;;  %v7784_v20 = vld [vmem:[#allocation187_spill] sm:$0xff] }
 0x8a1   : > { %1920 = vmatpush1.bf16.msra.mxu0 %v7775_v45  ;;  %v7785_v45 = vld [vmem:[#allocation188_spill] sm:$0xff] }
 0x8a2   : > { %2067 = vmatprep.subr.bf16.mxu0 %v7776_v22  ;;  %v7786_v22 = vld [vmem:[#allocation191_spill] sm:$0xff] }
 0x8a4   : > { %1922 = vmatmul.mubr.bf16.vlgmr.msra.gmra.mrb[32].mxu0 %v5719_v37  ;;  %v7787_v37 = vld [vmem:[#allocation192_spill] sm:$0xff] }
 0x8a5   : > { %2068 = vmatpush1.bf16.msra.mxu0 %v7777_v38  ;;  %v7788_v38 = vld [vmem:[#allocation195_spill] sm:$0xff] }
 0x8a6   : > { %2069 = vmatprep.subr.bf16.mxu0 %v7778_v53  ;;  %v7789_v53 = vld [vmem:[#allocation196_spill] sm:$0xff] }
 0x8a9   : > { %2070 = vmatpush1.bf16.msra.mxu0 %v7779_v63  ;;  %v7790_v63 = vld [vmem:[#allocation199_spill] sm:$0xff] }
 0x8aa   : > { %2071 = vmatprep.subr.bf16.mxu0 %v7780_v14  ;;  %v7791_v14 = vld [vmem:[#allocation200_spill] sm:$0xff] }
 0x8ad   : > { %2072 = vmatpush1.bf16.msra.mxu0 %v7781_v23  ;;  %v7792_v23 = vld [vmem:[#allocation203_spill] sm:$0xff] }
 0x8ae   : > { %2073 = vmatprep.subr.bf16.mxu0 %v7782_v52  ;;  %v7793_v52 = vld [vmem:[#allocation204_spill] sm:$0xff] }
 0x8b1   : > { %2074 = vmatpush1.bf16.msra.mxu0 %v7783_v31  ;;  %v7794_v31 = vld [vmem:[#allocation207_spill] sm:$0xff] }
 0x8b2   : > { %2075 = vmatprep.subr.bf16.mxu0 %v7784_v20  ;;  %v7795_v20 = vld [vmem:[#allocation208_spill] sm:$0xff] }
 0x8b5   : > { %2076 = vmatpush1.bf16.msra.mxu0 %v7785_v45  ;;  %v7796_v45 = vld [vmem:[#allocation211_spill] sm:$0xff] }
 0x8b6   : > { %2077 = vmatprep.subr.bf16.mxu0 %v7786_v22  ;;  %v7797_v22 = vld [vmem:[#allocation212_spill] sm:$0xff] }
 0x8b9   : > { %2078 = vmatpush1.bf16.msra.mxu0 %v7787_v37  ;;  %v7798_v37 = vld [vmem:[#allocation215_spill] sm:$0xff] }
 0x8ba   : > { %2079 = vmatprep.subr.bf16.mxu0 %v7788_v38  ;;  %v7799_v38 = vld [vmem:[#allocation216_spill] sm:$0xff] }
 0x8bd   : > { %2080 = vmatpush1.bf16.msra.mxu0 %v7789_v53  ;;  %v7800_v53 = vld [vmem:[#allocation219_spill] sm:$0xff] }
 0x8be   : > { %2081 = vmatprep.subr.bf16.mxu0 %v7790_v63  ;;  %v7801_v63 = vld [vmem:[#allocation220_spill] sm:$0xff] }
 0x8c1   : > { %2082 = vmatpush1.bf16.msra.mxu0 %v7791_v14  ;;  %v7802_v14 = vld [vmem:[#allocation223_spill] sm:$0xff] }
 0x8c2   : > { %2083 = vmatprep.subr.bf16.mxu0 %v7792_v23  ;;  %v7803_v23 = vld [vmem:[#allocation225_spill] sm:$0xff] }
 0x8c5   : > { %2084 = vmatpush1.bf16.msra.mxu0 %v7793_v52  ;;  %v7804_v52 = vld [vmem:[#allocation227_spill] sm:$0xff] }
 0x8c6   : > { %2085 = vmatprep.subr.bf16.mxu0 %v7794_v31  ;;  %v7805_v31 = vld [vmem:[#allocation229_spill] sm:$0xff] }
 0x8c9   : > { %2086 = vmatpush1.bf16.msra.mxu0 %v7795_v20  ;;  %v7806_v20 = vld [vmem:[#allocation231_spill] sm:$0xff] }
 0x8ca   : > { %2087 = vmatprep.subr.bf16.mxu0 %v7796_v45  ;;  %v7807_v45 = vld [vmem:[#allocation233_spill] sm:$0xff] }
 0x8cd   : > { %2088 = vmatpush1.bf16.msra.mxu0 %v7797_v22  ;;  %v7808_v22 = vld [vmem:[#allocation235_spill] sm:$0xff] }
 0x8ce   : > { %2089 = vmatprep.subr.bf16.mxu0 %v7798_v37  ;;  %v1798_v37 = vpop.permute.xlu1 %1797 }
 0x8d1   : > { %2090 = vmatpush1.bf16.msra.mxu0 %v7799_v38  ;;  %v7809_v38 = vld [vmem:[#allocation166_spill] sm:$0xff] }
 0x8d2   : > { %2091 = vmatprep.subr.bf16.mxu0 %v7800_v53  ;;  %v1800_v58 = vmul.f32 %v1798_v37, %v7809_v38  ;;  %v7810_v53 = vld [vmem:[#allocation167_spill] sm:$0xff] }
 0x8d3   : > { %v1801_v30 = vmul.f32 %v1798_v37, %v7810_v53 }
 0x8d5   : > { %2092 = vmatpush1.bf16.msra.mxu0 %v7801_v63  ;;  %v7811_v63 = vld [vmem:[#allocation168_spill] sm:$0xff] }
 0x8d6   : > { %2093 = vmatprep.subr.bf16.mxu0 %v7802_v14  ;;  %v1803_v7 = vadd.f32 %v1800_v58, %v7811_v63  ;;  %v1802_v63 = vmul.f32 %v1798_v37, %v7533_v61 }
 0x8d9   : > { %2094 = vmatpush1.bf16.msra.mxu0 %v7803_v23  ;;  %v1804_v23 = vadd.f32 %v1801_v30, %v7627_v6 }
 0x8da   : > { %2095 = vmatprep.subr.bf16.mxu0 %v7804_v52 }
 0x8dd   : > { %2096 = vmatpush1.bf16.msra.mxu0 %v7805_v31 }
 0x8de   : > { %2097 = vmatprep.subr.bf16.mxu0 %v7806_v20 }
 0x8e1   : > { %2098 = vmatpush1.bf16.msra.mxu0 %v7807_v45 }
 0x8e2   : > { %2149 = vmatprep.subr.bf16.mxu0 %v7808_v22 }
 0x937   : > { %v1841_v14 = vpop.f32.mrb[28].mxu0  ;;  %v1882_v50 = vpop.f32.mrb[40].mxu1 }
 0x938   : > { %v1930_v52 = vadd.f32 %v1841_v14, %v1803_v7  ;;  %v1843_v2 = vpop.f32.mrb[29].mxu0  ;;  %v5875_v31 = vpop.f32.mrb[41].mxu1  ;;  %v1944_v7 = vadd.f32 %v7534_v34, %v1882_v50  ;;  %v7812_v50 = vld [vmem:[#allocation150_spill] sm:$0xff] }
 0x939   : > { %v1845_v20 = vpop.f32.mrb[30].mxu0  ;;  %v1886_v36 = vpop.f32.mrb[42].mxu1  ;;  %v1931_v33 = vadd.f32 %v1843_v2, %v1804_v23 }
 0x93a   : > { %v3549_v45 = vmul.f32 -1.442695, %v1930_v52  ;;  %v1846_v48 = vpop.f32.mrb[31].mxu0  ;;  %v1887_v22 = vpop.f32.mrb[43].mxu1  ;;  %v1805_v20 = vadd.f32 %v1802_v63, %v7535_v8  ;;  %v7815_v63 = vld [vmem:[#allocation153_spill] sm:$0xff] }
 0x93b   : > { %v3550_v38 = vmul.f32 -1.442695, %v1931_v33 }
 0x93c   : > { %3995 = vpow2.f32 %v3549_v45 }
 0x93d   : > { %3997 = vpow2.f32 %v3550_v38 }
 0x946   : > { %v3996_v53 = vpop.eup %3995 }
 0x947   : > { %v1938_v13 = vadd.f32 1.0, %v3996_v53  ;;  %v3998_v58 = vpop.eup %3997  ;;  %v7813_v53 = vld [vmem:[#allocation151_spill] sm:$0xff] }
 0x948   : > { %v1939_v30 = vadd.f32 1.0, %v3998_v58 }
 0x949   : > { %3999 = vrcp.f32 %v1938_v13 }
 0x94a   : > { %4001 = vrcp.f32 %v1939_v30 }
 0x953   : > { %v4000_v14 = vpop.eup %3999 }
 0x954   : > { %v1945_v36 = vmul.f32 %v4000_v14, %v1944_v7  ;;  %v4002_v2 = vpop.eup %4001  ;;  %v7816_v7 = vld [vmem:[#allocation155_spill] sm:$0xff]  ;;  %v7817_v14 = vld [vmem:[#allocation157_spill] sm:$0xff] }
 0x955   : > { %v1948_v52 = vsub.f32 1.0, %v4002_v2  ;;  %v1950_v45 = vmul.f32 %v4002_v2, %v5715_v10  ;;  %v7814_v10 = vld [vmem:[#allocation152_spill] sm:$0xff]  ;;  %v7821_v2 = vld [vmem:[#allocation174_spill] sm:$0xff] }
 0x956   : > { %v1946_v48 = vadd.f32 %v1945_v36, %v1805_v20  ;;  %v7818_v20 = vld [vmem:[#allocation160_spill] sm:$0xff]  ;;  %v7819_v36 = vld [vmem:[#allocation163_spill] sm:$0xff] }
 0x958   : > { %4003 = vtanh.f32 %v1946_v48  ;;  %v7820_v48 = vld [vmem:[#allocation165_spill] sm:$0xff] }
 0x962   : > { %v4004_v33 = vpop.eup %4003 }
 0x963   : > { %v1949_v22 = vmul.f32 %v4004_v33, %v1948_v52  ;;  %v7822_v52 = vld [vmem:[#allocation176_spill] sm:$0xff]  ;;  %v7823_v33 = vld [vmem:[#allocation178_spill] sm:$0xff] }
 0x965   : > { %v5881_v13 = vadd.f32 %v1950_v45, %v1949_v22  ;;  %v7824_v45 = vld [vmem:[#allocation180_spill] sm:$0xff]  ;;  %v7825_v22 = vld [vmem:[#allocation182_spill] sm:$0xff] }
 0x967   : > { %v5885_v38 = vpack.c.bf16 %v5881_v13, %v5881_v13 }
 0x969   : > { %1986 = vmatmul.mubr.bf16.vlgmr.msra.gmra.mrb[44].mxu1 %v5885_v38 }
 0x96a   : > { %3746 = vmatpush3.bf16.msra.mxu1 %v7812_v50  ;;  %3761 = vmatprep.mubr.msk.bf16.mxu1 %vm4234_vm0, %v7340_v0 }
 0x96b   : > { %3747 = vmatprep.subr.bf16.mxu1 %v7340_v0 }
 0x96e   : > { %3748 = vmatpush3.bf16.msra.mxu1 %v7813_v53 }
 0x96f   : > { %3749 = vmatprep.subr.bf16.mxu1 %v7340_v0 }
 0x972   : > { %3750 = vmatpush3.bf16.msra.mxu1 %v7814_v10 }
 0x973   : > { %3751 = vmatprep.subr.bf16.mxu1 %v7340_v0 }
 0x976   : > { %3752 = vmatpush3.bf16.msra.mxu1 %v7815_v63 }
 0x977   : > { %v1923_v23 = vpop.f32.mrb[32].mxu0  ;;  %3753 = vmatprep.subr.bf16.mxu1 %v7340_v0 }
 0x978   : > { %v5898_v37 = vpop.f32.mrb[33].mxu0 }
 0x979   : > { %v1927_v58 = vpop.f32.mrb[34].mxu0 }
 0x97a   : > { %v1928_v30 = vpop.f32.mrb[35].mxu0  ;;  %3754 = vmatpush3.bf16.msra.mxu1 %v7816_v7  ;;  %v7826_v58 = vld [vmem:[#allocation184_spill] sm:$0xff] }
 0x97b   : > { %3755 = vmatprep.subr.bf16.mxu1 %v7340_v0  ;;  %v7827_v30 = vld [vmem:[#allocation186_spill] sm:$0xff] }
 0x97e   : > { %3756 = vmatpush3.bf16.msra.mxu1 %v7817_v14  ;;  %v7831_v14 = vld [vmem:[#allocation194_spill] sm:$0xff] }
 0x97f   : > { %3757 = vmatprep.subr.bf16.mxu1 %v7340_v0 }
 0x982   : > { %3758 = vmatpush3.bf16.msra.mxu1 %v7818_v20  ;;  %v7828_v20 = vld [vmem:[#allocation189_spill] sm:$0xff] }
 0x983   : > { %3759 = vmatprep.subr.bf16.mxu1 %v7340_v0 }
 0x986   : > { %3760 = vmatpush3.bf16.msra.mxu1 %v7819_v36  ;;  %v7829_v36 = vld [vmem:[#allocation190_spill] sm:$0xff] }
 0x987   : > { %2108 = vmatprep.subr.bf16.mxu1 %v7820_v48  ;;  %v7830_v48 = vld [vmem:[#allocation193_spill] sm:$0xff] }
 0x989   : > { %3762 = vmatmul.mubr.bf16.vlgmr.msra.gmra.mrb[48].mxu1 %v5885_v38 }
 0x98a   : > { %2109 = vmatpush1.bf16.msra.mxu1 %v7821_v2  ;;  %v7832_v2 = vld [vmem:[#allocation197_spill] sm:$0xff] }
 0x98b   : > { %2110 = vmatprep.subr.bf16.mxu1 %v7822_v52  ;;  %v7833_v52 = vld [vmem:[#allocation198_spill] sm:$0xff] }
 0x98e   : > { %2111 = vmatpush1.bf16.msra.mxu1 %v7823_v33  ;;  %v7834_v33 = vld [vmem:[#allocation201_spill] sm:$0xff] }
 0x98f   : > { %2112 = vmatprep.subr.bf16.mxu1 %v7824_v45  ;;  %v7835_v45 = vld [vmem:[#allocation202_spill] sm:$0xff] }
 0x992   : > { %2113 = vmatpush1.bf16.msra.mxu1 %v7825_v22  ;;  %v7836_v22 = vld [vmem:[#allocation205_spill] sm:$0xff] }
 0x993   : > { %2114 = vmatprep.subr.bf16.mxu1 %v7826_v58  ;;  %v7837_v58 = vld [vmem:[#allocation206_spill] sm:$0xff] }
 0x996   : > { %2115 = vmatpush1.bf16.msra.mxu1 %v7827_v30  ;;  %v7838_v30 = vld [vmem:[#allocation209_spill] sm:$0xff] }
 0x997   : > { %2116 = vmatprep.subr.bf16.mxu1 %v7828_v20  ;;  %v7839_v20 = vld [vmem:[#allocation210_spill] sm:$0xff] }
 0x99a   : > { %2117 = vmatpush1.bf16.msra.mxu1 %v7829_v36  ;;  %v7840_v36 = vld [vmem:[#allocation213_spill] sm:$0xff] }
 0x99b   : > { %2118 = vmatprep.subr.bf16.mxu1 %v7830_v48  ;;  %v7841_v48 = vld [vmem:[#allocation214_spill] sm:$0xff] }
 0x99e   : > { %2119 = vmatpush1.bf16.msra.mxu1 %v7831_v14  ;;  %v7842_v14 = vld [vmem:[#allocation217_spill] sm:$0xff] }
 0x99f   : > { %2120 = vmatprep.subr.bf16.mxu1 %v7832_v2  ;;  %v7843_v2 = vld [vmem:[#allocation218_spill] sm:$0xff] }
 0x9a2   : > { %2121 = vmatpush1.bf16.msra.mxu1 %v7833_v52  ;;  %v7844_v52 = vld [vmem:[#allocation221_spill] sm:$0xff] }
 0x9a3   : > { %2122 = vmatprep.subr.bf16.mxu1 %v7834_v33  ;;  %v7845_v33 = vld [vmem:[#allocation222_spill] sm:$0xff] }
 0x9a6   : > { %2123 = vmatpush1.bf16.msra.mxu1 %v7835_v45  ;;  %v7846_v45 = vld [vmem:[#allocation224_spill] sm:$0xff] }
 0x9a7   : > { %2124 = vmatprep.subr.bf16.mxu1 %v7836_v22  ;;  %v7847_v22 = vld [vmem:[#allocation226_spill] sm:$0xff] }
 0x9aa   : > { %2125 = vmatpush1.bf16.msra.mxu1 %v7837_v58  ;;  %v7848_v58 = vld [vmem:[#allocation228_spill] sm:$0xff] }
 0x9ab   : > { %2126 = vmatprep.subr.bf16.mxu1 %v7838_v30  ;;  %v7849_v30 = vld [vmem:[#allocation230_spill] sm:$0xff] }
 0x9ae   : > { %2127 = vmatpush1.bf16.msra.mxu1 %v7839_v20  ;;  %v7850_v20 = vld [vmem:[#allocation232_spill] sm:$0xff] }
 0x9af   : > { %2128 = vmatprep.subr.bf16.mxu1 %v7840_v36  ;;  %v7851_v36 = vld [vmem:[#allocation234_spill] sm:$0xff] }
 0x9b2   : > { %2129 = vmatpush1.bf16.msra.mxu1 %v7841_v48  ;;  %v7852_v48 = vld [vmem:[#allocation149_spill] sm:$0xff] }
 0x9b3   : > { %2130 = vmatprep.subr.bf16.mxu1 %v7842_v14  ;;  %v4239_v14 = vmov 5  }
 0x9b4   : > { %3909 = vset.pattern.permute.xlu0 %v4239_v14 }
 0x9b6   : > { %2131 = vmatpush1.bf16.msra.mxu1 %v7843_v2  ;;  %v7853_v2 = vld [vmem:[#allocation148_spill] sm:$0xff] }
 0x9b7   : > { %2132 = vmatprep.subr.bf16.mxu1 %v7844_v52  ;;  %2057 = vperm.xlu0 %3909, %v7853_v2   ;;  %v2048_v2 = vadd.f32 %v7469_v1, %v5898_v37 }
 0x9ba   : > { %2133 = vmatpush1.bf16.msra.mxu1 %v7845_v33  ;;  %v7854_v33 = vld [vmem:[#allocation236_spill] sm:$0xff] }
 0x9bb   : > { %2134 = vmatprep.subr.bf16.mxu1 %v7846_v45 }
 0x9be   : > { %2135 = vmatpush1.bf16.msra.mxu1 %v7847_v22 }
 0x9bf   : > { %2136 = vmatprep.subr.bf16.mxu1 %v7848_v58 }
 0x9c2   : > { %2137 = vmatpush1.bf16.msra.mxu1 %v7849_v30 }
 0x9c3   : > { %2138 = vmatprep.subr.bf16.mxu1 %v7850_v20 }
 0x9c6   : > { %2139 = vmatpush1.bf16.msra.mxu1 %v7851_v36 }
 0x9c7   : > { %2213 = vmatprep.subr.bf16.mxu1 %v7852_v48 }
 0xa3c   : > { %v1987_v52 = vpop.f32.mrb[44].mxu1 }
 0xa3d   : > { %v1988_v7 = vadd.f32 %v1987_v52, %v7854_v33  ;;  %v1989_v45 = vpop.f32.mrb[45].mxu1 }
 0xa3e   : > { %v1990_v22 = vadd.f32 %v1989_v45, %v5151_v46  ;;  %v1991_v63 = vpop.f32.mrb[46].mxu1 }
 0xa3f   : > { %v2034_v58 = vadd.f32 %v1988_v7, %v5875_v31  ;;  %v1992_v30 = vpop.f32.mrb[47].mxu1 }
 0xa40   : > { %v2035_v10 = vadd.f32 %v1990_v22, %v1923_v23  ;;  %v7859_v30 = vld [vmem:[#allocation248_spill] sm:$0xff] }
 0xa41   : > { %v3551_v20 = vmul.f32 -1.442695, %v2034_v58 }
 0xa42   : > { %v3552_v36 = vmul.f32 -1.442695, %v2035_v10 }
 0xa43   : > { %4005 = vpow2.f32 %v3551_v20 }
 0xa44   : > { %4007 = vpow2.f32 %v3552_v36 }
 0xa4d   : > { %v4006_v48 = vpop.eup %4005 }
 0xa4e   : > { %v2042_v53 = vadd.f32 1.0, %v4006_v48  ;;  %v4008_v14 = vpop.eup %4007 }
 0xa4f   : > { %v2043_v52 = vadd.f32 1.0, %v4008_v14  ;;  %v7860_v14 = vld [vmem:[#allocation249_spill] sm:$0xff] }
 0xa50   : > { %4009 = vrcp.f32 %v2042_v53 }
 0xa51   : > { %4011 = vrcp.f32 %v2043_v52  ;;  %v7861_v52 = vld [vmem:[#allocation250_spill] sm:$0xff] }
 0xa5a   : > { %v4010_v33 = vpop.eup %4009 }
 0xa5b   : > { %v2049_v50 = vmul.f32 %v4010_v33, %v2048_v2  ;;  %v4012_v10 = vpop.eup %4011  ;;  %v7857_v2 = vld [vmem:[#allocation246_spill] sm:$0xff]  ;;  %v7858_v33 = vld [vmem:[#allocation247_spill] sm:$0xff] }
 0xa5c   : > { %v2028_v45 = vpop.f32.mrb[48].mxu1  ;;  %v2052_v36 = vsub.f32 1.0, %v4012_v10  ;;  %v2054_v22 = vmul.f32 %v4012_v10, %v5783_v5  ;;  %v7855_v5 = vld [vmem:[#allocation244_spill] sm:$0xff] }
 0xa5d   : > { %v2029_v31 = vadd.f32 %v2028_v45, %v5157_v57  ;;  %v3763_v63 = vpop.f32.mrb[49].mxu1  ;;  %v7862_v45 = vld [vmem:[#allocation251_spill] sm:$0xff]  ;;  %v7868_v10 = vld [vmem:[#allocation164_spill] sm:$0xff] }
 0xa5e   : > { %v2031_v23 = vpop.f32.mrb[50].mxu1  ;;  %v7864_v63 = vld [vmem:[#allocation253_spill] sm:$0xff] }
 0xa5f   : > { %v2050_v7 = vadd.f32 %v2049_v50, %v2029_v31  ;;  %v3764_v20 = vpop.f32.mrb[51].mxu1  ;;  %v7856_v50 = vld [vmem:[#allocation245_spill] sm:$0xff]  ;;  %v7863_v31 = vld [vmem:[#allocation252_spill] sm:$0xff]  ;;  %v7865_v23 = vld [vmem:[#allocation254_spill] sm:$0xff] }
 0xa60   : > { %v7867_v20 = vld [vmem:[#allocation256_spill] sm:$0xff] }
 0xa61   : > { %4013 = vtanh.f32 %v2050_v7  ;;  %v7866_v7 = vld [vmem:[#allocation255_spill] sm:$0xff] }
 0xa6b   : > { %v4014_v48 = vpop.eup %4013 }
 0xa6c   : > { %v2053_v53 = vmul.f32 %v4014_v48, %v2052_v36  ;;  %v7869_v36 = vld [vmem:[#allocation173_spill] sm:$0xff]  ;;  %v7870_v48 = vld [vmem:[#allocation175_spill] sm:$0xff] }
 0xa6e   : > { %v5949_v58 = vadd.f32 %v2054_v22, %v2053_v53  ;;  %v7871_v53 = vld [vmem:[#allocation177_spill] sm:$0xff]  ;;  %v7872_v22 = vld [vmem:[#allocation179_spill] sm:$0xff] }
 0xa70   : > { %v2066_v37 = vpack.c.bf16 %v5949_v58, %v5949_v58 }
 0xa72   : > { %2099 = vmatprep.mubr.bf16.mxu0 %v2066_v37  ;;  %2140 = vmatprep.mubr.bf16.mxu1 %v2066_v37 }
 0xa73   : > { %2100 = vmatmul.mubr.bf16.vlgmr.msra.gmra.mrb[36].mxu0 %v5885_v38  ;;  %2141 = vmatmul.mubr.bf16.vlgmr.msra.gmra.mrb[52].mxu1 %v5885_v38 }
 0xa74   : > { %2150 = vmatpush1.bf16.msra.mxu0 %v5167_v15  ;;  %2181 = vmatprep.mubr.bf16.mxu0 %v2066_v37  ;;  %v7873_v37 = vld [vmem:[#allocation181_spill] sm:$0xff] }
 0xa75   : > { %2151 = vmatprep.subr.bf16.mxu0 %v5171_v11  ;;  %2214 = vmatpush1.bf16.msra.mxu1 %v4649_v44 }
 0xa76   : > { %2215 = vmatprep.subr.bf16.mxu1 %v4661_v41  ;;  %2245 = vmatprep.mubr.bf16.mxu1 %v7474_v51 }
 0xa78   : > { %2152 = vmatpush1.bf16.msra.mxu0 %v5178_v55 }
 0xa79   : > { %2153 = vmatprep.subr.bf16.mxu0 %v5183_v60  ;;  %2216 = vmatpush1.bf16.msra.mxu1 %v4666_v24 }
 0xa7a   : > { %2217 = vmatprep.subr.bf16.mxu1 %v4677_v42 }
 0xa7c   : > { %2154 = vmatpush1.bf16.msra.mxu0 %v5191_v4 }
 0xa7d   : > { %2155 = vmatprep.subr.bf16.mxu0 %v5196_v43  ;;  %2218 = vmatpush1.bf16.msra.mxu1 %v4682_v12 }
 0xa7e   : > { %2219 = vmatprep.subr.bf16.mxu1 %v4693_v21 }
 0xa80   : > { %2156 = vmatpush1.bf16.msra.mxu0 %v5203_v18 }
 0xa81   : > { %2157 = vmatprep.subr.bf16.mxu0 %v5208_v39  ;;  %2220 = vmatpush1.bf16.msra.mxu1 %v4698_v9 }
 0xa82   : > { %2221 = vmatprep.subr.bf16.mxu1 %v7579_v47 }
 0xa84   : > { %2158 = vmatpush1.bf16.msra.mxu0 %v7580_v32 }
 0xa85   : > { %2159 = vmatprep.subr.bf16.mxu0 %v5220_v49  ;;  %2222 = vmatpush1.bf16.msra.mxu1 %v4714_v27 }
 0xa86   : > { %2223 = vmatprep.subr.bf16.mxu1 %v7581_v29 }
 0xa88   : > { %2160 = vmatpush1.bf16.msra.mxu0 %v7582_v16 }
 0xa89   : > { %2161 = vmatprep.subr.bf16.mxu0 %v5232_v62  ;;  %2224 = vmatpush1.bf16.msra.mxu1 %v4729_v35 }
 0xa8a   : > { %2225 = vmatprep.subr.bf16.mxu1 %v7583_v3 }
 0xa8c   : > { %2162 = vmatpush1.bf16.msra.mxu0 %v7584_v59 }
 0xa8d   : > { %2163 = vmatprep.subr.bf16.mxu0 %v5244_v40  ;;  %2226 = vmatpush1.bf16.msra.mxu1 %v7585_v28 }
 0xa8e   : > { %2227 = vmatprep.subr.bf16.mxu1 %v7586_v19 }
 0xa90   : > { %2164 = vmatpush1.bf16.msra.mxu0 %v7587_v56 }
 0xa91   : > { %2165 = vmatprep.subr.bf16.mxu0 %v7671_v17  ;;  %2228 = vmatpush1.bf16.msra.mxu1 %v7589_v54 }
 0xa92   : > { %3765 = vmatprep.subr.bf16.mxu1 %v7340_v0 }
 0xa94   : > { %2166 = vmatpush1.bf16.msra.mxu0 %v7590_v25 }
 0xa95   : > { %2167 = vmatprep.subr.bf16.mxu0 %v7591_v26 }
 0xa98   : > { %2168 = vmatpush1.bf16.msra.mxu0 %v7855_v5 }
 0xa99   : > { %2169 = vmatprep.subr.bf16.mxu0 %v7856_v50 }
 0xa9c   : > { %2170 = vmatpush1.bf16.msra.mxu0 %v7857_v2 }
 0xa9d   : > { %2171 = vmatprep.subr.bf16.mxu0 %v7858_v33 }
 0xaa0   : > { %2172 = vmatpush1.bf16.msra.mxu0 %v7859_v30 }
 0xaa1   : > { %2173 = vmatprep.subr.bf16.mxu0 %v7860_v14 }
 0xaa4   : > { %2174 = vmatpush1.bf16.msra.mxu0 %v7861_v52 }
 0xaa5   : > { %2175 = vmatprep.subr.bf16.mxu0 %v7862_v45 }
 0xaa8   : > { %2176 = vmatpush1.bf16.msra.mxu0 %v7863_v31 }
 0xaa9   : > { %2177 = vmatprep.subr.bf16.mxu0 %v7864_v63  ;;  %v7874_v63 = vld [vmem:[#allocation183_spill] sm:$0xff] }
 0xaac   : > { %2178 = vmatpush1.bf16.msra.mxu0 %v7865_v23  ;;  %v7875_v23 = vld [vmem:[#allocation185_spill] sm:$0xff] }
 0xaad   : > { %2179 = vmatprep.subr.bf16.mxu0 %v7866_v7  ;;  %v7876_v7 = vld [vmem:[#allocation187_spill] sm:$0xff] }
 0xab0   : > { %2180 = vmatpush1.bf16.msra.mxu0 %v7867_v20  ;;  %v7877_v20 = vld [vmem:[#allocation188_spill] sm:$0xff] }
 0xab1   : > { %2327 = vmatprep.subr.bf16.mxu0 %v7868_v10  ;;  %v7878_v10 = vld [vmem:[#allocation191_spill] sm:$0xff] }
 0xab3   : > { %2182 = vmatmul.mubr.bf16.vlgmr.msra.gmra.mrb[40].mxu0 %v5885_v38  ;;  %v7879_v38 = vld [vmem:[#allocation192_spill] sm:$0xff] }
 0xab4   : > { %2328 = vmatpush1.bf16.msra.mxu0 %v7869_v36  ;;  %v7880_v36 = vld [vmem:[#allocation195_spill] sm:$0xff] }
 0xab5   : > { %2329 = vmatprep.subr.bf16.mxu0 %v7870_v48  ;;  %v7881_v48 = vld [vmem:[#allocation196_spill] sm:$0xff] }
 0xab8   : > { %2330 = vmatpush1.bf16.msra.mxu0 %v7871_v53  ;;  %v7882_v53 = vld [vmem:[#allocation199_spill] sm:$0xff] }
 0xab9   : > { %2331 = vmatprep.subr.bf16.mxu0 %v7872_v22  ;;  %v7883_v22 = vld [vmem:[#allocation200_spill] sm:$0xff] }
 0xabc   : > { %2332 = vmatpush1.bf16.msra.mxu0 %v7873_v37  ;;  %v7884_v37 = vld [vmem:[#allocation203_spill] sm:$0xff] }
 0xabd   : > { %2333 = vmatprep.subr.bf16.mxu0 %v7874_v63  ;;  %v7885_v63 = vld [vmem:[#allocation204_spill] sm:$0xff] }
 0xac0   : > { %2334 = vmatpush1.bf16.msra.mxu0 %v7875_v23  ;;  %v7886_v23 = vld [vmem:[#allocation207_spill] sm:$0xff] }
 0xac1   : > { %2335 = vmatprep.subr.bf16.mxu0 %v7876_v7  ;;  %v7887_v7 = vld [vmem:[#allocation208_spill] sm:$0xff] }
 0xac4   : > { %2336 = vmatpush1.bf16.msra.mxu0 %v7877_v20  ;;  %v7888_v20 = vld [vmem:[#allocation211_spill] sm:$0xff] }
 0xac5   : > { %2337 = vmatprep.subr.bf16.mxu0 %v7878_v10  ;;  %v7889_v10 = vld [vmem:[#allocation212_spill] sm:$0xff] }
 0xac8   : > { %2338 = vmatpush1.bf16.msra.mxu0 %v7879_v38  ;;  %v7890_v38 = vld [vmem:[#allocation215_spill] sm:$0xff] }
 0xac9   : > { %2339 = vmatprep.subr.bf16.mxu0 %v7880_v36  ;;  %v7891_v36 = vld [vmem:[#allocation216_spill] sm:$0xff] }
 0xacc   : > { %2340 = vmatpush1.bf16.msra.mxu0 %v7881_v48  ;;  %v7892_v48 = vld [vmem:[#allocation219_spill] sm:$0xff] }
 0xacd   : > { %2341 = vmatprep.subr.bf16.mxu0 %v7882_v53  ;;  %v7893_v53 = vld [vmem:[#allocation220_spill] sm:$0xff] }
 0xad0   : > { %2342 = vmatpush1.bf16.msra.mxu0 %v7883_v22  ;;  %v7894_v22 = vld [vmem:[#allocation223_spill] sm:$0xff] }
 0xad1   : > { %2343 = vmatprep.subr.bf16.mxu0 %v7884_v37  ;;  %v7895_v37 = vld [vmem:[#allocation225_spill] sm:$0xff] }
 0xad4   : > { %2344 = vmatpush1.bf16.msra.mxu0 %v7885_v63  ;;  %v7896_v63 = vld [vmem:[#allocation227_spill] sm:$0xff] }
 0xad5   : > { %2345 = vmatprep.subr.bf16.mxu0 %v7886_v23  ;;  %v7897_v23 = vld [vmem:[#allocation229_spill] sm:$0xff] }
 0xad8   : > { %2346 = vmatpush1.bf16.msra.mxu0 %v7887_v7  ;;  %v7898_v7 = vld [vmem:[#allocation231_spill] sm:$0xff] }
 0xad9   : > { %2347 = vmatprep.subr.bf16.mxu0 %v7888_v20  ;;  %v7899_v20 = vld [vmem:[#allocation233_spill] sm:$0xff] }
 0xadc   : > { %2348 = vmatpush1.bf16.msra.mxu0 %v7889_v10  ;;  %v7900_v10 = vld [vmem:[#allocation235_spill] sm:$0xff] }
 0xadd   : > { %2349 = vmatprep.subr.bf16.mxu0 %v7890_v38  ;;  %v2058_v38 = vpop.permute.xlu0 %2057 }
 0xae0   : > { %2350 = vmatpush1.bf16.msra.mxu0 %v7891_v36  ;;  %v7901_v36 = vld [vmem:[#allocation166_spill] sm:$0xff] }
 0xae1   : > { %2351 = vmatprep.subr.bf16.mxu0 %v7892_v48  ;;  %v2060_v31 = vmul.f32 %v2058_v38, %v7901_v36  ;;  %v7902_v48 = vld [vmem:[#allocation167_spill] sm:$0xff] }
 0xae2   : > { %v2061_v45 = vmul.f32 %v2058_v38, %v7902_v48 }
 0xae4   : > { %2352 = vmatpush1.bf16.msra.mxu0 %v7893_v53  ;;  %v7903_v53 = vld [vmem:[#allocation168_spill] sm:$0xff] }
 0xae5   : > { %2353 = vmatprep.subr.bf16.mxu0 %v7894_v22  ;;  %v2063_v52 = vadd.f32 %v2060_v31, %v7903_v53  ;;  %v2062_v53 = vmul.f32 %v2058_v38, %v7533_v61 }
 0xae8   : > { %2354 = vmatpush1.bf16.msra.mxu0 %v7895_v37  ;;  %v2064_v37 = vadd.f32 %v2061_v45, %v7627_v6 }
 0xae9   : > { %2355 = vmatprep.subr.bf16.mxu0 %v7896_v63 }
 0xaec   : > { %2356 = vmatpush1.bf16.msra.mxu0 %v7897_v23 }
 0xaed   : > { %2357 = vmatprep.subr.bf16.mxu0 %v7898_v7 }
 0xaf0   : > { %2358 = vmatpush1.bf16.msra.mxu0 %v7899_v20 }
 0xaf1   : > { %2409 = vmatprep.subr.bf16.mxu0 %v7900_v10 }
 0xb46   : > { %v2101_v22 = vpop.f32.mrb[36].mxu0  ;;  %v2142_v14 = vpop.f32.mrb[52].mxu1 }
 0xb47   : > { %v2190_v63 = vadd.f32 %v2101_v22, %v2063_v52  ;;  %v2103_v30 = vpop.f32.mrb[37].mxu0  ;;  %v6041_v23 = vpop.f32.mrb[53].mxu1  ;;  %v2204_v52 = vadd.f32 %v7534_v34, %v2142_v14  ;;  %v7904_v14 = vld [vmem:[#allocation150_spill] sm:$0xff] }
 0xb48   : > { %v2105_v7 = vpop.f32.mrb[38].mxu0  ;;  %v2146_v33 = vpop.f32.mrb[54].mxu1  ;;  %v2191_v50 = vadd.f32 %v2103_v30, %v2064_v37 }
 0xb49   : > { %v3553_v20 = vmul.f32 -1.442695, %v2190_v63  ;;  %v2106_v2 = vpop.f32.mrb[39].mxu0  ;;  %v2147_v10 = vpop.f32.mrb[55].mxu1  ;;  %v2065_v7 = vadd.f32 %v2062_v53, %v7535_v8  ;;  %v7907_v53 = vld [vmem:[#allocation153_spill] sm:$0xff] }
 0xb4a   : > { %v3554_v36 = vmul.f32 -1.442695, %v2191_v50 }
 0xb4b   : > { %4015 = vpow2.f32 %v3553_v20 }
 0xb4c   : > { %4017 = vpow2.f32 %v3554_v36 }
 0xb55   : > { %v4016_v48 = vpop.eup %4015 }
 0xb56   : > { %v2198_v5 = vadd.f32 1.0, %v4016_v48  ;;  %v4018_v31 = vpop.eup %4017  ;;  %v7905_v48 = vld [vmem:[#allocation151_spill] sm:$0xff] }
 0xb57   : > { %v2199_v45 = vadd.f32 1.0, %v4018_v31 }
 0xb58   : > { %4019 = vrcp.f32 %v2198_v5 }
 0xb59   : > { %4021 = vrcp.f32 %v2199_v45 }
 0xb62   : > { %v4020_v22 = vpop.eup %4019 }
 0xb63   : > { %v2205_v33 = vmul.f32 %v4020_v22, %v2204_v52  ;;  %v4022_v30 = vpop.eup %4021  ;;  %v7908_v52 = vld [vmem:[#allocation155_spill] sm:$0xff]  ;;  %v7909_v22 = vld [vmem:[#allocation157_spill] sm:$0xff] }
 0xb64   : > { %v2208_v63 = vsub.f32 1.0, %v4022_v30  ;;  %v2210_v20 = vmul.f32 %v4022_v30, %v5881_v13  ;;  %v7906_v13 = vld [vmem:[#allocation152_spill] sm:$0xff]  ;;  %v7913_v30 = vld [vmem:[#allocation174_spill] sm:$0xff] }
 0xb65   : > { %v2206_v2 = vadd.f32 %v2205_v33, %v2065_v7  ;;  %v7910_v7 = vld [vmem:[#allocation160_spill] sm:$0xff]  ;;  %v7911_v33 = vld [vmem:[#allocation163_spill] sm:$0xff] }
 0xb67   : > { %4023 = vtanh.f32 %v2206_v2  ;;  %v7912_v2 = vld [vmem:[#allocation165_spill] sm:$0xff] }
 0xb71   : > { %v4024_v50 = vpop.eup %4023 }
 0xb72   : > { %v2209_v10 = vmul.f32 %v4024_v50, %v2208_v63  ;;  %v7914_v63 = vld [vmem:[#allocation176_spill] sm:$0xff]  ;;  %v7915_v50 = vld [vmem:[#allocation178_spill] sm:$0xff] }
 0xb74   : > { %v6047_v5 = vadd.f32 %v2210_v20, %v2209_v10  ;;  %v7916_v20 = vld [vmem:[#allocation180_spill] sm:$0xff]  ;;  %v7917_v10 = vld [vmem:[#allocation182_spill] sm:$0xff] }
 0xb76   : > { %v6051_v36 = vpack.c.bf16 %v6047_v5, %v6047_v5 }
 0xb78   : > { %2246 = vmatmul.mubr.bf16.vlgmr.msra.gmra.mrb[56].mxu1 %v6051_v36 }
 0xb79   : > { %3766 = vmatpush3.bf16.msra.mxu1 %v7904_v14  ;;  %3781 = vmatprep.mubr.msk.bf16.mxu1 %vm4234_vm0, %v7340_v0 }
 0xb7a   : > { %3767 = vmatprep.subr.bf16.mxu1 %v7340_v0 }
 0xb7d   : > { %3768 = vmatpush3.bf16.msra.mxu1 %v7905_v48 }
 0xb7e   : > { %3769 = vmatprep.subr.bf16.mxu1 %v7340_v0 }
 0xb81   : > { %3770 = vmatpush3.bf16.msra.mxu1 %v7906_v13 }
 0xb82   : > { %3771 = vmatprep.subr.bf16.mxu1 %v7340_v0 }
 0xb85   : > { %3772 = vmatpush3.bf16.msra.mxu1 %v7907_v53 }
 0xb86   : > { %v2183_v37 = vpop.f32.mrb[40].mxu0  ;;  %3773 = vmatprep.subr.bf16.mxu1 %v7340_v0 }
 0xb87   : > { %v6064_v38 = vpop.f32.mrb[41].mxu0 }
 0xb88   : > { %v2187_v31 = vpop.f32.mrb[42].mxu0 }
 0xb89   : > { %v2188_v45 = vpop.f32.mrb[43].mxu0  ;;  %3774 = vmatpush3.bf16.msra.mxu1 %v7908_v52  ;;  %v7918_v31 = vld [vmem:[#allocation184_spill] sm:$0xff] }
 0xb8a   : > { %3775 = vmatprep.subr.bf16.mxu1 %v7340_v0  ;;  %v7919_v45 = vld [vmem:[#allocation186_spill] sm:$0xff] }
 0xb8d   : > { %3776 = vmatpush3.bf16.msra.mxu1 %v7909_v22  ;;  %v7923_v22 = vld [vmem:[#allocation194_spill] sm:$0xff] }
 0xb8e   : > { %3777 = vmatprep.subr.bf16.mxu1 %v7340_v0 }
 0xb91   : > { %3778 = vmatpush3.bf16.msra.mxu1 %v7910_v7  ;;  %v7920_v7 = vld [vmem:[#allocation189_spill] sm:$0xff] }
 0xb92   : > { %3779 = vmatprep.subr.bf16.mxu1 %v7340_v0 }
 0xb95   : > { %3780 = vmatpush3.bf16.msra.mxu1 %v7911_v33  ;;  %v7921_v33 = vld [vmem:[#allocation190_spill] sm:$0xff] }
 0xb96   : > { %2368 = vmatprep.subr.bf16.mxu1 %v7912_v2  ;;  %v7922_v2 = vld [vmem:[#allocation193_spill] sm:$0xff] }
 0xb98   : > { %3782 = vmatmul.mubr.bf16.vlgmr.msra.gmra.mrb[60].mxu1 %v6051_v36 }
 0xb99   : > { %2369 = vmatpush1.bf16.msra.mxu1 %v7913_v30  ;;  %v7924_v30 = vld [vmem:[#allocation197_spill] sm:$0xff] }
 0xb9a   : > { %2370 = vmatprep.subr.bf16.mxu1 %v7914_v63  ;;  %v7925_v63 = vld [vmem:[#allocation198_spill] sm:$0xff] }
 0xb9d   : > { %2371 = vmatpush1.bf16.msra.mxu1 %v7915_v50  ;;  %v7926_v50 = vld [vmem:[#allocation201_spill] sm:$0xff] }
 0xb9e   : > { %2372 = vmatprep.subr.bf16.mxu1 %v7916_v20  ;;  %v7927_v20 = vld [vmem:[#allocation202_spill] sm:$0xff] }
 0xba1   : > { %2373 = vmatpush1.bf16.msra.mxu1 %v7917_v10  ;;  %v7928_v10 = vld [vmem:[#allocation205_spill] sm:$0xff] }
 0xba2   : > { %2374 = vmatprep.subr.bf16.mxu1 %v7918_v31  ;;  %v7929_v31 = vld [vmem:[#allocation206_spill] sm:$0xff] }
 0xba5   : > { %2375 = vmatpush1.bf16.msra.mxu1 %v7919_v45  ;;  %v7930_v45 = vld [vmem:[#allocation209_spill] sm:$0xff] }
 0xba6   : > { %2376 = vmatprep.subr.bf16.mxu1 %v7920_v7  ;;  %v7931_v7 = vld [vmem:[#allocation210_spill] sm:$0xff] }
 0xba9   : > { %2377 = vmatpush1.bf16.msra.mxu1 %v7921_v33  ;;  %v7932_v33 = vld [vmem:[#allocation213_spill] sm:$0xff] }
 0xbaa   : > { %2378 = vmatprep.subr.bf16.mxu1 %v7922_v2  ;;  %v7933_v2 = vld [vmem:[#allocation214_spill] sm:$0xff] }
 0xbad   : > { %2379 = vmatpush1.bf16.msra.mxu1 %v7923_v22  ;;  %v7934_v22 = vld [vmem:[#allocation217_spill] sm:$0xff] }
 0xbae   : > { %2380 = vmatprep.subr.bf16.mxu1 %v7924_v30  ;;  %v7935_v30 = vld [vmem:[#allocation218_spill] sm:$0xff] }
 0xbb1   : > { %2381 = vmatpush1.bf16.msra.mxu1 %v7925_v63  ;;  %v7936_v63 = vld [vmem:[#allocation221_spill] sm:$0xff] }
 0xbb2   : > { %2382 = vmatprep.subr.bf16.mxu1 %v7926_v50  ;;  %v7937_v50 = vld [vmem:[#allocation222_spill] sm:$0xff] }
 0xbb5   : > { %2383 = vmatpush1.bf16.msra.mxu1 %v7927_v20  ;;  %v7938_v20 = vld [vmem:[#allocation224_spill] sm:$0xff] }
 0xbb6   : > { %2384 = vmatprep.subr.bf16.mxu1 %v7928_v10  ;;  %v7939_v10 = vld [vmem:[#allocation226_spill] sm:$0xff] }
 0xbb9   : > { %2385 = vmatpush1.bf16.msra.mxu1 %v7929_v31  ;;  %v7940_v31 = vld [vmem:[#allocation228_spill] sm:$0xff] }
 0xbba   : > { %2386 = vmatprep.subr.bf16.mxu1 %v7930_v45  ;;  %v7941_v45 = vld [vmem:[#allocation230_spill] sm:$0xff] }
 0xbbd   : > { %2387 = vmatpush1.bf16.msra.mxu1 %v7931_v7  ;;  %v7942_v7 = vld [vmem:[#allocation232_spill] sm:$0xff] }
 0xbbe   : > { %2388 = vmatprep.subr.bf16.mxu1 %v7932_v33  ;;  %v7943_v33 = vld [vmem:[#allocation234_spill] sm:$0xff] }
 0xbc1   : > { %2389 = vmatpush1.bf16.msra.mxu1 %v7933_v2  ;;  %v7944_v2 = vld [vmem:[#allocation149_spill] sm:$0xff] }
 0xbc2   : > { %2390 = vmatprep.subr.bf16.mxu1 %v7934_v22  ;;  %v4240_v22 = vmov 6  }
 0xbc3   : > { %3910 = vset.pattern.permute.xlu1 %v4240_v22 }
 0xbc5   : > { %2391 = vmatpush1.bf16.msra.mxu1 %v7935_v30  ;;  %v7945_v30 = vld [vmem:[#allocation148_spill] sm:$0xff] }
 0xbc6   : > { %2392 = vmatprep.subr.bf16.mxu1 %v7936_v63  ;;  %2317 = vperm.xlu1 %3910, %v7945_v30   ;;  %v2308_v30 = vadd.f32 %v7469_v1, %v6064_v38 }
 0xbc9   : > { %2393 = vmatpush1.bf16.msra.mxu1 %v7937_v50  ;;  %v7946_v50 = vld [vmem:[#allocation236_spill] sm:$0xff] }
 0xbca   : > { %2394 = vmatprep.subr.bf16.mxu1 %v7938_v20 }
 0xbcd   : > { %2395 = vmatpush1.bf16.msra.mxu1 %v7939_v10 }
 0xbce   : > { %2396 = vmatprep.subr.bf16.mxu1 %v7940_v31 }
 0xbd1   : > { %2397 = vmatpush1.bf16.msra.mxu1 %v7941_v45 }
 0xbd2   : > { %2398 = vmatprep.subr.bf16.mxu1 %v7942_v7 }
 0xbd5   : > { %2399 = vmatpush1.bf16.msra.mxu1 %v7943_v33 }
 0xbd6   : > { %2473 = vmatprep.subr.bf16.mxu1 %v7944_v2 }
 0xc4b   : > { %v2247_v63 = vpop.f32.mrb[56].mxu1 }
 0xc4c   : > { %v2248_v52 = vadd.f32 %v2247_v63, %v7946_v50  ;;  %v2249_v20 = vpop.f32.mrb[57].mxu1 }
 0xc4d   : > { %v2250_v10 = vadd.f32 %v2249_v20, %v5151_v46  ;;  %v2251_v53 = vpop.f32.mrb[58].mxu1 }
 0xc4e   : > { %v2294_v31 = vadd.f32 %v2248_v52, %v6041_v23  ;;  %v2252_v45 = vpop.f32.mrb[59].mxu1 }
 0xc4f   : > { %v2295_v13 = vadd.f32 %v2250_v10, %v2183_v37  ;;  %v7951_v45 = vld [vmem:[#allocation248_spill] sm:$0xff] }
 0xc50   : > { %v3555_v7 = vmul.f32 -1.442695, %v2294_v31 }
 0xc51   : > { %v3556_v33 = vmul.f32 -1.442695, %v2295_v13 }
 0xc52   : > { %4025 = vpow2.f32 %v3555_v7 }
 0xc53   : > { %4027 = vpow2.f32 %v3556_v33 }
 0xc5c   : > { %v4026_v2 = vpop.eup %4025 }
 0xc5d   : > { %v2302_v48 = vadd.f32 1.0, %v4026_v2  ;;  %v4028_v22 = vpop.eup %4027 }
 0xc5e   : > { %v2303_v63 = vadd.f32 1.0, %v4028_v22  ;;  %v7952_v22 = vld [vmem:[#allocation249_spill] sm:$0xff] }
 0xc5f   : > { %4029 = vrcp.f32 %v2302_v48 }
 0xc60   : > { %4031 = vrcp.f32 %v2303_v63  ;;  %v7953_v63 = vld [vmem:[#allocation250_spill] sm:$0xff] }
 0xc69   : > { %v4030_v50 = vpop.eup %4029 }
 0xc6a   : > { %v2309_v14 = vmul.f32 %v4030_v50, %v2308_v30  ;;  %v4032_v13 = vpop.eup %4031  ;;  %v7949_v30 = vld [vmem:[#allocation246_spill] sm:$0xff]  ;;  %v7950_v50 = vld [vmem:[#allocation247_spill] sm:$0xff] }
 0xc6b   : > { %v2288_v20 = vpop.f32.mrb[60].mxu1  ;;  %v2312_v33 = vsub.f32 1.0, %v4032_v13  ;;  %v2314_v10 = vmul.f32 %v4032_v13, %v5949_v58  ;;  %v7947_v58 = vld [vmem:[#allocation244_spill] sm:$0xff] }
 0xc6c   : > { %v2289_v23 = vadd.f32 %v2288_v20, %v5157_v57  ;;  %v3783_v53 = vpop.f32.mrb[61].mxu1  ;;  %v7954_v20 = vld [vmem:[#allocation251_spill] sm:$0xff]  ;;  %v7960_v13 = vld [vmem:[#allocation164_spill] sm:$0xff] }
 0xc6d   : > { %v2291_v37 = vpop.f32.mrb[62].mxu1  ;;  %v7956_v53 = vld [vmem:[#allocation253_spill] sm:$0xff] }
 0xc6e   : > { %v2310_v52 = vadd.f32 %v2309_v14, %v2289_v23  ;;  %v3784_v7 = vpop.f32.mrb[63].mxu1  ;;  %v7948_v14 = vld [vmem:[#allocation245_spill] sm:$0xff]  ;;  %v7955_v23 = vld [vmem:[#allocation252_spill] sm:$0xff]  ;;  %v7957_v37 = vld [vmem:[#allocation254_spill] sm:$0xff] }
 0xc6f   : > { %v7959_v7 = vld [vmem:[#allocation256_spill] sm:$0xff] }
 0xc70   : > { %4033 = vtanh.f32 %v2310_v52  ;;  %v7958_v52 = vld [vmem:[#allocation255_spill] sm:$0xff] }
 0xc7a   : > { %v4034_v2 = vpop.eup %4033 }
 0xc7b   : > { %v2313_v48 = vmul.f32 %v4034_v2, %v2312_v33  ;;  %v7961_v33 = vld [vmem:[#allocation173_spill] sm:$0xff]  ;;  %v7962_v2 = vld [vmem:[#allocation175_spill] sm:$0xff] }
 0xc7d   : > { %v6115_v31 = vadd.f32 %v2314_v10, %v2313_v48  ;;  %v7963_v48 = vld [vmem:[#allocation177_spill] sm:$0xff]  ;;  %v7964_v10 = vld [vmem:[#allocation179_spill] sm:$0xff] }
 0xc7f   : > { %v2326_v38 = vpack.c.bf16 %v6115_v31, %v6115_v31 }
 0xc81   : > { %2359 = vmatprep.mubr.bf16.mxu0 %v2326_v38  ;;  %2400 = vmatprep.mubr.bf16.mxu1 %v2326_v38 }
 0xc82   : > { %2360 = vmatmul.mubr.bf16.vlgmr.msra.gmra.mrb[44].mxu0 %v6051_v36  ;;  %2401 = vmatmul.mubr.bf16.vlgmr.msra.gmra.mrb[64].mxu1 %v6051_v36 }
 0xc83   : > { %2410 = vmatpush1.bf16.msra.mxu0 %v5167_v15  ;;  %2441 = vmatprep.mubr.bf16.mxu0 %v2326_v38  ;;  %v7965_v38 = vld [vmem:[#allocation181_spill] sm:$0xff] }
 0xc84   : > { %2411 = vmatprep.subr.bf16.mxu0 %v5171_v11  ;;  %2474 = vmatpush1.bf16.msra.mxu1 %v4649_v44 }
 0xc85   : > { %2475 = vmatprep.subr.bf16.mxu1 %v4661_v41  ;;  %2505 = vmatprep.mubr.bf16.mxu1 %v7474_v51 }
 0xc87   : > { %2412 = vmatpush1.bf16.msra.mxu0 %v5178_v55 }
 0xc88   : > { %2413 = vmatprep.subr.bf16.mxu0 %v5183_v60  ;;  %2476 = vmatpush1.bf16.msra.mxu1 %v4666_v24 }
 0xc89   : > { %2477 = vmatprep.subr.bf16.mxu1 %v4677_v42 }
 0xc8b   : > { %2414 = vmatpush1.bf16.msra.mxu0 %v5191_v4 }
 0xc8c   : > { %2415 = vmatprep.subr.bf16.mxu0 %v5196_v43  ;;  %2478 = vmatpush1.bf16.msra.mxu1 %v4682_v12 }
 0xc8d   : > { %2479 = vmatprep.subr.bf16.mxu1 %v4693_v21 }
 0xc8f   : > { %2416 = vmatpush1.bf16.msra.mxu0 %v5203_v18 }
 0xc90   : > { %2417 = vmatprep.subr.bf16.mxu0 %v5208_v39  ;;  %2480 = vmatpush1.bf16.msra.mxu1 %v4698_v9 }
 0xc91   : > { %2481 = vmatprep.subr.bf16.mxu1 %v7579_v47 }
 0xc93   : > { %2418 = vmatpush1.bf16.msra.mxu0 %v7580_v32 }
 0xc94   : > { %2419 = vmatprep.subr.bf16.mxu0 %v5220_v49  ;;  %2482 = vmatpush1.bf16.msra.mxu1 %v4714_v27 }
 0xc95   : > { %2483 = vmatprep.subr.bf16.mxu1 %v7581_v29 }
 0xc97   : > { %2420 = vmatpush1.bf16.msra.mxu0 %v7582_v16 }
 0xc98   : > { %2421 = vmatprep.subr.bf16.mxu0 %v5232_v62  ;;  %2484 = vmatpush1.bf16.msra.mxu1 %v4729_v35 }
 0xc99   : > { %2485 = vmatprep.subr.bf16.mxu1 %v7583_v3 }
 0xc9b   : > { %2422 = vmatpush1.bf16.msra.mxu0 %v7584_v59 }
 0xc9c   : > { %2423 = vmatprep.subr.bf16.mxu0 %v5244_v40  ;;  %2486 = vmatpush1.bf16.msra.mxu1 %v7585_v28 }
 0xc9d   : > { %2487 = vmatprep.subr.bf16.mxu1 %v7586_v19 }
 0xc9f   : > { %2424 = vmatpush1.bf16.msra.mxu0 %v7587_v56 }
 0xca0   : > { %2425 = vmatprep.subr.bf16.mxu0 %v7671_v17  ;;  %2488 = vmatpush1.bf16.msra.mxu1 %v7589_v54 }
 0xca1   : > { %3785 = vmatprep.subr.bf16.mxu1 %v7340_v0 }
 0xca3   : > { %2426 = vmatpush1.bf16.msra.mxu0 %v7590_v25 }
 0xca4   : > { %2427 = vmatprep.subr.bf16.mxu0 %v7591_v26 }
 0xca7   : > { %2428 = vmatpush1.bf16.msra.mxu0 %v7947_v58 }
 0xca8   : > { %2429 = vmatprep.subr.bf16.mxu0 %v7948_v14 }
 0xcab   : > { %2430 = vmatpush1.bf16.msra.mxu0 %v7949_v30 }
 0xcac   : > { %2431 = vmatprep.subr.bf16.mxu0 %v7950_v50 }
 0xcaf   : > { %2432 = vmatpush1.bf16.msra.mxu0 %v7951_v45 }
 0xcb0   : > { %2433 = vmatprep.subr.bf16.mxu0 %v7952_v22 }
 0xcb3   : > { %2434 = vmatpush1.bf16.msra.mxu0 %v7953_v63 }
 0xcb4   : > { %2435 = vmatprep.subr.bf16.mxu0 %v7954_v20 }
 0xcb7   : > { %2436 = vmatpush1.bf16.msra.mxu0 %v7955_v23 }
 0xcb8   : > { %2437 = vmatprep.subr.bf16.mxu0 %v7956_v53  ;;  %v7966_v53 = vld [vmem:[#allocation183_spill] sm:$0xff] }
 0xcbb   : > { %2438 = vmatpush1.bf16.msra.mxu0 %v7957_v37  ;;  %v7967_v37 = vld [vmem:[#allocation185_spill] sm:$0xff] }
 0xcbc   : > { %2439 = vmatprep.subr.bf16.mxu0 %v7958_v52  ;;  %v7968_v52 = vld [vmem:[#allocation187_spill] sm:$0xff] }
 0xcbf   : > { %2440 = vmatpush1.bf16.msra.mxu0 %v7959_v7  ;;  %v7969_v7 = vld [vmem:[#allocation188_spill] sm:$0xff] }
 0xcc0   : > { %2587 = vmatprep.subr.bf16.mxu0 %v7960_v13  ;;  %v7970_v13 = vld [vmem:[#allocation191_spill] sm:$0xff] }
 0xcc2   : > { %2442 = vmatmul.mubr.bf16.vlgmr.msra.gmra.mrb[48].mxu0 %v6051_v36  ;;  %v7971_v36 = vld [vmem:[#allocation192_spill] sm:$0xff] }
 0xcc3   : > { %2588 = vmatpush1.bf16.msra.mxu0 %v7961_v33  ;;  %v7972_v33 = vld [vmem:[#allocation195_spill] sm:$0xff] }
 0xcc4   : > { %2589 = vmatprep.subr.bf16.mxu0 %v7962_v2  ;;  %v7973_v2 = vld [vmem:[#allocation196_spill] sm:$0xff] }
 0xcc7   : > { %2590 = vmatpush1.bf16.msra.mxu0 %v7963_v48  ;;  %v7974_v48 = vld [vmem:[#allocation199_spill] sm:$0xff] }
 0xcc8   : > { %2591 = vmatprep.subr.bf16.mxu0 %v7964_v10  ;;  %v7975_v10 = vld [vmem:[#allocation200_spill] sm:$0xff] }
 0xccb   : > { %2592 = vmatpush1.bf16.msra.mxu0 %v7965_v38  ;;  %v7976_v38 = vld [vmem:[#allocation203_spill] sm:$0xff] }
 0xccc   : > { %2593 = vmatprep.subr.bf16.mxu0 %v7966_v53  ;;  %v7977_v53 = vld [vmem:[#allocation204_spill] sm:$0xff] }
 0xccf   : > { %2594 = vmatpush1.bf16.msra.mxu0 %v7967_v37  ;;  %v7978_v37 = vld [vmem:[#allocation207_spill] sm:$0xff] }
 0xcd0   : > { %2595 = vmatprep.subr.bf16.mxu0 %v7968_v52  ;;  %v7979_v52 = vld [vmem:[#allocation208_spill] sm:$0xff] }
 0xcd3   : > { %2596 = vmatpush1.bf16.msra.mxu0 %v7969_v7  ;;  %v7980_v7 = vld [vmem:[#allocation211_spill] sm:$0xff] }
 0xcd4   : > { %2597 = vmatprep.subr.bf16.mxu0 %v7970_v13  ;;  %v7981_v13 = vld [vmem:[#allocation212_spill] sm:$0xff] }
 0xcd7   : > { %2598 = vmatpush1.bf16.msra.mxu0 %v7971_v36  ;;  %v7982_v36 = vld [vmem:[#allocation215_spill] sm:$0xff] }
 0xcd8   : > { %2599 = vmatprep.subr.bf16.mxu0 %v7972_v33  ;;  %v7983_v33 = vld [vmem:[#allocation216_spill] sm:$0xff] }
 0xcdb   : > { %2600 = vmatpush1.bf16.msra.mxu0 %v7973_v2  ;;  %v7984_v2 = vld [vmem:[#allocation219_spill] sm:$0xff] }
 0xcdc   : > { %2601 = vmatprep.subr.bf16.mxu0 %v7974_v48  ;;  %v7985_v48 = vld [vmem:[#allocation220_spill] sm:$0xff] }
 0xcdf   : > { %2602 = vmatpush1.bf16.msra.mxu0 %v7975_v10  ;;  %v7986_v10 = vld [vmem:[#allocation223_spill] sm:$0xff] }
 0xce0   : > { %2603 = vmatprep.subr.bf16.mxu0 %v7976_v38  ;;  %v7987_v38 = vld [vmem:[#allocation225_spill] sm:$0xff] }
 0xce3   : > { %2604 = vmatpush1.bf16.msra.mxu0 %v7977_v53  ;;  %v7988_v53 = vld [vmem:[#allocation227_spill] sm:$0xff] }
 0xce4   : > { %2605 = vmatprep.subr.bf16.mxu0 %v7978_v37  ;;  %v7989_v37 = vld [vmem:[#allocation229_spill] sm:$0xff] }
 0xce7   : > { %2606 = vmatpush1.bf16.msra.mxu0 %v7979_v52  ;;  %v7990_v52 = vld [vmem:[#allocation231_spill] sm:$0xff] }
 0xce8   : > { %2607 = vmatprep.subr.bf16.mxu0 %v7980_v7  ;;  %v7991_v7 = vld [vmem:[#allocation233_spill] sm:$0xff] }
 0xceb   : > { %2608 = vmatpush1.bf16.msra.mxu0 %v7981_v13  ;;  %v7992_v13 = vld [vmem:[#allocation235_spill] sm:$0xff] }
 0xcec   : > { %2609 = vmatprep.subr.bf16.mxu0 %v7982_v36  ;;  %v2318_v36 = vpop.permute.xlu1 %2317 }
 0xcef   : > { %2610 = vmatpush1.bf16.msra.mxu0 %v7983_v33  ;;  %v7993_v33 = vld [vmem:[#allocation166_spill] sm:$0xff] }
 0xcf0   : > { %2611 = vmatprep.subr.bf16.mxu0 %v7984_v2  ;;  %v2320_v23 = vmul.f32 %v2318_v36, %v7993_v33  ;;  %v7994_v2 = vld [vmem:[#allocation167_spill] sm:$0xff] }
 0xcf1   : > { %v2321_v20 = vmul.f32 %v2318_v36, %v7994_v2 }
 0xcf3   : > { %2612 = vmatpush1.bf16.msra.mxu0 %v7985_v48  ;;  %v7995_v48 = vld [vmem:[#allocation168_spill] sm:$0xff] }
 0xcf4   : > { %2613 = vmatprep.subr.bf16.mxu0 %v7986_v10  ;;  %v2323_v63 = vadd.f32 %v2320_v23, %v7995_v48  ;;  %v2322_v48 = vmul.f32 %v2318_v36, %v7533_v61 }
 0xcf7   : > { %2614 = vmatpush1.bf16.msra.mxu0 %v7987_v38  ;;  %v2324_v38 = vadd.f32 %v2321_v20, %v7627_v6 }
 0xcf8   : > { %2615 = vmatprep.subr.bf16.mxu0 %v7988_v53 }
 0xcfb   : > { %2616 = vmatpush1.bf16.msra.mxu0 %v7989_v37 }
 0xcfc   : > { %2617 = vmatprep.subr.bf16.mxu0 %v7990_v52 }
 0xcff   : > { %2618 = vmatpush1.bf16.msra.mxu0 %v7991_v7 }
 0xd00   : > { %2669 = vmatprep.subr.bf16.mxu0 %v7992_v13 }
 0xd55   : > { %v2361_v10 = vpop.f32.mrb[44].mxu0  ;;  %v2402_v22 = vpop.f32.mrb[64].mxu1 }
 0xd56   : > { %v2450_v53 = vadd.f32 %v2361_v10, %v2323_v63  ;;  %v2363_v45 = vpop.f32.mrb[45].mxu0  ;;  %v6207_v37 = vpop.f32.mrb[65].mxu1  ;;  %v2464_v63 = vadd.f32 %v7534_v34, %v2402_v22  ;;  %v7996_v22 = vld [vmem:[#allocation150_spill] sm:$0xff] }
 0xd57   : > { %v2365_v52 = vpop.f32.mrb[46].mxu0  ;;  %v2406_v50 = vpop.f32.mrb[66].mxu1  ;;  %v2451_v14 = vadd.f32 %v2363_v45, %v2324_v38 }
 0xd58   : > { %v3557_v7 = vmul.f32 -1.442695, %v2450_v53  ;;  %v2366_v30 = vpop.f32.mrb[47].mxu0  ;;  %v2407_v13 = vpop.f32.mrb[67].mxu1  ;;  %v2325_v52 = vadd.f32 %v2322_v48, %v7535_v8  ;;  %v7999_v48 = vld [vmem:[#allocation153_spill] sm:$0xff] }
 0xd59   : > { %v3558_v33 = vmul.f32 -1.442695, %v2451_v14 }
 0xd5a   : > { %4035 = vpow2.f32 %v3557_v7 }
 0xd5b   : > { %4037 = vpow2.f32 %v3558_v33 }
 0xd64   : > { %v4036_v2 = vpop.eup %4035 }
 0xd65   : > { %v2458_v58 = vadd.f32 1.0, %v4036_v2  ;;  %v4038_v23 = vpop.eup %4037  ;;  %v7997_v2 = vld [vmem:[#allocation151_spill] sm:$0xff] }
 0xd66   : > { %v2459_v20 = vadd.f32 1.0, %v4038_v23 }
 0xd67   : > { %4039 = vrcp.f32 %v2458_v58 }
 0xd68   : > { %4041 = vrcp.f32 %v2459_v20 }
 0xd71   : > { %v4040_v10 = vpop.eup %4039 }
 0xd72   : > { %v2465_v50 = vmul.f32 %v4040_v10, %v2464_v63  ;;  %v4042_v45 = vpop.eup %4041  ;;  %v8000_v63 = vld [vmem:[#allocation155_spill] sm:$0xff]  ;;  %v8001_v10 = vld [vmem:[#allocation157_spill] sm:$0xff] }
 0xd73   : > { %v2468_v53 = vsub.f32 1.0, %v4042_v45  ;;  %v2470_v7 = vmul.f32 %v4042_v45, %v6047_v5  ;;  %v7998_v5 = vld [vmem:[#allocation152_spill] sm:$0xff]  ;;  %v8005_v45 = vld [vmem:[#allocation174_spill] sm:$0xff] }
 0xd74   : > { %v2466_v30 = vadd.f32 %v2465_v50, %v2325_v52  ;;  %v8002_v52 = vld [vmem:[#allocation160_spill] sm:$0xff]  ;;  %v8003_v50 = vld [vmem:[#allocation163_spill] sm:$0xff] }
 0xd76   : > { %4043 = vtanh.f32 %v2466_v30  ;;  %v8004_v30 = vld [vmem:[#allocation165_spill] sm:$0xff] }
 0xd80   : > { %v4044_v14 = vpop.eup %4043 }
 0xd81   : > { %v2469_v13 = vmul.f32 %v4044_v14, %v2468_v53  ;;  %v8006_v53 = vld [vmem:[#allocation176_spill] sm:$0xff]  ;;  %v8007_v14 = vld [vmem:[#allocation178_spill] sm:$0xff] }
 0xd83   : > { %v6213_v58 = vadd.f32 %v2470_v7, %v2469_v13  ;;  %v8008_v7 = vld [vmem:[#allocation180_spill] sm:$0xff]  ;;  %v8009_v13 = vld [vmem:[#allocation182_spill] sm:$0xff] }
 0xd85   : > { %v6217_v33 = vpack.c.bf16 %v6213_v58, %v6213_v58 }
 0xd87   : > { %2506 = vmatmul.mubr.bf16.vlgmr.msra.gmra.mrb[68].mxu1 %v6217_v33 }
 0xd88   : > { %3786 = vmatpush3.bf16.msra.mxu1 %v7996_v22  ;;  %3801 = vmatprep.mubr.msk.bf16.mxu1 %vm4234_vm0, %v7340_v0 }
 0xd89   : > { %3787 = vmatprep.subr.bf16.mxu1 %v7340_v0 }
 0xd8c   : > { %3788 = vmatpush3.bf16.msra.mxu1 %v7997_v2 }
 0xd8d   : > { %3789 = vmatprep.subr.bf16.mxu1 %v7340_v0 }
 0xd90   : > { %3790 = vmatpush3.bf16.msra.mxu1 %v7998_v5 }
 0xd91   : > { %3791 = vmatprep.subr.bf16.mxu1 %v7340_v0 }
 0xd94   : > { %3792 = vmatpush3.bf16.msra.mxu1 %v7999_v48 }
 0xd95   : > { %v2443_v38 = vpop.f32.mrb[48].mxu0  ;;  %3793 = vmatprep.subr.bf16.mxu1 %v7340_v0 }
 0xd96   : > { %v6230_v36 = vpop.f32.mrb[49].mxu0 }
 0xd97   : > { %v2447_v23 = vpop.f32.mrb[50].mxu0 }
 0xd98   : > { %v2448_v20 = vpop.f32.mrb[51].mxu0  ;;  %3794 = vmatpush3.bf16.msra.mxu1 %v8000_v63  ;;  %v8010_v23 = vld [vmem:[#allocation184_spill] sm:$0xff] }
 0xd99   : > { %3795 = vmatprep.subr.bf16.mxu1 %v7340_v0  ;;  %v8011_v20 = vld [vmem:[#allocation186_spill] sm:$0xff] }
 0xd9c   : > { %3796 = vmatpush3.bf16.msra.mxu1 %v8001_v10  ;;  %v8015_v10 = vld [vmem:[#allocation194_spill] sm:$0xff] }
 0xd9d   : > { %3797 = vmatprep.subr.bf16.mxu1 %v7340_v0 }
 0xda0   : > { %3798 = vmatpush3.bf16.msra.mxu1 %v8002_v52  ;;  %v8012_v52 = vld [vmem:[#allocation189_spill] sm:$0xff] }
 0xda1   : > { %3799 = vmatprep.subr.bf16.mxu1 %v7340_v0 }
 0xda4   : > { %3800 = vmatpush3.bf16.msra.mxu1 %v8003_v50  ;;  %v8013_v50 = vld [vmem:[#allocation190_spill] sm:$0xff] }
 0xda5   : > { %2628 = vmatprep.subr.bf16.mxu1 %v8004_v30  ;;  %v8014_v30 = vld [vmem:[#allocation193_spill] sm:$0xff] }
 0xda7   : > { %3802 = vmatmul.mubr.bf16.vlgmr.msra.gmra.mrb[72].mxu1 %v6217_v33 }
 0xda8   : > { %2629 = vmatpush1.bf16.msra.mxu1 %v8005_v45  ;;  %v8016_v45 = vld [vmem:[#allocation197_spill] sm:$0xff] }
 0xda9   : > { %2630 = vmatprep.subr.bf16.mxu1 %v8006_v53  ;;  %v8017_v53 = vld [vmem:[#allocation198_spill] sm:$0xff] }
 0xdac   : > { %2631 = vmatpush1.bf16.msra.mxu1 %v8007_v14  ;;  %v8018_v14 = vld [vmem:[#allocation201_spill] sm:$0xff] }
 0xdad   : > { %2632 = vmatprep.subr.bf16.mxu1 %v8008_v7  ;;  %v8019_v7 = vld [vmem:[#allocation202_spill] sm:$0xff] }
 0xdb0   : > { %2633 = vmatpush1.bf16.msra.mxu1 %v8009_v13  ;;  %v8020_v13 = vld [vmem:[#allocation205_spill] sm:$0xff] }
 0xdb1   : > { %2634 = vmatprep.subr.bf16.mxu1 %v8010_v23  ;;  %v8021_v23 = vld [vmem:[#allocation206_spill] sm:$0xff] }
 0xdb4   : > { %2635 = vmatpush1.bf16.msra.mxu1 %v8011_v20  ;;  %v8022_v20 = vld [vmem:[#allocation209_spill] sm:$0xff] }
 0xdb5   : > { %2636 = vmatprep.subr.bf16.mxu1 %v8012_v52  ;;  %v8023_v52 = vld [vmem:[#allocation210_spill] sm:$0xff] }
 0xdb8   : > { %2637 = vmatpush1.bf16.msra.mxu1 %v8013_v50  ;;  %v8024_v50 = vld [vmem:[#allocation213_spill] sm:$0xff] }
 0xdb9   : > { %2638 = vmatprep.subr.bf16.mxu1 %v8014_v30  ;;  %v8025_v30 = vld [vmem:[#allocation214_spill] sm:$0xff] }
 0xdbc   : > { %2639 = vmatpush1.bf16.msra.mxu1 %v8015_v10  ;;  %v8026_v10 = vld [vmem:[#allocation217_spill] sm:$0xff] }
 0xdbd   : > { %2640 = vmatprep.subr.bf16.mxu1 %v8016_v45  ;;  %v8027_v45 = vld [vmem:[#allocation218_spill] sm:$0xff] }
 0xdc0   : > { %2641 = vmatpush1.bf16.msra.mxu1 %v8017_v53  ;;  %v8028_v53 = vld [vmem:[#allocation221_spill] sm:$0xff] }
 0xdc1   : > { %2642 = vmatprep.subr.bf16.mxu1 %v8018_v14  ;;  %v8029_v14 = vld [vmem:[#allocation222_spill] sm:$0xff] }
 0xdc4   : > { %2643 = vmatpush1.bf16.msra.mxu1 %v8019_v7  ;;  %v8030_v7 = vld [vmem:[#allocation224_spill] sm:$0xff] }
 0xdc5   : > { %2644 = vmatprep.subr.bf16.mxu1 %v8020_v13  ;;  %v8031_v13 = vld [vmem:[#allocation226_spill] sm:$0xff] }
 0xdc8   : > { %2645 = vmatpush1.bf16.msra.mxu1 %v8021_v23  ;;  %v8032_v23 = vld [vmem:[#allocation228_spill] sm:$0xff] }
 0xdc9   : > { %2646 = vmatprep.subr.bf16.mxu1 %v8022_v20  ;;  %v8033_v20 = vld [vmem:[#allocation230_spill] sm:$0xff] }
 0xdcc   : > { %2647 = vmatpush1.bf16.msra.mxu1 %v8023_v52  ;;  %v8034_v52 = vld [vmem:[#allocation232_spill] sm:$0xff] }
 0xdcd   : > { %2648 = vmatprep.subr.bf16.mxu1 %v8024_v50  ;;  %v8035_v50 = vld [vmem:[#allocation234_spill] sm:$0xff] }
 0xdd0   : > { %2649 = vmatpush1.bf16.msra.mxu1 %v8025_v30  ;;  %v8036_v30 = vld [vmem:[#allocation149_spill] sm:$0xff] }
 0xdd1   : > { %2650 = vmatprep.subr.bf16.mxu1 %v8026_v10  ;;  %v4241_v10 = vmov 7  }
 0xdd2   : > { %3911 = vset.pattern.permute.xlu1 %v4241_v10 }
 0xdd4   : > { %2651 = vmatpush1.bf16.msra.mxu1 %v8027_v45  ;;  %v8037_v45 = vld [vmem:[#allocation148_spill] sm:$0xff] }
 0xdd5   : > { %2652 = vmatprep.subr.bf16.mxu1 %v8028_v53  ;;  %2577 = vperm.xlu1 %3911, %v8037_v45   ;;  %v2568_v45 = vadd.f32 %v7469_v1, %v6230_v36 }
 0xdd8   : > { %2653 = vmatpush1.bf16.msra.mxu1 %v8029_v14  ;;  %v8038_v14 = vld [vmem:[#allocation236_spill] sm:$0xff] }
 0xdd9   : > { %2654 = vmatprep.subr.bf16.mxu1 %v8030_v7 }
 0xddc   : > { %2655 = vmatpush1.bf16.msra.mxu1 %v8031_v13 }
 0xddd   : > { %2656 = vmatprep.subr.bf16.mxu1 %v8032_v23 }
 0xde0   : > { %2657 = vmatpush1.bf16.msra.mxu1 %v8033_v20 }
 0xde1   : > { %2658 = vmatprep.subr.bf16.mxu1 %v8034_v52 }
 0xde4   : > { %2659 = vmatpush1.bf16.msra.mxu1 %v8035_v50 }
 0xde5   : > { %2733 = vmatprep.subr.bf16.mxu1 %v8036_v30 }
 0xe5a   : > { %v2507_v53 = vpop.f32.mrb[68].mxu1 }
 0xe5b   : > { %v2508_v63 = vadd.f32 %v2507_v53, %v8038_v14  ;;  %v2509_v7 = vpop.f32.mrb[69].mxu1 }
 0xe5c   : > { %v2510_v13 = vadd.f32 %v2509_v7, %v5151_v46  ;;  %v2511_v48 = vpop.f32.mrb[70].mxu1 }
 0xe5d   : > { %v2554_v23 = vadd.f32 %v2508_v63, %v6207_v37  ;;  %v2512_v20 = vpop.f32.mrb[71].mxu1 }
 0xe5e   : > { %v2555_v5 = vadd.f32 %v2510_v13, %v2443_v38  ;;  %v8043_v20 = vld [vmem:[#allocation248_spill] sm:$0xff] }
 0xe5f   : > { %v3559_v52 = vmul.f32 -1.442695, %v2554_v23 }
 0xe60   : > { %v3560_v50 = vmul.f32 -1.442695, %v2555_v5 }
 0xe61   : > { %4045 = vpow2.f32 %v3559_v52 }
 0xe62   : > { %4047 = vpow2.f32 %v3560_v50 }
 0xe6b   : > { %v4046_v30 = vpop.eup %4045 }
 0xe6c   : > { %v2562_v2 = vadd.f32 1.0, %v4046_v30  ;;  %v4048_v10 = vpop.eup %4047 }
 0xe6d   : > { %v2563_v53 = vadd.f32 1.0, %v4048_v10  ;;  %v8044_v10 = vld [vmem:[#allocation249_spill] sm:$0xff] }
 0xe6e   : > { %4049 = vrcp.f32 %v2562_v2 }
 0xe6f   : > { %4051 = vrcp.f32 %v2563_v53  ;;  %v8045_v53 = vld [vmem:[#allocation250_spill] sm:$0xff] }
 0xe78   : > { %v4050_v14 = vpop.eup %4049 }
 0xe79   : > { %v2569_v22 = vmul.f32 %v4050_v14, %v2568_v45  ;;  %v4052_v5 = vpop.eup %4051  ;;  %v8041_v45 = vld [vmem:[#allocation246_spill] sm:$0xff]  ;;  %v8042_v14 = vld [vmem:[#allocation247_spill] sm:$0xff] }
 0xe7a   : > { %v2548_v7 = vpop.f32.mrb[72].mxu1  ;;  %v2572_v50 = vsub.f32 1.0, %v4052_v5  ;;  %v2574_v13 = vmul.f32 %v4052_v5, %v6115_v31  ;;  %v8039_v31 = vld [vmem:[#allocation244_spill] sm:$0xff] }
 0xe7b   : > { %v2549_v37 = vadd.f32 %v2548_v7, %v5157_v57  ;;  %v3803_v48 = vpop.f32.mrb[73].mxu1  ;;  %v8046_v7 = vld [vmem:[#allocation251_spill] sm:$0xff]  ;;  %v8052_v5 = vld [vmem:[#allocation164_spill] sm:$0xff] }
 0xe7c   : > { %v2551_v38 = vpop.f32.mrb[74].mxu1  ;;  %v8048_v48 = vld [vmem:[#allocation253_spill] sm:$0xff] }
 0xe7d   : > { %v2570_v63 = vadd.f32 %v2569_v22, %v2549_v37  ;;  %v3804_v52 = vpop.f32.mrb[75].mxu1  ;;  %v8040_v22 = vld [vmem:[#allocation245_spill] sm:$0xff]  ;;  %v8047_v37 = vld [vmem:[#allocation252_spill] sm:$0xff]  ;;  %v8049_v38 = vld [vmem:[#allocation254_spill] sm:$0xff] }
 0xe7e   : > { %v8051_v52 = vld [vmem:[#allocation256_spill] sm:$0xff] }
 0xe7f   : > { %4053 = vtanh.f32 %v2570_v63  ;;  %v8050_v63 = vld [vmem:[#allocation255_spill] sm:$0xff] }
 0xe89   : > { %v4054_v30 = vpop.eup %4053 }
 0xe8a   : > { %v2573_v2 = vmul.f32 %v4054_v30, %v2572_v50  ;;  %v8053_v50 = vld [vmem:[#allocation173_spill] sm:$0xff]  ;;  %v8054_v30 = vld [vmem:[#allocation175_spill] sm:$0xff] }
 0xe8c   : > { %v6281_v23 = vadd.f32 %v2574_v13, %v2573_v2  ;;  %v8055_v2 = vld [vmem:[#allocation177_spill] sm:$0xff]  ;;  %v8056_v13 = vld [vmem:[#allocation179_spill] sm:$0xff] }
 0xe8e   : > { %v2586_v36 = vpack.c.bf16 %v6281_v23, %v6281_v23 }
 0xe90   : > { %2619 = vmatprep.mubr.bf16.mxu0 %v2586_v36  ;;  %2660 = vmatprep.mubr.bf16.mxu1 %v2586_v36 }
 0xe91   : > { %2620 = vmatmul.mubr.bf16.vlgmr.msra.gmra.mrb[52].mxu0 %v6217_v33  ;;  %2661 = vmatmul.mubr.bf16.vlgmr.msra.gmra.mrb[76].mxu1 %v6217_v33 }
 0xe92   : > { %2670 = vmatpush1.bf16.msra.mxu0 %v5167_v15  ;;  %2701 = vmatprep.mubr.bf16.mxu0 %v2586_v36  ;;  %v8057_v36 = vld [vmem:[#allocation181_spill] sm:$0xff] }
 0xe93   : > { %2671 = vmatprep.subr.bf16.mxu0 %v5171_v11  ;;  %2734 = vmatpush1.bf16.msra.mxu1 %v4649_v44 }
 0xe94   : > { %2735 = vmatprep.subr.bf16.mxu1 %v4661_v41  ;;  %2765 = vmatprep.mubr.bf16.mxu1 %v7474_v51 }
 0xe96   : > { %2672 = vmatpush1.bf16.msra.mxu0 %v5178_v55 }
 0xe97   : > { %2673 = vmatprep.subr.bf16.mxu0 %v5183_v60  ;;  %2736 = vmatpush1.bf16.msra.mxu1 %v4666_v24 }
 0xe98   : > { %2737 = vmatprep.subr.bf16.mxu1 %v4677_v42 }
 0xe9a   : > { %2674 = vmatpush1.bf16.msra.mxu0 %v5191_v4 }
 0xe9b   : > { %2675 = vmatprep.subr.bf16.mxu0 %v5196_v43  ;;  %2738 = vmatpush1.bf16.msra.mxu1 %v4682_v12 }
 0xe9c   : > { %2739 = vmatprep.subr.bf16.mxu1 %v4693_v21 }
 0xe9e   : > { %2676 = vmatpush1.bf16.msra.mxu0 %v5203_v18 }
 0xe9f   : > { %2677 = vmatprep.subr.bf16.mxu0 %v5208_v39  ;;  %2740 = vmatpush1.bf16.msra.mxu1 %v4698_v9 }
 0xea0   : > { %2741 = vmatprep.subr.bf16.mxu1 %v7579_v47 }
 0xea2   : > { %2678 = vmatpush1.bf16.msra.mxu0 %v7580_v32 }
 0xea3   : > { %2679 = vmatprep.subr.bf16.mxu0 %v5220_v49  ;;  %2742 = vmatpush1.bf16.msra.mxu1 %v4714_v27 }
 0xea4   : > { %2743 = vmatprep.subr.bf16.mxu1 %v7581_v29 }
 0xea6   : > { %2680 = vmatpush1.bf16.msra.mxu0 %v7582_v16 }
 0xea7   : > { %2681 = vmatprep.subr.bf16.mxu0 %v5232_v62  ;;  %2744 = vmatpush1.bf16.msra.mxu1 %v4729_v35 }
 0xea8   : > { %2745 = vmatprep.subr.bf16.mxu1 %v7583_v3 }
 0xeaa   : > { %2682 = vmatpush1.bf16.msra.mxu0 %v7584_v59 }
 0xeab   : > { %2683 = vmatprep.subr.bf16.mxu0 %v5244_v40  ;;  %2746 = vmatpush1.bf16.msra.mxu1 %v7585_v28 }
 0xeac   : > { %2747 = vmatprep.subr.bf16.mxu1 %v7586_v19 }
 0xeae   : > { %2684 = vmatpush1.bf16.msra.mxu0 %v7587_v56 }
 0xeaf   : > { %2685 = vmatprep.subr.bf16.mxu0 %v7671_v17  ;;  %2748 = vmatpush1.bf16.msra.mxu1 %v7589_v54 }
 0xeb0   : > { %3805 = vmatprep.subr.bf16.mxu1 %v7340_v0 }
 0xeb2   : > { %2686 = vmatpush1.bf16.msra.mxu0 %v7590_v25 }
 0xeb3   : > { %2687 = vmatprep.subr.bf16.mxu0 %v7591_v26 }
 0xeb6   : > { %2688 = vmatpush1.bf16.msra.mxu0 %v8039_v31 }
 0xeb7   : > { %2689 = vmatprep.subr.bf16.mxu0 %v8040_v22 }
 0xeba   : > { %2690 = vmatpush1.bf16.msra.mxu0 %v8041_v45 }
 0xebb   : > { %2691 = vmatprep.subr.bf16.mxu0 %v8042_v14 }
 0xebe   : > { %2692 = vmatpush1.bf16.msra.mxu0 %v8043_v20 }
 0xebf   : > { %2693 = vmatprep.subr.bf16.mxu0 %v8044_v10 }
 0xec2   : > { %2694 = vmatpush1.bf16.msra.mxu0 %v8045_v53 }
 0xec3   : > { %2695 = vmatprep.subr.bf16.mxu0 %v8046_v7 }
 0xec6   : > { %2696 = vmatpush1.bf16.msra.mxu0 %v8047_v37 }
 0xec7   : > { %2697 = vmatprep.subr.bf16.mxu0 %v8048_v48  ;;  %v8058_v48 = vld [vmem:[#allocation183_spill] sm:$0xff] }
 0xeca   : > { %2698 = vmatpush1.bf16.msra.mxu0 %v8049_v38  ;;  %v8059_v38 = vld [vmem:[#allocation185_spill] sm:$0xff] }
 0xecb   : > { %2699 = vmatprep.subr.bf16.mxu0 %v8050_v63  ;;  %v8060_v63 = vld [vmem:[#allocation187_spill] sm:$0xff] }
 0xece   : > { %2700 = vmatpush1.bf16.msra.mxu0 %v8051_v52  ;;  %v8061_v52 = vld [vmem:[#allocation188_spill] sm:$0xff] }
 0xecf   : > { %2847 = vmatprep.subr.bf16.mxu0 %v8052_v5  ;;  %v8062_v5 = vld [vmem:[#allocation191_spill] sm:$0xff] }
 0xed1   : > { %2702 = vmatmul.mubr.bf16.vlgmr.msra.gmra.mrb[56].mxu0 %v6217_v33  ;;  %v8063_v33 = vld [vmem:[#allocation192_spill] sm:$0xff] }
 0xed2   : > { %2848 = vmatpush1.bf16.msra.mxu0 %v8053_v50  ;;  %v8064_v50 = vld [vmem:[#allocation195_spill] sm:$0xff] }
 0xed3   : > { %2849 = vmatprep.subr.bf16.mxu0 %v8054_v30  ;;  %v8065_v30 = vld [vmem:[#allocation196_spill] sm:$0xff] }
 0xed6   : > { %2850 = vmatpush1.bf16.msra.mxu0 %v8055_v2  ;;  %v8066_v2 = vld [vmem:[#allocation199_spill] sm:$0xff] }
 0xed7   : > { %2851 = vmatprep.subr.bf16.mxu0 %v8056_v13  ;;  %v8067_v13 = vld [vmem:[#allocation200_spill] sm:$0xff] }
 0xeda   : > { %2852 = vmatpush1.bf16.msra.mxu0 %v8057_v36  ;;  %v8068_v36 = vld [vmem:[#allocation203_spill] sm:$0xff] }
 0xedb   : > { %2853 = vmatprep.subr.bf16.mxu0 %v8058_v48  ;;  %v8069_v48 = vld [vmem:[#allocation204_spill] sm:$0xff] }
 0xede   : > { %2854 = vmatpush1.bf16.msra.mxu0 %v8059_v38  ;;  %v8070_v38 = vld [vmem:[#allocation207_spill] sm:$0xff] }
 0xedf   : > { %2855 = vmatprep.subr.bf16.mxu0 %v8060_v63  ;;  %v8071_v63 = vld [vmem:[#allocation208_spill] sm:$0xff] }
 0xee2   : > { %2856 = vmatpush1.bf16.msra.mxu0 %v8061_v52  ;;  %v8072_v52 = vld [vmem:[#allocation211_spill] sm:$0xff] }
 0xee3   : > { %2857 = vmatprep.subr.bf16.mxu0 %v8062_v5  ;;  %v8073_v5 = vld [vmem:[#allocation212_spill] sm:$0xff] }
 0xee6   : > { %2858 = vmatpush1.bf16.msra.mxu0 %v8063_v33  ;;  %v8074_v33 = vld [vmem:[#allocation215_spill] sm:$0xff] }
 0xee7   : > { %2859 = vmatprep.subr.bf16.mxu0 %v8064_v50  ;;  %v8075_v50 = vld [vmem:[#allocation216_spill] sm:$0xff] }
 0xeea   : > { %2860 = vmatpush1.bf16.msra.mxu0 %v8065_v30  ;;  %v8076_v30 = vld [vmem:[#allocation219_spill] sm:$0xff] }
 0xeeb   : > { %2861 = vmatprep.subr.bf16.mxu0 %v8066_v2  ;;  %v8077_v2 = vld [vmem:[#allocation220_spill] sm:$0xff] }
 0xeee   : > { %2862 = vmatpush1.bf16.msra.mxu0 %v8067_v13  ;;  %v8078_v13 = vld [vmem:[#allocation223_spill] sm:$0xff] }
 0xeef   : > { %2863 = vmatprep.subr.bf16.mxu0 %v8068_v36  ;;  %v8079_v36 = vld [vmem:[#allocation225_spill] sm:$0xff] }
 0xef2   : > { %2864 = vmatpush1.bf16.msra.mxu0 %v8069_v48  ;;  %v8080_v48 = vld [vmem:[#allocation227_spill] sm:$0xff] }
 0xef3   : > { %2865 = vmatprep.subr.bf16.mxu0 %v8070_v38  ;;  %v8081_v38 = vld [vmem:[#allocation229_spill] sm:$0xff] }
 0xef6   : > { %2866 = vmatpush1.bf16.msra.mxu0 %v8071_v63  ;;  %v8082_v63 = vld [vmem:[#allocation231_spill] sm:$0xff] }
 0xef7   : > { %2867 = vmatprep.subr.bf16.mxu0 %v8072_v52  ;;  %v8083_v52 = vld [vmem:[#allocation233_spill] sm:$0xff] }
 0xefa   : > { %2868 = vmatpush1.bf16.msra.mxu0 %v8073_v5  ;;  %v8084_v5 = vld [vmem:[#allocation235_spill] sm:$0xff] }
 0xefb   : > { %2869 = vmatprep.subr.bf16.mxu0 %v8074_v33  ;;  %v2578_v33 = vpop.permute.xlu1 %2577 }
 0xefe   : > { %2870 = vmatpush1.bf16.msra.mxu0 %v8075_v50  ;;  %v8085_v50 = vld [vmem:[#allocation166_spill] sm:$0xff] }
 0xeff   : > { %2871 = vmatprep.subr.bf16.mxu0 %v8076_v30  ;;  %v2580_v37 = vmul.f32 %v2578_v33, %v8085_v50  ;;  %v8086_v30 = vld [vmem:[#allocation167_spill] sm:$0xff] }
 0xf00   : > { %v2581_v7 = vmul.f32 %v2578_v33, %v8086_v30 }
 0xf02   : > { %2872 = vmatpush1.bf16.msra.mxu0 %v8077_v2  ;;  %v8087_v2 = vld [vmem:[#allocation168_spill] sm:$0xff] }
 0xf03   : > { %2873 = vmatprep.subr.bf16.mxu0 %v8078_v13  ;;  %v2583_v53 = vadd.f32 %v2580_v37, %v8087_v2  ;;  %v2582_v2 = vmul.f32 %v2578_v33, %v7533_v61 }
 0xf06   : > { %2874 = vmatpush1.bf16.msra.mxu0 %v8079_v36  ;;  %v2584_v36 = vadd.f32 %v2581_v7, %v7627_v6 }
 0xf07   : > { %2875 = vmatprep.subr.bf16.mxu0 %v8080_v48 }
 0xf0a   : > { %2876 = vmatpush1.bf16.msra.mxu0 %v8081_v38 }
 0xf0b   : > { %2877 = vmatprep.subr.bf16.mxu0 %v8082_v63 }
 0xf0e   : > { %2878 = vmatpush1.bf16.msra.mxu0 %v8083_v52 }
 0xf0f   : > { %2929 = vmatprep.subr.bf16.mxu0 %v8084_v5 }
 0xf64   : > { %v2621_v13 = vpop.f32.mrb[52].mxu0  ;;  %v2662_v10 = vpop.f32.mrb[76].mxu1 }
 0xf65   : > { %v2710_v48 = vadd.f32 %v2621_v13, %v2583_v53  ;;  %v2623_v20 = vpop.f32.mrb[53].mxu0  ;;  %v6373_v38 = vpop.f32.mrb[77].mxu1  ;;  %v2724_v53 = vadd.f32 %v7534_v34, %v2662_v10  ;;  %v8088_v10 = vld [vmem:[#allocation150_spill] sm:$0xff] }
 0xf66   : > { %v2625_v63 = vpop.f32.mrb[54].mxu0  ;;  %v2666_v14 = vpop.f32.mrb[78].mxu1  ;;  %v2711_v22 = vadd.f32 %v2623_v20, %v2584_v36 }
 0xf67   : > { %v3561_v52 = vmul.f32 -1.442695, %v2710_v48  ;;  %v2626_v45 = vpop.f32.mrb[55].mxu0  ;;  %v2667_v5 = vpop.f32.mrb[79].mxu1  ;;  %v2585_v63 = vadd.f32 %v2582_v2, %v7535_v8  ;;  %v8091_v2 = vld [vmem:[#allocation153_spill] sm:$0xff] }
 0xf68   : > { %v3562_v50 = vmul.f32 -1.442695, %v2711_v22 }
 0xf69   : > { %4055 = vpow2.f32 %v3561_v52 }
 0xf6a   : > { %4057 = vpow2.f32 %v3562_v50 }
 0xf73   : > { %v4056_v30 = vpop.eup %4055 }
 0xf74   : > { %v2718_v31 = vadd.f32 1.0, %v4056_v30  ;;  %v4058_v37 = vpop.eup %4057  ;;  %v8089_v30 = vld [vmem:[#allocation151_spill] sm:$0xff] }
 0xf75   : > { %v2719_v7 = vadd.f32 1.0, %v4058_v37 }
 0xf76   : > { %4059 = vrcp.f32 %v2718_v31 }
 0xf77   : > { %4061 = vrcp.f32 %v2719_v7 }
 0xf80   : > { %v4060_v13 = vpop.eup %4059 }
 0xf81   : > { %v2725_v14 = vmul.f32 %v4060_v13, %v2724_v53  ;;  %v4062_v20 = vpop.eup %4061  ;;  %v8092_v53 = vld [vmem:[#allocation155_spill] sm:$0xff]  ;;  %v8093_v13 = vld [vmem:[#allocation157_spill] sm:$0xff] }
 0xf82   : > { %v2728_v48 = vsub.f32 1.0, %v4062_v20  ;;  %v2730_v52 = vmul.f32 %v4062_v20, %v6213_v58  ;;  %v8090_v58 = vld [vmem:[#allocation152_spill] sm:$0xff]  ;;  %v8097_v20 = vld [vmem:[#allocation174_spill] sm:$0xff] }
 0xf83   : > { %v2726_v45 = vadd.f32 %v2725_v14, %v2585_v63  ;;  %v8094_v63 = vld [vmem:[#allocation160_spill] sm:$0xff]  ;;  %v8095_v14 = vld [vmem:[#allocation163_spill] sm:$0xff] }
 0xf85   : > { %4063 = vtanh.f32 %v2726_v45  ;;  %v8096_v45 = vld [vmem:[#allocation165_spill] sm:$0xff] }
 0xf8f   : > { %v4064_v22 = vpop.eup %4063 }
 0xf90   : > { %v2729_v5 = vmul.f32 %v4064_v22, %v2728_v48  ;;  %v8098_v48 = vld [vmem:[#allocation176_spill] sm:$0xff]  ;;  %v8099_v22 = vld [vmem:[#allocation178_spill] sm:$0xff] }
 0xf92   : > { %v6379_v31 = vadd.f32 %v2730_v52, %v2729_v5  ;;  %v8100_v52 = vld [vmem:[#allocation180_spill] sm:$0xff]  ;;  %v8101_v5 = vld [vmem:[#allocation182_spill] sm:$0xff] }
 0xf94   : > { %v6383_v50 = vpack.c.bf16 %v6379_v31, %v6379_v31 }
 0xf96   : > { %2766 = vmatmul.mubr.bf16.vlgmr.msra.gmra.mrb[80].mxu1 %v6383_v50 }
 0xf97   : > { %3806 = vmatpush3.bf16.msra.mxu1 %v8088_v10  ;;  %3821 = vmatprep.mubr.msk.bf16.mxu1 %vm4234_vm0, %v7340_v0 }
 0xf98   : > { %3807 = vmatprep.subr.bf16.mxu1 %v7340_v0 }
 0xf9b   : > { %3808 = vmatpush3.bf16.msra.mxu1 %v8089_v30 }
 0xf9c   : > { %3809 = vmatprep.subr.bf16.mxu1 %v7340_v0 }
 0xf9f   : > { %3810 = vmatpush3.bf16.msra.mxu1 %v8090_v58 }
 0xfa0   : > { %3811 = vmatprep.subr.bf16.mxu1 %v7340_v0 }
 0xfa3   : > { %3812 = vmatpush3.bf16.msra.mxu1 %v8091_v2 }
 0xfa4   : > { %v2703_v36 = vpop.f32.mrb[56].mxu0  ;;  %3813 = vmatprep.subr.bf16.mxu1 %v7340_v0 }
 0xfa5   : > { %v6396_v33 = vpop.f32.mrb[57].mxu0 }
 0xfa6   : > { %v2707_v37 = vpop.f32.mrb[58].mxu0 }
 0xfa7   : > { %v2708_v7 = vpop.f32.mrb[59].mxu0  ;;  %3814 = vmatpush3.bf16.msra.mxu1 %v8092_v53  ;;  %v8102_v37 = vld [vmem:[#allocation184_spill] sm:$0xff] }
 0xfa8   : > { %3815 = vmatprep.subr.bf16.mxu1 %v7340_v0  ;;  %v8103_v7 = vld [vmem:[#allocation186_spill] sm:$0xff] }
 0xfab   : > { %3816 = vmatpush3.bf16.msra.mxu1 %v8093_v13  ;;  %v8107_v13 = vld [vmem:[#allocation194_spill] sm:$0xff] }
 0xfac   : > { %3817 = vmatprep.subr.bf16.mxu1 %v7340_v0 }
 0xfaf   : > { %3818 = vmatpush3.bf16.msra.mxu1 %v8094_v63  ;;  %v8104_v63 = vld [vmem:[#allocation189_spill] sm:$0xff] }
 0xfb0   : > { %3819 = vmatprep.subr.bf16.mxu1 %v7340_v0 }
 0xfb3   : > { %3820 = vmatpush3.bf16.msra.mxu1 %v8095_v14  ;;  %v8105_v14 = vld [vmem:[#allocation190_spill] sm:$0xff] }
 0xfb4   : > { %2888 = vmatprep.subr.bf16.mxu1 %v8096_v45  ;;  %v8106_v45 = vld [vmem:[#allocation193_spill] sm:$0xff] }
 0xfb6   : > { %3822 = vmatmul.mubr.bf16.vlgmr.msra.gmra.mrb[84].mxu1 %v6383_v50 }
 0xfb7   : > { %2889 = vmatpush1.bf16.msra.mxu1 %v8097_v20  ;;  %v8108_v20 = vld [vmem:[#allocation197_spill] sm:$0xff] }
 0xfb8   : > { %2890 = vmatprep.subr.bf16.mxu1 %v8098_v48  ;;  %v8109_v48 = vld [vmem:[#allocation198_spill] sm:$0xff] }
 0xfbb   : > { %2891 = vmatpush1.bf16.msra.mxu1 %v8099_v22  ;;  %v8110_v22 = vld [vmem:[#allocation201_spill] sm:$0xff] }
 0xfbc   : > { %2892 = vmatprep.subr.bf16.mxu1 %v8100_v52  ;;  %v8111_v52 = vld [vmem:[#allocation202_spill] sm:$0xff] }
 0xfbf   : > { %2893 = vmatpush1.bf16.msra.mxu1 %v8101_v5  ;;  %v8112_v5 = vld [vmem:[#allocation205_spill] sm:$0xff] }
 0xfc0   : > { %2894 = vmatprep.subr.bf16.mxu1 %v8102_v37  ;;  %v8113_v37 = vld [vmem:[#allocation206_spill] sm:$0xff] }
 0xfc3   : > { %2895 = vmatpush1.bf16.msra.mxu1 %v8103_v7  ;;  %v8114_v7 = vld [vmem:[#allocation209_spill] sm:$0xff] }
 0xfc4   : > { %2896 = vmatprep.subr.bf16.mxu1 %v8104_v63  ;;  %v8115_v63 = vld [vmem:[#allocation210_spill] sm:$0xff] }
 0xfc7   : > { %2897 = vmatpush1.bf16.msra.mxu1 %v8105_v14  ;;  %v8116_v14 = vld [vmem:[#allocation213_spill] sm:$0xff] }
 0xfc8   : > { %2898 = vmatprep.subr.bf16.mxu1 %v8106_v45  ;;  %v8117_v45 = vld [vmem:[#allocation214_spill] sm:$0xff] }
 0xfcb   : > { %2899 = vmatpush1.bf16.msra.mxu1 %v8107_v13  ;;  %v8118_v13 = vld [vmem:[#allocation217_spill] sm:$0xff] }
 0xfcc   : > { %2900 = vmatprep.subr.bf16.mxu1 %v8108_v20  ;;  %v8119_v20 = vld [vmem:[#allocation218_spill] sm:$0xff] }
 0xfcf   : > { %2901 = vmatpush1.bf16.msra.mxu1 %v8109_v48  ;;  %v8120_v48 = vld [vmem:[#allocation221_spill] sm:$0xff] }
 0xfd0   : > { %2902 = vmatprep.subr.bf16.mxu1 %v8110_v22  ;;  %v8121_v22 = vld [vmem:[#allocation222_spill] sm:$0xff] }
 0xfd3   : > { %2903 = vmatpush1.bf16.msra.mxu1 %v8111_v52  ;;  %v8122_v52 = vld [vmem:[#allocation224_spill] sm:$0xff] }
 0xfd4   : > { %2904 = vmatprep.subr.bf16.mxu1 %v8112_v5  ;;  %v8123_v5 = vld [vmem:[#allocation226_spill] sm:$0xff] }
 0xfd7   : > { %2905 = vmatpush1.bf16.msra.mxu1 %v8113_v37  ;;  %v8124_v37 = vld [vmem:[#allocation228_spill] sm:$0xff] }
 0xfd8   : > { %2906 = vmatprep.subr.bf16.mxu1 %v8114_v7  ;;  %v8125_v7 = vld [vmem:[#allocation230_spill] sm:$0xff] }
 0xfdb   : > { %2907 = vmatpush1.bf16.msra.mxu1 %v8115_v63  ;;  %v8126_v63 = vld [vmem:[#allocation232_spill] sm:$0xff] }
 0xfdc   : > { %2908 = vmatprep.subr.bf16.mxu1 %v8116_v14  ;;  %v8127_v14 = vld [vmem:[#allocation234_spill] sm:$0xff] }
 0xfdf   : > { %2909 = vmatpush1.bf16.msra.mxu1 %v8117_v45  ;;  %v8128_v45 = vld [vmem:[#allocation149_spill] sm:$0xff] }
 0xfe0   : > { %2910 = vmatprep.subr.bf16.mxu1 %v8118_v13  ;;  %v4242_v13 = vmov 8  }
 0xfe1   : > { %3912 = vset.pattern.permute.xlu0 %v4242_v13 }
 0xfe3   : > { %2911 = vmatpush1.bf16.msra.mxu1 %v8119_v20  ;;  %v8129_v20 = vld [vmem:[#allocation148_spill] sm:$0xff] }
 0xfe4   : > { %2912 = vmatprep.subr.bf16.mxu1 %v8120_v48  ;;  %2837 = vperm.xlu0 %3912, %v8129_v20   ;;  %v2828_v20 = vadd.f32 %v7469_v1, %v6396_v33 }
 0xfe7   : > { %2913 = vmatpush1.bf16.msra.mxu1 %v8121_v22  ;;  %v8130_v22 = vld [vmem:[#allocation236_spill] sm:$0xff] }
 0xfe8   : > { %2914 = vmatprep.subr.bf16.mxu1 %v8122_v52 }
 0xfeb   : > { %2915 = vmatpush1.bf16.msra.mxu1 %v8123_v5 }
 0xfec   : > { %2916 = vmatprep.subr.bf16.mxu1 %v8124_v37 }
 0xfef   : > { %2917 = vmatpush1.bf16.msra.mxu1 %v8125_v7 }
 0xff0   : > { %2918 = vmatprep.subr.bf16.mxu1 %v8126_v63 }
 0xff3   : > { %2919 = vmatpush1.bf16.msra.mxu1 %v8127_v14 }
 0xff4   : > { %2993 = vmatprep.subr.bf16.mxu1 %v8128_v45 }
0x1069   : > { %v2767_v48 = vpop.f32.mrb[80].mxu1 }
0x106a   : > { %v2768_v53 = vadd.f32 %v2767_v48, %v8130_v22  ;;  %v2769_v52 = vpop.f32.mrb[81].mxu1 }
0x106b   : > { %v2770_v5 = vadd.f32 %v2769_v52, %v5151_v46  ;;  %v2771_v2 = vpop.f32.mrb[82].mxu1 }
0x106c   : > { %v2814_v37 = vadd.f32 %v2768_v53, %v6373_v38  ;;  %v2772_v7 = vpop.f32.mrb[83].mxu1 }
0x106d   : > { %v2815_v58 = vadd.f32 %v2770_v5, %v2703_v36  ;;  %v8135_v7 = vld [vmem:[#allocation248_spill] sm:$0xff] }
0x106e   : > { %v3563_v63 = vmul.f32 -1.442695, %v2814_v37 }
0x106f   : > { %v3564_v14 = vmul.f32 -1.442695, %v2815_v58 }
0x1070   : > { %4065 = vpow2.f32 %v3563_v63 }
0x1071   : > { %4067 = vpow2.f32 %v3564_v14 }
0x107a   : > { %v4066_v45 = vpop.eup %4065 }
0x107b   : > { %v2822_v30 = vadd.f32 1.0, %v4066_v45  ;;  %v4068_v13 = vpop.eup %4067 }
0x107c   : > { %v2823_v48 = vadd.f32 1.0, %v4068_v13  ;;  %v8136_v13 = vld [vmem:[#allocation249_spill] sm:$0xff] }
0x107d   : > { %4069 = vrcp.f32 %v2822_v30 }
0x107e   : > { %4071 = vrcp.f32 %v2823_v48  ;;  %v8137_v48 = vld [vmem:[#allocation250_spill] sm:$0xff] }
0x1087   : > { %v4070_v22 = vpop.eup %4069 }
0x1088   : > { %v2829_v10 = vmul.f32 %v4070_v22, %v2828_v20  ;;  %v4072_v58 = vpop.eup %4071  ;;  %v8133_v20 = vld [vmem:[#allocation246_spill] sm:$0xff]  ;;  %v8134_v22 = vld [vmem:[#allocation247_spill] sm:$0xff] }
0x1089   : > { %v2808_v52 = vpop.f32.mrb[84].mxu1  ;;  %v2832_v14 = vsub.f32 1.0, %v4072_v58  ;;  %v2834_v5 = vmul.f32 %v4072_v58, %v6281_v23  ;;  %v8131_v23 = vld [vmem:[#allocation244_spill] sm:$0xff] }
0x108a   : > { %v2809_v38 = vadd.f32 %v2808_v52, %v5157_v57  ;;  %v3823_v2 = vpop.f32.mrb[85].mxu1  ;;  %v8138_v52 = vld [vmem:[#allocation251_spill] sm:$0xff]  ;;  %v8144_v58 = vld [vmem:[#allocation164_spill] sm:$0xff] }
0x108b   : > { %v2811_v36 = vpop.f32.mrb[86].mxu1  ;;  %v8140_v2 = vld [vmem:[#allocation253_spill] sm:$0xff] }
0x108c   : > { %v2830_v53 = vadd.f32 %v2829_v10, %v2809_v38  ;;  %v3824_v63 = vpop.f32.mrb[87].mxu1  ;;  %v8132_v10 = vld [vmem:[#allocation245_spill] sm:$0xff]  ;;  %v8139_v38 = vld [vmem:[#allocation252_spill] sm:$0xff]  ;;  %v8141_v36 = vld [vmem:[#allocation254_spill] sm:$0xff] }
0x108d   : > { %v8143_v63 = vld [vmem:[#allocation256_spill] sm:$0xff] }
0x108e   : > { %4073 = vtanh.f32 %v2830_v53  ;;  %v8142_v53 = vld [vmem:[#allocation255_spill] sm:$0xff] }
0x1098   : > { %v4074_v45 = vpop.eup %4073 }
0x1099   : > { %v2833_v30 = vmul.f32 %v4074_v45, %v2832_v14  ;;  %v8145_v14 = vld [vmem:[#allocation173_spill] sm:$0xff]  ;;  %v8146_v45 = vld [vmem:[#allocation175_spill] sm:$0xff] }
0x109b   : > { %v6447_v37 = vadd.f32 %v2834_v5, %v2833_v30  ;;  %v8147_v30 = vld [vmem:[#allocation177_spill] sm:$0xff]  ;;  %v8148_v5 = vld [vmem:[#allocation179_spill] sm:$0xff] }
0x109d   : > { %v2846_v33 = vpack.c.bf16 %v6447_v37, %v6447_v37 }
0x109f   : > { %2879 = vmatprep.mubr.bf16.mxu0 %v2846_v33  ;;  %2920 = vmatprep.mubr.bf16.mxu1 %v2846_v33 }
0x10a0   : > { %2880 = vmatmul.mubr.bf16.vlgmr.msra.gmra.mrb[60].mxu0 %v6383_v50  ;;  %2921 = vmatmul.mubr.bf16.vlgmr.msra.gmra.mrb[88].mxu1 %v6383_v50 }
0x10a1   : > { %2930 = vmatpush1.bf16.msra.mxu0 %v5167_v15  ;;  %2961 = vmatprep.mubr.bf16.mxu0 %v2846_v33  ;;  %v8149_v33 = vld [vmem:[#allocation181_spill] sm:$0xff] }
0x10a2   : > { %2931 = vmatprep.subr.bf16.mxu0 %v5171_v11  ;;  %2994 = vmatpush1.bf16.msra.mxu1 %v4649_v44 }
0x10a3   : > { %2995 = vmatprep.subr.bf16.mxu1 %v4661_v41  ;;  %3025 = vmatprep.mubr.bf16.mxu1 %v7474_v51 }
0x10a5   : > { %2932 = vmatpush1.bf16.msra.mxu0 %v5178_v55 }
0x10a6   : > { %2933 = vmatprep.subr.bf16.mxu0 %v5183_v60  ;;  %2996 = vmatpush1.bf16.msra.mxu1 %v4666_v24 }
0x10a7   : > { %2997 = vmatprep.subr.bf16.mxu1 %v4677_v42 }
0x10a9   : > { %2934 = vmatpush1.bf16.msra.mxu0 %v5191_v4 }
0x10aa   : > { %2935 = vmatprep.subr.bf16.mxu0 %v5196_v43  ;;  %2998 = vmatpush1.bf16.msra.mxu1 %v4682_v12 }
0x10ab   : > { %2999 = vmatprep.subr.bf16.mxu1 %v4693_v21 }
0x10ad   : > { %2936 = vmatpush1.bf16.msra.mxu0 %v5203_v18 }
0x10ae   : > { %2937 = vmatprep.subr.bf16.mxu0 %v5208_v39  ;;  %3000 = vmatpush1.bf16.msra.mxu1 %v4698_v9 }
0x10af   : > { %3001 = vmatprep.subr.bf16.mxu1 %v7579_v47 }
0x10b1   : > { %2938 = vmatpush1.bf16.msra.mxu0 %v7580_v32 }
0x10b2   : > { %2939 = vmatprep.subr.bf16.mxu0 %v5220_v49  ;;  %3002 = vmatpush1.bf16.msra.mxu1 %v4714_v27 }
0x10b3   : > { %3003 = vmatprep.subr.bf16.mxu1 %v7581_v29 }
0x10b5   : > { %2940 = vmatpush1.bf16.msra.mxu0 %v7582_v16 }
0x10b6   : > { %2941 = vmatprep.subr.bf16.mxu0 %v5232_v62  ;;  %3004 = vmatpush1.bf16.msra.mxu1 %v4729_v35 }
0x10b7   : > { %3005 = vmatprep.subr.bf16.mxu1 %v7583_v3 }
0x10b9   : > { %2942 = vmatpush1.bf16.msra.mxu0 %v7584_v59 }
0x10ba   : > { %2943 = vmatprep.subr.bf16.mxu0 %v5244_v40  ;;  %3006 = vmatpush1.bf16.msra.mxu1 %v7585_v28 }
0x10bb   : > { %3007 = vmatprep.subr.bf16.mxu1 %v7586_v19 }
0x10bd   : > { %2944 = vmatpush1.bf16.msra.mxu0 %v7587_v56 }
0x10be   : > { %2945 = vmatprep.subr.bf16.mxu0 %v7671_v17  ;;  %3008 = vmatpush1.bf16.msra.mxu1 %v7589_v54 }
0x10bf   : > { %3825 = vmatprep.subr.bf16.mxu1 %v7340_v0 }
0x10c1   : > { %2946 = vmatpush1.bf16.msra.mxu0 %v7590_v25 }
0x10c2   : > { %2947 = vmatprep.subr.bf16.mxu0 %v7591_v26 }
0x10c5   : > { %2948 = vmatpush1.bf16.msra.mxu0 %v8131_v23 }
0x10c6   : > { %2949 = vmatprep.subr.bf16.mxu0 %v8132_v10 }
0x10c9   : > { %2950 = vmatpush1.bf16.msra.mxu0 %v8133_v20 }
0x10ca   : > { %2951 = vmatprep.subr.bf16.mxu0 %v8134_v22 }
0x10cd   : > { %2952 = vmatpush1.bf16.msra.mxu0 %v8135_v7 }
0x10ce   : > { %2953 = vmatprep.subr.bf16.mxu0 %v8136_v13 }
0x10d1   : > { %2954 = vmatpush1.bf16.msra.mxu0 %v8137_v48 }
0x10d2   : > { %2955 = vmatprep.subr.bf16.mxu0 %v8138_v52 }
0x10d5   : > { %2956 = vmatpush1.bf16.msra.mxu0 %v8139_v38 }
0x10d6   : > { %2957 = vmatprep.subr.bf16.mxu0 %v8140_v2  ;;  %v8150_v2 = vld [vmem:[#allocation183_spill] sm:$0xff] }
0x10d9   : > { %2958 = vmatpush1.bf16.msra.mxu0 %v8141_v36  ;;  %v8151_v36 = vld [vmem:[#allocation185_spill] sm:$0xff] }
0x10da   : > { %2959 = vmatprep.subr.bf16.mxu0 %v8142_v53  ;;  %v8152_v53 = vld [vmem:[#allocation187_spill] sm:$0xff] }
0x10dd   : > { %2960 = vmatpush1.bf16.msra.mxu0 %v8143_v63  ;;  %v8153_v63 = vld [vmem:[#allocation188_spill] sm:$0xff] }
0x10de   : > { %3107 = vmatprep.subr.bf16.mxu0 %v8144_v58  ;;  %v8154_v58 = vld [vmem:[#allocation191_spill] sm:$0xff] }
0x10e0   : > { %2962 = vmatmul.mubr.bf16.vlgmr.msra.gmra.mrb[64].mxu0 %v6383_v50  ;;  %v8155_v50 = vld [vmem:[#allocation192_spill] sm:$0xff] }
0x10e1   : > { %3108 = vmatpush1.bf16.msra.mxu0 %v8145_v14  ;;  %v8156_v14 = vld [vmem:[#allocation195_spill] sm:$0xff] }
0x10e2   : > { %3109 = vmatprep.subr.bf16.mxu0 %v8146_v45  ;;  %v8157_v45 = vld [vmem:[#allocation196_spill] sm:$0xff] }
0x10e5   : > { %3110 = vmatpush1.bf16.msra.mxu0 %v8147_v30  ;;  %v8158_v30 = vld [vmem:[#allocation199_spill] sm:$0xff] }
0x10e6   : > { %3111 = vmatprep.subr.bf16.mxu0 %v8148_v5  ;;  %v8159_v5 = vld [vmem:[#allocation200_spill] sm:$0xff] }
0x10e9   : > { %3112 = vmatpush1.bf16.msra.mxu0 %v8149_v33  ;;  %v8160_v33 = vld [vmem:[#allocation203_spill] sm:$0xff] }
0x10ea   : > { %3113 = vmatprep.subr.bf16.mxu0 %v8150_v2  ;;  %v8161_v2 = vld [vmem:[#allocation204_spill] sm:$0xff] }
0x10ed   : > { %3114 = vmatpush1.bf16.msra.mxu0 %v8151_v36  ;;  %v8162_v36 = vld [vmem:[#allocation207_spill] sm:$0xff] }
0x10ee   : > { %3115 = vmatprep.subr.bf16.mxu0 %v8152_v53  ;;  %v8163_v53 = vld [vmem:[#allocation208_spill] sm:$0xff] }
0x10f1   : > { %3116 = vmatpush1.bf16.msra.mxu0 %v8153_v63  ;;  %v8164_v63 = vld [vmem:[#allocation211_spill] sm:$0xff] }
0x10f2   : > { %3117 = vmatprep.subr.bf16.mxu0 %v8154_v58  ;;  %v8165_v58 = vld [vmem:[#allocation212_spill] sm:$0xff] }
0x10f5   : > { %3118 = vmatpush1.bf16.msra.mxu0 %v8155_v50  ;;  %v8166_v50 = vld [vmem:[#allocation215_spill] sm:$0xff] }
0x10f6   : > { %3119 = vmatprep.subr.bf16.mxu0 %v8156_v14  ;;  %v8167_v14 = vld [vmem:[#allocation216_spill] sm:$0xff] }
0x10f9   : > { %3120 = vmatpush1.bf16.msra.mxu0 %v8157_v45  ;;  %v8168_v45 = vld [vmem:[#allocation219_spill] sm:$0xff] }
0x10fa   : > { %3121 = vmatprep.subr.bf16.mxu0 %v8158_v30  ;;  %v8169_v30 = vld [vmem:[#allocation220_spill] sm:$0xff] }
0x10fd   : > { %3122 = vmatpush1.bf16.msra.mxu0 %v8159_v5  ;;  %v8170_v5 = vld [vmem:[#allocation223_spill] sm:$0xff] }
0x10fe   : > { %3123 = vmatprep.subr.bf16.mxu0 %v8160_v33  ;;  %v8171_v33 = vld [vmem:[#allocation225_spill] sm:$0xff] }
0x1101   : > { %3124 = vmatpush1.bf16.msra.mxu0 %v8161_v2  ;;  %v8172_v2 = vld [vmem:[#allocation227_spill] sm:$0xff] }
0x1102   : > { %3125 = vmatprep.subr.bf16.mxu0 %v8162_v36  ;;  %v8173_v36 = vld [vmem:[#allocation229_spill] sm:$0xff] }
0x1105   : > { %3126 = vmatpush1.bf16.msra.mxu0 %v8163_v53  ;;  %v8174_v53 = vld [vmem:[#allocation231_spill] sm:$0xff] }
0x1106   : > { %3127 = vmatprep.subr.bf16.mxu0 %v8164_v63  ;;  %v8175_v63 = vld [vmem:[#allocation233_spill] sm:$0xff] }
0x1109   : > { %3128 = vmatpush1.bf16.msra.mxu0 %v8165_v58  ;;  %v8176_v58 = vld [vmem:[#allocation235_spill] sm:$0xff] }
0x110a   : > { %3129 = vmatprep.subr.bf16.mxu0 %v8166_v50  ;;  %v2838_v50 = vpop.permute.xlu0 %2837 }
0x110d   : > { %3130 = vmatpush1.bf16.msra.mxu0 %v8167_v14  ;;  %v8177_v14 = vld [vmem:[#allocation166_spill] sm:$0xff] }
0x110e   : > { %3131 = vmatprep.subr.bf16.mxu0 %v8168_v45  ;;  %v2840_v38 = vmul.f32 %v2838_v50, %v8177_v14  ;;  %v8178_v45 = vld [vmem:[#allocation167_spill] sm:$0xff] }
0x110f   : > { %v2841_v52 = vmul.f32 %v2838_v50, %v8178_v45 }
0x1111   : > { %3132 = vmatpush1.bf16.msra.mxu0 %v8169_v30  ;;  %v8179_v30 = vld [vmem:[#allocation168_spill] sm:$0xff] }
0x1112   : > { %3133 = vmatprep.subr.bf16.mxu0 %v8170_v5  ;;  %v2843_v48 = vadd.f32 %v2840_v38, %v8179_v30  ;;  %v2842_v30 = vmul.f32 %v2838_v50, %v7533_v61 }
0x1115   : > { %3134 = vmatpush1.bf16.msra.mxu0 %v8171_v33  ;;  %v2844_v33 = vadd.f32 %v2841_v52, %v7627_v6 }
0x1116   : > { %3135 = vmatprep.subr.bf16.mxu0 %v8172_v2 }
0x1119   : > { %3136 = vmatpush1.bf16.msra.mxu0 %v8173_v36 }
0x111a   : > { %3137 = vmatprep.subr.bf16.mxu0 %v8174_v53 }
0x111d   : > { %3138 = vmatpush1.bf16.msra.mxu0 %v8175_v63 }
0x111e   : > { %3189 = vmatprep.subr.bf16.mxu0 %v8176_v58 }
0x1173   : > { %v2881_v5 = vpop.f32.mrb[60].mxu0  ;;  %v2922_v13 = vpop.f32.mrb[88].mxu1 }
0x1174   : > { %v2970_v2 = vadd.f32 %v2881_v5, %v2843_v48  ;;  %v2883_v7 = vpop.f32.mrb[61].mxu0  ;;  %v6539_v36 = vpop.f32.mrb[89].mxu1  ;;  %v2984_v48 = vadd.f32 %v7534_v34, %v2922_v13  ;;  %v8180_v13 = vld [vmem:[#allocation150_spill] sm:$0xff] }
0x1175   : > { %v2885_v53 = vpop.f32.mrb[62].mxu0  ;;  %v2926_v22 = vpop.f32.mrb[90].mxu1  ;;  %v2971_v10 = vadd.f32 %v2883_v7, %v2844_v33 }
0x1176   : > { %v3565_v63 = vmul.f32 -1.442695, %v2970_v2  ;;  %v2886_v20 = vpop.f32.mrb[63].mxu0  ;;  %v2927_v58 = vpop.f32.mrb[91].mxu1  ;;  %v2845_v53 = vadd.f32 %v2842_v30, %v7535_v8  ;;  %v8181_v30 = vld [vmem:[#allocation151_spill] sm:$0xff]  ;;  %v8183_v2 = vld [vmem:[#allocation153_spill] sm:$0xff] }
0x1177   : > { %v3566_v14 = vmul.f32 -1.442695, %v2971_v10 }
0x1178   : > { %4075 = vpow2.f32 %v3565_v63 }
0x1179   : > { %4077 = vpow2.f32 %v3566_v14 }
0x1182   : > { %v4076_v45 = vpop.eup %4075 }
0x1183   : > { %v2978_v23 = vadd.f32 1.0, %v4076_v45  ;;  %v4078_v38 = vpop.eup %4077 }
0x1184   : > { %v2979_v52 = vadd.f32 1.0, %v4078_v38 }
0x1185   : > { %4079 = vrcp.f32 %v2978_v23 }
0x1186   : > { %4081 = vrcp.f32 %v2979_v52 }
0x118f   : > { %v4080_v5 = vpop.eup %4079 }
0x1190   : > { %v2985_v22 = vmul.f32 %v4080_v5, %v2984_v48  ;;  %v4082_v7 = vpop.eup %4081  ;;  %v8184_v48 = vld [vmem:[#allocation155_spill] sm:$0xff]  ;;  %v8185_v5 = vld [vmem:[#allocation157_spill] sm:$0xff] }
0x1191   : > { %v2988_v33 = vsub.f32 1.0, %v4082_v7  ;;  %v2990_v14 = vmul.f32 %v4082_v7, %v6379_v31  ;;  %v8182_v31 = vld [vmem:[#allocation152_spill] sm:$0xff]  ;;  %v8189_v7 = vld [vmem:[#allocation174_spill] sm:$0xff] }
0x1192   : > { %v2986_v20 = vadd.f32 %v2985_v22, %v2845_v53  ;;  %v8186_v53 = vld [vmem:[#allocation160_spill] sm:$0xff]  ;;  %v8187_v22 = vld [vmem:[#allocation163_spill] sm:$0xff] }
0x1194   : > { %4083 = vtanh.f32 %v2986_v20  ;;  %v8188_v20 = vld [vmem:[#allocation165_spill] sm:$0xff] }
0x119e   : > { %v4084_v10 = vpop.eup %4083 }
0x119f   : > { %v2989_v45 = vmul.f32 %v4084_v10, %v2988_v33  ;;  %v8190_v33 = vld [vmem:[#allocation176_spill] sm:$0xff]  ;;  %v8191_v10 = vld [vmem:[#allocation178_spill] sm:$0xff] }
0x11a1   : > { %v6545_v23 = vadd.f32 %v2990_v14, %v2989_v45  ;;  %v8192_v14 = vld [vmem:[#allocation180_spill] sm:$0xff]  ;;  %v8193_v45 = vld [vmem:[#allocation182_spill] sm:$0xff] }
0x11a3   : > { %v6549_v50 = vpack.c.bf16 %v6545_v23, %v6545_v23 }
0x11a5   : > { %3026 = vmatmul.mubr.bf16.vlgmr.msra.gmra.mrb[92].mxu1 %v6549_v50 }
0x11a6   : > { %3826 = vmatpush3.bf16.msra.mxu1 %v8180_v13  ;;  %3841 = vmatprep.mubr.msk.bf16.mxu1 %vm4234_vm0, %v7340_v0 }
0x11a7   : > { %3827 = vmatprep.subr.bf16.mxu1 %v7340_v0 }
0x11aa   : > { %3828 = vmatpush3.bf16.msra.mxu1 %v8181_v30 }
0x11ab   : > { %3829 = vmatprep.subr.bf16.mxu1 %v7340_v0 }
0x11ae   : > { %3830 = vmatpush3.bf16.msra.mxu1 %v8182_v31 }
0x11af   : > { %3831 = vmatprep.subr.bf16.mxu1 %v7340_v0 }
0x11b2   : > { %3832 = vmatpush3.bf16.msra.mxu1 %v8183_v2 }
0x11b3   : > { %v2963_v63 = vpop.f32.mrb[64].mxu0  ;;  %3833 = vmatprep.subr.bf16.mxu1 %v7340_v0 }
0x11b4   : > { %v6562_v58 = vpop.f32.mrb[65].mxu0 }
0x11b5   : > { %v2967_v38 = vpop.f32.mrb[66].mxu0 }
0x11b6   : > { %v2968_v52 = vpop.f32.mrb[67].mxu0  ;;  %3834 = vmatpush3.bf16.msra.mxu1 %v8184_v48  ;;  %v8194_v38 = vld [vmem:[#allocation184_spill] sm:$0xff] }
0x11b7   : > { %3835 = vmatprep.subr.bf16.mxu1 %v7340_v0  ;;  %v8195_v52 = vld [vmem:[#allocation186_spill] sm:$0xff] }
0x11ba   : > { %3836 = vmatpush3.bf16.msra.mxu1 %v8185_v5  ;;  %v8199_v5 = vld [vmem:[#allocation194_spill] sm:$0xff] }
0x11bb   : > { %3837 = vmatprep.subr.bf16.mxu1 %v7340_v0 }
0x11be   : > { %3838 = vmatpush3.bf16.msra.mxu1 %v8186_v53  ;;  %v8196_v53 = vld [vmem:[#allocation189_spill] sm:$0xff] }
0x11bf   : > { %3839 = vmatprep.subr.bf16.mxu1 %v7340_v0 }
0x11c2   : > { %3840 = vmatpush3.bf16.msra.mxu1 %v8187_v22  ;;  %v8197_v22 = vld [vmem:[#allocation190_spill] sm:$0xff] }
0x11c3   : > { %3148 = vmatprep.subr.bf16.mxu1 %v8188_v20  ;;  %v8198_v20 = vld [vmem:[#allocation193_spill] sm:$0xff] }
0x11c5   : > { %3842 = vmatmul.mubr.bf16.vlgmr.msra.gmra.mrb[96].mxu1 %v6549_v50 }
0x11c6   : > { %3149 = vmatpush1.bf16.msra.mxu1 %v8189_v7  ;;  %v8200_v7 = vld [vmem:[#allocation197_spill] sm:$0xff] }
0x11c7   : > { %3150 = vmatprep.subr.bf16.mxu1 %v8190_v33  ;;  %v8201_v33 = vld [vmem:[#allocation198_spill] sm:$0xff] }
0x11ca   : > { %3151 = vmatpush1.bf16.msra.mxu1 %v8191_v10  ;;  %v8202_v10 = vld [vmem:[#allocation201_spill] sm:$0xff] }
0x11cb   : > { %3152 = vmatprep.subr.bf16.mxu1 %v8192_v14  ;;  %v8203_v14 = vld [vmem:[#allocation202_spill] sm:$0xff] }
0x11ce   : > { %3153 = vmatpush1.bf16.msra.mxu1 %v8193_v45  ;;  %v8204_v45 = vld [vmem:[#allocation205_spill] sm:$0xff] }
0x11cf   : > { %3154 = vmatprep.subr.bf16.mxu1 %v8194_v38  ;;  %v8205_v38 = vld [vmem:[#allocation206_spill] sm:$0xff] }
0x11d2   : > { %3155 = vmatpush1.bf16.msra.mxu1 %v8195_v52  ;;  %v8206_v52 = vld [vmem:[#allocation209_spill] sm:$0xff] }
0x11d3   : > { %3156 = vmatprep.subr.bf16.mxu1 %v8196_v53  ;;  %v8207_v53 = vld [vmem:[#allocation210_spill] sm:$0xff] }
0x11d6   : > { %3157 = vmatpush1.bf16.msra.mxu1 %v8197_v22  ;;  %v8208_v22 = vld [vmem:[#allocation213_spill] sm:$0xff] }
0x11d7   : > { %3158 = vmatprep.subr.bf16.mxu1 %v8198_v20  ;;  %v8209_v20 = vld [vmem:[#allocation214_spill] sm:$0xff] }
0x11da   : > { %3159 = vmatpush1.bf16.msra.mxu1 %v8199_v5  ;;  %v8210_v5 = vld [vmem:[#allocation217_spill] sm:$0xff] }
0x11db   : > { %3160 = vmatprep.subr.bf16.mxu1 %v8200_v7  ;;  %v8211_v7 = vld [vmem:[#allocation218_spill] sm:$0xff] }
0x11de   : > { %3161 = vmatpush1.bf16.msra.mxu1 %v8201_v33  ;;  %v8212_v33 = vld [vmem:[#allocation221_spill] sm:$0xff] }
0x11df   : > { %3162 = vmatprep.subr.bf16.mxu1 %v8202_v10  ;;  %v8213_v10 = vld [vmem:[#allocation222_spill] sm:$0xff] }
0x11e2   : > { %3163 = vmatpush1.bf16.msra.mxu1 %v8203_v14  ;;  %v8214_v14 = vld [vmem:[#allocation224_spill] sm:$0xff] }
0x11e3   : > { %3164 = vmatprep.subr.bf16.mxu1 %v8204_v45  ;;  %v8215_v45 = vld [vmem:[#allocation226_spill] sm:$0xff] }
0x11e6   : > { %3165 = vmatpush1.bf16.msra.mxu1 %v8205_v38  ;;  %v8216_v38 = vld [vmem:[#allocation228_spill] sm:$0xff] }
0x11e7   : > { %3166 = vmatprep.subr.bf16.mxu1 %v8206_v52  ;;  %v8217_v52 = vld [vmem:[#allocation230_spill] sm:$0xff] }
0x11ea   : > { %3167 = vmatpush1.bf16.msra.mxu1 %v8207_v53  ;;  %v8218_v53 = vld [vmem:[#allocation232_spill] sm:$0xff] }
0x11eb   : > { %3168 = vmatprep.subr.bf16.mxu1 %v8208_v22  ;;  %v8219_v22 = vld [vmem:[#allocation234_spill] sm:$0xff] }
0x11ee   : > { %3169 = vmatpush1.bf16.msra.mxu1 %v8209_v20  ;;  %v8220_v20 = vld [vmem:[#allocation149_spill] sm:$0xff] }
0x11ef   : > { %3170 = vmatprep.subr.bf16.mxu1 %v8210_v5  ;;  %v4243_v5 = vmov 9  }
0x11f0   : > { %3913 = vset.pattern.permute.xlu1 %v4243_v5  ;;  %3914 = vset.pattern.permute.xlu0 %v4243_v5 }
0x11f2   : > { %3171 = vmatpush1.bf16.msra.mxu1 %v8211_v7  ;;  %v8221_v7 = vld [vmem:[#allocation148_spill] sm:$0xff] }
0x11f3   : > { %3172 = vmatprep.subr.bf16.mxu1 %v8212_v33  ;;  %3097 = vperm.xlu1 %3913, %v8221_v7   ;;  %v3088_v7 = vadd.f32 %v7469_v1, %v6562_v58 }
0x11f6   : > { %3173 = vmatpush1.bf16.msra.mxu1 %v8213_v10  ;;  %v8222_v10 = vld [vmem:[#allocation236_spill] sm:$0xff] }
0x11f7   : > { %3174 = vmatprep.subr.bf16.mxu1 %v8214_v14 }
0x11fa   : > { %3175 = vmatpush1.bf16.msra.mxu1 %v8215_v45 }
0x11fb   : > { %3176 = vmatprep.subr.bf16.mxu1 %v8216_v38 }
0x11fe   : > { %3177 = vmatpush1.bf16.msra.mxu1 %v8217_v52 }
0x11ff   : > { %3178 = vmatprep.subr.bf16.mxu1 %v8218_v53 }
0x1202   : > { %3179 = vmatpush1.bf16.msra.mxu1 %v8219_v22 }
0x1203   : > { %3253 = vmatprep.subr.bf16.mxu1 %v8220_v20 }
0x1278   : > { %v3027_v33 = vpop.f32.mrb[92].mxu1 }
0x1279   : > { %v3028_v14 = vadd.f32 %v3027_v33, %v8222_v10  ;;  %v3029_v48 = vpop.f32.mrb[93].mxu1 }
0x127a   : > { %v3030_v45 = vadd.f32 %v3029_v48, %v5151_v46  ;;  %v3031_v38 = vpop.f32.mrb[94].mxu1 }
0x127b   : > { %v3074_v52 = vadd.f32 %v3028_v14, %v6539_v36  ;;  %v3032_v2 = vpop.f32.mrb[95].mxu1 }
0x127c   : > { %v3075_v53 = vadd.f32 %v3030_v45, %v2963_v63 }
0x127d   : > { %v3567_v31 = vmul.f32 -1.442695, %v3074_v52 }
0x127e   : > { %v3568_v22 = vmul.f32 -1.442695, %v3075_v53 }
0x127f   : > { %4085 = vpow2.f32 %v3567_v31 }
0x1280   : > { %4087 = vpow2.f32 %v3568_v22 }
0x1289   : > { %v4086_v20 = vpop.eup %4085 }
0x128a   : > { %v3082_v30 = vadd.f32 1.0, %v4086_v20  ;;  %v4088_v5 = vpop.eup %4087 }
0x128b   : > { %v3083_v33 = vadd.f32 1.0, %v4088_v5 }
0x128c   : > { %4089 = vrcp.f32 %v3082_v30 }
0x128d   : > { %4091 = vrcp.f32 %v3083_v33 }
0x1296   : > { %v4090_v10 = vpop.eup %4089 }
0x1297   : > { %v3089_v13 = vmul.f32 %v4090_v10, %v3088_v7  ;;  %v4092_v45 = vpop.eup %4091 }
0x1298   : > { %v3068_v48 = vpop.f32.mrb[96].mxu1  ;;  %v3092_v38 = vsub.f32 1.0, %v4092_v45  ;;  %v3094_v53 = vmul.f32 %v4092_v45, %v6447_v37 }
0x1299   : > { %v3069_v36 = vadd.f32 %v3068_v48, %v5157_v57  ;;  %v3843_v2 = vpop.f32.mrb[97].mxu1 }
0x129a   : > { %v3071_v63 = vpop.f32.mrb[98].mxu1 }
0x129b   : > { %v3090_v14 = vadd.f32 %v3089_v13, %v3069_v36  ;;  %v3844_v31 = vpop.f32.mrb[99].mxu1 }
0x129d   : > { %4093 = vtanh.f32 %v3090_v14 }
0x12a7   : > { %v4094_v52 = vpop.eup %4093 }
0x12a8   : > { %v3093_v30 = vmul.f32 %v4094_v52, %v3092_v38  ;;  %v8242_v38 = vld [vmem:[#allocation153_spill] sm:$0xff] }
0x12aa   : > { %v6613_v22 = vadd.f32 %v3094_v53, %v3093_v30 }
0x12ac   : > { %v3106_v58 = vpack.c.bf16 %v6613_v22, %v6613_v22 }
0x12ae   : > { %3139 = vmatprep.mubr.bf16.mxu0 %v3106_v58  ;;  %3180 = vmatprep.mubr.bf16.mxu1 %v3106_v58 }
0x12af   : > { %3140 = vmatmul.mubr.bf16.vlgmr.msra.gmra.mrb[68].mxu0 %v6549_v50  ;;  %3181 = vmatmul.mubr.bf16.vlgmr.msra.gmra.mrb[100].mxu1 %v6549_v50 }
0x12b0   : > { %3190 = vmatpush1.bf16.msra.mxu0 %v5167_v15  ;;  %3221 = vmatprep.mubr.bf16.mxu0 %v3106_v58  ;;  %v8234_v15 = vld [vmem:[#allocation255_spill] sm:$0xff] }
0x12b1   : > { %3191 = vmatprep.subr.bf16.mxu0 %v5171_v11  ;;  %3254 = vmatpush1.bf16.msra.mxu1 %v4649_v44  ;;  %v8231_v44 = vld [vmem:[#allocation252_spill] sm:$0xff]  ;;  %v3098_v11 = vpop.permute.xlu1 %3097  ;;  %v8243_v58 = vld [vmem:[#allocation155_spill] sm:$0xff] }
0x12b2   : > { %3255 = vmatprep.subr.bf16.mxu1 %v4661_v41  ;;  %3285 = vmatprep.mubr.bf16.mxu1 %v7474_v51  ;;  %v8229_v41 = vld [vmem:[#allocation250_spill] sm:$0xff]  ;;  %v3102_v13 = vmul.f32 %v3098_v11, %v7533_v61 }
0x12b3   : > { %v8239_v61 = vld [vmem:[#allocation150_spill] sm:$0xff] }
0x12b4   : > { %3192 = vmatpush1.bf16.msra.mxu0 %v5178_v55  ;;  %v8236_v55 = vld [vmem:[#allocation166_spill] sm:$0xff]  ;;  %v3105_v20 = vadd.f32 %v3102_v13, %v7535_v8  ;;  %v8240_v8 = vld [vmem:[#allocation151_spill] sm:$0xff] }
0x12b5   : > { %3193 = vmatprep.subr.bf16.mxu0 %v5183_v60  ;;  %3256 = vmatpush1.bf16.msra.mxu1 %v4666_v24  ;;  %v8226_v24 = vld [vmem:[#allocation247_spill] sm:$0xff] }
0x12b6   : > { %3257 = vmatprep.subr.bf16.mxu1 %v4677_v42  ;;  %v8230_v42 = vld [vmem:[#allocation251_spill] sm:$0xff] }
0x12b7   : > { %v8237_v60 = vld [vmem:[#allocation167_spill] sm:$0xff] }
0x12b8   : > { %3194 = vmatpush1.bf16.msra.mxu0 %v5191_v4  ;;  %v3101_v51 = vmul.f32 %v3098_v11, %v8237_v60  ;;  %v8238_v4 = vld [vmem:[#allocation168_spill] sm:$0xff] }
0x12b9   : > { %3195 = vmatprep.subr.bf16.mxu0 %v5196_v43  ;;  %3258 = vmatpush1.bf16.msra.mxu1 %v4682_v12  ;;  %v8224_v12 = vld [vmem:[#allocation245_spill] sm:$0xff] }
0x12ba   : > { %3259 = vmatprep.subr.bf16.mxu1 %v4693_v21  ;;  %v8225_v21 = vld [vmem:[#allocation246_spill] sm:$0xff] }
0x12bc   : > { %3196 = vmatpush1.bf16.msra.mxu0 %v5203_v18 }
0x12bd   : > { %3197 = vmatprep.subr.bf16.mxu0 %v5208_v39  ;;  %3260 = vmatpush1.bf16.msra.mxu1 %v4698_v9  ;;  %v8223_v9 = vld [vmem:[#allocation244_spill] sm:$0xff] }
0x12be   : > { %3261 = vmatprep.subr.bf16.mxu1 %v7579_v47  ;;  %v8235_v39 = vld [vmem:[#allocation256_spill] sm:$0xff] }
0x12c0   : > { %3198 = vmatpush1.bf16.msra.mxu0 %v7580_v32  ;;  %v3104_v32 = vadd.f32 %v3101_v51, %v7627_v6 }
0x12c1   : > { %3199 = vmatprep.subr.bf16.mxu0 %v5220_v49  ;;  %3262 = vmatpush1.bf16.msra.mxu1 %v4714_v27  ;;  %v8227_v27 = vld [vmem:[#allocation248_spill] sm:$0xff]  ;;  %v8232_v49 = vld [vmem:[#allocation253_spill] sm:$0xff] }
0x12c2   : > { %3263 = vmatprep.subr.bf16.mxu1 %v7581_v29 }
0x12c4   : > { %3200 = vmatpush1.bf16.msra.mxu0 %v7582_v16 }
0x12c5   : > { %3201 = vmatprep.subr.bf16.mxu0 %v5232_v62  ;;  %3264 = vmatpush1.bf16.msra.mxu1 %v4729_v35  ;;  %v8228_v35 = vld [vmem:[#allocation249_spill] sm:$0xff]  ;;  %v8233_v62 = vld [vmem:[#allocation254_spill] sm:$0xff] }
0x12c6   : > { %3265 = vmatprep.subr.bf16.mxu1 %v7583_v3 }
0x12c8   : > { %3202 = vmatpush1.bf16.msra.mxu0 %v7584_v59 }
0x12c9   : > { %3203 = vmatprep.subr.bf16.mxu0 %v5244_v40  ;;  %3266 = vmatpush1.bf16.msra.mxu1 %v7585_v28  ;;  %v3100_v40 = vmul.f32 %v3098_v11, %v8236_v55 }
0x12ca   : > { %3267 = vmatprep.subr.bf16.mxu1 %v7586_v19 }
0x12cb   : > { %v3103_v43 = vadd.f32 %v3100_v40, %v8238_v4 }
0x12cc   : > { %3204 = vmatpush1.bf16.msra.mxu0 %v7587_v56 }
0x12cd   : > { %3205 = vmatprep.subr.bf16.mxu0 %v7671_v17  ;;  %3268 = vmatpush1.bf16.msra.mxu1 %v7589_v54 }
0x12ce   : > { %3845 = vmatprep.subr.bf16.mxu1 %v7340_v0 }
0x12d0   : > { %3206 = vmatpush1.bf16.msra.mxu0 %v7590_v25 }
0x12d1   : > { %3207 = vmatprep.subr.bf16.mxu0 %v7591_v26 }
0x12d4   : > { %3208 = vmatpush1.bf16.msra.mxu0 %v8223_v9  ;;  %v8244_v9 = vld [vmem:[#allocation157_spill] sm:$0xff] }
0x12d5   : > { %3209 = vmatprep.subr.bf16.mxu0 %v8224_v12  ;;  %v8245_v12 = vld [vmem:[#allocation160_spill] sm:$0xff] }
0x12d8   : > { %3210 = vmatpush1.bf16.msra.mxu0 %v8225_v21  ;;  %v8246_v21 = vld [vmem:[#allocation163_spill] sm:$0xff] }
0x12d9   : > { %3211 = vmatprep.subr.bf16.mxu0 %v8226_v24  ;;  %v8247_v24 = vld [vmem:[#allocation148_spill] sm:$0xff] }
0x12da   : > { %3372 = vrot.lane.b32.xlu0 %v8247_v24, %s4244_s6 }
0x12dc   : > { %3212 = vmatpush1.bf16.msra.mxu0 %v8227_v27 }
0x12dd   : > { %3213 = vmatprep.subr.bf16.mxu0 %v8228_v35  ;;  %v8248_v35 = vld [vmem:[#allocation236_spill] sm:$0xff] }
0x12e0   : > { %3214 = vmatpush1.bf16.msra.mxu0 %v8229_v41 }
0x12e1   : > { %3215 = vmatprep.subr.bf16.mxu0 %v8230_v42 }
0x12e4   : > { %3216 = vmatpush1.bf16.msra.mxu0 %v8231_v44 }
0x12e5   : > { %3217 = vmatprep.subr.bf16.mxu0 %v8232_v49 }
0x12e8   : > { %3218 = vmatpush1.bf16.msra.mxu0 %v8233_v62 }
0x12e9   : > { %3219 = vmatprep.subr.bf16.mxu0 %v8234_v15 }
0x12ec   : > { %3220 = vmatpush1.bf16.msra.mxu0 %v8235_v39 }
0x12ef   : > { %3222 = vmatmul.mubr.bf16.vlgmr.msra.gmra.mrb[72].mxu0 %v6549_v50 }
0x1382   : > { %v3141_v18 = vpop.f32.mrb[68].mxu0  ;;  %v3182_v47 = vpop.f32.mrb[100].mxu1 }
0x1383   : > { %v3230_v29 = vadd.f32 %v3141_v18, %v3103_v43  ;;  %v3143_v16 = vpop.f32.mrb[69].mxu0  ;;  %v3184_v3 = vpop.f32.mrb[101].mxu1  ;;  %v3244_v6 = vadd.f32 %v7534_v34, %v3182_v47  ;;  %v8241_v34 = vld [vmem:[#allocation152_spill] sm:$0xff] }
0x1384   : > { %v3145_v59 = vpop.f32.mrb[70].mxu0  ;;  %v3186_v28 = vpop.f32.mrb[102].mxu1  ;;  %v3231_v25 = vadd.f32 %v3143_v16, %v3104_v32 }
0x1385   : > { %v3569_v19 = vmul.f32 -1.442695, %v3230_v29  ;;  %v3146_v56 = vpop.f32.mrb[71].mxu0  ;;  %v3187_v54 = vpop.f32.mrb[103].mxu1 }
0x1386   : > { %v3570_v26 = vmul.f32 -1.442695, %v3231_v25 }
0x1387   : > { %4095 = vpow2.f32 %v3569_v19 }
0x1388   : > { %4097 = vpow2.f32 %v3570_v26  ;;  %v8249_v26 = vld [vmem:[#allocation146_spill] sm:$0xff] }
0x1391   : > { %v4096_v17 = vpop.eup %4095 }
0x1392   : > { %v3238_v37 = vadd.f32 1.0, %v4096_v17  ;;  %v4098_v50 = vpop.eup %4097 }
0x1393   : > { %v3239_v7 = vadd.f32 1.0, %v4098_v50  ;;  %v8250_v50 = vld [vmem:[#allocation147_spill] sm:$0xff] }
0x1394   : > { %4099 = vrcp.f32 %v3238_v37 }
0x1395   : > { %4101 = vrcp.f32 %v3239_v7 }
0x139e   : > { %v4100_v10 = vpop.eup %4099 }
0x139f   : > { %v3245_v5 = vmul.f32 %v4100_v10, %v3244_v6  ;;  %v4102_v48 = vpop.eup %4101 }
0x13a0   : > { %v3248_v36 = vsub.f32 1.0, %v4102_v48  ;;  %v3250_v14 = vmul.f32 %v4102_v48, %v6545_v23 }
0x13a1   : > { %v3246_v33 = vadd.f32 %v3245_v5, %v3105_v20 }
0x13a3   : > { %4103 = vtanh.f32 %v3246_v33 }
0x13ad   : > { %v4104_v2 = vpop.eup %4103 }
0x13ae   : > { %v3249_v63 = vmul.f32 %v4104_v2, %v3248_v36 }
0x13b0   : > { %v3251_v31 = vadd.f32 %v3250_v14, %v3249_v63 }
0x13b2   : > { %v3252_v45 = vpack.c.bf16 %v3251_v31, %v3251_v31 }
0x13b4   : > { %3286 = vmatmul.mubr.bf16.vlgmr.msra.gmra.mrb[104].mxu1 %v3252_v45 }
0x13b5   : > { %3846 = vmatpush3.bf16.msra.mxu1 %v8239_v61  ;;  %3861 = vmatprep.mubr.msk.bf16.mxu1 %vm4234_vm0, %v7340_v0 }
0x13b6   : > { %3847 = vmatprep.subr.bf16.mxu1 %v7340_v0 }
0x13b9   : > { %3848 = vmatpush3.bf16.msra.mxu1 %v8240_v8 }
0x13ba   : > { %3849 = vmatprep.subr.bf16.mxu1 %v7340_v0 }
0x13bd   : > { %3850 = vmatpush3.bf16.msra.mxu1 %v8241_v34 }
0x13be   : > { %3851 = vmatprep.subr.bf16.mxu1 %v7340_v0 }
0x13c1   : > { %3852 = vmatpush3.bf16.msra.mxu1 %v8242_v38 }
0x13c2   : > { %v3223_v23 = vpop.f32.mrb[72].mxu0  ;;  %3853 = vmatprep.subr.bf16.mxu1 %v7340_v0 }
0x13c3   : > { %v3225_v52 = vpop.f32.mrb[73].mxu0 }
0x13c4   : > { %v3227_v30 = vpop.f32.mrb[74].mxu0  ;;  %v3348_v51 = vadd.f32 %v7469_v1, %v3225_v52 }
0x13c5   : > { %v3228_v53 = vpop.f32.mrb[75].mxu0  ;;  %3854 = vmatpush3.bf16.msra.mxu1 %v8243_v58 }
0x13c6   : > { %3855 = vmatprep.subr.bf16.mxu1 %v7340_v0 }
0x13c9   : > { %3856 = vmatpush3.bf16.msra.mxu1 %v8244_v9 }
0x13ca   : > { %3857 = vmatprep.subr.bf16.mxu1 %v7340_v0 }
0x13cd   : > { %3858 = vmatpush3.bf16.msra.mxu1 %v8245_v12 }
0x13ce   : > { %3859 = vmatprep.subr.bf16.mxu1 %v7340_v0 }
0x13d1   : > { %3860 = vmatpush3.bf16.msra.mxu1 %v8246_v21 }
0x13d4   : > { %3862 = vmatmul.mubr.bf16.vlgmr.msra.gmra.mrb[108].mxu1 %v3252_v45 }
0x1487   : > { %v3287_v27 = vpop.f32.mrb[104].mxu1 }
0x1488   : > { %v3288_v41 = vadd.f32 %v3287_v27, %v8248_v35  ;;  %v3289_v42 = vpop.f32.mrb[105].mxu1 }
0x1489   : > { %v3290_v44 = vadd.f32 %v3289_v42, %v5151_v46  ;;  %v3291_v49 = vpop.f32.mrb[106].mxu1 }
0x148a   : > { %v3334_v62 = vadd.f32 %v3288_v41, %v3184_v3  ;;  %v3292_v15 = vpop.f32.mrb[107].mxu1 }
0x148b   : > { %v3335_v39 = vadd.f32 %v3290_v44, %v3223_v23 }
0x148c   : > { %v3571_v11 = vmul.f32 -1.442695, %v3334_v62 }
0x148d   : > { %v3572_v55 = vmul.f32 -1.442695, %v3335_v39 }
0x148e   : > { %4105 = vpow2.f32 %v3571_v11 }
0x148f   : > { %4107 = vpow2.f32 %v3572_v55 }
0x1498   : > { %v4106_v0 = vpop.eup %4105 }
0x1499   : > { %v3342_v40 = vadd.f32 1.0, %v4106_v0  ;;  %v4108_v60 = vpop.eup %4107 }
0x149a   : > { %v3343_v4 = vadd.f32 1.0, %v4108_v60 }
0x149b   : > { %4109 = vrcp.f32 %v3342_v40 }
0x149c   : > { %4111 = vrcp.f32 %v3343_v4 }
0x14a5   : > { %v4110_v43 = vpop.eup %4109 }
0x14a6   : > { %v3349_v18 = vmul.f32 %v4110_v43, %v3348_v51  ;;  %v4112_v59 = vpop.eup %4111 }
0x14a7   : > { %v3328_v47 = vpop.f32.mrb[108].mxu1  ;;  %v3352_v28 = vsub.f32 1.0, %v4112_v59  ;;  %v3354_v54 = vmul.f32 %v4112_v59, %v6613_v22 }
0x14a8   : > { %v3329_v46 = vadd.f32 %v3328_v47, %v5157_v57  ;;  %v3863_v32 = vpop.f32.mrb[109].mxu1  ;;  %v3373_v57 = vpop.permute.xlu0 %3372 }
0x14a9   : > { %v3331_v29 = vpop.f32.mrb[110].mxu1 }
0x14aa   : > { %v3350_v16 = vadd.f32 %v3349_v18, %v3329_v46  ;;  %v3864_v3 = vpop.f32.mrb[111].mxu1 }
0x14ac   : > { %4113 = vtanh.f32 %v3350_v16 }
0x14b6   : > { %v4114_v19 = vpop.eup %4113 }
0x14b7   : > { %v3353_v56 = vmul.f32 %v4114_v19, %v3352_v28 }
0x14b9   : > { %v3355_v25 = vadd.f32 %v3354_v54, %v3353_v56 }
0x14bb   : > { %v3362_v17 = vmul.f32 %v8249_v26, %v3355_v25 }
0x14bd   : > { %3363 = vadd.xlane.f32.xlu1 %v3362_v17 }
0x154a   : > { %v3364_v37 = vpop.xlane.xlu1 %3363 }
0x154b   : > { %v3371_v13 = vadd.f32 %v8250_v50, %v3364_v37 }
0x154d   : > { %3376 = vrot.lane.b32.xlu0 %v3371_v13, %s4245_s7 }
0x15bb   :  { %218 = sbr.rel (!%p216_p10) target bundleno = 128 (0x80), region = 79 }
0x15bf   : > { %v3377_v7 = vpop.permute.xlu0 %3376 }
0x15c0   : > { %v3380_v6 = vsel %vm3379_vm1, %v3373_v57, %v3377_v7  }
0x15c1   : > { %v8251_v43 = vmov %v3380_v6  ;;  %3382 = vrot.lane.b32.xlu0 (%p216_p10), %v3380_v6, %s4246_s8 }
0x1633   :  { %v3383_v22 = vpop.permute.xlu0 %3382 }
0x1634   :  { %3386 = vst.msk [vmem:[#allocation9] sm:$0xff] %vm3385_vm2, %v3383_v22 }
0x1635   :  { %4192 = shalt.err (!%p4189_p1)
}
0x1636   :  { %s4193_s9 = scalar_lea.hbm %s6728_s10, 128 }
0x1637   :  { %p4194_p2 = scmp.ne.s32.totalorder %s6728_s10, %s4193_s9  ;;  %p4197_p3 = scmp.lt.u32.totalorder %s4193_s9, %s6728_s10 }
0x1639   :  { %p4199_p4 = pnand %p4197_p3, %p4194_p2 }
0x163b   :  { %4202 = shalt.err (!%p4199_p4)
}
0x163c   :  { %3396 = dma.vmem_to_hbm [thread:$0]  %s3394_s20, 128, %s6728_s10, [#allocation5]  }
0x163d   :  { %4215 = dma.done.wait [#allocation5], 128  }
0x163e   :  { %4216 = vsyncadd [#allocation5], 4294967168 }
0x163f   :  { %3400 = vsyncpa [#allocation4], 1 }
0x1640   :  { %3401 = vsyncpa [#allocation7], 1 }
0x1641   :  { %3402 = vsyncpa [#allocation5], 1 }

</bundles_post_ra>
